<compile_context>
chip_gen: v5e
topology: v5e:2x2
jax: 0.10.0
libtpu: 0.0.40
codegen_flags: <defaults>
</compile_context>

<pallas_src>
import jax
import jax.numpy as jnp
from jax.experimental import pallas as pl
from jax.experimental.pallas import tpu as pltpu

EPS = 1e-5  # torch.nn.InstanceNorm2d default


def _reflect_pad_into(pad_ref, x):
    """Write ReflectionPad2d(1)(x) into the (H+2, W+2, C) VMEM scratch."""
    H, W, _ = x.shape
    # Interior.
    pad_ref[1:H + 1, 1:W + 1, :] = x
    # Top / bottom rows: padded row 0 <- row 1, padded row H+1 <- row H-2.
    pad_ref[0:1, 1:W + 1, :] = x[1:2]
    pad_ref[H + 1:H + 2, 1:W + 1, :] = x[H - 2:H - 1]
    # Left / right columns (read back from pad_ref so corners come along).
    pad_ref[:, 0:1, :] = pad_ref[:, 2:3, :]
    pad_ref[:, W + 1:W + 2, :] = pad_ref[:, W - 1:W, :]


def _conv3x3_instance_norm(pad_ref, w, acc_ref):
    """3x3 valid conv on the padded scratch + InstanceNorm (affine=False).

    pad_ref: (H+2, W+2, C) VMEM scratch with the reflection-padded input
    w:       (3, 3, C, C) HWIO weights (loaded value)
    acc_ref: (H*W, C) f32 VMEM scratch accumulator
    returns: (H, W, C) float32 normalized activations
    """
    Hp, Wp, C = pad_ref.shape
    H, W = Hp - 2, Wp - 2
    acc_ref[...] = jnp.zeros_like(acc_ref)
    # 3x3 conv as 9 shifted (H*W, C) x (C, C) MXU matmuls; taps are static
    # slices of the padded VMEM scratch.  (W is a multiple of 8 here, so the
    # (H,W,C)->(H*W,C) reshape is a free re-tiling, not a relayout.)
    for dy in range(3):
        for dx in range(3):
            patch = pad_ref[dy:dy + H, dx:dx + W, :].reshape(H * W, C)
            acc_ref[...] += jnp.dot(patch, w[dy, dx],
                                    preferred_element_type=jnp.float32)
    acc = acc_ref[...]
    # InstanceNorm2d(affine=False): per-channel mean / biased variance over
    # the spatial dims, eps added to the variance.  (No bias add: a constant
    # per-channel bias cancels exactly here.)
    mean = jnp.mean(acc, axis=0, keepdims=True)
    var = jnp.mean((acc - mean) ** 2, axis=0, keepdims=True)
    y = (acc - mean) * jax.lax.rsqrt(var + EPS)
    return y.reshape(H, W, C)


def residual_block_kernel(x_ref, w1_ref, w2_ref, o_ref, pad_ref, acc_ref):
    """Fused: pad -> conv1 -> IN -> ReLU -> pad -> conv2 -> IN -> (+x)."""
    x = x_ref[0].astype(jnp.float32)                 # (H, W, C)
    w1 = w1_ref[...]
    w2 = w2_ref[...]

    _reflect_pad_into(pad_ref, x)
    y1 = _conv3x3_instance_norm(pad_ref, w1, acc_ref)
    y1 = jnp.maximum(y1, 0.0)                        # ReLU

    _reflect_pad_into(pad_ref, y1)                   # scratch fully overwritten
    y2 = _conv3x3_instance_norm(pad_ref, w2, acc_ref)

    # Residual add; re-read the input block (still resident in VMEM) so x is
    # not kept live across the whole body.
    o_ref[0] = (x_ref[0].astype(jnp.float32) + y2).astype(o_ref.dtype)


def residual_block_nhwc(x_nhwc, w1_hwio, w2_hwio):
    """Fused residual block on NHWC activations (fast path, no transposes)."""
    N, H, W, C = x_nhwc.shape
    assert H >= 2 and W >= 2, "ReflectionPad2d(1) needs H, W >= 2"
    return pl.pallas_call(
        residual_block_kernel,
        out_shape=jax.ShapeDtypeStruct((N, H, W, C), x_nhwc.dtype),
        grid_spec=pltpu.PrefetchScalarGridSpec(
            num_scalar_prefetch=0,
            grid=(N,),
            in_specs=[
                pl.BlockSpec((1, H, W, C), lambda n: (n, 0, 0, 0)),
                pl.BlockSpec((3, 3, C, C), lambda n: (0, 0, 0, 0)),
                pl.BlockSpec((3, 3, C, C), lambda n: (0, 0, 0, 0)),
            ],
            out_specs=pl.BlockSpec((1, H, W, C), lambda n: (n, 0, 0, 0)),
            scratch_shapes=[
                pltpu.VMEM((H + 2, W + 2, C), jnp.float32),  # padded plane
                pltpu.VMEM((H * W, C), jnp.float32),         # conv accumulator
            ],
        ),
        compiler_params=pltpu.CompilerParams(
            dimension_semantics=("parallel",),
            # Keep the budget under half of v7x's 64 MiB physical VMEM so
            # double-buffering survives; plenty for v5e/v6e too.
            vmem_limit_bytes=48 * 1024 * 1024,
        ),
    )(x_nhwc, w1_hwio, w2_hwio)


@jax.jit
def residual_block(x_nchw, w1, b1, w2, b2):
    """Forward pass of the PyTorch ResidualBlock (NCHW interface).

    b1 / b2 are accepted for parameter parity with nn.Conv2d but unused: a
    per-channel constant bias cancels exactly under InstanceNorm2d with
    affine=False.  In an NHWC model call residual_block_nhwc directly and
    skip the two full-tensor boundary transposes below.
    """
    del b1, b2
    x = jnp.transpose(x_nchw, (0, 2, 3, 1))          # NCHW -> NHWC
    w1_hwio = jnp.transpose(w1, (2, 3, 1, 0))        # (Cout,Cin,3,3) -> HWIO
    w2_hwio = jnp.transpose(w2, (2, 3, 1, 0))
    y = residual_block_nhwc(x, w1_hwio, w2_hwio)
    return jnp.transpose(y, (0, 3, 1, 2))            # NHWC -> NCHW


# ----------------------------- pure-JAX reference ---------------------------
def _reference(x_nchw, w1, b1, w2, b2):
    def conv_in(x, w, b):  # x: NHWC, w: (Cout,Cin,3,3)
        xp = jnp.pad(x, ((0, 0), (1, 1), (1, 1), (0, 0)), mode="reflect")
        y = jax.lax.conv_general_dilated(
            xp, jnp.transpose(w, (2, 3, 1, 0)),
            window_strides=(1, 1), padding="VALID",
            dimension_numbers=("NHWC", "HWIO", "NHWC"))
        y = y + b[None, None, None, :]
        mean = jnp.mean(y, axis=(1, 2), keepdims=True)
        var = jnp.var(y, axis=(1, 2), keepdims=True)
        return (y - mean) / jnp.sqrt(var + EPS)

    x = jnp.transpose(x_nchw, (0, 2, 3, 1))
    h = jax.nn.relu(conv_in(x, w1, b1))
    h = conv_in(h, w2, b2)
    return jnp.transpose(x + h, (0, 3, 1, 2))


if __name__ == "__main__":
    N, C, H, W = 2, 4, 16, 16
    key = jax.random.PRNGKey(0)
    kx, kw1, kb1, kw2, kb2 = jax.random.split(key, 5)

    x = jax.random.normal(kx, (N, C, H, W), dtype=jnp.float32)
    # Deterministic "kaiming-ish" init matching nn.Conv2d parameter shapes.
    fan_in = C * 3 * 3
    bound = 1.0 / jnp.sqrt(fan_in)
    w1 = jax.random.uniform(kw1, (C, C, 3, 3), jnp.float32, -bound, bound)
    b1 = jax.random.uniform(kb1, (C,), jnp.float32, -bound, bound)
    w2 = jax.random.uniform(kw2, (C, C, 3, 3), jnp.float32, -bound, bound)
    b2 = jax.random.uniform(kb2, (C,), jnp.float32, -bound, bound)

    out = residual_block(x, w1, b1, w2, b2)
    jax.block_until_ready(out)

    ref = _reference(x, w1, b1, w2, b2)
    assert out.shape == (N, C, H, W)
    # Tolerance covers fp reassociation from the exact (mathematical) bias
    # cancellation inside InstanceNorm.
    assert jnp.allclose(out, ref, atol=2e-4, rtol=2e-4), (
        float(jnp.max(jnp.abs(out - ref))))

    print("KERNEL_OK")
</pallas_src>

<mosaic_0001>
module attributes {stable_mosaic.version = 11 : i64} {
  func.func @residual_block_kernel(%arg0: i32, %arg1: memref<1x16x16x4xf32, #tpu.memory_space<vmem>>, %arg2: memref<3x3x4x4xf32, #tpu.memory_space<vmem>>, %arg3: memref<3x3x4x4xf32, #tpu.memory_space<vmem>>, %arg4: memref<1x16x16x4xf32, #tpu.memory_space<vmem>>, %arg5: memref<18x18x4xf32, #tpu.memory_space<vmem>>, %arg6: memref<256x4xf32, #tpu.memory_space<vmem>>) attributes {dimension_semantics = [#tpu.dimension_semantics<parallel>], iteration_bounds = array<i64: 2>, scalar_prefetch = 0 : i64, scratch_operands = 2 : i64, tpu.core_type = #tpu.core_type<tc>, window_params = [{transform_indices = @transform_0, window_bounds = array<i64: 1, 16, 16, 4>}, {pipeline_mode = #tpu.pipeline_mode<synchronous>, transform_indices = @transform_1, window_bounds = array<i64: 3, 3, 4, 4>}, {pipeline_mode = #tpu.pipeline_mode<synchronous>, transform_indices = @transform_2, window_bounds = array<i64: 3, 3, 4, 4>}, {transform_indices = @transform_3, window_bounds = array<i64: 1, 16, 16, 4>}]} {
    %c0 = arith.constant 0 : index
    %c0_0 = arith.constant 0 : index
    %c0_1 = arith.constant 0 : index
    %c0_2 = arith.constant 0 : index
    %0 = vector.load %arg1[%c0, %c0_0, %c0_1, %c0_2] : memref<1x16x16x4xf32, #tpu.memory_space<vmem>>, vector<1x16x16x4xf32>
    %1 = vector.shape_cast %0 : vector<1x16x16x4xf32> to vector<16x16x4xf32>
    %c0_3 = arith.constant 0 : index
    %c0_4 = arith.constant 0 : index
    %c0_5 = arith.constant 0 : index
    %c0_6 = arith.constant 0 : index
    %2 = vector.load %arg2[%c0_3, %c0_4, %c0_5, %c0_6] : memref<3x3x4x4xf32, #tpu.memory_space<vmem>>, vector<3x3x4x4xf32>
    %c0_7 = arith.constant 0 : index
    %c0_8 = arith.constant 0 : index
    %c0_9 = arith.constant 0 : index
    %c0_10 = arith.constant 0 : index
    %3 = vector.load %arg3[%c0_7, %c0_8, %c0_9, %c0_10] : memref<3x3x4x4xf32, #tpu.memory_space<vmem>>, vector<3x3x4x4xf32>
    %c1 = arith.constant 1 : index
    %c1_11 = arith.constant 1 : index
    %c0_12 = arith.constant 0 : index
    %4 = vector.load %arg5[%c1, %c1_11, %c0_12] : memref<18x18x4xf32, #tpu.memory_space<vmem>>, vector<16x16x4xf32>
    tpu.vector_store %arg5[%c1, %c1_11, %c0_12], %1 {strides = array<i32>} : memref<18x18x4xf32, #tpu.memory_space<vmem>>, vector<16x16x4xf32>,
    %5 = vector.extract_strided_slice %1 {offsets = [1, 0, 0], sizes = [1, 16, 4], strides = [1, 1, 1]} : vector<16x16x4xf32> to vector<1x16x4xf32>
    %c0_13 = arith.constant 0 : index
    %c1_14 = arith.constant 1 : index
    %c0_15 = arith.constant 0 : index
    %6 = vector.load %arg5[%c0_13, %c1_14, %c0_15] : memref<18x18x4xf32, #tpu.memory_space<vmem>>, vector<1x16x4xf32>
    tpu.vector_store %arg5[%c0_13, %c1_14, %c0_15], %5 {strides = array<i32>} : memref<18x18x4xf32, #tpu.memory_space<vmem>>, vector<1x16x4xf32>,
    %7 = vector.extract_strided_slice %1 {offsets = [14, 0, 0], sizes = [1, 16, 4], strides = [1, 1, 1]} : vector<16x16x4xf32> to vector<1x16x4xf32>
    %c17 = arith.constant 17 : index
    %c1_16 = arith.constant 1 : index
    %c0_17 = arith.constant 0 : index
    %8 = vector.load %arg5[%c17, %c1_16, %c0_17] : memref<18x18x4xf32, #tpu.memory_space<vmem>>, vector<1x16x4xf32>
    tpu.vector_store %arg5[%c17, %c1_16, %c0_17], %7 {strides = array<i32>} : memref<18x18x4xf32, #tpu.memory_space<vmem>>, vector<1x16x4xf32>,
    %c0_18 = arith.constant 0 : index
    %c2 = arith.constant 2 : index
    %c0_19 = arith.constant 0 : index
    %9 = vector.load %arg5[%c0_18, %c2, %c0_19] : memref<18x18x4xf32, #tpu.memory_space<vmem>>, vector<18x1x4xf32>
    %c0_20 = arith.constant 0 : index
    %c0_21 = arith.constant 0 : index
    %c0_22 = arith.constant 0 : index
    %10 = vector.load %arg5[%c0_20, %c0_21, %c0_22] : memref<18x18x4xf32, #tpu.memory_space<vmem>>, vector<18x1x4xf32>
    tpu.vector_store %arg5[%c0_20, %c0_21, %c0_22], %9 {strides = array<i32>} : memref<18x18x4xf32, #tpu.memory_space<vmem>>, vector<18x1x4xf32>,
    %c0_23 = arith.constant 0 : index
    %c15 = arith.constant 15 : index
    %c0_24 = arith.constant 0 : index
    %11 = vector.load %arg5[%c0_23, %c15, %c0_24] : memref<18x18x4xf32, #tpu.memory_space<vmem>>, vector<18x1x4xf32>
    %c0_25 = arith.constant 0 : index
    %c17_26 = arith.constant 17 : index
    %c0_27 = arith.constant 0 : index
    %12 = vector.load %arg5[%c0_25, %c17_26, %c0_27] : memref<18x18x4xf32, #tpu.memory_space<vmem>>, vector<18x1x4xf32>
    tpu.vector_store %arg5[%c0_25, %c17_26, %c0_27], %11 {strides = array<i32>} : memref<18x18x4xf32, #tpu.memory_space<vmem>>, vector<18x1x4xf32>,
    %cst = arith.constant 0.000000e+00 : f32
    %13 = vector.broadcast %cst : f32 to vector<256x4xf32>
    %c0_28 = arith.constant 0 : index
    %c0_29 = arith.constant 0 : index
    %14 = vector.load %arg6[%c0_28, %c0_29] : memref<256x4xf32, #tpu.memory_space<vmem>>, vector<256x4xf32>
    tpu.vector_store %arg6[%c0_28, %c0_29], %13 {strides = array<i32>} : memref<256x4xf32, #tpu.memory_space<vmem>>, vector<256x4xf32>,
    %c0_30 = arith.constant 0 : index
    %c0_31 = arith.constant 0 : index
    %c0_32 = arith.constant 0 : index
    %15 = vector.load %arg5[%c0_30, %c0_31, %c0_32] : memref<18x18x4xf32, #tpu.memory_space<vmem>>, vector<16x16x4xf32>
    %16 = vector.shape_cast %15 : vector<16x16x4xf32> to vector<256x4xf32>
    %c0_33 = arith.constant 0 : index
    %c0_34 = arith.constant 0 : index
    %17 = vector.load %arg6[%c0_33, %c0_34] : memref<256x4xf32, #tpu.memory_space<vmem>>, vector<256x4xf32>
    %18 = vector.extract_strided_slice %2 {offsets = [0, 0, 0, 0], sizes = [1, 1, 4, 4], strides = [1, 1, 1, 1]} : vector<3x3x4x4xf32> to vector<1x1x4x4xf32>
    %19 = vector.shape_cast %18 : vector<1x1x4x4xf32> to vector<4x4xf32>
    %cst_35 = arith.constant dense<0.000000e+00> : vector<256x4xf32>
    %20 = tpu.matmul %16, %19, %cst_35 {dimension_numbers = #tpu.dot_dimension_numbers<[1], [0], [0], [1], [0, 0, 1, 1], [], []>} : vector<256x4xf32>, vector<4x4xf32>, vector<256x4xf32> -> vector<256x4xf32>
    %21 = arith.addf %17, %20 : vector<256x4xf32>
    %c0_36 = arith.constant 0 : index
    %c0_37 = arith.constant 0 : index
    %22 = vector.load %arg6[%c0_36, %c0_37] : memref<256x4xf32, #tpu.memory_space<vmem>>, vector<256x4xf32>
    tpu.vector_store %arg6[%c0_36, %c0_37], %21 {strides = array<i32>} : memref<256x4xf32, #tpu.memory_space<vmem>>, vector<256x4xf32>,
    %c0_38 = arith.constant 0 : index
    %c1_39 = arith.constant 1 : index
    %c0_40 = arith.constant 0 : index
    %23 = vector.load %arg5[%c0_38, %c1_39, %c0_40] : memref<18x18x4xf32, #tpu.memory_space<vmem>>, vector<16x16x4xf32>
    %24 = vector.shape_cast %23 : vector<16x16x4xf32> to vector<256x4xf32>
    %c0_41 = arith.constant 0 : index
    %c0_42 = arith.constant 0 : index
    %25 = vector.load %arg6[%c0_41, %c0_42] : memref<256x4xf32, #tpu.memory_space<vmem>>, vector<256x4xf32>
    %26 = vector.extract_strided_slice %2 {offsets = [0, 1, 0, 0], sizes = [1, 1, 4, 4], strides = [1, 1, 1, 1]} : vector<3x3x4x4xf32> to vector<1x1x4x4xf32>
    %27 = vector.shape_cast %26 : vector<1x1x4x4xf32> to vector<4x4xf32>
    %cst_43 = arith.constant dense<0.000000e+00> : vector<256x4xf32>
    %28 = tpu.matmul %24, %27, %cst_43 {dimension_numbers = #tpu.dot_dimension_numbers<[1], [0], [0], [1], [0, 0, 1, 1], [], []>} : vector<256x4xf32>, vector<4x4xf32>, vector<256x4xf32> -> vector<256x4xf32>
    %29 = arith.addf %25, %28 : vector<256x4xf32>
    %c0_44 = arith.constant 0 : index
    %c0_45 = arith.constant 0 : index
    %30 = vector.load %arg6[%c0_44, %c0_45] : memref<256x4xf32, #tpu.memory_space<vmem>>, vector<256x4xf32>
    tpu.vector_store %arg6[%c0_44, %c0_45], %29 {strides = array<i32>} : memref<256x4xf32, #tpu.memory_space<vmem>>, vector<256x4xf32>,
    %c0_46 = arith.constant 0 : index
    %c2_47 = arith.constant 2 : index
    %c0_48 = arith.constant 0 : index
    %31 = vector.load %arg5[%c0_46, %c2_47, %c0_48] : memref<18x18x4xf32, #tpu.memory_space<vmem>>, vector<16x16x4xf32>
    %32 = vector.shape_cast %31 : vector<16x16x4xf32> to vector<256x4xf32>
    %c0_49 = arith.constant 0 : index
    %c0_50 = arith.constant 0 : index
    %33 = vector.load %arg6[%c0_49, %c0_50] : memref<256x4xf32, #tpu.memory_space<vmem>>, vector<256x4xf32>
    %34 = vector.extract_strided_slice %2 {offsets = [0, 2, 0, 0], sizes = [1, 1, 4, 4], strides = [1, 1, 1, 1]} : vector<3x3x4x4xf32> to vector<1x1x4x4xf32>
    %35 = vector.shape_cast %34 : vector<1x1x4x4xf32> to vector<4x4xf32>
    %cst_51 = arith.constant dense<0.000000e+00> : vector<256x4xf32>
    %36 = tpu.matmul %32, %35, %cst_51 {dimension_numbers = #tpu.dot_dimension_numbers<[1], [0], [0], [1], [0, 0, 1, 1], [], []>} : vector<256x4xf32>, vector<4x4xf32>, vector<256x4xf32> -> vector<256x4xf32>
    %37 = arith.addf %33, %36 : vector<256x4xf32>
    %c0_52 = arith.constant 0 : index
    %c0_53 = arith.constant 0 : index
    %38 = vector.load %arg6[%c0_52, %c0_53] : memref<256x4xf32, #tpu.memory_space<vmem>>, vector<256x4xf32>
    tpu.vector_store %arg6[%c0_52, %c0_53], %37 {strides = array<i32>} : memref<256x4xf32, #tpu.memory_space<vmem>>, vector<256x4xf32>,
    %c1_54 = arith.constant 1 : index
    %c0_55 = arith.constant 0 : index
    %c0_56 = arith.constant 0 : index
    %39 = vector.load %arg5[%c1_54, %c0_55, %c0_56] : memref<18x18x4xf32, #tpu.memory_space<vmem>>, vector<16x16x4xf32>
    %40 = vector.shape_cast %39 : vector<16x16x4xf32> to vector<256x4xf32>
    %c0_57 = arith.constant 0 : index
    %c0_58 = arith.constant 0 : index
    %41 = vector.load %arg6[%c0_57, %c0_58] : memref<256x4xf32, #tpu.memory_space<vmem>>, vector<256x4xf32>
    %42 = vector.extract_strided_slice %2 {offsets = [1, 0, 0, 0], sizes = [1, 1, 4, 4], strides = [1, 1, 1, 1]} : vector<3x3x4x4xf32> to vector<1x1x4x4xf32>
    %43 = vector.shape_cast %42 : vector<1x1x4x4xf32> to vector<4x4xf32>
    %cst_59 = arith.constant dense<0.000000e+00> : vector<256x4xf32>
    %44 = tpu.matmul %40, %43, %cst_59 {dimension_numbers = #tpu.dot_dimension_numbers<[1], [0], [0], [1], [0, 0, 1, 1], [], []>} : vector<256x4xf32>, vector<4x4xf32>, vector<256x4xf32> -> vector<256x4xf32>
    %45 = arith.addf %41, %44 : vector<256x4xf32>
    %c0_60 = arith.constant 0 : index
    %c0_61 = arith.constant 0 : index
    %46 = vector.load %arg6[%c0_60, %c0_61] : memref<256x4xf32, #tpu.memory_space<vmem>>, vector<256x4xf32>
    tpu.vector_store %arg6[%c0_60, %c0_61], %45 {strides = array<i32>} : memref<256x4xf32, #tpu.memory_space<vmem>>, vector<256x4xf32>,
    %c1_62 = arith.constant 1 : index
    %c1_63 = arith.constant 1 : index
    %c0_64 = arith.constant 0 : index
    %47 = vector.load %arg5[%c1_62, %c1_63, %c0_64] : memref<18x18x4xf32, #tpu.memory_space<vmem>>, vector<16x16x4xf32>
    %48 = vector.shape_cast %47 : vector<16x16x4xf32> to vector<256x4xf32>
    %c0_65 = arith.constant 0 : index
    %c0_66 = arith.constant 0 : index
    %49 = vector.load %arg6[%c0_65, %c0_66] : memref<256x4xf32, #tpu.memory_space<vmem>>, vector<256x4xf32>
    %50 = vector.extract_strided_slice %2 {offsets = [1, 1, 0, 0], sizes = [1, 1, 4, 4], strides = [1, 1, 1, 1]} : vector<3x3x4x4xf32> to vector<1x1x4x4xf32>
    %51 = vector.shape_cast %50 : vector<1x1x4x4xf32> to vector<4x4xf32>
    %cst_67 = arith.constant dense<0.000000e+00> : vector<256x4xf32>
    %52 = tpu.matmul %48, %51, %cst_67 {dimension_numbers = #tpu.dot_dimension_numbers<[1], [0], [0], [1], [0, 0, 1, 1], [], []>} : vector<256x4xf32>, vector<4x4xf32>, vector<256x4xf32> -> vector<256x4xf32>
    %53 = arith.addf %49, %52 : vector<256x4xf32>
    %c0_68 = arith.constant 0 : index
    %c0_69 = arith.constant 0 : index
    %54 = vector.load %arg6[%c0_68, %c0_69] : memref<256x4xf32, #tpu.memory_space<vmem>>, vector<256x4xf32>
    tpu.vector_store %arg6[%c0_68, %c0_69], %53 {strides = array<i32>} : memref<256x4xf32, #tpu.memory_space<vmem>>, vector<256x4xf32>,
    %c1_70 = arith.constant 1 : index
    %c2_71 = arith.constant 2 : index
    %c0_72 = arith.constant 0 : index
    %55 = vector.load %arg5[%c1_70, %c2_71, %c0_72] : memref<18x18x4xf32, #tpu.memory_space<vmem>>, vector<16x16x4xf32>
    %56 = vector.shape_cast %55 : vector<16x16x4xf32> to vector<256x4xf32>
    %c0_73 = arith.constant 0 : index
    %c0_74 = arith.constant 0 : index
    %57 = vector.load %arg6[%c0_73, %c0_74] : memref<256x4xf32, #tpu.memory_space<vmem>>, vector<256x4xf32>
    %58 = vector.extract_strided_slice %2 {offsets = [1, 2, 0, 0], sizes = [1, 1, 4, 4], strides = [1, 1, 1, 1]} : vector<3x3x4x4xf32> to vector<1x1x4x4xf32>
    %59 = vector.shape_cast %58 : vector<1x1x4x4xf32> to vector<4x4xf32>
    %cst_75 = arith.constant dense<0.000000e+00> : vector<256x4xf32>
    %60 = tpu.matmul %56, %59, %cst_75 {dimension_numbers = #tpu.dot_dimension_numbers<[1], [0], [0], [1], [0, 0, 1, 1], [], []>} : vector<256x4xf32>, vector<4x4xf32>, vector<256x4xf32> -> vector<256x4xf32>
    %61 = arith.addf %57, %60 : vector<256x4xf32>
    %c0_76 = arith.constant 0 : index
    %c0_77 = arith.constant 0 : index
    %62 = vector.load %arg6[%c0_76, %c0_77] : memref<256x4xf32, #tpu.memory_space<vmem>>, vector<256x4xf32>
    tpu.vector_store %arg6[%c0_76, %c0_77], %61 {strides = array<i32>} : memref<256x4xf32, #tpu.memory_space<vmem>>, vector<256x4xf32>,
    %c2_78 = arith.constant 2 : index
    %c0_79 = arith.constant 0 : index
    %c0_80 = arith.constant 0 : index
    %63 = vector.load %arg5[%c2_78, %c0_79, %c0_80] : memref<18x18x4xf32, #tpu.memory_space<vmem>>, vector<16x16x4xf32>
    %64 = vector.shape_cast %63 : vector<16x16x4xf32> to vector<256x4xf32>
    %c0_81 = arith.constant 0 : index
    %c0_82 = arith.constant 0 : index
    %65 = vector.load %arg6[%c0_81, %c0_82] : memref<256x4xf32, #tpu.memory_space<vmem>>, vector<256x4xf32>
    %66 = vector.extract_strided_slice %2 {offsets = [2, 0, 0, 0], sizes = [1, 1, 4, 4], strides = [1, 1, 1, 1]} : vector<3x3x4x4xf32> to vector<1x1x4x4xf32>
    %67 = vector.shape_cast %66 : vector<1x1x4x4xf32> to vector<4x4xf32>
    %cst_83 = arith.constant dense<0.000000e+00> : vector<256x4xf32>
    %68 = tpu.matmul %64, %67, %cst_83 {dimension_numbers = #tpu.dot_dimension_numbers<[1], [0], [0], [1], [0, 0, 1, 1], [], []>} : vector<256x4xf32>, vector<4x4xf32>, vector<256x4xf32> -> vector<256x4xf32>
    %69 = arith.addf %65, %68 : vector<256x4xf32>
    %c0_84 = arith.constant 0 : index
    %c0_85 = arith.constant 0 : index
    %70 = vector.load %arg6[%c0_84, %c0_85] : memref<256x4xf32, #tpu.memory_space<vmem>>, vector<256x4xf32>
    tpu.vector_store %arg6[%c0_84, %c0_85], %69 {strides = array<i32>} : memref<256x4xf32, #tpu.memory_space<vmem>>, vector<256x4xf32>,
    %c2_86 = arith.constant 2 : index
    %c1_87 = arith.constant 1 : index
    %c0_88 = arith.constant 0 : index
    %71 = vector.load %arg5[%c2_86, %c1_87, %c0_88] : memref<18x18x4xf32, #tpu.memory_space<vmem>>, vector<16x16x4xf32>
    %72 = vector.shape_cast %71 : vector<16x16x4xf32> to vector<256x4xf32>
    %c0_89 = arith.constant 0 : index
    %c0_90 = arith.constant 0 : index
    %73 = vector.load %arg6[%c0_89, %c0_90] : memref<256x4xf32, #tpu.memory_space<vmem>>, vector<256x4xf32>
    %74 = vector.extract_strided_slice %2 {offsets = [2, 1, 0, 0], sizes = [1, 1, 4, 4], strides = [1, 1, 1, 1]} : vector<3x3x4x4xf32> to vector<1x1x4x4xf32>
    %75 = vector.shape_cast %74 : vector<1x1x4x4xf32> to vector<4x4xf32>
    %cst_91 = arith.constant dense<0.000000e+00> : vector<256x4xf32>
    %76 = tpu.matmul %72, %75, %cst_91 {dimension_numbers = #tpu.dot_dimension_numbers<[1], [0], [0], [1], [0, 0, 1, 1], [], []>} : vector<256x4xf32>, vector<4x4xf32>, vector<256x4xf32> -> vector<256x4xf32>
    %77 = arith.addf %73, %76 : vector<256x4xf32>
    %c0_92 = arith.constant 0 : index
    %c0_93 = arith.constant 0 : index
    %78 = vector.load %arg6[%c0_92, %c0_93] : memref<256x4xf32, #tpu.memory_space<vmem>>, vector<256x4xf32>
    tpu.vector_store %arg6[%c0_92, %c0_93], %77 {strides = array<i32>} : memref<256x4xf32, #tpu.memory_space<vmem>>, vector<256x4xf32>,
    %c2_94 = arith.constant 2 : index
    %c2_95 = arith.constant 2 : index
    %c0_96 = arith.constant 0 : index
    %79 = vector.load %arg5[%c2_94, %c2_95, %c0_96] : memref<18x18x4xf32, #tpu.memory_space<vmem>>, vector<16x16x4xf32>
    %80 = vector.shape_cast %79 : vector<16x16x4xf32> to vector<256x4xf32>
    %c0_97 = arith.constant 0 : index
    %c0_98 = arith.constant 0 : index
    %81 = vector.load %arg6[%c0_97, %c0_98] : memref<256x4xf32, #tpu.memory_space<vmem>>, vector<256x4xf32>
    %82 = vector.extract_strided_slice %2 {offsets = [2, 2, 0, 0], sizes = [1, 1, 4, 4], strides = [1, 1, 1, 1]} : vector<3x3x4x4xf32> to vector<1x1x4x4xf32>
    %83 = vector.shape_cast %82 : vector<1x1x4x4xf32> to vector<4x4xf32>
    %cst_99 = arith.constant dense<0.000000e+00> : vector<256x4xf32>
    %84 = tpu.matmul %80, %83, %cst_99 {dimension_numbers = #tpu.dot_dimension_numbers<[1], [0], [0], [1], [0, 0, 1, 1], [], []>} : vector<256x4xf32>, vector<4x4xf32>, vector<256x4xf32> -> vector<256x4xf32>
    %85 = arith.addf %81, %84 : vector<256x4xf32>
    %c0_100 = arith.constant 0 : index
    %c0_101 = arith.constant 0 : index
    %86 = vector.load %arg6[%c0_100, %c0_101] : memref<256x4xf32, #tpu.memory_space<vmem>>, vector<256x4xf32>
    tpu.vector_store %arg6[%c0_100, %c0_101], %85 {strides = array<i32>} : memref<256x4xf32, #tpu.memory_space<vmem>>, vector<256x4xf32>,
    %c0_102 = arith.constant 0 : index
    %c0_103 = arith.constant 0 : index
    %87 = vector.load %arg6[%c0_102, %c0_103] : memref<256x4xf32, #tpu.memory_space<vmem>>, vector<256x4xf32>
    %cst_104 = arith.constant dense<0.000000e+00> : vector<4xf32>
    %88 = vector.multi_reduction <add>, %87, %cst_104 [0] : vector<256x4xf32> to vector<4xf32>
    %89 = vector.shape_cast %88 : vector<4xf32> to vector<1x4xf32>
    %cst_105 = arith.constant 2.560000e+02 : f32
    %90 = vector.broadcast %cst_105 : f32 to vector<1x4xf32>
    %91 = arith.divf %89, %90 : vector<1x4xf32>
    %92 = vector.broadcast %91 : vector<1x4xf32> to vector<256x4xf32>
    %93 = arith.subf %87, %92 : vector<256x4xf32>
    %94 = arith.mulf %93, %93 : vector<256x4xf32>
    %cst_106 = arith.constant dense<0.000000e+00> : vector<4xf32>
    %95 = vector.multi_reduction <add>, %94, %cst_106 [0] : vector<256x4xf32> to vector<4xf32>
    %96 = vector.shape_cast %95 : vector<4xf32> to vector<1x4xf32>
    %cst_107 = arith.constant 2.560000e+02 : f32
    %97 = vector.broadcast %cst_107 : f32 to vector<1x4xf32>
    %98 = arith.divf %96, %97 : vector<1x4xf32>
    %99 = vector.broadcast %91 : vector<1x4xf32> to vector<256x4xf32>
    %100 = arith.subf %87, %99 : vector<256x4xf32>
    %cst_108 = arith.constant 9.99999974E-6 : f32
    %101 = vector.broadcast %cst_108 : f32 to vector<1x4xf32>
    %102 = arith.addf %98, %101 : vector<1x4xf32>
    %103 = math.rsqrt %102 : vector<1x4xf32>
    %104 = vector.broadcast %103 : vector<1x4xf32> to vector<256x4xf32>
    %105 = arith.mulf %100, %104 : vector<256x4xf32>
    %106 = vector.shape_cast %105 : vector<256x4xf32> to vector<16x16x4xf32>
    %cst_109 = arith.constant 0.000000e+00 : f32
    %107 = vector.broadcast %cst_109 : f32 to vector<16x16x4xf32>
    %108 = arith.maximumf %106, %107 : vector<16x16x4xf32>
    %c1_110 = arith.constant 1 : index
    %c1_111 = arith.constant 1 : index
    %c0_112 = arith.constant 0 : index
    %109 = vector.load %arg5[%c1_110, %c1_111, %c0_112] : memref<18x18x4xf32, #tpu.memory_space<vmem>>, vector<16x16x4xf32>
    tpu.vector_store %arg5[%c1_110, %c1_111, %c0_112], %108 {strides = array<i32>} : memref<18x18x4xf32, #tpu.memory_space<vmem>>, vector<16x16x4xf32>,
    %110 = vector.extract_strided_slice %108 {offsets = [1, 0, 0], sizes = [1, 16, 4], strides = [1, 1, 1]} : vector<16x16x4xf32> to vector<1x16x4xf32>
    %c0_113 = arith.constant 0 : index
    %c1_114 = arith.constant 1 : index
    %c0_115 = arith.constant 0 : index
    %111 = vector.load %arg5[%c0_113, %c1_114, %c0_115] : memref<18x18x4xf32, #tpu.memory_space<vmem>>, vector<1x16x4xf32>
    tpu.vector_store %arg5[%c0_113, %c1_114, %c0_115], %110 {strides = array<i32>} : memref<18x18x4xf32, #tpu.memory_space<vmem>>, vector<1x16x4xf32>,
    %112 = vector.extract_strided_slice %108 {offsets = [14, 0, 0], sizes = [1, 16, 4], strides = [1, 1, 1]} : vector<16x16x4xf32> to vector<1x16x4xf32>
    %c17_116 = arith.constant 17 : index
    %c1_117 = arith.constant 1 : index
    %c0_118 = arith.constant 0 : index
    %113 = vector.load %arg5[%c17_116, %c1_117, %c0_118] : memref<18x18x4xf32, #tpu.memory_space<vmem>>, vector<1x16x4xf32>
    tpu.vector_store %arg5[%c17_116, %c1_117, %c0_118], %112 {strides = array<i32>} : memref<18x18x4xf32, #tpu.memory_space<vmem>>, vector<1x16x4xf32>,
    %c0_119 = arith.constant 0 : index
    %c2_120 = arith.constant 2 : index
    %c0_121 = arith.constant 0 : index
    %114 = vector.load %arg5[%c0_119, %c2_120, %c0_121] : memref<18x18x4xf32, #tpu.memory_space<vmem>>, vector<18x1x4xf32>
    %c0_122 = arith.constant 0 : index
    %c0_123 = arith.constant 0 : index
    %c0_124 = arith.constant 0 : index
    %115 = vector.load %arg5[%c0_122, %c0_123, %c0_124] : memref<18x18x4xf32, #tpu.memory_space<vmem>>, vector<18x1x4xf32>
    tpu.vector_store %arg5[%c0_122, %c0_123, %c0_124], %114 {strides = array<i32>} : memref<18x18x4xf32, #tpu.memory_space<vmem>>, vector<18x1x4xf32>,
    %c0_125 = arith.constant 0 : index
    %c15_126 = arith.constant 15 : index
    %c0_127 = arith.constant 0 : index
    %116 = vector.load %arg5[%c0_125, %c15_126, %c0_127] : memref<18x18x4xf32, #tpu.memory_space<vmem>>, vector<18x1x4xf32>
    %c0_128 = arith.constant 0 : index
    %c17_129 = arith.constant 17 : index
    %c0_130 = arith.constant 0 : index
    %117 = vector.load %arg5[%c0_128, %c17_129, %c0_130] : memref<18x18x4xf32, #tpu.memory_space<vmem>>, vector<18x1x4xf32>
    tpu.vector_store %arg5[%c0_128, %c17_129, %c0_130], %116 {strides = array<i32>} : memref<18x18x4xf32, #tpu.memory_space<vmem>>, vector<18x1x4xf32>,
    %cst_131 = arith.constant 0.000000e+00 : f32
    %118 = vector.broadcast %cst_131 : f32 to vector<256x4xf32>
    %c0_132 = arith.constant 0 : index
    %c0_133 = arith.constant 0 : index
    %119 = vector.load %arg6[%c0_132, %c0_133] : memref<256x4xf32, #tpu.memory_space<vmem>>, vector<256x4xf32>
    tpu.vector_store %arg6[%c0_132, %c0_133], %118 {strides = array<i32>} : memref<256x4xf32, #tpu.memory_space<vmem>>, vector<256x4xf32>,
    %c0_134 = arith.constant 0 : index
    %c0_135 = arith.constant 0 : index
    %c0_136 = arith.constant 0 : index
    %120 = vector.load %arg5[%c0_134, %c0_135, %c0_136] : memref<18x18x4xf32, #tpu.memory_space<vmem>>, vector<16x16x4xf32>
    %121 = vector.shape_cast %120 : vector<16x16x4xf32> to vector<256x4xf32>
    %c0_137 = arith.constant 0 : index
    %c0_138 = arith.constant 0 : index
    %122 = vector.load %arg6[%c0_137, %c0_138] : memref<256x4xf32, #tpu.memory_space<vmem>>, vector<256x4xf32>
    %123 = vector.extract_strided_slice %3 {offsets = [0, 0, 0, 0], sizes = [1, 1, 4, 4], strides = [1, 1, 1, 1]} : vector<3x3x4x4xf32> to vector<1x1x4x4xf32>
    %124 = vector.shape_cast %123 : vector<1x1x4x4xf32> to vector<4x4xf32>
    %cst_139 = arith.constant dense<0.000000e+00> : vector<256x4xf32>
    %125 = tpu.matmul %121, %124, %cst_139 {dimension_numbers = #tpu.dot_dimension_numbers<[1], [0], [0], [1], [0, 0, 1, 1], [], []>} : vector<256x4xf32>, vector<4x4xf32>, vector<256x4xf32> -> vector<256x4xf32>
    %126 = arith.addf %122, %125 : vector<256x4xf32>
    %c0_140 = arith.constant 0 : index
    %c0_141 = arith.constant 0 : index
    %127 = vector.load %arg6[%c0_140, %c0_141] : memref<256x4xf32, #tpu.memory_space<vmem>>, vector<256x4xf32>
    tpu.vector_store %arg6[%c0_140, %c0_141], %126 {strides = array<i32>} : memref<256x4xf32, #tpu.memory_space<vmem>>, vector<256x4xf32>,
    %c0_142 = arith.constant 0 : index
    %c1_143 = arith.constant 1 : index
    %c0_144 = arith.constant 0 : index
    %128 = vector.load %arg5[%c0_142, %c1_143, %c0_144] : memref<18x18x4xf32, #tpu.memory_space<vmem>>, vector<16x16x4xf32>
    %129 = vector.shape_cast %128 : vector<16x16x4xf32> to vector<256x4xf32>
    %c0_145 = arith.constant 0 : index
    %c0_146 = arith.constant 0 : index
    %130 = vector.load %arg6[%c0_145, %c0_146] : memref<256x4xf32, #tpu.memory_space<vmem>>, vector<256x4xf32>
    %131 = vector.extract_strided_slice %3 {offsets = [0, 1, 0, 0], sizes = [1, 1, 4, 4], strides = [1, 1, 1, 1]} : vector<3x3x4x4xf32> to vector<1x1x4x4xf32>
    %132 = vector.shape_cast %131 : vector<1x1x4x4xf32> to vector<4x4xf32>
    %cst_147 = arith.constant dense<0.000000e+00> : vector<256x4xf32>
    %133 = tpu.matmul %129, %132, %cst_147 {dimension_numbers = #tpu.dot_dimension_numbers<[1], [0], [0], [1], [0, 0, 1, 1], [], []>} : vector<256x4xf32>, vector<4x4xf32>, vector<256x4xf32> -> vector<256x4xf32>
    %134 = arith.addf %130, %133 : vector<256x4xf32>
    %c0_148 = arith.constant 0 : index
    %c0_149 = arith.constant 0 : index
    %135 = vector.load %arg6[%c0_148, %c0_149] : memref<256x4xf32, #tpu.memory_space<vmem>>, vector<256x4xf32>
    tpu.vector_store %arg6[%c0_148, %c0_149], %134 {strides = array<i32>} : memref<256x4xf32, #tpu.memory_space<vmem>>, vector<256x4xf32>,
    %c0_150 = arith.constant 0 : index
    %c2_151 = arith.constant 2 : index
    %c0_152 = arith.constant 0 : index
    %136 = vector.load %arg5[%c0_150, %c2_151, %c0_152] : memref<18x18x4xf32, #tpu.memory_space<vmem>>, vector<16x16x4xf32>
    %137 = vector.shape_cast %136 : vector<16x16x4xf32> to vector<256x4xf32>
    %c0_153 = arith.constant 0 : index
    %c0_154 = arith.constant 0 : index
    %138 = vector.load %arg6[%c0_153, %c0_154] : memref<256x4xf32, #tpu.memory_space<vmem>>, vector<256x4xf32>
    %139 = vector.extract_strided_slice %3 {offsets = [0, 2, 0, 0], sizes = [1, 1, 4, 4], strides = [1, 1, 1, 1]} : vector<3x3x4x4xf32> to vector<1x1x4x4xf32>
    %140 = vector.shape_cast %139 : vector<1x1x4x4xf32> to vector<4x4xf32>
    %cst_155 = arith.constant dense<0.000000e+00> : vector<256x4xf32>
    %141 = tpu.matmul %137, %140, %cst_155 {dimension_numbers = #tpu.dot_dimension_numbers<[1], [0], [0], [1], [0, 0, 1, 1], [], []>} : vector<256x4xf32>, vector<4x4xf32>, vector<256x4xf32> -> vector<256x4xf32>
    %142 = arith.addf %138, %141 : vector<256x4xf32>
    %c0_156 = arith.constant 0 : index
    %c0_157 = arith.constant 0 : index
    %143 = vector.load %arg6[%c0_156, %c0_157] : memref<256x4xf32, #tpu.memory_space<vmem>>, vector<256x4xf32>
    tpu.vector_store %arg6[%c0_156, %c0_157], %142 {strides = array<i32>} : memref<256x4xf32, #tpu.memory_space<vmem>>, vector<256x4xf32>,
    %c1_158 = arith.constant 1 : index
    %c0_159 = arith.constant 0 : index
    %c0_160 = arith.constant 0 : index
    %144 = vector.load %arg5[%c1_158, %c0_159, %c0_160] : memref<18x18x4xf32, #tpu.memory_space<vmem>>, vector<16x16x4xf32>
    %145 = vector.shape_cast %144 : vector<16x16x4xf32> to vector<256x4xf32>
    %c0_161 = arith.constant 0 : index
    %c0_162 = arith.constant 0 : index
    %146 = vector.load %arg6[%c0_161, %c0_162] : memref<256x4xf32, #tpu.memory_space<vmem>>, vector<256x4xf32>
    %147 = vector.extract_strided_slice %3 {offsets = [1, 0, 0, 0], sizes = [1, 1, 4, 4], strides = [1, 1, 1, 1]} : vector<3x3x4x4xf32> to vector<1x1x4x4xf32>
    %148 = vector.shape_cast %147 : vector<1x1x4x4xf32> to vector<4x4xf32>
    %cst_163 = arith.constant dense<0.000000e+00> : vector<256x4xf32>
    %149 = tpu.matmul %145, %148, %cst_163 {dimension_numbers = #tpu.dot_dimension_numbers<[1], [0], [0], [1], [0, 0, 1, 1], [], []>} : vector<256x4xf32>, vector<4x4xf32>, vector<256x4xf32> -> vector<256x4xf32>
    %150 = arith.addf %146, %149 : vector<256x4xf32>
    %c0_164 = arith.constant 0 : index
    %c0_165 = arith.constant 0 : index
    %151 = vector.load %arg6[%c0_164, %c0_165] : memref<256x4xf32, #tpu.memory_space<vmem>>, vector<256x4xf32>
    tpu.vector_store %arg6[%c0_164, %c0_165], %150 {strides = array<i32>} : memref<256x4xf32, #tpu.memory_space<vmem>>, vector<256x4xf32>,
    %c1_166 = arith.constant 1 : index
    %c1_167 = arith.constant 1 : index
    %c0_168 = arith.constant 0 : index
    %152 = vector.load %arg5[%c1_166, %c1_167, %c0_168] : memref<18x18x4xf32, #tpu.memory_space<vmem>>, vector<16x16x4xf32>
    %153 = vector.shape_cast %152 : vector<16x16x4xf32> to vector<256x4xf32>
    %c0_169 = arith.constant 0 : index
    %c0_170 = arith.constant 0 : index
    %154 = vector.load %arg6[%c0_169, %c0_170] : memref<256x4xf32, #tpu.memory_space<vmem>>, vector<256x4xf32>
    %155 = vector.extract_strided_slice %3 {offsets = [1, 1, 0, 0], sizes = [1, 1, 4, 4], strides = [1, 1, 1, 1]} : vector<3x3x4x4xf32> to vector<1x1x4x4xf32>
    %156 = vector.shape_cast %155 : vector<1x1x4x4xf32> to vector<4x4xf32>
    %cst_171 = arith.constant dense<0.000000e+00> : vector<256x4xf32>
    %157 = tpu.matmul %153, %156, %cst_171 {dimension_numbers = #tpu.dot_dimension_numbers<[1], [0], [0], [1], [0, 0, 1, 1], [], []>} : vector<256x4xf32>, vector<4x4xf32>, vector<256x4xf32> -> vector<256x4xf32>
    %158 = arith.addf %154, %157 : vector<256x4xf32>
    %c0_172 = arith.constant 0 : index
    %c0_173 = arith.constant 0 : index
    %159 = vector.load %arg6[%c0_172, %c0_173] : memref<256x4xf32, #tpu.memory_space<vmem>>, vector<256x4xf32>
    tpu.vector_store %arg6[%c0_172, %c0_173], %158 {strides = array<i32>} : memref<256x4xf32, #tpu.memory_space<vmem>>, vector<256x4xf32>,
    %c1_174 = arith.constant 1 : index
    %c2_175 = arith.constant 2 : index
    %c0_176 = arith.constant 0 : index
    %160 = vector.load %arg5[%c1_174, %c2_175, %c0_176] : memref<18x18x4xf32, #tpu.memory_space<vmem>>, vector<16x16x4xf32>
    %161 = vector.shape_cast %160 : vector<16x16x4xf32> to vector<256x4xf32>
    %c0_177 = arith.constant 0 : index
    %c0_178 = arith.constant 0 : index
    %162 = vector.load %arg6[%c0_177, %c0_178] : memref<256x4xf32, #tpu.memory_space<vmem>>, vector<256x4xf32>
    %163 = vector.extract_strided_slice %3 {offsets = [1, 2, 0, 0], sizes = [1, 1, 4, 4], strides = [1, 1, 1, 1]} : vector<3x3x4x4xf32> to vector<1x1x4x4xf32>
    %164 = vector.shape_cast %163 : vector<1x1x4x4xf32> to vector<4x4xf32>
    %cst_179 = arith.constant dense<0.000000e+00> : vector<256x4xf32>
    %165 = tpu.matmul %161, %164, %cst_179 {dimension_numbers = #tpu.dot_dimension_numbers<[1], [0], [0], [1], [0, 0, 1, 1], [], []>} : vector<256x4xf32>, vector<4x4xf32>, vector<256x4xf32> -> vector<256x4xf32>
    %166 = arith.addf %162, %165 : vector<256x4xf32>
    %c0_180 = arith.constant 0 : index
    %c0_181 = arith.constant 0 : index
    %167 = vector.load %arg6[%c0_180, %c0_181] : memref<256x4xf32, #tpu.memory_space<vmem>>, vector<256x4xf32>
    tpu.vector_store %arg6[%c0_180, %c0_181], %166 {strides = array<i32>} : memref<256x4xf32, #tpu.memory_space<vmem>>, vector<256x4xf32>,
    %c2_182 = arith.constant 2 : index
    %c0_183 = arith.constant 0 : index
    %c0_184 = arith.constant 0 : index
    %168 = vector.load %arg5[%c2_182, %c0_183, %c0_184] : memref<18x18x4xf32, #tpu.memory_space<vmem>>, vector<16x16x4xf32>
    %169 = vector.shape_cast %168 : vector<16x16x4xf32> to vector<256x4xf32>
    %c0_185 = arith.constant 0 : index
    %c0_186 = arith.constant 0 : index
    %170 = vector.load %arg6[%c0_185, %c0_186] : memref<256x4xf32, #tpu.memory_space<vmem>>, vector<256x4xf32>
    %171 = vector.extract_strided_slice %3 {offsets = [2, 0, 0, 0], sizes = [1, 1, 4, 4], strides = [1, 1, 1, 1]} : vector<3x3x4x4xf32> to vector<1x1x4x4xf32>
    %172 = vector.shape_cast %171 : vector<1x1x4x4xf32> to vector<4x4xf32>
    %cst_187 = arith.constant dense<0.000000e+00> : vector<256x4xf32>
    %173 = tpu.matmul %169, %172, %cst_187 {dimension_numbers = #tpu.dot_dimension_numbers<[1], [0], [0], [1], [0, 0, 1, 1], [], []>} : vector<256x4xf32>, vector<4x4xf32>, vector<256x4xf32> -> vector<256x4xf32>
    %174 = arith.addf %170, %173 : vector<256x4xf32>
    %c0_188 = arith.constant 0 : index
    %c0_189 = arith.constant 0 : index
    %175 = vector.load %arg6[%c0_188, %c0_189] : memref<256x4xf32, #tpu.memory_space<vmem>>, vector<256x4xf32>
    tpu.vector_store %arg6[%c0_188, %c0_189], %174 {strides = array<i32>} : memref<256x4xf32, #tpu.memory_space<vmem>>, vector<256x4xf32>,
    %c2_190 = arith.constant 2 : index
    %c1_191 = arith.constant 1 : index
    %c0_192 = arith.constant 0 : index
    %176 = vector.load %arg5[%c2_190, %c1_191, %c0_192] : memref<18x18x4xf32, #tpu.memory_space<vmem>>, vector<16x16x4xf32>
    %177 = vector.shape_cast %176 : vector<16x16x4xf32> to vector<256x4xf32>
    %c0_193 = arith.constant 0 : index
    %c0_194 = arith.constant 0 : index
    %178 = vector.load %arg6[%c0_193, %c0_194] : memref<256x4xf32, #tpu.memory_space<vmem>>, vector<256x4xf32>
    %179 = vector.extract_strided_slice %3 {offsets = [2, 1, 0, 0], sizes = [1, 1, 4, 4], strides = [1, 1, 1, 1]} : vector<3x3x4x4xf32> to vector<1x1x4x4xf32>
    %180 = vector.shape_cast %179 : vector<1x1x4x4xf32> to vector<4x4xf32>
    %cst_195 = arith.constant dense<0.000000e+00> : vector<256x4xf32>
    %181 = tpu.matmul %177, %180, %cst_195 {dimension_numbers = #tpu.dot_dimension_numbers<[1], [0], [0], [1], [0, 0, 1, 1], [], []>} : vector<256x4xf32>, vector<4x4xf32>, vector<256x4xf32> -> vector<256x4xf32>
    %182 = arith.addf %178, %181 : vector<256x4xf32>
    %c0_196 = arith.constant 0 : index
    %c0_197 = arith.constant 0 : index
    %183 = vector.load %arg6[%c0_196, %c0_197] : memref<256x4xf32, #tpu.memory_space<vmem>>, vector<256x4xf32>
    tpu.vector_store %arg6[%c0_196, %c0_197], %182 {strides = array<i32>} : memref<256x4xf32, #tpu.memory_space<vmem>>, vector<256x4xf32>,
    %c2_198 = arith.constant 2 : index
    %c2_199 = arith.constant 2 : index
    %c0_200 = arith.constant 0 : index
    %184 = vector.load %arg5[%c2_198, %c2_199, %c0_200] : memref<18x18x4xf32, #tpu.memory_space<vmem>>, vector<16x16x4xf32>
    %185 = vector.shape_cast %184 : vector<16x16x4xf32> to vector<256x4xf32>
    %c0_201 = arith.constant 0 : index
    %c0_202 = arith.constant 0 : index
    %186 = vector.load %arg6[%c0_201, %c0_202] : memref<256x4xf32, #tpu.memory_space<vmem>>, vector<256x4xf32>
    %187 = vector.extract_strided_slice %3 {offsets = [2, 2, 0, 0], sizes = [1, 1, 4, 4], strides = [1, 1, 1, 1]} : vector<3x3x4x4xf32> to vector<1x1x4x4xf32>
    %188 = vector.shape_cast %187 : vector<1x1x4x4xf32> to vector<4x4xf32>
    %cst_203 = arith.constant dense<0.000000e+00> : vector<256x4xf32>
    %189 = tpu.matmul %185, %188, %cst_203 {dimension_numbers = #tpu.dot_dimension_numbers<[1], [0], [0], [1], [0, 0, 1, 1], [], []>} : vector<256x4xf32>, vector<4x4xf32>, vector<256x4xf32> -> vector<256x4xf32>
    %190 = arith.addf %186, %189 : vector<256x4xf32>
    %c0_204 = arith.constant 0 : index
    %c0_205 = arith.constant 0 : index
    %191 = vector.load %arg6[%c0_204, %c0_205] : memref<256x4xf32, #tpu.memory_space<vmem>>, vector<256x4xf32>
    tpu.vector_store %arg6[%c0_204, %c0_205], %190 {strides = array<i32>} : memref<256x4xf32, #tpu.memory_space<vmem>>, vector<256x4xf32>,
    %c0_206 = arith.constant 0 : index
    %c0_207 = arith.constant 0 : index
    %192 = vector.load %arg6[%c0_206, %c0_207] : memref<256x4xf32, #tpu.memory_space<vmem>>, vector<256x4xf32>
    %cst_208 = arith.constant dense<0.000000e+00> : vector<4xf32>
    %193 = vector.multi_reduction <add>, %192, %cst_208 [0] : vector<256x4xf32> to vector<4xf32>
    %194 = vector.shape_cast %193 : vector<4xf32> to vector<1x4xf32>
    %cst_209 = arith.constant 2.560000e+02 : f32
    %195 = vector.broadcast %cst_209 : f32 to vector<1x4xf32>
    %196 = arith.divf %194, %195 : vector<1x4xf32>
    %197 = vector.broadcast %196 : vector<1x4xf32> to vector<256x4xf32>
    %198 = arith.subf %192, %197 : vector<256x4xf32>
    %199 = arith.mulf %198, %198 : vector<256x4xf32>
    %cst_210 = arith.constant dense<0.000000e+00> : vector<4xf32>
    %200 = vector.multi_reduction <add>, %199, %cst_210 [0] : vector<256x4xf32> to vector<4xf32>
    %201 = vector.shape_cast %200 : vector<4xf32> to vector<1x4xf32>
    %cst_211 = arith.constant 2.560000e+02 : f32
    %202 = vector.broadcast %cst_211 : f32 to vector<1x4xf32>
    %203 = arith.divf %201, %202 : vector<1x4xf32>
    %204 = vector.broadcast %196 : vector<1x4xf32> to vector<256x4xf32>
    %205 = arith.subf %192, %204 : vector<256x4xf32>
    %cst_212 = arith.constant 9.99999974E-6 : f32
    %206 = vector.broadcast %cst_212 : f32 to vector<1x4xf32>
    %207 = arith.addf %203, %206 : vector<1x4xf32>
    %208 = math.rsqrt %207 : vector<1x4xf32>
    %209 = vector.broadcast %208 : vector<1x4xf32> to vector<256x4xf32>
    %210 = arith.mulf %205, %209 : vector<256x4xf32>
    %211 = vector.shape_cast %210 : vector<256x4xf32> to vector<16x16x4xf32>
    %c0_213 = arith.constant 0 : index
    %c0_214 = arith.constant 0 : index
    %c0_215 = arith.constant 0 : index
    %c0_216 = arith.constant 0 : index
    %212 = vector.load %arg1[%c0_213, %c0_214, %c0_215, %c0_216] : memref<1x16x16x4xf32, #tpu.memory_space<vmem>>, vector<1x16x16x4xf32>
    %213 = vector.shape_cast %212 : vector<1x16x16x4xf32> to vector<16x16x4xf32>
    %214 = arith.addf %213, %211 : vector<16x16x4xf32>
    %c0_217 = arith.constant 0 : index
    %c0_218 = arith.constant 0 : index
    %c0_219 = arith.constant 0 : index
    %c0_220 = arith.constant 0 : index
    %215 = vector.load %arg4[%c0_217, %c0_218, %c0_219, %c0_220] : memref<1x16x16x4xf32, #tpu.memory_space<vmem>>, vector<1x16x16x4xf32>
    %216 = vector.shape_cast %215 : vector<1x16x16x4xf32> to vector<16x16x4xf32>
    %217 = vector.shape_cast %214 : vector<16x16x4xf32> to vector<1x16x16x4xf32>
    tpu.vector_store %arg4[%c0_217, %c0_218, %c0_219, %c0_220], %217 {strides = array<i32>} : memref<1x16x16x4xf32, #tpu.memory_space<vmem>>, vector<1x16x16x4xf32>,
    return
  }
  func.func @transform_0(%arg0: i32) -> (i32, i32, i32, i32) {
    %c0_i32 = arith.constant 0 : i32
    %c0_i32_0 = arith.constant 0 : i32
    %c0_i32_1 = arith.constant 0 : i32
    %c0_i32_2 = arith.constant 0 : i32
    return %arg0, %c0_i32, %c0_i32_0, %c0_i32_1 : i32, i32, i32, i32
  }
  func.func @transform_1(%arg0: i32) -> (i32, i32, i32, i32) {
    %c0_i32 = arith.constant 0 : i32
    %c0_i32_0 = arith.constant 0 : i32
    %c0_i32_1 = arith.constant 0 : i32
    %c0_i32_2 = arith.constant 0 : i32
    %c0_i32_3 = arith.constant 0 : i32
    return %c0_i32, %c0_i32_0, %c0_i32_1, %c0_i32_2 : i32, i32, i32, i32
  }
  func.func @transform_2(%arg0: i32) -> (i32, i32, i32, i32) {
    %c0_i32 = arith.constant 0 : i32
    %c0_i32_0 = arith.constant 0 : i32
    %c0_i32_1 = arith.constant 0 : i32
    %c0_i32_2 = arith.constant 0 : i32
    %c0_i32_3 = arith.constant 0 : i32
    return %c0_i32, %c0_i32_0, %c0_i32_1, %c0_i32_2 : i32, i32, i32, i32
  }
  func.func @transform_3(%arg0: i32) -> (i32, i32, i32, i32) {
    %c0_i32 = arith.constant 0 : i32
    %c0_i32_0 = arith.constant 0 : i32
    %c0_i32_1 = arith.constant 0 : i32
    %c0_i32_2 = arith.constant 0 : i32
    return %arg0, %c0_i32, %c0_i32_0, %c0_i32_1 : i32, i32, i32, i32
  }
}

</mosaic_0001>

<bundles_post_ra>
// kernel: residual_block.1
= control target key start
LH: loop header
LB: loop body
LE: loop exit
PB: predicated region body
PF: predicated region fallthrough
CT: control target
= control target key end

     0   :  { %s8030_s12 = smov 0   ;;  %s10878_s0 = inlined_call_operand.vmem [shape: f32[2,16,16,4], index: 0, kind: input, shape index: {}]   ;;  %s10879_s1 = inlined_call_operand.vmem [shape: f32[3,3,4,4], index: 1, kind: input, shape index: {}]   ;;  %s10880_s2 = inlined_call_operand.vmem [shape: f32[3,3,4,4], index: 2, kind: input, shape index: {}]   ;;  %s10881_s3 = inlined_call_operand.vmem [shape: f32[2,16,16,4], index: 3, kind: output, shape index: {}]  }
   0x1 LB: > { %s7375_s13 = sadd.s32 4294967295, %s8006_s12   ;;  %p7379_p0 = scmp.ge.s32.totalorder %s8006_s12, 1  ;;  %s8006_s12 = sphi %s8030_s12, %s13_s12  }
   0x2   : > { %p137_p1 = scmp.lt.s32.totalorder %s8006_s12, 3 }
   0x4   : > { %p138_p2 = pnand %p7379_p0, %p137_p1 }
   0x5   : > { %p161_p3 = scmp.lt.s32.totalorder (!%p138_p2), %s7375_s13, 1 }
   0x6   : > { %141 = sbr.rel (%p138_p2) target bundleno = 2047 (0x7ff), region = 32 }
   0xb   : > { %v203_v0 = vld [vmem:[%s10879_s1] sm:$0xf]  ;;  %vm525_vm0 = vcmask 1043456   ;;  %v205_v1 = vld [vmem:[%s10879_s1 + $0x8] sm:$0xf]  ;;  %s10883_s13 = smov (!%p161_p3, %s7375_s13), 1 }
   0xc   : > { %7982 = vmatpush.msk.msra.mxu2 %vm525_vm0, %v203_v0  ;;  %v204_v2 = vld [vmem:[%s10879_s1 + $0x4] sm:$0xf]  ;;  %v206_v3 = vld [vmem:[%s10879_s1 + $0xc] sm:$0xf]  ;;  %7384 = vmatpush.msk.msra.mxu0 %vm525_vm0, %v203_v0  ;;  %s7980_s22 = sshll.u32 %s10883_s13, 8  ;;  %vm222_vm1 = vcmask 31744  }
   0xd   : > { %7983 = vmatpush.msk.msra.mxu3 %vm525_vm0, %v204_v2  ;;  %7417 = vmatpush.msk.msra.mxu1 %vm525_vm0, %v204_v2  ;;  %s8064_s25 = scalar_lea.vmem %s10878_s0, %s7980_s22  ;;  %vm278_vm2 = vcmask 24576   ;;  %v207_v12 = vld [vmem:[%s10879_s1 + $0x10] sm:$0xf]  ;;  %s10727_s6 = scalar_lea.vmem %s10881_s3, %s7980_s22 }
   0xe   : > { %7450 = vmatpush.msk.msrb.mxu2 %vm525_vm0, %v205_v1  ;;  %v185_v4 = vld [vmem:[%s8064_s25 + $0x70] sm:$0xff]  ;;  %v186_v5 = vld [vmem:[%s8064_s25 + $0x78] sm:$0xff]  ;;  %v187_v6 = vld [vmem:[%s8064_s25 + $0x80] sm:$0xff]  ;;  %7516 = vmatpush.msk.msrb.mxu0 %vm525_vm0, %v207_v12 }
   0xf   : > { %7483 = vmatpush.msk.msrb.mxu3 %vm525_vm0, %v206_v3  ;;  %237 = vst.msk [vmem:[#allocation2 + $0xc1] sm:$0xff] %vm222_vm1, %v185_v4  ;;  %v188_v7 = vld [vmem:[%s8064_s25 + $0x88] sm:$0xff]  ;;  %v173_v8 = vld [vmem:[%s8064_s25 + $0x10] sm:$0xff]  ;;  %v174_v14 = vld [vmem:[%s8064_s25 + $0x18] sm:$0xff] }
  0x10   : > { %238 = vst.msk [vmem:[#allocation2 + $0xc9] sm:$0xff] %vm222_vm1, %v186_v5  ;;  %v189_v9 = vld [vmem:[%s8064_s25 + $0x90] sm:$0xff]  ;;  %v171_v16 = vld [vmem:[%s8064_s25] sm:$0xff]  ;;  %v190_v20 = vld [vmem:[%s8064_s25 + $0x98] sm:$0xff] }
  0x11   : > { %239 = vst.msk [vmem:[#allocation2 + $0xd9] sm:$0xff] %vm222_vm1, %v187_v6  ;;  %v191_v21 = vld [vmem:[%s8064_s25 + $0xa0] sm:$0xff]  ;;  %v172_v30 = vld [vmem:[%s8064_s25 + $0x8] sm:$0xff]  ;;  %v193_v34 = vld [vmem:[%s8064_s25 + $0xb0] sm:$0xff] }
  0x12   : > { %240 = vst.msk [vmem:[#allocation2 + $0xe1] sm:$0xff] %vm222_vm1, %v188_v7  ;;  %v192_v33 = vld [vmem:[%s8064_s25 + $0xa8] sm:$0xff]  ;;  %v175_v43 = vld [vmem:[%s8064_s25 + $0x20] sm:$0xff]  ;;  %v194_v46 = vld [vmem:[%s8064_s25 + $0xb8] sm:$0xff] }
  0x13   : > { %255 = vst.msk [vmem:[#allocation2 + $0x1] sm:$0xff] %vm222_vm1, %v173_v8  ;;  %v195_v47 = vld [vmem:[%s8064_s25 + $0xc0] sm:$0xff]  ;;  %v176_v56 = vld [vmem:[%s8064_s25 + $0x28] sm:$0xff]  ;;  %v177_v57 = vld [vmem:[%s8064_s25 + $0x30] sm:$0xff] }
  0x14   : > { %225 = vst.msk [vmem:[#allocation2 + $0x31] sm:$0xff] %vm222_vm1, %v173_v8  ;;  %v196_v60 = vld [vmem:[%s8064_s25 + $0xc8] sm:$0xff]  ;;  %v197_v61 = vld [vmem:[%s8064_s25 + $0xd0] sm:$0xff]  ;;  %v178_v6 = vld [vmem:[%s8064_s25 + $0x38] sm:$0xff] }
  0x15   : > { %241 = vst.msk [vmem:[#allocation2 + $0xf1] sm:$0xff] %vm222_vm1, %v189_v9  ;;  %v179_v7 = vld [vmem:[%s8064_s25 + $0x40] sm:$0xff] }
  0x16   : > { %v268_v10 = vld [vmem:[#allocation2 + $0xc2] sm:$0x1]  ;;  %256 = vst.msk [vmem:[#allocation2 + $0x9] sm:$0xff] %vm222_vm1, %v174_v14 }
  0x17   : > { %v722_v11 = vld [vmem:[#allocation2 + $0xc1] sm:$0xff]  ;;  %287 = vst.msk [vmem:[#allocation2 + $0xc0] sm:$0x1] %vm278_vm2, %v268_v10  ;;  %v723_v17 = vld [vmem:[#allocation2 + $0xc9] sm:$0xff]  ;;  %v198_v10 = vld [vmem:[%s8064_s25 + $0xd8] sm:$0xff] }
  0x18   : > { %7434 = vmatmul.msk.f32.vlgmr.msra.gmra.mxu3 %vm222_vm1, %v722_v11  ;;  %v269_v13 = vld [vmem:[#allocation2 + $0xda] sm:$0x1]  ;;  %226 = vst.msk [vmem:[#allocation2 + $0x39] sm:$0xff] %vm222_vm1, %v174_v14  ;;  %v382_v24 = vld [vmem:[#allocation2 + $0xc8] sm:$0xff]  ;;  %v199_v11 = vld [vmem:[%s8064_s25 + $0xe0] sm:$0xff] }
  0x19   : > { %288 = vst.msk [vmem:[#allocation2 + $0xd8] sm:$0x1] %vm278_vm2, %v269_v13  ;;  %v724_v25 = vld [vmem:[#allocation2 + $0xd9] sm:$0xff]  ;;  %v725_v32 = vld [vmem:[#allocation2 + $0xe1] sm:$0xff] }
  0x1a   : > { %v260_v15 = vld [vmem:[#allocation2 + $0x2] sm:$0x1]  ;;  %223 = vst.msk [vmem:[#allocation2 + $0x19] sm:$0xff] %vm222_vm1, %v171_v16 }
  0x1b   : > { %279 = vst.msk [vmem:[#allocation2] sm:$0x1] %vm278_vm2, %v260_v15  ;;  %v706_v22 = vld [vmem:[#allocation2 + $0x1] sm:$0xff]  ;;  %v262_v37 = vld [vmem:[#allocation2 + $0x32] sm:$0x1] }
  0x1c   : > { %v270_v18 = vld [vmem:[#allocation2 + $0xf2] sm:$0x1]  ;;  %242 = vst.msk [vmem:[#allocation2 + $0xf9] sm:$0xff] %vm222_vm1, %v190_v20  ;;  %7418 = vmatmul.msk.f32.vlgmr.msra.gmra.mxu1 %vm222_vm1, %v706_v22  ;;  %v384_v38 = vld [vmem:[#allocation2 + $0xe0] sm:$0xff]  ;;  %v180_v20 = vld [vmem:[%s8064_s25 + $0x48] sm:$0xff] }
  0x1d   : > { %289 = vst.msk [vmem:[#allocation2 + $0xf0] sm:$0x1] %vm278_vm2, %v270_v18  ;;  %v707_v27 = vld [vmem:[#allocation2 + $0x9] sm:$0xff]  ;;  %v726_v39 = vld [vmem:[#allocation2 + $0xf1] sm:$0xff] }
  0x1e   : > { %v381_v19 = vld [vmem:[#allocation2 + $0xc0] sm:$0xff]  ;;  %243 = vst.msk [vmem:[#allocation2 + $0x109] sm:$0xff] %vm222_vm1, %v191_v21  ;;  %v366_v29 = vld [vmem:[#allocation2 + $0x8] sm:$0xff]  ;;  %v8144_v49 = vld [vmem:[#allocation2 + $0x31] sm:$0xff] }
  0x1f   : > { %7401 = vmatmul.msk.f32.vlgmr.msra.gmra.mxu2 %vm222_vm1, %v381_v19  ;;  %224 = vst.msk [vmem:[#allocation2 + $0x21] sm:$0xff] %vm222_vm1, %v172_v30  ;;  %v8154_v53 = vld [vmem:[#allocation2 + $0x39] sm:$0xff]  ;;  %v181_v21 = vld [vmem:[%s8064_s25 + $0x50] sm:$0xff] }
  0x20   : > { %7435 = vmatmul.msk.f32.gmra.mxu3 %vm222_vm1, %v723_v17  ;;  %v383_v31 = vld [vmem:[#allocation2 + $0xd8] sm:$0xff]  ;;  %244 = vst.msk [vmem:[#allocation2 + $0x111] sm:$0xff] %vm222_vm1, %v192_v33  ;;  %v183_v33 = vld [vmem:[%s8064_s25 + $0x60] sm:$0xff] }
  0x21   : > { %v261_v26 = vld [vmem:[#allocation2 + $0x1a] sm:$0x1]  ;;  %245 = vst.msk [vmem:[#allocation2 + $0x121] sm:$0xff] %vm222_vm1, %v193_v34  ;;  %v8008_v34 = vmov 0.0  }
  0x22   : > { %v365_v23 = vld [vmem:[#allocation2] sm:$0xff]  ;;  %280 = vst.msk [vmem:[#allocation2 + $0x18] sm:$0x1] %vm278_vm2, %v261_v26  ;;  %v8156_v55 = vld [vmem:[#allocation2 + $0x38] sm:$0xff] }
  0x23   : > { %7385 = vmatmul.msk.f32.vlgmr.msra.gmra.mxu0 %vm222_vm1, %v365_v23  ;;  %v8113_v35 = vld [vmem:[#allocation2 + $0x19] sm:$0xff]  ;;  %281 = vst.msk [vmem:[#allocation2 + $0x30] sm:$0x1] %vm278_vm2, %v262_v37 }
  0x24   : > { %7419 = vmatmul.msk.f32.gmra.mxu1 %vm222_vm1, %v707_v27  ;;  %227 = vst.msk [vmem:[#allocation2 + $0x49] sm:$0xff] %vm222_vm1, %v175_v43  ;;  %v385_v44 = vld [vmem:[#allocation2 + $0xf0] sm:$0xff]  ;;  %v727_v45 = vld [vmem:[#allocation2 + $0xf9] sm:$0xff] }
  0x25   : > { %v271_v28 = vld [vmem:[#allocation2 + $0x10a] sm:$0x1]  ;;  %246 = vst.msk [vmem:[#allocation2 + $0x129] sm:$0xff] %vm222_vm1, %v194_v46  ;;  %v386_v51 = vld [vmem:[#allocation2 + $0xf8] sm:$0xff] }
  0x26   : > { %290 = vst.msk [vmem:[#allocation2 + $0x108] sm:$0x1] %vm278_vm2, %v271_v28  ;;  %v8126_v40 = vld [vmem:[#allocation2 + $0x21] sm:$0xff]  ;;  %v728_v52 = vld [vmem:[#allocation2 + $0x109] sm:$0xff]  ;;  %v210_v46 = vld [vmem:[%s10879_s1 + $0x1c] sm:$0xf] }
  0x27   : > { %7402 = vmatmul.msk.f32.gmra.mxu2 %vm222_vm1, %v382_v24  ;;  %v8128_v42 = vld [vmem:[#allocation2 + $0x20] sm:$0xff]  ;;  %247 = vst.msk [vmem:[#allocation2 + $0x139] sm:$0xff] %vm222_vm1, %v195_v47  ;;  %v729_v59 = vld [vmem:[#allocation2 + $0x111] sm:$0xff]  ;;  %v200_v24 = vld [vmem:[%s8064_s25 + $0xe8] sm:$0xff]  ;;  %7615 = vmatpush.msk.msra.mxu3 %vm525_vm0, %v210_v46 }
  0x28   : > { %7436 = vmatmul.msk.f32.gmra.mxu3 %vm222_vm1, %v724_v25  ;;  %v272_v41 = vld [vmem:[#allocation2 + $0x122] sm:$0x1]  ;;  %228 = vst.msk [vmem:[#allocation2 + $0x51] sm:$0xff] %vm222_vm1, %v176_v56  ;;  %v388_v1 = vld [vmem:[#allocation2 + $0x110] sm:$0xff] }
  0x29   : > { %v8116_v36 = vld [vmem:[#allocation2 + $0x18] sm:$0xff]  ;;  %291 = vst.msk [vmem:[#allocation2 + $0x120] sm:$0x1] %vm278_vm2, %v272_v41  ;;  %v730_v2 = vld [vmem:[#allocation2 + $0x121] sm:$0xff] }
  0x2a   : > { %v8142_v48 = vld [vmem:[#allocation2 + $0x30] sm:$0xff]  ;;  %229 = vst.msk [vmem:[#allocation2 + $0x61] sm:$0xff] %vm222_vm1, %v177_v57  ;;  %v211_v57 = vld [vmem:[%s10879_s1 + $0x20] sm:$0xf] }
  0x2b   : > { %7386 = vmatmul.msk.f32.gmra.mxu0 %vm222_vm1, %v366_v29  ;;  %v263_v50 = vld [vmem:[#allocation2 + $0x4a] sm:$0x1]  ;;  %248 = vst.msk [vmem:[#allocation2 + $0x141] sm:$0xff] %vm222_vm1, %v196_v60 }
  0x2c   : > { %7420 = vmatmul.msk.f32.gmra.mxu1 %vm222_vm1, %v8113_v35  ;;  %282 = vst.msk [vmem:[#allocation2 + $0x48] sm:$0x1] %vm278_vm2, %v263_v50  ;;  %v8171_v62 = vld [vmem:[#allocation2 + $0x49] sm:$0xff]  ;;  %7648 = vmatpush.msk.msra.mxu0 %vm525_vm0, %v211_v57 }
  0x2d   : > { %v387_v58 = vld [vmem:[#allocation2 + $0x108] sm:$0xff]  ;;  %249 = vst.msk [vmem:[#allocation2 + $0x151] sm:$0xff] %vm222_vm1, %v197_v61 }
  0x2e   : > { %v273_v54 = vld [vmem:[#allocation2 + $0x13a] sm:$0x1]  ;;  %230 = vst.msk [vmem:[#allocation2 + $0x69] sm:$0xff] %vm222_vm1, %v178_v6  ;;  %v731_v9 = vld [vmem:[#allocation2 + $0x129] sm:$0xff] }
  0x2f   : > { %7403 = vmatmul.msk.f32.gmra.mxu2 %vm222_vm1, %v383_v31  ;;  %292 = vst.msk [vmem:[#allocation2 + $0x138] sm:$0x1] %vm278_vm2, %v273_v54  ;;  %v8184_v3 = vld [vmem:[#allocation2 + $0x51] sm:$0xff]  ;;  %v390_v15 = vld [vmem:[#allocation2 + $0x128] sm:$0xff]  ;;  %v732_v16 = vld [vmem:[#allocation2 + $0x139] sm:$0xff] }
  0x30   : > { %7437 = vmatmul.msk.f32.gmra.mxu3 %vm222_vm1, %v725_v32  ;;  %v8186_v5 = vld [vmem:[#allocation2 + $0x50] sm:$0xff]  ;;  %231 = vst.msk [vmem:[#allocation2 + $0x79] sm:$0xff] %vm222_vm1, %v179_v7  ;;  %v389_v8 = vld [vmem:[#allocation2 + $0x120] sm:$0xff]  ;;  %v182_v32 = vld [vmem:[%s8064_s25 + $0x58] sm:$0xff] }
  0x31   : > { %v264_v0 = vld [vmem:[#allocation2 + $0x62] sm:$0x1]  ;;  %250 = vst.msk [vmem:[#allocation2 + $0x159] sm:$0xff] %vm222_vm1, %v198_v10  ;;  %v184_v61 = vld [vmem:[%s8064_s25 + $0x68] sm:$0xff] }
  0x32   : > { %283 = vst.msk [vmem:[#allocation2 + $0x60] sm:$0x1] %vm278_vm2, %v264_v0  ;;  %v8201_v12 = vld [vmem:[#allocation2 + $0x61] sm:$0xff] }
  0x33   : > { %7387 = vmatmul.msk.f32.gmra.mxu0 %vm222_vm1, %v8116_v36  ;;  %v8174_v63 = vld [vmem:[#allocation2 + $0x48] sm:$0xff]  ;;  %251 = vst.msk [vmem:[#allocation2 + $0x169] sm:$0xff] %vm222_vm1, %v199_v11  ;;  %v392_v28 = vld [vmem:[#allocation2 + $0x140] sm:$0xff] }
  0x34   : > { %7421 = vmatmul.msk.f32.gmra.mxu1 %vm222_vm1, %v8126_v40  ;;  %v274_v4 = vld [vmem:[#allocation2 + $0x152] sm:$0x1]  ;;  %258 = vst.msk [vmem:[#allocation2 + $0x199] sm:$0xff] %vm222_vm1, %v199_v11  ;;  %v733_v23 = vld [vmem:[#allocation2 + $0x141] sm:$0xff] }
  0x35   : > { %293 = vst.msk [vmem:[#allocation2 + $0x150] sm:$0x1] %vm278_vm2, %v274_v4  ;;  %v8215_v17 = vld [vmem:[#allocation2 + $0x69] sm:$0xff]  ;;  %v734_v29 = vld [vmem:[#allocation2 + $0x151] sm:$0xff] }
  0x36   : > { %v8217_v19 = vld [vmem:[#allocation2 + $0x68] sm:$0xff]  ;;  %232 = vst.msk [vmem:[#allocation2 + $0x81] sm:$0xff] %vm222_vm1, %v180_v20  ;;  %v391_v22 = vld [vmem:[#allocation2 + $0x138] sm:$0xff] }
  0x37   : > { %7404 = vmatmul.msk.f32.gmra.mxu2 %vm222_vm1, %v384_v38  ;;  %v265_v14 = vld [vmem:[#allocation2 + $0x7a] sm:$0x1]  ;;  %233 = vst.msk [vmem:[#allocation2 + $0x91] sm:$0xff] %vm222_vm1, %v181_v21  ;;  %v1046_v0 = vld [vmem:[#allocation2 + $0x2] sm:$0xff] }
  0x38   : > { %7438 = vmatmul.msk.f32.gmra.mxu3 %vm222_vm1, %v726_v39  ;;  %284 = vst.msk [vmem:[#allocation2 + $0x78] sm:$0x1] %vm278_vm2, %v265_v14  ;;  %v8231_v25 = vld [vmem:[#allocation2 + $0x79] sm:$0xff] }
  0x39   : > { %v8204_v13 = vld [vmem:[#allocation2 + $0x60] sm:$0xff]  ;;  %252 = vst.msk [vmem:[#allocation2 + $0x171] sm:$0xff] %vm222_vm1, %v200_v24  ;;  %v209_v39 = vld [vmem:[%s10879_s1 + $0x18] sm:$0xf] }
  0x3a   : > { %v275_v18 = vld [vmem:[#allocation2 + $0x16a] sm:$0x1]  ;;  %259 = vst.msk [vmem:[#allocation2 + $0x1a1] sm:$0xff] %vm222_vm1, %v200_v24  ;;  %v735_v38 = vld [vmem:[#allocation2 + $0x159] sm:$0xff]  ;;  %7582 = vmatpush.msk.msra.mxu2 %vm525_vm0, %v209_v39 }
  0x3b   : > { %7388 = vmatmul.msk.f32.gmra.mxu0 %vm222_vm1, %v8128_v42  ;;  %294 = vst.msk [vmem:[#allocation2 + $0x168] sm:$0x1] %vm278_vm2, %v275_v18 }
  0x3c   : > { %7422 = vmatmul.msk.f32.gmra.mxu1 %vm222_vm1, %v8144_v49  ;;  %234 = vst.msk [vmem:[#allocation2 + $0x99] sm:$0xff] %vm222_vm1, %v182_v32  ;;  %v393_v37 = vld [vmem:[#allocation2 + $0x150] sm:$0xff] }
  0x3d   : > { %v8244_v30 = vld [vmem:[#allocation2 + $0x81] sm:$0xff]  ;;  %235 = vst.msk [vmem:[#allocation2 + $0xa9] sm:$0xff] %vm222_vm1, %v183_v33 }
  0x3e   : > { %v266_v27 = vld [vmem:[#allocation2 + $0x92] sm:$0x1]  ;;  %v8246_v31 = vld [vmem:[#allocation2 + $0x80] sm:$0xff]  ;;  %349 = vst.msk [vmem:[#allocation3 + $0x80] sm:$0xff] %vm222_vm1, %v8008_v34 }
  0x3f   : > { %7405 = vmatmul.msk.f32.gmra.mxu2 %vm222_vm1, %v385_v44  ;;  %v8234_v26 = vld [vmem:[#allocation2 + $0x78] sm:$0xff]  ;;  %285 = vst.msk [vmem:[#allocation2 + $0x90] sm:$0x1] %vm278_vm2, %v266_v27 }
  0x40   : > { %7439 = vmatmul.msk.f32.gmra.mxu3 %vm222_vm1, %v727_v45  ;;  %333 = vst.msk [vmem:[#allocation3] sm:$0xff] %vm222_vm1, %v8008_v34  ;;  %v8280_v43 = vld [vmem:[#allocation2 + $0x91] sm:$0xff]  ;;  %v736_v45 = vld [vmem:[#allocation2 + $0x169] sm:$0xff] }
  0x41   : > { %334 = vst.msk [vmem:[#allocation3 + $0x8] sm:$0xff] %vm222_vm1, %v8008_v34  ;;  %v394_v44 = vld [vmem:[#allocation2 + $0x158] sm:$0xff]  ;;  %v396_v56 = vld [vmem:[#allocation2 + $0x170] sm:$0xff] }
  0x42   : > { %335 = vst.msk [vmem:[#allocation3 + $0x10] sm:$0xff] %vm222_vm1, %v8008_v34 }
  0x43   : > { %7389 = vmatmul.msk.f32.gmra.mxu0 %vm222_vm1, %v8142_v48  ;;  %336 = vst.msk [vmem:[#allocation3 + $0x18] sm:$0xff] %vm222_vm1, %v8008_v34  ;;  %v8301_v47 = vld [vmem:[#allocation2 + $0x98] sm:$0xff] }
  0x44   : > { %7423 = vmatmul.msk.f32.gmra.mxu1 %vm222_vm1, %v8154_v53  ;;  %337 = vst.msk [vmem:[#allocation3 + $0x20] sm:$0xff] %vm222_vm1, %v8008_v34  ;;  %v8310_v50 = vld [vmem:[#allocation2 + $0x99] sm:$0xff]  ;;  %v8334_v54 = vld [vmem:[#allocation2 + $0xa9] sm:$0xff] }
  0x45   : > { %338 = vst.msk [vmem:[#allocation3 + $0x28] sm:$0xff] %vm222_vm1, %v8008_v34  ;;  %v413_v6 = vld [vmem:[#allocation3 + $0x80] sm:$0xff] }
  0x46   : > { %v8271_v41 = vld [vmem:[#allocation2 + $0x90] sm:$0xff]  ;;  %339 = vst.msk [vmem:[#allocation3 + $0x30] sm:$0xff] %vm222_vm1, %v8008_v34 }
  0x47   : > { %7406 = vmatmul.msk.f32.gmra.mxu2 %vm222_vm1, %v386_v51  ;;  %340 = vst.msk [vmem:[#allocation3 + $0x38] sm:$0xff] %vm222_vm1, %v8008_v34  ;;  %v395_v51 = vld [vmem:[#allocation2 + $0x168] sm:$0xff] }
  0x48   : > { %7440 = vmatmul.msk.f32.gmra.mxu3 %vm222_vm1, %v728_v52  ;;  %341 = vst.msk [vmem:[#allocation3 + $0x40] sm:$0xff] %vm222_vm1, %v8008_v34  ;;  %v737_v52 = vld [vmem:[#allocation2 + $0x171] sm:$0xff] }
  0x49   : > { %342 = vst.msk [vmem:[#allocation3 + $0x48] sm:$0xff] %vm222_vm1, %v8008_v34  ;;  %v398_v18 = vld [vmem:[#allocation3 + $0x8] sm:$0xff]  ;;  %v399_v39 = vld [vmem:[#allocation3 + $0x10] sm:$0xff] }
  0x4a   : > { %343 = vst.msk [vmem:[#allocation3 + $0x50] sm:$0xff] %vm222_vm1, %v8008_v34 }
  0x4b   : > { %7390 = vmatmul.msk.f32.gmra.mxu0 %vm222_vm1, %v8156_v55  ;;  %344 = vst.msk [vmem:[#allocation3 + $0x58] sm:$0xff] %vm222_vm1, %v8008_v34 }
  0x4c   : > { %7424 = vmatmul.msk.f32.gmra.mxu1 %vm222_vm1, %v8171_v62  ;;  %345 = vst.msk [vmem:[#allocation3 + $0x60] sm:$0xff] %vm222_vm1, %v8008_v34 }
  0x4d   : > { %346 = vst.msk [vmem:[#allocation3 + $0x68] sm:$0xff] %vm222_vm1, %v8008_v34 }
  0x4e   : > { %347 = vst.msk [vmem:[#allocation3 + $0x70] sm:$0xff] %vm222_vm1, %v8008_v34 }
  0x4f   : > { %7407 = vmatmul.msk.f32.gmra.mxu2 %vm222_vm1, %v387_v58  ;;  %348 = vst.msk [vmem:[#allocation3 + $0x78] sm:$0xff] %vm222_vm1, %v8008_v34  ;;  %v297_v58 = vld [vmem:[#allocation2 + $0xf] sm:$0x1] }
  0x50   : > { %7441 = vmatmul.msk.f32.gmra.mxu3 %vm222_vm1, %v729_v59  ;;  %350 = vst.msk [vmem:[#allocation3 + $0x88] sm:$0xff] %vm222_vm1, %v8008_v34  ;;  %v267_v59 = vld [vmem:[#allocation2 + $0xaa] sm:$0x1] }
  0x51   : > { %351 = vst.msk [vmem:[#allocation3 + $0x90] sm:$0xff] %vm222_vm1, %v8008_v34 }
  0x52   : > { %352 = vst.msk [vmem:[#allocation3 + $0x98] sm:$0xff] %vm222_vm1, %v8008_v34 }
  0x53   : > { %7391 = vmatmul.msk.f32.gmra.mxu0 %vm222_vm1, %v8174_v63  ;;  %353 = vst.msk [vmem:[#allocation3 + $0xa0] sm:$0xff] %vm222_vm1, %v8008_v34 }
  0x54   : > { %7425 = vmatmul.msk.f32.gmra.mxu1 %vm222_vm1, %v8184_v3  ;;  %354 = vst.msk [vmem:[#allocation3 + $0xa8] sm:$0xff] %vm222_vm1, %v8008_v34 }
  0x55   : > { %355 = vst.msk [vmem:[#allocation3 + $0xb0] sm:$0xff] %vm222_vm1, %v8008_v34 }
  0x56   : > { %356 = vst.msk [vmem:[#allocation3 + $0xb8] sm:$0xff] %vm222_vm1, %v8008_v34 }
  0x57   : > { %7408 = vmatmul.msk.f32.gmra.mxu2 %vm222_vm1, %v388_v1  ;;  %357 = vst.msk [vmem:[#allocation3 + $0xc0] sm:$0xff] %vm222_vm1, %v8008_v34  ;;  %v397_v1 = vld [vmem:[#allocation3] sm:$0xff]  ;;  %v414_v21 = vld [vmem:[#allocation3 + $0x88] sm:$0xff] }
  0x58   : > { %7442 = vmatmul.msk.f32.gmra.mxu3 %vm222_vm1, %v730_v2  ;;  %358 = vst.msk [vmem:[#allocation3 + $0xc8] sm:$0xff] %vm222_vm1, %v8008_v34  ;;  %v299_v2 = vld [vmem:[#allocation2 + $0x3f] sm:$0x1]  ;;  %v415_v46 = vld [vmem:[#allocation3 + $0x90] sm:$0xff] }
  0x59   : > { %359 = vst.msk [vmem:[#allocation3 + $0xd0] sm:$0xff] %vm222_vm1, %v8008_v34 }
  0x5a   : > { %360 = vst.msk [vmem:[#allocation3 + $0xd8] sm:$0xff] %vm222_vm1, %v8008_v34 }
  0x5b   : > { %7392 = vmatmul.msk.f32.gmra.mxu0 %vm222_vm1, %v8186_v5  ;;  %361 = vst.msk [vmem:[#allocation3 + $0xe0] sm:$0xff] %vm222_vm1, %v8008_v34 }
  0x5c   : > { %7426 = vmatmul.msk.f32.gmra.mxu1 %vm222_vm1, %v8201_v12  ;;  %362 = vst.msk [vmem:[#allocation3 + $0xe8] sm:$0xff] %vm222_vm1, %v8008_v34 }
  0x5d   : > { %363 = vst.msk [vmem:[#allocation3 + $0xf0] sm:$0xff] %vm222_vm1, %v8008_v34 }
  0x5e   : > { %364 = vst.msk [vmem:[#allocation3 + $0xf8] sm:$0xff] %vm222_vm1, %v8008_v34 }
  0x5f   : > { %7409 = vmatmul.msk.f32.gmra.mxu2 %vm222_vm1, %v389_v8  ;;  %315 = vst.msk [vmem:[#allocation2 + $0x11] sm:$0x1] %vm278_vm2, %v297_v58 }
  0x60   : > { %7443 = vmatmul.msk.f32.gmra.mxu3 %vm222_vm1, %v731_v9  ;;  %286 = vst.msk [vmem:[#allocation2 + $0xa8] sm:$0x1] %vm278_vm2, %v267_v59  ;;  %v208_v9 = vld [vmem:[%s10879_s1 + $0x14] sm:$0xf] }
  0x61   : > { %236 = vst.msk [vmem:[#allocation2 + $0xb1] sm:$0xff] %vm222_vm1, %v184_v61  ;;  %7549 = vmatpush.msk.msrb.mxu1 %vm525_vm0, %v208_v9 }
  0x62   : > { %317 = vst.msk [vmem:[#allocation2 + $0x41] sm:$0x1] %vm278_vm2, %v299_v2  ;;  %v416_v2 = vld [vmem:[#allocation3 + $0x98] sm:$0xff] }
  0x63   : > { %7393 = vmatmul.msk.f32.gmra.mxu0 %vm222_vm1, %v8204_v13 }
  0x64   : > { %7427 = vmatmul.msk.f32.gmra.mxu1 %vm222_vm1, %v8215_v17 }
  0x67   : > { %7410 = vmatmul.msk.f32.gmra.mxu2 %vm222_vm1, %v390_v15  ;;  %v8374_v15 = vld [vmem:[#allocation2 + $0xa8] sm:$0xff] }
  0x68   : > { %7444 = vmatmul.msk.f32.gmra.mxu3 %vm222_vm1, %v732_v16  ;;  %v8379_v16 = vld [vmem:[#allocation2 + $0xb1] sm:$0xff] }
  0x6b   : > { %7394 = vmatmul.msk.f32.gmra.mxu0 %vm222_vm1, %v8217_v19 }
  0x6c   : > { %7428 = vmatmul.msk.f32.gmra.mxu1 %vm222_vm1, %v8231_v25 }
  0x6f   : > { %7411 = vmatmul.msk.f32.gmra.mxu2 %vm222_vm1, %v391_v22 }
  0x70   : > { %7445 = vmatmul.msk.f32.gmra.mxu3 %vm222_vm1, %v733_v23  ;;  %v8387_v23 = vld [vmem:[#allocation2 + $0xb0] sm:$0xff] }
  0x73   : > { %7395 = vmatmul.msk.f32.gmra.mxu0 %vm222_vm1, %v8234_v26 }
  0x74   : > { %7429 = vmatmul.msk.f32.gmra.mxu1 %vm222_vm1, %v8244_v30 }
  0x77   : > { %7412 = vmatmul.msk.f32.gmra.mxu2 %vm222_vm1, %v392_v28 }
  0x78   : > { %7446 = vmatmul.msk.f32.gmra.mxu3 %vm222_vm1, %v734_v29 }
  0x7b   : > { %7396 = vmatmul.msk.f32.gmra.mxu0 %vm222_vm1, %v8246_v31 }
  0x7c   : > { %7430 = vmatmul.msk.f32.gmra.mxu1 %vm222_vm1, %v8280_v43 }
  0x7f   : > { %7413 = vmatmul.msk.f32.gmra.mxu2 %vm222_vm1, %v393_v37 }
  0x80   : > { %7447 = vmatmul.msk.f32.gmra.mxu3 %vm222_vm1, %v735_v38  ;;  %v1048_v38 = vld [vmem:[#allocation2 + $0x1a] sm:$0xff] }
  0x83   : > { %7397 = vmatmul.msk.f32.gmra.mxu0 %vm222_vm1, %v8271_v41 }
  0x84   : > { %7431 = vmatmul.msk.f32.gmra.mxu1 %vm222_vm1, %v8310_v50 }
  0x87   : > { %7414 = vmatmul.msk.f32.gmra.mxu2 %vm222_vm1, %v394_v44  ;;  %v300_v44 = vld [vmem:[#allocation2 + $0x57] sm:$0x1] }
  0x88   : > { %7448 = vmatmul.msk.f32.gmra.mxu3 %vm222_vm1, %v736_v45  ;;  %318 = vst.msk [vmem:[#allocation2 + $0x59] sm:$0x1] %vm278_vm2, %v300_v44 }
  0x8b   : > { %7398 = vmatmul.msk.f32.gmra.mxu0 %vm222_vm1, %v8301_v47 }
  0x8c   : > { %7432 = vmatmul.msk.f32.gmra.mxu1 %vm222_vm1, %v8334_v54 }
  0x8f   : > { %7415 = vmatmul.msk.f32.gmra.mxu2 %vm222_vm1, %v395_v51 }
  0x90   : > { %7449 = vmatmul.msk.f32.gmra.mxu3 %vm222_vm1, %v737_v52 }
  0x93   : > { %7399 = vmatmul.msk.f32.gmra.mxu0 %vm222_vm1, %v8374_v15 }
  0x94   : > { %7433 = vmatmul.msk.f32.gmra.mxu1 %vm222_vm1, %v8379_v16 }
  0x97   : > { %7416 = vmatmul.msk.f32.gmra.mxu2 %vm222_vm1, %v396_v56 }
  0x98   : > { %7484 = vmatmul.msk.f32.vlgmr.msrb.gmra.mxu3 %vm222_vm1, %v8116_v36  ;;  %v298_v36 = vld [vmem:[#allocation2 + $0x27] sm:$0x1] }
  0x99   : > { %316 = vst.msk [vmem:[#allocation2 + $0x29] sm:$0x1] %vm278_vm2, %v298_v36  ;;  %v886_v4 = vpop.f32.mrf.mxu1 }
  0x9b   : > { %v934_v60 = vpop.f32.mrf.mxu3  ;;  %7400 = vmatmul.msk.f32.gmra.mxu0 %vm222_vm1, %v8387_v23 }
  0x9c   : > { %7550 = vmatmul.msk.f32.vlgmr.msrb.gmra.mxu1 %vm222_vm1, %v1048_v38 }
  0x9f   : > { %7451 = vmatmul.msk.f32.vlgmr.msrb.gmra.mxu2 %vm222_vm1, %v1046_v0  ;;  %v400_v0 = vld [vmem:[#allocation3 + $0x18] sm:$0xff] }
  0xa0   : > { %7485 = vmatmul.msk.f32.gmra.mxu3 %vm222_vm1, %v8128_v42  ;;  %v546_v7 = vpop.f32.mrf.mxu0  ;;  %v1047_v42 = vld [vmem:[#allocation2 + $0xa] sm:$0xff]  ;;  %v1049_v36 = vld [vmem:[#allocation2 + $0x22] sm:$0xff] }
  0xa1   : > { %v642_v8 = vadd.f32 %v546_v7, %v397_v1  ;;  %v889_v20 = vpop.f32.mrf.mxu1 }
  0xa2   : > { %v594_v10 = vpop.f32.mrf.mxu2 }
  0xa3   : > { %v937_v11 = vpop.f32.mrf.mxu3  ;;  %v658_v14 = vadd.f32 %v594_v10, %v413_v6  ;;  %674 = vst.msk [vmem:[#allocation3] sm:$0xff] %vm222_vm1, %v642_v8  ;;  %7517 = vmatmul.msk.f32.vlgmr.msrb.gmra.mxu0 %vm222_vm1, %v8113_v35 }
  0xa4   : > { %7551 = vmatmul.msk.f32.gmra.mxu1 %vm222_vm1, %v1049_v36 }
  0xa5   : > { %690 = vst.msk [vmem:[#allocation3 + $0x80] sm:$0xff] %vm222_vm1, %v658_v14  ;;  %v1050_v14 = vld [vmem:[#allocation2 + $0x32] sm:$0xff] }
  0xa7   : > { %7452 = vmatmul.msk.f32.gmra.mxu2 %vm222_vm1, %v1047_v42 }
  0xa8   : > { %7486 = vmatmul.msk.f32.gmra.mxu3 %vm222_vm1, %v8142_v48  ;;  %v549_v22 = vpop.f32.mrf.mxu0 }
  0xa9   : > { %v643_v24 = vadd.f32 %v549_v22, %v398_v18  ;;  %v892_v45 = vpop.f32.mrf.mxu1  ;;  %v301_v18 = vld [vmem:[#allocation2 + $0x6f] sm:$0x1] }
  0xaa   : > { %v597_v27 = vpop.f32.mrf.mxu2  ;;  %v738_v29 = vld [vmem:[#allocation3] sm:$0xff]  ;;  %319 = vst.msk [vmem:[#allocation2 + $0x71] sm:$0x1] %vm278_vm2, %v301_v18 }
  0xab   : > { %v940_v28 = vpop.f32.mrf.mxu3  ;;  %v659_v32 = vadd.f32 %v597_v27, %v414_v21  ;;  %675 = vst.msk [vmem:[#allocation3 + $0x8] sm:$0xff] %vm222_vm1, %v643_v24  ;;  %v982_v33 = vadd.f32 %v886_v4, %v738_v29  ;;  %7518 = vmatmul.msk.f32.gmra.mxu0 %vm222_vm1, %v8126_v40  ;;  %v417_v21 = vld [vmem:[#allocation3 + $0xa0] sm:$0xff] }
  0xac   : > { %v754_v37 = vld [vmem:[#allocation3 + $0x80] sm:$0xff]  ;;  %7552 = vmatmul.msk.f32.gmra.mxu1 %vm222_vm1, %v1050_v14 }
  0xad   : > { %691 = vst.msk [vmem:[#allocation3 + $0x88] sm:$0xff] %vm222_vm1, %v659_v32  ;;  %v998_v48 = vadd.f32 %v934_v60, %v754_v37  ;;  %v1051_v37 = vld [vmem:[#allocation2 + $0x3a] sm:$0xff] }
  0xae   : > { %1014 = vst.msk [vmem:[#allocation3] sm:$0xff] %vm222_vm1, %v982_v33 }
  0xaf   : > { %1030 = vst.msk [vmem:[#allocation3 + $0x80] sm:$0xff] %vm222_vm1, %v998_v48  ;;  %7453 = vmatmul.msk.f32.gmra.mxu2 %vm222_vm1, %v1048_v38  ;;  %v402_v38 = vld [vmem:[#allocation3 + $0x28] sm:$0xff] }
  0xb0   : > { %7487 = vmatmul.msk.f32.gmra.mxu3 %vm222_vm1, %v8156_v55  ;;  %v552_v51 = vpop.f32.mrf.mxu0 }
  0xb1   : > { %v644_v52 = vadd.f32 %v552_v51, %v399_v39  ;;  %v895_v1 = vpop.f32.mrf.mxu1  ;;  %v418_v39 = vld [vmem:[#allocation3 + $0xa8] sm:$0xff] }
  0xb2   : > { %v600_v56 = vpop.f32.mrf.mxu2  ;;  %v739_v58 = vld [vmem:[#allocation3 + $0x8] sm:$0xff] }
  0xb3   : > { %v943_v57 = vpop.f32.mrf.mxu3  ;;  %v660_v59 = vadd.f32 %v600_v56, %v415_v46  ;;  %676 = vst.msk [vmem:[#allocation3 + $0x10] sm:$0xff] %vm222_vm1, %v644_v52  ;;  %v983_v60 = vadd.f32 %v889_v20, %v739_v58  ;;  %7519 = vmatmul.msk.f32.gmra.mxu0 %vm222_vm1, %v8144_v49  ;;  %v1052_v58 = vld [vmem:[#allocation2 + $0x4a] sm:$0xff] }
  0xb4   : > { %v755_v61 = vld [vmem:[#allocation3 + $0x88] sm:$0xff]  ;;  %7553 = vmatmul.msk.f32.gmra.mxu1 %vm222_vm1, %v1051_v37 }
  0xb5   : > { %692 = vst.msk [vmem:[#allocation3 + $0x90] sm:$0xff] %vm222_vm1, %v660_v59  ;;  %v999_v55 = vadd.f32 %v937_v11, %v755_v61 }
  0xb6   : > { %1015 = vst.msk [vmem:[#allocation3 + $0x8] sm:$0xff] %vm222_vm1, %v983_v60  ;;  %v302_v60 = vld [vmem:[#allocation2 + $0x87] sm:$0x1] }
  0xb7   : > { %1031 = vst.msk [vmem:[#allocation3 + $0x88] sm:$0xff] %vm222_vm1, %v999_v55  ;;  %7454 = vmatmul.msk.f32.gmra.mxu2 %vm222_vm1, %v1049_v36  ;;  %v419_v36 = vld [vmem:[#allocation3 + $0xb0] sm:$0xff] }
  0xb8   : > { %7488 = vmatmul.msk.f32.gmra.mxu3 %vm222_vm1, %v8174_v63  ;;  %v555_v4 = vpop.f32.mrf.mxu0  ;;  %v401_v63 = vld [vmem:[#allocation3 + $0x20] sm:$0xff]  ;;  %320 = vst.msk [vmem:[#allocation2 + $0x89] sm:$0x1] %vm278_vm2, %v302_v60 }
  0xb9   : > { %v645_v6 = vadd.f32 %v555_v4, %v400_v0  ;;  %v898_v20 = vpop.f32.mrf.mxu1 }
  0xba   : > { %v603_v35 = vpop.f32.mrf.mxu2  ;;  %v740_v8 = vld [vmem:[#allocation3 + $0x10] sm:$0xff] }
  0xbb   : > { %v946_v7 = vpop.f32.mrf.mxu3  ;;  %v661_v9 = vadd.f32 %v603_v35, %v416_v2  ;;  %677 = vst.msk [vmem:[#allocation3 + $0x18] sm:$0xff] %vm222_vm1, %v645_v6  ;;  %v984_v10 = vadd.f32 %v892_v45, %v740_v8  ;;  %7520 = vmatmul.msk.f32.gmra.mxu0 %vm222_vm1, %v8154_v53  ;;  %v404_v8 = vld [vmem:[#allocation3 + $0x38] sm:$0xff] }
  0xbc   : > { %v756_v11 = vld [vmem:[#allocation3 + $0x90] sm:$0xff]  ;;  %7554 = vmatmul.msk.f32.gmra.mxu1 %vm222_vm1, %v1052_v58 }
  0xbd   : > { %693 = vst.msk [vmem:[#allocation3 + $0x98] sm:$0xff] %vm222_vm1, %v661_v9  ;;  %v1000_v42 = vadd.f32 %v940_v28, %v756_v11 }
  0xbe   : > { %1016 = vst.msk [vmem:[#allocation3 + $0x10] sm:$0xff] %vm222_vm1, %v984_v10  ;;  %v420_v10 = vld [vmem:[#allocation3 + $0xb8] sm:$0xff] }
  0xbf   : > { %1032 = vst.msk [vmem:[#allocation3 + $0x90] sm:$0xff] %vm222_vm1, %v1000_v42  ;;  %7455 = vmatmul.msk.f32.gmra.mxu2 %vm222_vm1, %v1050_v14 }
  0xc0   : > { %7489 = vmatmul.msk.f32.gmra.mxu3 %vm222_vm1, %v8186_v5  ;;  %v558_v22 = vpop.f32.mrf.mxu0 }
  0xc1   : > { %v646_v40 = vadd.f32 %v558_v22, %v401_v63  ;;  %v901_v48 = vpop.f32.mrf.mxu1  ;;  %v1054_v22 = vld [vmem:[#allocation2 + $0x62] sm:$0xff] }
  0xc2   : > { %v606_v24 = vpop.f32.mrf.mxu2  ;;  %v741_v28 = vld [vmem:[#allocation3 + $0x18] sm:$0xff] }
  0xc3   : > { %v949_v27 = vpop.f32.mrf.mxu3  ;;  %v662_v29 = vadd.f32 %v606_v24, %v417_v21  ;;  %678 = vst.msk [vmem:[#allocation3 + $0x20] sm:$0xff] %vm222_vm1, %v646_v40  ;;  %v985_v32 = vadd.f32 %v895_v1, %v741_v28  ;;  %7521 = vmatmul.msk.f32.gmra.mxu0 %vm222_vm1, %v8171_v62  ;;  %v303_v24 = vld [vmem:[#allocation2 + $0x9f] sm:$0x1]  ;;  %v421_v28 = vld [vmem:[#allocation3 + $0xc0] sm:$0xff] }
  0xc4   : > { %v757_v33 = vld [vmem:[#allocation3 + $0x98] sm:$0xff]  ;;  %321 = vst.msk [vmem:[#allocation2 + $0xa1] sm:$0x1] %vm278_vm2, %v303_v24 }
  0xc5   : > { %694 = vst.msk [vmem:[#allocation3 + $0xa0] sm:$0xff] %vm222_vm1, %v662_v29  ;;  %v1001_v5 = vadd.f32 %v943_v57, %v757_v33 }
  0xc6   : > { %1017 = vst.msk [vmem:[#allocation3 + $0x18] sm:$0xff] %vm222_vm1, %v985_v32 }
  0xc7   : > { %1033 = vst.msk [vmem:[#allocation3 + $0x98] sm:$0xff] %vm222_vm1, %v1001_v5  ;;  %7456 = vmatmul.msk.f32.gmra.mxu2 %vm222_vm1, %v1051_v37 }
  0xc8   : > { %7490 = vmatmul.msk.f32.gmra.mxu3 %vm222_vm1, %v8204_v13  ;;  %v561_v44 = vpop.f32.mrf.mxu0  ;;  %v403_v13 = vld [vmem:[#allocation3 + $0x30] sm:$0xff] }
  0xc9   : > { %v647_v45 = vadd.f32 %v561_v44, %v402_v38  ;;  %v904_v61 = vpop.f32.mrf.mxu1  ;;  %v406_v44 = vld [vmem:[#allocation3 + $0x48] sm:$0xff] }
  0xca   : > { %v609_v49 = vpop.f32.mrf.mxu2  ;;  %v742_v51 = vld [vmem:[#allocation3 + $0x20] sm:$0xff] }
  0xcb   : > { %v952_v46 = vpop.f32.mrf.mxu3  ;;  %v663_v52 = vadd.f32 %v609_v49, %v418_v39  ;;  %679 = vst.msk [vmem:[#allocation3 + $0x28] sm:$0xff] %vm222_vm1, %v647_v45  ;;  %v986_v56 = vadd.f32 %v898_v20, %v742_v51  ;;  %7522 = vmatmul.msk.f32.gmra.mxu0 %vm222_vm1, %v8184_v3  ;;  %v1055_v39 = vld [vmem:[#allocation2 + $0x6a] sm:$0xff]  ;;  %v422_v49 = vld [vmem:[#allocation3 + $0xc8] sm:$0xff] }
  0xcc   : > { %v758_v57 = vld [vmem:[#allocation3 + $0xa0] sm:$0xff] }
  0xcd   : > { %695 = vst.msk [vmem:[#allocation3 + $0xa8] sm:$0xff] %vm222_vm1, %v663_v52  ;;  %v1002_v59 = vadd.f32 %v946_v7, %v758_v57  ;;  %v1053_v7 = vld [vmem:[#allocation2 + $0x52] sm:$0xff] }
  0xce   : > { %1018 = vst.msk [vmem:[#allocation3 + $0x20] sm:$0xff] %vm222_vm1, %v986_v56  ;;  %7555 = vmatmul.msk.f32.gmra.mxu1 %vm222_vm1, %v1053_v7 }
  0xcf   : > { %1034 = vst.msk [vmem:[#allocation3 + $0xa0] sm:$0xff] %vm222_vm1, %v1002_v59  ;;  %7457 = vmatmul.msk.f32.gmra.mxu2 %vm222_vm1, %v1052_v58 }
  0xd0   : > { %7491 = vmatmul.msk.f32.gmra.mxu3 %vm222_vm1, %v8217_v19  ;;  %v564_v55 = vpop.f32.mrf.mxu0 }
  0xd1   : > { %v648_v53 = vadd.f32 %v564_v55, %v403_v13  ;;  %v907_v9 = vpop.f32.mrf.mxu1  ;;  %v1056_v13 = vld [vmem:[#allocation2 + $0x7a] sm:$0xff] }
  0xd2   : > { %v612_v0 = vpop.f32.mrf.mxu2  ;;  %v743_v2 = vld [vmem:[#allocation3 + $0x28] sm:$0xff] }
  0xd3   : > { %v955_v1 = vpop.f32.mrf.mxu3  ;;  %v664_v4 = vadd.f32 %v612_v0, %v419_v36  ;;  %680 = vst.msk [vmem:[#allocation3 + $0x30] sm:$0xff] %vm222_vm1, %v648_v53  ;;  %v987_v6 = vadd.f32 %v901_v48, %v743_v2  ;;  %7523 = vmatmul.msk.f32.gmra.mxu0 %vm222_vm1, %v8201_v12  ;;  %v423_v36 = vld [vmem:[#allocation3 + $0xd0] sm:$0xff] }
  0xd4   : > { %v759_v35 = vld [vmem:[#allocation3 + $0xa8] sm:$0xff] }
  0xd5   : > { %696 = vst.msk [vmem:[#allocation3 + $0xb0] sm:$0xff] %vm222_vm1, %v664_v4  ;;  %v1003_v19 = vadd.f32 %v949_v27, %v759_v35 }
  0xd6   : > { %1019 = vst.msk [vmem:[#allocation3 + $0x28] sm:$0xff] %vm222_vm1, %v987_v6  ;;  %7556 = vmatmul.msk.f32.gmra.mxu1 %vm222_vm1, %v1054_v22 }
  0xd7   : > { %1035 = vst.msk [vmem:[#allocation3 + $0xa8] sm:$0xff] %vm222_vm1, %v1003_v19  ;;  %7458 = vmatmul.msk.f32.gmra.mxu2 %vm222_vm1, %v1053_v7  ;;  %v1057_v7 = vld [vmem:[#allocation2 + $0x82] sm:$0xff] }
  0xd8   : > { %7492 = vmatmul.msk.f32.gmra.mxu3 %vm222_vm1, %v8234_v26  ;;  %v567_v11 = vpop.f32.mrf.mxu0  ;;  %v405_v26 = vld [vmem:[#allocation3 + $0x40] sm:$0xff]  ;;  %v408_v19 = vld [vmem:[#allocation3 + $0x58] sm:$0xff] }
  0xd9   : > { %v649_v14 = vadd.f32 %v567_v11, %v404_v8  ;;  %v910_v27 = vpop.f32.mrf.mxu1  ;;  %v424_v8 = vld [vmem:[#allocation3 + $0xd8] sm:$0xff] }
  0xda   : > { %v615_v62 = vpop.f32.mrf.mxu2  ;;  %v744_v63 = vld [vmem:[#allocation3 + $0x30] sm:$0xff] }
  0xdb   : > { %v958_v42 = vpop.f32.mrf.mxu3  ;;  %v665_v18 = vadd.f32 %v615_v62, %v420_v10  ;;  %681 = vst.msk [vmem:[#allocation3 + $0x38] sm:$0xff] %vm222_vm1, %v649_v14  ;;  %v988_v20 = vadd.f32 %v904_v61, %v744_v63  ;;  %7524 = vmatmul.msk.f32.gmra.mxu0 %vm222_vm1, %v8215_v17  ;;  %v304_v61 = vld [vmem:[#allocation2 + $0xb7] sm:$0x1] }
  0xdc   : > { %v760_v21 = vld [vmem:[#allocation3 + $0xb0] sm:$0xff]  ;;  %322 = vst.msk [vmem:[#allocation2 + $0xb9] sm:$0x1] %vm278_vm2, %v304_v61 }
  0xdd   : > { %697 = vst.msk [vmem:[#allocation3 + $0xb8] sm:$0xff] %vm222_vm1, %v665_v18  ;;  %v1004_v40 = vadd.f32 %v952_v46, %v760_v21 }
  0xde   : > { %1020 = vst.msk [vmem:[#allocation3 + $0x30] sm:$0xff] %vm222_vm1, %v988_v20  ;;  %7557 = vmatmul.msk.f32.gmra.mxu1 %vm222_vm1, %v1055_v39  ;;  %v1058_v20 = vld [vmem:[#allocation2 + $0x92] sm:$0xff] }
  0xdf   : > { %1036 = vst.msk [vmem:[#allocation3 + $0xb0] sm:$0xff] %vm222_vm1, %v1004_v40  ;;  %7459 = vmatmul.msk.f32.gmra.mxu2 %vm222_vm1, %v1054_v22  ;;  %v305_v22 = vld [vmem:[#allocation2 + $0xcf] sm:$0x1]  ;;  %v425_v40 = vld [vmem:[#allocation3 + $0xe0] sm:$0xff] }
  0xe0   : > { %7493 = vmatmul.msk.f32.gmra.mxu3 %vm222_vm1, %v8246_v31  ;;  %v570_v29 = vpop.f32.mrf.mxu0  ;;  %323 = vst.msk [vmem:[#allocation2 + $0xd1] sm:$0x1] %vm278_vm2, %v305_v22 }
  0xe1   : > { %v650_v3 = vadd.f32 %v570_v29, %v405_v26  ;;  %v913_v45 = vpop.f32.mrf.mxu1 }
  0xe2   : > { %v618_v32 = vpop.f32.mrf.mxu2  ;;  %v745_v37 = vld [vmem:[#allocation3 + $0x38] sm:$0xff] }
  0xe3   : > { %v961_v33 = vpop.f32.mrf.mxu3  ;;  %v666_v5 = vadd.f32 %v618_v32, %v421_v28  ;;  %682 = vst.msk [vmem:[#allocation3 + $0x40] sm:$0xff] %vm222_vm1, %v650_v3  ;;  %v989_v38 = vadd.f32 %v907_v9, %v745_v37  ;;  %7525 = vmatmul.msk.f32.gmra.mxu0 %vm222_vm1, %v8231_v25  ;;  %v1400_v37 = vld [vmem:[#allocation2 + $0xc0] sm:$0xff] }
  0xe4   : > { %v761_v48 = vld [vmem:[#allocation3 + $0xb8] sm:$0xff] }
  0xe5   : > { %698 = vst.msk [vmem:[#allocation3 + $0xc0] sm:$0xff] %vm222_vm1, %v666_v5  ;;  %v1005_v31 = vadd.f32 %v955_v1, %v761_v48  ;;  %v426_v48 = vld [vmem:[#allocation3 + $0xe8] sm:$0xff] }
  0xe6   : > { %1021 = vst.msk [vmem:[#allocation3 + $0x38] sm:$0xff] %vm222_vm1, %v989_v38  ;;  %7558 = vmatmul.msk.f32.gmra.mxu1 %vm222_vm1, %v1056_v13  ;;  %v410_v38 = vld [vmem:[#allocation3 + $0x68] sm:$0xff] }
  0xe7   : > { %1037 = vst.msk [vmem:[#allocation3 + $0xb8] sm:$0xff] %vm222_vm1, %v1005_v31  ;;  %7460 = vmatmul.msk.f32.gmra.mxu2 %vm222_vm1, %v1055_v39 }
  0xe8   : > { %7494 = vmatmul.msk.f32.gmra.mxu3 %vm222_vm1, %v8271_v41  ;;  %v573_v46 = vpop.f32.mrf.mxu0  ;;  %v407_v41 = vld [vmem:[#allocation3 + $0x50] sm:$0xff] }
  0xe9   : > { %v651_v51 = vadd.f32 %v573_v46, %v406_v44  ;;  %v916_v53 = vpop.f32.mrf.mxu1 }
  0xea   : > { %v621_v12 = vpop.f32.mrf.mxu2  ;;  %v746_v56 = vld [vmem:[#allocation3 + $0x40] sm:$0xff] }
  0xeb   : > { %v964_v52 = vpop.f32.mrf.mxu3  ;;  %v667_v57 = vadd.f32 %v621_v12, %v422_v49  ;;  %683 = vst.msk [vmem:[#allocation3 + $0x48] sm:$0xff] %vm222_vm1, %v651_v51  ;;  %v990_v58 = vadd.f32 %v910_v27, %v746_v56  ;;  %7526 = vmatmul.msk.f32.gmra.mxu0 %vm222_vm1, %v8244_v30  ;;  %v1060_v12 = vld [vmem:[#allocation2 + $0xaa] sm:$0xff] }
  0xec   : > { %v762_v59 = vld [vmem:[#allocation3 + $0xc0] sm:$0xff] }
  0xed   : > { %699 = vst.msk [vmem:[#allocation3 + $0xc8] sm:$0xff] %vm222_vm1, %v667_v57  ;;  %v1006_v60 = vadd.f32 %v958_v42, %v762_v59  ;;  %v306_v57 = vld [vmem:[#allocation2 + $0xe7] sm:$0x1] }
  0xee   : > { %1022 = vst.msk [vmem:[#allocation3 + $0x40] sm:$0xff] %vm222_vm1, %v990_v58  ;;  %7559 = vmatmul.msk.f32.gmra.mxu1 %vm222_vm1, %v1057_v7  ;;  %v427_v59 = vld [vmem:[#allocation3 + $0xf0] sm:$0xff] }
  0xef   : > { %1038 = vst.msk [vmem:[#allocation3 + $0xc0] sm:$0xff] %vm222_vm1, %v1006_v60  ;;  %7461 = vmatmul.msk.f32.gmra.mxu2 %vm222_vm1, %v1056_v13 }
  0xf0   : > { %7495 = vmatmul.msk.f32.gmra.mxu3 %vm222_vm1, %v8301_v47  ;;  %v576_v55 = vpop.f32.mrf.mxu0  ;;  %324 = vst.msk [vmem:[#allocation2 + $0xe9] sm:$0x1] %vm278_vm2, %v306_v57 }
  0xf1   : > { %v652_v17 = vadd.f32 %v576_v55, %v407_v41  ;;  %v919_v63 = vpop.f32.mrf.mxu1  ;;  %v1061_v55 = vld [vmem:[#allocation2 + $0xb2] sm:$0xff] }
  0xf2   : > { %v624_v0 = vpop.f32.mrf.mxu2  ;;  %v747_v2 = vld [vmem:[#allocation3 + $0x48] sm:$0xff] }
  0xf3   : > { %v967_v1 = vpop.f32.mrf.mxu3  ;;  %v668_v4 = vadd.f32 %v624_v0, %v423_v36  ;;  %684 = vst.msk [vmem:[#allocation3 + $0x50] sm:$0xff] %vm222_vm1, %v652_v17  ;;  %v991_v6 = vadd.f32 %v913_v45, %v747_v2  ;;  %7527 = vmatmul.msk.f32.gmra.mxu0 %vm222_vm1, %v8280_v43  ;;  %v1402_v17 = vld [vmem:[#allocation2 + $0xd8] sm:$0xff]  ;;  %v428_v0 = vld [vmem:[#allocation3 + $0xf8] sm:$0xff] }
  0xf4   : > { %v763_v35 = vld [vmem:[#allocation3 + $0xc8] sm:$0xff] }
  0xf5   : > { %700 = vst.msk [vmem:[#allocation3 + $0xd0] sm:$0xff] %vm222_vm1, %v668_v4  ;;  %v1007_v47 = vadd.f32 %v961_v33, %v763_v35  ;;  %v1059_v33 = vld [vmem:[#allocation2 + $0x9a] sm:$0xff]  ;;  %v1062_v35 = vld [vmem:[#allocation2 + $0xc2] sm:$0xff] }
  0xf6   : > { %1023 = vst.msk [vmem:[#allocation3 + $0x48] sm:$0xff] %vm222_vm1, %v991_v6  ;;  %7560 = vmatmul.msk.f32.gmra.mxu1 %vm222_vm1, %v1058_v20 }
  0xf7   : > { %1039 = vst.msk [vmem:[#allocation3 + $0xc8] sm:$0xff] %vm222_vm1, %v1007_v47  ;;  %7462 = vmatmul.msk.f32.gmra.mxu2 %vm222_vm1, %v1057_v7  ;;  %v1403_v7 = vld [vmem:[#allocation2 + $0xe0] sm:$0xff] }
  0xf8   : > { %7496 = vmatmul.msk.f32.gmra.mxu3 %vm222_vm1, %v8374_v15  ;;  %v579_v9 = vpop.f32.mrf.mxu0  ;;  %v409_v15 = vld [vmem:[#allocation3 + $0x60] sm:$0xff] }
  0xf9   : > { %v653_v10 = vadd.f32 %v579_v9, %v408_v19  ;;  %v922_v5 = vpop.f32.mrf.mxu1  ;;  %v307_v19 = vld [vmem:[#allocation2 + $0xff] sm:$0x1] }
  0xfa   : > { %v627_v11 = vpop.f32.mrf.mxu2  ;;  %v748_v14 = vld [vmem:[#allocation3 + $0x50] sm:$0xff]  ;;  %325 = vst.msk [vmem:[#allocation2 + $0x101] sm:$0x1] %vm278_vm2, %v307_v19  ;;  %v1082_v19 = vld [vmem:[#allocation3 + $0x20] sm:$0xff] }
  0xfb   : > { %v970_v25 = vpop.f32.mrf.mxu3  ;;  %v669_v62 = vadd.f32 %v627_v11, %v424_v8  ;;  %685 = vst.msk [vmem:[#allocation3 + $0x58] sm:$0xff] %vm222_vm1, %v653_v10  ;;  %v992_v42 = vadd.f32 %v916_v53, %v748_v14  ;;  %7528 = vmatmul.msk.f32.gmra.mxu0 %vm222_vm1, %v8310_v50  ;;  %v411_v8 = vld [vmem:[#allocation3 + $0x70] sm:$0xff]  ;;  %v1078_v11 = vld [vmem:[#allocation3] sm:$0xff] }
  0xfc   : > { %v764_v18 = vld [vmem:[#allocation3 + $0xd0] sm:$0xff] }
  0xfd   : > { %701 = vst.msk [vmem:[#allocation3 + $0xd8] sm:$0xff] %vm222_vm1, %v669_v62  ;;  %v1008_v21 = vadd.f32 %v964_v52, %v764_v18  ;;  %v1401_v52 = vld [vmem:[#allocation2 + $0xc8] sm:$0xff] }
  0xfe   : > { %1024 = vst.msk [vmem:[#allocation3 + $0x50] sm:$0xff] %vm222_vm1, %v992_v42  ;;  %7561 = vmatmul.msk.f32.gmra.mxu1 %vm222_vm1, %v1059_v33  ;;  %v1740_v10 = vld [vmem:[#allocation2 + $0xc1] sm:$0xff]  ;;  %v1063_v18 = vld [vmem:[#allocation2 + $0xca] sm:$0xff] }
  0xff   : > { %1040 = vst.msk [vmem:[#allocation3 + $0xd0] sm:$0xff] %vm222_vm1, %v1008_v21  ;;  %7463 = vmatmul.msk.f32.gmra.mxu2 %vm222_vm1, %v1058_v20  ;;  %v1404_v20 = vld [vmem:[#allocation2 + $0xf0] sm:$0xff] }
 0x100   : > { %7497 = vmatmul.msk.f32.gmra.mxu3 %vm222_vm1, %v8387_v23  ;;  %v582_v26 = vpop.f32.mrf.mxu0 }
 0x101   : > { %v654_v30 = vadd.f32 %v582_v26, %v409_v15  ;;  %v925_v58 = vpop.f32.mrf.mxu1  ;;  %v412_v15 = vld [vmem:[#allocation3 + $0x78] sm:$0xff]  ;;  %v1079_v26 = vld [vmem:[#allocation3 + $0x8] sm:$0xff] }
 0x102   : > { %v630_v24 = vpop.f32.mrf.mxu2  ;;  %v749_v28 = vld [vmem:[#allocation3 + $0x58] sm:$0xff] }
 0x103   : > { %v973_v27 = vpop.f32.mrf.mxu3  ;;  %v670_v29 = vadd.f32 %v630_v24, %v425_v40  ;;  %686 = vst.msk [vmem:[#allocation3 + $0x60] sm:$0xff] %vm222_vm1, %v654_v30  ;;  %v993_v3 = vadd.f32 %v919_v63, %v749_v28  ;;  %7529 = vmatmul.msk.f32.gmra.mxu0 %vm222_vm1, %v8334_v54  ;;  %v1741_v40 = vld [vmem:[#allocation2 + $0xc9] sm:$0xff] }
 0x104   : > { %v765_v32 = vld [vmem:[#allocation3 + $0xd8] sm:$0xff] }
 0x105   : > { %702 = vst.msk [vmem:[#allocation3 + $0xe0] sm:$0xff] %vm222_vm1, %v670_v29  ;;  %v1009_v23 = vadd.f32 %v967_v1, %v765_v32 }
 0x106   : > { %1025 = vst.msk [vmem:[#allocation3 + $0x58] sm:$0xff] %vm222_vm1, %v993_v3  ;;  %7562 = vmatmul.msk.f32.gmra.mxu1 %vm222_vm1, %v1060_v12 }
 0x107   : > { %1041 = vst.msk [vmem:[#allocation3 + $0xd8] sm:$0xff] %vm222_vm1, %v1009_v23  ;;  %7464 = vmatmul.msk.f32.gmra.mxu2 %vm222_vm1, %v1059_v33  ;;  %v1064_v33 = vld [vmem:[#allocation2 + $0xda] sm:$0xff] }
 0x108   : > { %7498 = vmatmul.msk.f32.gmra.mxu3 %vm222_vm1, %v1400_v37  ;;  %v585_v39 = vpop.f32.mrf.mxu0  ;;  %v1405_v23 = vld [vmem:[#allocation2 + $0xf8] sm:$0xff] }
 0x109   : > { %v655_v31 = vadd.f32 %v585_v39, %v410_v38  ;;  %v928_v1 = vpop.f32.mrf.mxu1  ;;  %v308_v38 = vld [vmem:[#allocation2 + $0x117] sm:$0x1]  ;;  %v1742_v39 = vld [vmem:[#allocation2 + $0xd9] sm:$0xff] }
 0x10a   : > { %v633_v43 = vpop.f32.mrf.mxu2  ;;  %v750_v45 = vld [vmem:[#allocation3 + $0x60] sm:$0xff]  ;;  %326 = vst.msk [vmem:[#allocation2 + $0x119] sm:$0x1] %vm278_vm2, %v308_v38 }
 0x10b   : > { %v976_v44 = vpop.f32.mrf.mxu3  ;;  %v671_v49 = vadd.f32 %v633_v43, %v426_v48  ;;  %687 = vst.msk [vmem:[#allocation3 + $0x68] sm:$0xff] %vm222_vm1, %v655_v31  ;;  %v994_v46 = vadd.f32 %v922_v5, %v750_v45  ;;  %7530 = vmatmul.msk.f32.gmra.mxu0 %vm222_vm1, %v8379_v16  ;;  %v1080_v31 = vld [vmem:[#allocation3 + $0x10] sm:$0xff] }
 0x10c   : > { %v766_v51 = vld [vmem:[#allocation3 + $0xe0] sm:$0xff] }
 0x10d   : > { %703 = vst.msk [vmem:[#allocation3 + $0xe8] sm:$0xff] %vm222_vm1, %v671_v49  ;;  %v1010_v56 = vadd.f32 %v970_v25, %v766_v51 }
 0x10e   : > { %1026 = vst.msk [vmem:[#allocation3 + $0x60] sm:$0xff] %vm222_vm1, %v994_v46  ;;  %7563 = vmatmul.msk.f32.gmra.mxu1 %vm222_vm1, %v1061_v55 }
 0x10f   : > { %1042 = vst.msk [vmem:[#allocation3 + $0xe0] sm:$0xff] %vm222_vm1, %v1010_v56  ;;  %7465 = vmatmul.msk.f32.gmra.mxu2 %vm222_vm1, %v1060_v12  ;;  %v1065_v12 = vld [vmem:[#allocation2 + $0xe2] sm:$0xff] }
 0x110   : > { %7499 = vmatmul.msk.f32.gmra.mxu3 %vm222_vm1, %v1401_v52  ;;  %v588_v9 = vpop.f32.mrf.mxu0  ;;  %v1406_v56 = vld [vmem:[#allocation2 + $0x108] sm:$0xff] }
 0x111   : > { %v656_v25 = vadd.f32 %v588_v9, %v411_v8  ;;  %v931_v42 = vpop.f32.mrf.mxu1 }
 0x112   : > { %v636_v50 = vpop.f32.mrf.mxu2  ;;  %v751_v60 = vld [vmem:[#allocation3 + $0x68] sm:$0xff] }
 0x113   : > { %v979_v13 = vpop.f32.mrf.mxu3  ;;  %v672_v41 = vadd.f32 %v636_v50, %v427_v59  ;;  %v995_v61 = vadd.f32 %v925_v58, %v751_v60  ;;  %688 = vst.msk [vmem:[#allocation3 + $0x70] sm:$0xff] %vm222_vm1, %v656_v25  ;;  %7531 = vmatmul.msk.f32.gmra.mxu0 %vm222_vm1, %v1740_v10  ;;  %v1081_v60 = vld [vmem:[#allocation3 + $0x18] sm:$0xff]  ;;  %v1067_v25 = vld [vmem:[#allocation2 + $0xfa] sm:$0xff] }
 0x114   : > { %v767_v36 = vld [vmem:[#allocation3 + $0xe8] sm:$0xff] }
 0x115   : > { %704 = vst.msk [vmem:[#allocation3 + $0xf0] sm:$0xff] %vm222_vm1, %v672_v41  ;;  %v1011_v53 = vadd.f32 %v973_v27, %v767_v36 }
 0x116   : > { %1027 = vst.msk [vmem:[#allocation3 + $0x68] sm:$0xff] %vm222_vm1, %v995_v61  ;;  %7564 = vmatmul.msk.f32.gmra.mxu1 %vm222_vm1, %v1062_v35 }
 0x117   : > { %1043 = vst.msk [vmem:[#allocation3 + $0xe8] sm:$0xff] %vm222_vm1, %v1011_v53  ;;  %7466 = vmatmul.msk.f32.gmra.mxu2 %vm222_vm1, %v1061_v55  ;;  %v1066_v53 = vld [vmem:[#allocation2 + $0xf2] sm:$0xff] }
 0x118   : > { %7500 = vmatmul.msk.f32.gmra.mxu3 %vm222_vm1, %v1402_v17  ;;  %v591_v22 = vpop.f32.mrf.mxu0 }
 0x119   : > { %v657_v24 = vadd.f32 %v591_v22, %v412_v15  ;;  %v2246_v3 = vpop.f32.mrf.mxu1  ;;  %v1745_v15 = vld [vmem:[#allocation2 + $0xf9] sm:$0xff] }
 0x11a   : > { %v639_v2 = vpop.f32.mrf.mxu2  ;;  %v752_v29 = vld [vmem:[#allocation3 + $0x70] sm:$0xff]  ;;  %v1083_v22 = vld [vmem:[#allocation3 + $0x28] sm:$0xff] }
 0x11b   : > { %v1566_v4 = vpop.f32.mrf.mxu3  ;;  %v673_v6 = vadd.f32 %v639_v2, %v428_v0  ;;  %689 = vst.msk [vmem:[#allocation3 + $0x78] sm:$0xff] %vm222_vm1, %v657_v24  ;;  %v996_v37 = vadd.f32 %v928_v1, %v752_v29  ;;  %7532 = vmatmul.msk.f32.gmra.mxu0 %vm222_vm1, %v1741_v40  ;;  %v1407_v0 = vld [vmem:[#allocation2 + $0x110] sm:$0xff]  ;;  %v1409_v29 = vld [vmem:[#allocation2 + $0x128] sm:$0xff] }
 0x11c   : > { %v768_v54 = vld [vmem:[#allocation3 + $0xf0] sm:$0xff] }
 0x11d   : > { %705 = vst.msk [vmem:[#allocation3 + $0xf8] sm:$0xff] %vm222_vm1, %v673_v6  ;;  %v1012_v47 = vadd.f32 %v976_v44, %v768_v54 }
 0x11e   : > { %7565 = vmatmul.msk.f32.gmra.mxu1 %vm222_vm1, %v1063_v18  ;;  %1028 = vst.msk [vmem:[#allocation3 + $0x70] sm:$0xff] %vm222_vm1, %v996_v37 }
 0x11f   : > { %1044 = vst.msk [vmem:[#allocation3 + $0xf0] sm:$0xff] %vm222_vm1, %v1012_v47  ;;  %7467 = vmatmul.msk.f32.gmra.mxu2 %vm222_vm1, %v1062_v35  ;;  %v1744_v47 = vld [vmem:[#allocation2 + $0xf1] sm:$0xff] }
 0x120   : > { %7501 = vmatmul.msk.f32.gmra.mxu3 %vm222_vm1, %v1403_v7  ;;  %v1906_v48 = vpop.f32.mrf.mxu0 }
 0x121   : > { %v2249_v46 = vpop.f32.mrf.mxu1 }
 0x122   : > { %v1226_v16 = vpop.f32.mrf.mxu2  ;;  %v753_v49 = vld [vmem:[#allocation3 + $0x78] sm:$0xff] }
 0x123   : > { %v1569_v14 = vpop.f32.mrf.mxu3  ;;  %v1322_v62 = vadd.f32 %v1226_v16, %v1078_v11  ;;  %v997_v52 = vadd.f32 %v931_v42, %v753_v49  ;;  %7533 = vmatmul.msk.f32.gmra.mxu0 %vm222_vm1, %v1742_v39  ;;  %v1084_v39 = vld [vmem:[#allocation3 + $0x30] sm:$0xff] }
 0x124   : > { %v769_v63 = vld [vmem:[#allocation3 + $0xf8] sm:$0xff] }
 0x125   : > { %1354 = vst.msk [vmem:[#allocation3] sm:$0xff] %vm222_vm1, %v1322_v62  ;;  %v1013_v21 = vadd.f32 %v979_v13, %v769_v63  ;;  %v1743_v13 = vld [vmem:[#allocation2 + $0xe1] sm:$0xff] }
 0x126   : > { %7566 = vmatmul.msk.f32.gmra.mxu1 %vm222_vm1, %v1064_v33  ;;  %1029 = vst.msk [vmem:[#allocation3 + $0x78] sm:$0xff] %vm222_vm1, %v997_v52 }
 0x127   : > { %1045 = vst.msk [vmem:[#allocation3 + $0xf8] sm:$0xff] %vm222_vm1, %v1013_v21  ;;  %7468 = vmatmul.msk.f32.gmra.mxu2 %vm222_vm1, %v1063_v18 }
 0x128   : > { %7502 = vmatmul.msk.f32.gmra.mxu3 %vm222_vm1, %v1404_v20  ;;  %v1909_v50 = vpop.f32.mrf.mxu0 }
 0x129   : > { %v8564_v55 = vpop.f32.mrf.mxu1 }
 0x12a   : > { %v1229_v30 = vpop.f32.mrf.mxu2 }
 0x12b   : > { %v1572_v27 = vpop.f32.mrf.mxu3  ;;  %v1323_v28 = vadd.f32 %v1229_v30, %v1079_v26  ;;  %7534 = vmatmul.msk.f32.gmra.mxu0 %vm222_vm1, %v1743_v13  ;;  %v1085_v13 = vld [vmem:[#allocation3 + $0x38] sm:$0xff] }
 0x12c   : > { %v1418_v32 = vld [vmem:[#allocation3] sm:$0xff] }
 0x12d   : > { %1355 = vst.msk [vmem:[#allocation3 + $0x8] sm:$0xff] %vm222_vm1, %v1323_v28  ;;  %v1662_v5 = vadd.f32 %v1566_v4, %v1418_v32  ;;  %v309_v4 = vld [vmem:[#allocation2 + $0x12f] sm:$0x1] }
 0x12e   : > { %7567 = vmatmul.msk.f32.gmra.mxu1 %vm222_vm1, %v1065_v12  ;;  %327 = vst.msk [vmem:[#allocation2 + $0x131] sm:$0x1] %vm278_vm2, %v309_v4  ;;  %v1068_v28 = vld [vmem:[#allocation2 + $0x10a] sm:$0xff] }
 0x12f   : > { %1694 = vst.msk [vmem:[#allocation3] sm:$0xff] %vm222_vm1, %v1662_v5  ;;  %7469 = vmatmul.msk.f32.gmra.mxu2 %vm222_vm1, %v1064_v33  ;;  %v310_v33 = vld [vmem:[#allocation2 + $0x147] sm:$0x1] }
 0x130   : > { %7503 = vmatmul.msk.f32.gmra.mxu3 %vm222_vm1, %v1405_v23  ;;  %v1912_v7 = vpop.f32.mrf.mxu0  ;;  %328 = vst.msk [vmem:[#allocation2 + $0x149] sm:$0x1] %vm278_vm2, %v310_v33  ;;  %v312_v33 = vld [vmem:[#allocation2 + $0x177] sm:$0x1] }
 0x131   : > { %v8575_v11 = vpop.f32.mrf.mxu1  ;;  %330 = vst.msk [vmem:[#allocation2 + $0x179] sm:$0x1] %vm278_vm2, %v312_v33 }
 0x132   : > { %v1232_v43 = vpop.f32.mrf.mxu2 }
 0x133   : > { %v1575_v44 = vpop.f32.mrf.mxu3  ;;  %v1324_v45 = vadd.f32 %v1232_v43, %v1080_v31  ;;  %7535 = vmatmul.msk.f32.gmra.mxu0 %vm222_vm1, %v1744_v47  ;;  %v1086_v47 = vld [vmem:[#allocation3 + $0x40] sm:$0xff] }
 0x134   : > { %v1419_v51 = vld [vmem:[#allocation3 + $0x8] sm:$0xff] }
 0x135   : > { %1356 = vst.msk [vmem:[#allocation3 + $0x10] sm:$0xff] %vm222_vm1, %v1324_v45  ;;  %v1663_v57 = vadd.f32 %v1569_v14, %v1419_v51  ;;  %v1408_v14 = vld [vmem:[#allocation2 + $0x120] sm:$0xff]  ;;  %v1410_v51 = vld [vmem:[#allocation2 + $0x138] sm:$0xff] }
 0x136   : > { %v1758_v58 = vld [vmem:[#allocation3] sm:$0xff]  ;;  %7568 = vmatmul.msk.f32.gmra.mxu1 %vm222_vm1, %v1066_v53 }
 0x137   : > { %1695 = vst.msk [vmem:[#allocation3 + $0x8] sm:$0xff] %vm222_vm1, %v1663_v57  ;;  %v2002_v59 = vadd.f32 %v1906_v48, %v1758_v58  ;;  %7470 = vmatmul.msk.f32.gmra.mxu2 %vm222_vm1, %v1065_v12  ;;  %v1746_v48 = vld [vmem:[#allocation2 + $0x109] sm:$0xff] }
 0x138   : > { %7504 = vmatmul.msk.f32.gmra.mxu3 %vm222_vm1, %v1406_v56  ;;  %v1915_v21 = vpop.f32.mrf.mxu0 }
 0x139   : > { %2034 = vst.msk [vmem:[#allocation3] sm:$0xff] %vm222_vm1, %v2002_v59  ;;  %v8585_v24 = vpop.f32.mrf.mxu1 }
 0x13a   : > { %v1235_v41 = vpop.f32.mrf.mxu2 }
 0x13b   : > { %v1578_v61 = vpop.f32.mrf.mxu3  ;;  %v1325_v36 = vadd.f32 %v1235_v41, %v1081_v60  ;;  %7536 = vmatmul.msk.f32.gmra.mxu0 %vm222_vm1, %v1745_v15  ;;  %v201_v15 = vld [vmem:[%s8064_s25 + $0xf0] sm:$0xff] }
 0x13c   : > { %v1420_v17 = vld [vmem:[#allocation3 + $0x10] sm:$0xff]  ;;  %253 = vst.msk [vmem:[#allocation2 + $0x181] sm:$0xff] %vm222_vm1, %v201_v15 }
 0x13d   : > { %1357 = vst.msk [vmem:[#allocation3 + $0x18] sm:$0xff] %vm222_vm1, %v1325_v36  ;;  %v1664_v1 = vadd.f32 %v1572_v27, %v1420_v17  ;;  %v1070_v17 = vld [vmem:[#allocation2 + $0x122] sm:$0xff]  ;;  %v1753_v15 = vld [vmem:[#allocation2 + $0x159] sm:$0xff] }
 0x13e   : > { %v1759_v2 = vld [vmem:[#allocation3 + $0x8] sm:$0xff]  ;;  %7569 = vmatmul.msk.f32.gmra.mxu1 %vm222_vm1, %v1067_v25 }
 0x13f   : > { %1696 = vst.msk [vmem:[#allocation3 + $0x10] sm:$0xff] %vm222_vm1, %v1664_v1  ;;  %v2003_v6 = vadd.f32 %v1909_v50, %v1759_v2  ;;  %7471 = vmatmul.msk.f32.gmra.mxu2 %vm222_vm1, %v1066_v53  ;;  %v1747_v50 = vld [vmem:[#allocation2 + $0x111] sm:$0xff]  ;;  %v1411_v53 = vld [vmem:[#allocation2 + $0x140] sm:$0xff]  ;;  %v311_v2 = vld [vmem:[#allocation2 + $0x15f] sm:$0x1] }
 0x140   : > { %7505 = vmatmul.msk.f32.gmra.mxu3 %vm222_vm1, %v1407_v0  ;;  %v2098_v54 = vld [vmem:[#allocation3] sm:$0xff]  ;;  %v1918_v38 = vpop.f32.mrf.mxu0  ;;  %329 = vst.msk [vmem:[#allocation2 + $0x161] sm:$0x1] %vm278_vm2, %v311_v2 }
 0x141   : > { %2035 = vst.msk [vmem:[#allocation3 + $0x8] sm:$0xff] %vm222_vm1, %v2003_v6  ;;  %v2342_v35 = vadd.f32 %v2246_v3, %v2098_v54 }
 0x142   : > { %v1238_v8 = vpop.f32.mrf.mxu2 }
 0x143   : > { %v1581_v9 = vpop.f32.mrf.mxu3  ;;  %2374 = vst.msk [vmem:[#allocation3] sm:$0xff] %vm222_vm1, %v2342_v35  ;;  %v1326_v10 = vadd.f32 %v1238_v8, %v1082_v19  ;;  %7537 = vmatmul.msk.f32.gmra.mxu0 %vm222_vm1, %v1746_v48  ;;  %v1750_v48 = vld [vmem:[#allocation2 + $0x139] sm:$0xff] }
 0x144   : > { %v1421_v16 = vld [vmem:[#allocation3 + $0x18] sm:$0xff] }
 0x145   : > { %1358 = vst.msk [vmem:[#allocation3 + $0x20] sm:$0xff] %vm222_vm1, %v1326_v10  ;;  %v1665_v62 = vadd.f32 %v1575_v44, %v1421_v16  ;;  %v1071_v16 = vld [vmem:[#allocation2 + $0x12a] sm:$0xff] }
 0x146   : > { %v1760_v42 = vld [vmem:[#allocation3 + $0x10] sm:$0xff]  ;;  %7570 = vmatmul.msk.f32.gmra.mxu1 %vm222_vm1, %v1068_v28 }
 0x147   : > { %1697 = vst.msk [vmem:[#allocation3 + $0x18] sm:$0xff] %vm222_vm1, %v1665_v62  ;;  %v2004_v63 = vadd.f32 %v1912_v7, %v1760_v42  ;;  %7472 = vmatmul.msk.f32.gmra.mxu2 %vm222_vm1, %v1067_v25  ;;  %v1748_v7 = vld [vmem:[#allocation2 + $0x121] sm:$0xff]  ;;  %v1412_v25 = vld [vmem:[#allocation2 + $0x150] sm:$0xff] }
 0x148   : > { %7506 = vmatmul.msk.f32.gmra.mxu3 %vm222_vm1, %v1408_v14  ;;  %v2099_v18 = vld [vmem:[#allocation3 + $0x8] sm:$0xff]  ;;  %v1921_v59 = vpop.f32.mrf.mxu0 }
 0x149   : > { %2036 = vst.msk [vmem:[#allocation3 + $0x10] sm:$0xff] %vm222_vm1, %v2004_v63  ;;  %v2343_v20 = vadd.f32 %v2249_v46, %v2099_v18  ;;  %v1069_v46 = vld [vmem:[#allocation2 + $0x112] sm:$0xff] }
 0x14a   : > { %v1241_v40 = vpop.f32.mrf.mxu2 }
 0x14b   : > { %v1584_v26 = vpop.f32.mrf.mxu3  ;;  %2375 = vst.msk [vmem:[#allocation3 + $0x8] sm:$0xff] %vm222_vm1, %v2343_v20  ;;  %v1327_v30 = vadd.f32 %v1241_v40, %v1083_v22  ;;  %v8597_v45 = vpop.f32.mrf.mxu1  ;;  %7538 = vmatmul.msk.f32.gmra.mxu0 %vm222_vm1, %v1747_v50  ;;  %v1087_v22 = vld [vmem:[#allocation3 + $0x48] sm:$0xff] }
 0x14c   : > { %v1422_v27 = vld [vmem:[#allocation3 + $0x20] sm:$0xff] }
 0x14d   : > { %1359 = vst.msk [vmem:[#allocation3 + $0x28] sm:$0xff] %vm222_vm1, %v1327_v30  ;;  %v1666_v3 = vadd.f32 %v1578_v61, %v1422_v27 }
 0x14e   : > { %v1761_v32 = vld [vmem:[#allocation3 + $0x18] sm:$0xff]  ;;  %7571 = vmatmul.msk.f32.gmra.mxu1 %vm222_vm1, %v1069_v46 }
 0x14f   : > { %1698 = vst.msk [vmem:[#allocation3 + $0x20] sm:$0xff] %vm222_vm1, %v1666_v3  ;;  %v2005_v37 = vadd.f32 %v1915_v21, %v1761_v32  ;;  %7473 = vmatmul.msk.f32.gmra.mxu2 %vm222_vm1, %v1068_v28  ;;  %v1749_v21 = vld [vmem:[#allocation2 + $0x129] sm:$0xff]  ;;  %v1072_v28 = vld [vmem:[#allocation2 + $0x13a] sm:$0xff] }
 0x150   : > { %7507 = vmatmul.msk.f32.gmra.mxu3 %vm222_vm1, %v1409_v29  ;;  %v2100_v23 = vld [vmem:[#allocation3 + $0x10] sm:$0xff]  ;;  %v1924_v35 = vpop.f32.mrf.mxu0  ;;  %v1413_v29 = vld [vmem:[#allocation2 + $0x158] sm:$0xff] }
 0x151   : > { %2037 = vst.msk [vmem:[#allocation3 + $0x18] sm:$0xff] %vm222_vm1, %v2005_v37  ;;  %v2344_v5 = vadd.f32 %v8564_v55, %v2100_v23 }
 0x152   : > { %v1244_v31 = vpop.f32.mrf.mxu2 }
 0x153   : > { %v1587_v43 = vpop.f32.mrf.mxu3  ;;  %2376 = vst.msk [vmem:[#allocation3 + $0x10] sm:$0xff] %vm222_vm1, %v2344_v5  ;;  %v1328_v44 = vadd.f32 %v1244_v31, %v1084_v39  ;;  %v8608_v36 = vpop.f32.mrf.mxu1  ;;  %7539 = vmatmul.msk.f32.gmra.mxu0 %vm222_vm1, %v1748_v7  ;;  %v276_v39 = vld [vmem:[#allocation2 + $0x182] sm:$0x1] }
 0x154   : > { %v1423_v49 = vld [vmem:[#allocation3 + $0x28] sm:$0xff]  ;;  %v1088_v31 = vld [vmem:[#allocation3 + $0x50] sm:$0xff]  ;;  %295 = vst.msk [vmem:[#allocation2 + $0x180] sm:$0x1] %vm278_vm2, %v276_v39 }
 0x155   : > { %1360 = vst.msk [vmem:[#allocation3 + $0x30] sm:$0xff] %vm222_vm1, %v1328_v44  ;;  %v1667_v12 = vadd.f32 %v1581_v9, %v1423_v49 }
 0x156   : > { %v1762_v52 = vld [vmem:[#allocation3 + $0x20] sm:$0xff]  ;;  %7572 = vmatmul.msk.f32.gmra.mxu1 %vm222_vm1, %v1070_v17 }
 0x157   : > { %1699 = vst.msk [vmem:[#allocation3 + $0x28] sm:$0xff] %vm222_vm1, %v1667_v12  ;;  %v2006_v56 = vadd.f32 %v1918_v38, %v1762_v52  ;;  %7474 = vmatmul.msk.f32.gmra.mxu2 %vm222_vm1, %v1069_v46  ;;  %v1414_v12 = vld [vmem:[#allocation2 + $0x168] sm:$0xff] }
 0x158   : > { %7508 = vmatmul.msk.f32.gmra.mxu3 %vm222_vm1, %v1410_v51  ;;  %v2101_v57 = vld [vmem:[#allocation3 + $0x18] sm:$0xff]  ;;  %v1927_v20 = vpop.f32.mrf.mxu0 }
 0x159   : > { %2038 = vst.msk [vmem:[#allocation3 + $0x20] sm:$0xff] %vm222_vm1, %v2006_v56  ;;  %v2345_v58 = vadd.f32 %v8575_v11, %v2101_v57  ;;  %v1073_v51 = vld [vmem:[#allocation2 + $0x142] sm:$0xff] }
 0x15a   : > { %v1247_v60 = vpop.f32.mrf.mxu2 }
 0x15b   : > { %v1590_v41 = vpop.f32.mrf.mxu3  ;;  %2377 = vst.msk [vmem:[#allocation3 + $0x18] sm:$0xff] %vm222_vm1, %v2345_v58  ;;  %v1329_v61 = vadd.f32 %v1247_v60, %v1085_v13  ;;  %v8620_v10 = vpop.f32.mrf.mxu1  ;;  %7540 = vmatmul.msk.f32.gmra.mxu0 %vm222_vm1, %v1749_v21  ;;  %v1751_v60 = vld [vmem:[#allocation2 + $0x141] sm:$0xff] }
 0x15c   : > { %v1424_v55 = vld [vmem:[#allocation3 + $0x30] sm:$0xff] }
 0x15d   : > { %1361 = vst.msk [vmem:[#allocation3 + $0x38] sm:$0xff] %vm222_vm1, %v1329_v61  ;;  %v1668_v0 = vadd.f32 %v1584_v26, %v1424_v55 }
 0x15e   : > { %v1763_v1 = vld [vmem:[#allocation3 + $0x28] sm:$0xff]  ;;  %7573 = vmatmul.msk.f32.gmra.mxu1 %vm222_vm1, %v1071_v16 }
 0x15f   : > { %1700 = vst.msk [vmem:[#allocation3 + $0x30] sm:$0xff] %vm222_vm1, %v1668_v0  ;;  %v2007_v4 = vadd.f32 %v1921_v59, %v1763_v1  ;;  %7475 = vmatmul.msk.f32.gmra.mxu2 %vm222_vm1, %v1070_v17  ;;  %v202_v59 = vld [vmem:[%s8064_s25 + $0xf8] sm:$0xff]  ;;  %v1415_v1 = vld [vmem:[#allocation2 + $0x170] sm:$0xff] }
 0x160   : > { %7509 = vmatmul.msk.f32.gmra.mxu3 %vm222_vm1, %v1411_v53  ;;  %v2102_v6 = vld [vmem:[#allocation3 + $0x20] sm:$0xff]  ;;  %v1930_v38 = vpop.f32.mrf.mxu0  ;;  %254 = vst.msk [vmem:[#allocation2 + $0x189] sm:$0xff] %vm222_vm1, %v202_v59 }
 0x161   : > { %2039 = vst.msk [vmem:[#allocation3 + $0x28] sm:$0xff] %vm222_vm1, %v2007_v4  ;;  %v2346_v54 = vadd.f32 %v8585_v24, %v2102_v6  ;;  %v1074_v0 = vld [vmem:[#allocation2 + $0x152] sm:$0xff] }
 0x162   : > { %v1250_v19 = vpop.f32.mrf.mxu2 }
 0x163   : > { %v1593_v8 = vpop.f32.mrf.mxu3  ;;  %2378 = vst.msk [vmem:[#allocation3 + $0x20] sm:$0xff] %vm222_vm1, %v2346_v54  ;;  %v1330_v9 = vadd.f32 %v1250_v19, %v1086_v47  ;;  %v8633_v24 = vpop.f32.mrf.mxu1  ;;  %7541 = vmatmul.msk.f32.gmra.mxu0 %vm222_vm1, %v1750_v48  ;;  %v1752_v47 = vld [vmem:[#allocation2 + $0x151] sm:$0xff]  ;;  %v1092_v48 = vld [vmem:[#allocation3 + $0x70] sm:$0xff] }
 0x164   : > { %v1425_v11 = vld [vmem:[#allocation3 + $0x38] sm:$0xff]  ;;  %v1090_v19 = vld [vmem:[#allocation3 + $0x60] sm:$0xff] }
 0x165   : > { %1362 = vst.msk [vmem:[#allocation3 + $0x40] sm:$0xff] %vm222_vm1, %v1330_v9  ;;  %v1669_v14 = vadd.f32 %v1587_v43, %v1425_v11 }
 0x166   : > { %v1764_v62 = vld [vmem:[#allocation3 + $0x30] sm:$0xff]  ;;  %7574 = vmatmul.msk.f32.gmra.mxu1 %vm222_vm1, %v1072_v28 }
 0x167   : > { %1701 = vst.msk [vmem:[#allocation3 + $0x38] sm:$0xff] %vm222_vm1, %v1669_v14  ;;  %v2008_v42 = vadd.f32 %v1924_v35, %v1764_v62  ;;  %7476 = vmatmul.msk.f32.gmra.mxu2 %vm222_vm1, %v1071_v16  ;;  %v1416_v14 = vld [vmem:[#allocation2 + $0x180] sm:$0xff] }
 0x168   : > { %7510 = vmatmul.msk.f32.gmra.mxu3 %vm222_vm1, %v1412_v25  ;;  %v2103_v63 = vld [vmem:[#allocation3 + $0x28] sm:$0xff]  ;;  %v1933_v13 = vpop.f32.mrf.mxu0 }
 0x169   : > { %2040 = vst.msk [vmem:[#allocation3 + $0x30] sm:$0xff] %vm222_vm1, %v2008_v42  ;;  %v2347_v18 = vadd.f32 %v8597_v45, %v2103_v63  ;;  %v1075_v25 = vld [vmem:[#allocation2 + $0x15a] sm:$0xff] }
 0x16a   : > { %v1253_v40 = vpop.f32.mrf.mxu2 }
 0x16b   : > { %v1596_v26 = vpop.f32.mrf.mxu3  ;;  %2379 = vst.msk [vmem:[#allocation3 + $0x28] sm:$0xff] %vm222_vm1, %v2347_v18  ;;  %v1331_v30 = vadd.f32 %v1253_v40, %v1087_v22  ;;  %v8646_v49 = vpop.f32.mrf.mxu1  ;;  %7542 = vmatmul.msk.f32.gmra.mxu0 %vm222_vm1, %v1751_v60  ;;  %v1091_v22 = vld [vmem:[#allocation3 + $0x68] sm:$0xff] }
 0x16c   : > { %v1426_v27 = vld [vmem:[#allocation3 + $0x40] sm:$0xff] }
 0x16d   : > { %1363 = vst.msk [vmem:[#allocation3 + $0x48] sm:$0xff] %vm222_vm1, %v1331_v30  ;;  %v1670_v3 = vadd.f32 %v1590_v41, %v1426_v27  ;;  %v1089_v41 = vld [vmem:[#allocation3 + $0x58] sm:$0xff] }
 0x16e   : > { %v1765_v32 = vld [vmem:[#allocation3 + $0x38] sm:$0xff]  ;;  %7575 = vmatmul.msk.f32.gmra.mxu1 %vm222_vm1, %v1073_v51 }
 0x16f   : > { %1702 = vst.msk [vmem:[#allocation3 + $0x40] sm:$0xff] %vm222_vm1, %v1670_v3  ;;  %v2009_v37 = vadd.f32 %v1927_v20, %v1765_v32  ;;  %7477 = vmatmul.msk.f32.gmra.mxu2 %vm222_vm1, %v1072_v28  ;;  %v1076_v28 = vld [vmem:[#allocation2 + $0x16a] sm:$0xff] }
 0x170   : > { %7511 = vmatmul.msk.f32.gmra.mxu3 %vm222_vm1, %v1413_v29  ;;  %v2104_v23 = vld [vmem:[#allocation3 + $0x30] sm:$0xff]  ;;  %v1936_v7 = vpop.f32.mrf.mxu0  ;;  %v1417_v29 = vld [vmem:[#allocation2 + $0x188] sm:$0xff] }
 0x171   : > { %2041 = vst.msk [vmem:[#allocation3 + $0x38] sm:$0xff] %vm222_vm1, %v2009_v37  ;;  %v2348_v5 = vadd.f32 %v8608_v36, %v2104_v23 }
 0x172   : > { %v1256_v43 = vpop.f32.mrf.mxu2 }
 0x173   : > { %v1599_v44 = vpop.f32.mrf.mxu3  ;;  %2380 = vst.msk [vmem:[#allocation3 + $0x30] sm:$0xff] %vm222_vm1, %v2348_v5  ;;  %v1332_v45 = vadd.f32 %v1256_v43, %v1088_v31  ;;  %v2276_v17 = vpop.f32.mrf.mxu1  ;;  %7543 = vmatmul.msk.f32.gmra.mxu0 %vm222_vm1, %v1752_v47  ;;  %v1094_v47 = vld [vmem:[#allocation3 + $0x80] sm:$0xff] }
 0x174   : > { %v1427_v46 = vld [vmem:[#allocation3 + $0x48] sm:$0xff] }
 0x175   : > { %1364 = vst.msk [vmem:[#allocation3 + $0x50] sm:$0xff] %vm222_vm1, %v1332_v45  ;;  %v1671_v52 = vadd.f32 %v1593_v8, %v1427_v46  ;;  %v313_v45 = vld [vmem:[#allocation2 + $0x18f] sm:$0x1]  ;;  %v1077_v46 = vld [vmem:[#allocation2 + $0x172] sm:$0xff] }
 0x176   : > { %v1766_v56 = vld [vmem:[#allocation3 + $0x40] sm:$0xff]  ;;  %7576 = vmatmul.msk.f32.gmra.mxu1 %vm222_vm1, %v1074_v0  ;;  %331 = vst.msk [vmem:[#allocation2 + $0x191] sm:$0x1] %vm278_vm2, %v313_v45 }
 0x177   : > { %1703 = vst.msk [vmem:[#allocation3 + $0x48] sm:$0xff] %vm222_vm1, %v1671_v52  ;;  %v2010_v57 = vadd.f32 %v1930_v38, %v1766_v56  ;;  %7478 = vmatmul.msk.f32.gmra.mxu2 %vm222_vm1, %v1073_v51  ;;  %v1754_v38 = vld [vmem:[#allocation2 + $0x169] sm:$0xff]  ;;  %v2747_v51 = vld [vmem:[#allocation2 + $0x31] sm:$0xff] }
 0x178   : > { %7512 = vmatmul.msk.f32.gmra.mxu3 %vm222_vm1, %v1414_v12  ;;  %v2105_v58 = vld [vmem:[#allocation3 + $0x38] sm:$0xff]  ;;  %v1939_v21 = vpop.f32.mrf.mxu0 }
 0x179   : > { %2042 = vst.msk [vmem:[#allocation3 + $0x40] sm:$0xff] %vm222_vm1, %v2010_v57  ;;  %v2349_v50 = vadd.f32 %v8620_v10, %v2105_v58 }
 0x17a   : > { %v1259_v61 = vpop.f32.mrf.mxu2 }
 0x17b   : > { %v1602_v36 = vpop.f32.mrf.mxu3  ;;  %2381 = vst.msk [vmem:[#allocation3 + $0x38] sm:$0xff] %vm222_vm1, %v2349_v50  ;;  %v1333_v55 = vadd.f32 %v1259_v61, %v1089_v41  ;;  %v8668_v11 = vpop.f32.mrf.mxu1  ;;  %7544 = vmatmul.msk.f32.gmra.mxu0 %vm222_vm1, %v1753_v15  ;;  %v1755_v50 = vld [vmem:[#allocation2 + $0x171] sm:$0xff]  ;;  %v2096_v61 = vld [vmem:[#allocation2 + $0x182] sm:$0xff] }
 0x17c   : > { %v1428_v53 = vld [vmem:[#allocation3 + $0x50] sm:$0xff]  ;;  %v1757_v15 = vld [vmem:[#allocation2 + $0x189] sm:$0xff] }
 0x17d   : > { %1365 = vst.msk [vmem:[#allocation3 + $0x58] sm:$0xff] %vm222_vm1, %v1333_v55  ;;  %v1672_v2 = vadd.f32 %v1596_v26, %v1428_v53  ;;  %v2407_v53 = vld [vmem:[#allocation2 + $0x30] sm:$0xff] }
 0x17e   : > { %v1767_v4 = vld [vmem:[#allocation3 + $0x48] sm:$0xff]  ;;  %7577 = vmatmul.msk.f32.gmra.mxu1 %vm222_vm1, %v1075_v25 }
 0x17f   : > { %1704 = vst.msk [vmem:[#allocation3 + $0x50] sm:$0xff] %vm222_vm1, %v1672_v2  ;;  %v2011_v6 = vadd.f32 %v1933_v13, %v1767_v4  ;;  %7479 = vmatmul.msk.f32.gmra.mxu2 %vm222_vm1, %v1074_v0  ;;  %v1093_v13 = vld [vmem:[#allocation3 + $0x78] sm:$0xff]  ;;  %v2748_v0 = vld [vmem:[#allocation2 + $0x39] sm:$0xff] }
 0x180   : > { %7513 = vmatmul.msk.f32.gmra.mxu3 %vm222_vm1, %v1415_v1  ;;  %v2106_v54 = vld [vmem:[#allocation3 + $0x40] sm:$0xff]  ;;  %v1942_v5 = vpop.f32.mrf.mxu0 }
 0x181   : > { %2043 = vst.msk [vmem:[#allocation3 + $0x48] sm:$0xff] %vm222_vm1, %v2011_v6  ;;  %v2350_v35 = vadd.f32 %v8633_v24, %v2106_v54 }
 0x182   : > { %v1262_v8 = vpop.f32.mrf.mxu2 }
 0x183   : > { %v1605_v9 = vpop.f32.mrf.mxu3  ;;  %2382 = vst.msk [vmem:[#allocation3 + $0x40] sm:$0xff] %vm222_vm1, %v2350_v35  ;;  %v1334_v10 = vadd.f32 %v1262_v8, %v1090_v19  ;;  %v8679_v24 = vpop.f32.mrf.mxu1  ;;  %7545 = vmatmul.msk.f32.gmra.mxu0 %vm222_vm1, %v1754_v38  ;;  %v3087_v38 = vld [vmem:[#allocation2 + $0x32] sm:$0xff] }
 0x184   : > { %v1429_v16 = vld [vmem:[#allocation3 + $0x58] sm:$0xff] }
 0x185   : > { %1366 = vst.msk [vmem:[#allocation3 + $0x60] sm:$0xff] %vm222_vm1, %v1334_v10  ;;  %v1673_v62 = vadd.f32 %v1599_v44, %v1429_v16 }
 0x186   : > { %v1768_v42 = vld [vmem:[#allocation3 + $0x50] sm:$0xff]  ;;  %7578 = vmatmul.msk.f32.gmra.mxu1 %vm222_vm1, %v1076_v28 }
 0x187   : > { %1705 = vst.msk [vmem:[#allocation3 + $0x58] sm:$0xff] %vm222_vm1, %v1673_v62  ;;  %v2012_v63 = vadd.f32 %v1936_v7, %v1768_v42  ;;  %7480 = vmatmul.msk.f32.gmra.mxu2 %vm222_vm1, %v1075_v25  ;;  %v1756_v7 = vld [vmem:[#allocation2 + $0x181] sm:$0xff]  ;;  %v2408_v25 = vld [vmem:[#allocation2 + $0x38] sm:$0xff] }
 0x188   : > { %7514 = vmatmul.msk.f32.gmra.mxu3 %vm222_vm1, %v1416_v14  ;;  %v2107_v18 = vld [vmem:[#allocation3 + $0x48] sm:$0xff]  ;;  %v1945_v59 = vpop.f32.mrf.mxu0  ;;  %v2749_v14 = vld [vmem:[#allocation2 + $0x49] sm:$0xff] }
 0x189   : > { %2044 = vst.msk [vmem:[#allocation3 + $0x50] sm:$0xff] %vm222_vm1, %v2012_v63  ;;  %v2351_v20 = vadd.f32 %v8646_v49, %v2107_v18 }
 0x18a   : > { %v1265_v40 = vpop.f32.mrf.mxu2 }
 0x18b   : > { %v1608_v26 = vpop.f32.mrf.mxu3  ;;  %2383 = vst.msk [vmem:[#allocation3 + $0x48] sm:$0xff] %vm222_vm1, %v2351_v20  ;;  %v1335_v30 = vadd.f32 %v1265_v40, %v1091_v22  ;;  %v8689_v44 = vpop.f32.mrf.mxu1  ;;  %7546 = vmatmul.msk.f32.gmra.mxu0 %vm222_vm1, %v1755_v50  ;;  %v1095_v22 = vld [vmem:[#allocation3 + $0x88] sm:$0xff]  ;;  %v1097_v50 = vld [vmem:[#allocation3 + $0x98] sm:$0xff] }
 0x18c   : > { %v1430_v27 = vld [vmem:[#allocation3 + $0x60] sm:$0xff] }
 0x18d   : > { %1367 = vst.msk [vmem:[#allocation3 + $0x68] sm:$0xff] %vm222_vm1, %v1335_v30  ;;  %v1674_v3 = vadd.f32 %v1602_v36, %v1430_v27 }
 0x18e   : > { %v1769_v32 = vld [vmem:[#allocation3 + $0x58] sm:$0xff]  ;;  %7579 = vmatmul.msk.f32.gmra.mxu1 %vm222_vm1, %v1077_v46 }
 0x18f   : > { %1706 = vst.msk [vmem:[#allocation3 + $0x60] sm:$0xff] %vm222_vm1, %v1674_v3  ;;  %v2013_v33 = vadd.f32 %v1939_v21, %v1769_v32  ;;  %7481 = vmatmul.msk.f32.gmra.mxu2 %vm222_vm1, %v1076_v28  ;;  %v2409_v28 = vld [vmem:[#allocation2 + $0x48] sm:$0xff] }
 0x190   : > { %7515 = vmatmul.msk.f32.gmra.mxu3 %vm222_vm1, %v1417_v29  ;;  %v2108_v37 = vld [vmem:[#allocation3 + $0x50] sm:$0xff]  ;;  %v1948_v35 = vpop.f32.mrf.mxu0  ;;  %v2750_v29 = vld [vmem:[#allocation2 + $0x51] sm:$0xff] }
 0x191   : > { %2045 = vst.msk [vmem:[#allocation3 + $0x58] sm:$0xff] %vm222_vm1, %v2013_v33  ;;  %v2352_v23 = vadd.f32 %v2276_v17, %v2108_v37 }
 0x192   : > { %v1268_v39 = vpop.f32.mrf.mxu2 }
 0x193   : > { %v1611_v31 = vpop.f32.mrf.mxu3  ;;  %2384 = vst.msk [vmem:[#allocation3 + $0x50] sm:$0xff] %vm222_vm1, %v2352_v23  ;;  %v1336_v43 = vadd.f32 %v1268_v39, %v1092_v48  ;;  %v2288_v55 = vpop.f32.mrf.mxu1  ;;  %7547 = vmatmul.msk.f32.gmra.mxu0 %vm222_vm1, %v1756_v7  ;;  %v1096_v48 = vld [vmem:[#allocation3 + $0x90] sm:$0xff] }
 0x194   : > { %v1431_v49 = vld [vmem:[#allocation3 + $0x68] sm:$0xff] }
 0x195   : > { %1368 = vst.msk [vmem:[#allocation3 + $0x70] sm:$0xff] %vm222_vm1, %v1336_v43  ;;  %v1675_v12 = vadd.f32 %v1605_v9, %v1431_v49  ;;  %v2097_v9 = vld [vmem:[#allocation2 + $0x18a] sm:$0xff] }
 0x196   : > { %v1770_v52 = vld [vmem:[#allocation3 + $0x60] sm:$0xff]  ;;  %7580 = vmatmul.msk.f32.gmra.mxu1 %vm222_vm1, %v2096_v61 }
 0x197   : > { %1707 = vst.msk [vmem:[#allocation3 + $0x68] sm:$0xff] %vm222_vm1, %v1675_v12  ;;  %v2014_v56 = vadd.f32 %v1942_v5, %v1770_v52  ;;  %7482 = vmatmul.msk.f32.gmra.mxu2 %vm222_vm1, %v1077_v46  ;;  %v2410_v49 = vld [vmem:[#allocation2 + $0x50] sm:$0xff]  ;;  %v2751_v46 = vld [vmem:[#allocation2 + $0x61] sm:$0xff] }
 0x198   : > { %7616 = vmatmul.msk.f32.vlgmr.msra.gmra.mxu3 %vm222_vm1, %v2747_v51  ;;  %v2109_v57 = vld [vmem:[#allocation3 + $0x58] sm:$0xff]  ;;  %v1951_v21 = vpop.f32.mrf.mxu0 }
 0x199   : > { %2046 = vst.msk [vmem:[#allocation3 + $0x60] sm:$0xff] %vm222_vm1, %v2014_v56  ;;  %v2353_v58 = vadd.f32 %v8668_v11, %v2109_v57 }
 0x19a   : > { %v1271_v60 = vpop.f32.mrf.mxu2 }
 0x19b   : > { %v1614_v41 = vpop.f32.mrf.mxu3  ;;  %2385 = vst.msk [vmem:[#allocation3 + $0x58] sm:$0xff] %vm222_vm1, %v2353_v58  ;;  %v1337_v36 = vadd.f32 %v1271_v60, %v1093_v13  ;;  %v2291_v11 = vpop.f32.mrf.mxu1  ;;  %7548 = vmatmul.msk.f32.gmra.mxu0 %vm222_vm1, %v1757_v15 }
 0x19c   : > { %v1432_v17 = vld [vmem:[#allocation3 + $0x70] sm:$0xff] }
 0x19d   : > { %1369 = vst.msk [vmem:[#allocation3 + $0x78] sm:$0xff] %vm222_vm1, %v1337_v36  ;;  %v1676_v1 = vadd.f32 %v1608_v26, %v1432_v17  ;;  %v2752_v17 = vld [vmem:[#allocation2 + $0x69] sm:$0xff] }
 0x19e   : > { %v1771_v2 = vld [vmem:[#allocation3 + $0x68] sm:$0xff]  ;;  %7581 = vmatmul.msk.f32.gmra.mxu1 %vm222_vm1, %v2097_v9 }
 0x19f   : > { %1708 = vst.msk [vmem:[#allocation3 + $0x70] sm:$0xff] %vm222_vm1, %v1676_v1  ;;  %v2015_v4 = vadd.f32 %v1945_v59, %v1771_v2  ;;  %7583 = vmatmul.msk.f32.vlgmr.msra.gmra.mxu2 %vm222_vm1, %v2407_v53  ;;  %v3088_v59 = vld [vmem:[#allocation2 + $0x3a] sm:$0xff] }
 0x1a0   : > { %7617 = vmatmul.msk.f32.gmra.mxu3 %vm222_vm1, %v2748_v0  ;;  %v2110_v6 = vld [vmem:[#allocation3 + $0x60] sm:$0xff]  ;;  %v1954_v5 = vpop.f32.mrf.mxu0 }
 0x1a1   : > { %2047 = vst.msk [vmem:[#allocation3 + $0x68] sm:$0xff] %vm222_vm1, %v2015_v4  ;;  %v2354_v54 = vadd.f32 %v8679_v24, %v2110_v6 }
 0x1a2   : > { %v1274_v19 = vpop.f32.mrf.mxu2 }
 0x1a3   : > { %v1617_v8 = vpop.f32.mrf.mxu3  ;;  %2386 = vst.msk [vmem:[#allocation3 + $0x60] sm:$0xff] %vm222_vm1, %v2354_v54  ;;  %v1338_v10 = vadd.f32 %v1274_v19, %v1094_v47  ;;  %v2294_v24 = vpop.f32.mrf.mxu1  ;;  %7649 = vmatmul.msk.f32.vlgmr.msra.gmra.mxu0 %vm222_vm1, %v3087_v38  ;;  %v3089_v54 = vld [vmem:[#allocation2 + $0x4a] sm:$0xff] }
 0x1a4   : > { %v1433_v16 = vld [vmem:[#allocation3 + $0x78] sm:$0xff] }
 0x1a5   : > { %1370 = vst.msk [vmem:[#allocation3 + $0x80] sm:$0xff] %vm222_vm1, %v1338_v10  ;;  %v1677_v62 = vadd.f32 %v1611_v31, %v1433_v16  ;;  %v2412_v10 = vld [vmem:[#allocation2 + $0x68] sm:$0xff] }
 0x1a6   : > { %v1772_v42 = vld [vmem:[#allocation3 + $0x70] sm:$0xff] }
 0x1a7   : > { %1709 = vst.msk [vmem:[#allocation3 + $0x78] sm:$0xff] %vm222_vm1, %v1677_v62  ;;  %v2016_v63 = vadd.f32 %v1948_v35, %v1772_v42  ;;  %7584 = vmatmul.msk.f32.gmra.mxu2 %vm222_vm1, %v2408_v25  ;;  %v1098_v35 = vld [vmem:[#allocation3 + $0xa0] sm:$0xff] }
 0x1a8   : > { %7618 = vmatmul.msk.f32.gmra.mxu3 %vm222_vm1, %v2749_v14  ;;  %v2111_v18 = vld [vmem:[#allocation3 + $0x68] sm:$0xff]  ;;  %v1957_v58 = vpop.f32.mrf.mxu0 }
 0x1a9   : > { %2048 = vst.msk [vmem:[#allocation3 + $0x70] sm:$0xff] %vm222_vm1, %v2016_v63  ;;  %v2355_v20 = vadd.f32 %v8689_v44, %v2111_v18  ;;  %v3090_v18 = vld [vmem:[#allocation2 + $0x52] sm:$0xff] }
 0x1aa   : > { %v1277_v40 = vpop.f32.mrf.mxu2 }
 0x1ab   : > { %v1620_v26 = vpop.f32.mrf.mxu3  ;;  %2387 = vst.msk [vmem:[#allocation3 + $0x68] sm:$0xff] %vm222_vm1, %v2355_v20  ;;  %v1339_v30 = vadd.f32 %v1277_v40, %v1095_v22  ;;  %v2297_v44 = vpop.f32.mrf.mxu1  ;;  %7650 = vmatmul.msk.f32.gmra.mxu0 %vm222_vm1, %v3088_v59  ;;  %v1099_v20 = vld [vmem:[#allocation3 + $0xa8] sm:$0xff] }
 0x1ac   : > { %v1434_v27 = vld [vmem:[#allocation3 + $0x80] sm:$0xff] }
 0x1ad   : > { %1371 = vst.msk [vmem:[#allocation3 + $0x88] sm:$0xff] %vm222_vm1, %v1339_v30  ;;  %v1678_v3 = vadd.f32 %v1614_v41, %v1434_v27  ;;  %v2413_v30 = vld [vmem:[#allocation2 + $0x78] sm:$0xff] }
 0x1ae   : > { %v1773_v32 = vld [vmem:[#allocation3 + $0x78] sm:$0xff] }
 0x1af   : > { %1710 = vst.msk [vmem:[#allocation3 + $0x80] sm:$0xff] %vm222_vm1, %v1678_v3  ;;  %v2017_v33 = vadd.f32 %v1951_v21, %v1773_v32  ;;  %7585 = vmatmul.msk.f32.gmra.mxu2 %vm222_vm1, %v2409_v28 }
 0x1b0   : > { %7619 = vmatmul.msk.f32.gmra.mxu3 %vm222_vm1, %v2750_v29  ;;  %v2112_v37 = vld [vmem:[#allocation3 + $0x70] sm:$0xff]  ;;  %v1960_v6 = vpop.f32.mrf.mxu0 }
 0x1b1   : > { %2049 = vst.msk [vmem:[#allocation3 + $0x78] sm:$0xff] %vm222_vm1, %v2017_v33  ;;  %v2356_v23 = vadd.f32 %v2288_v55, %v2112_v37  ;;  %v2411_v55 = vld [vmem:[#allocation2 + $0x60] sm:$0xff] }
 0x1b2   : > { %v1280_v39 = vpop.f32.mrf.mxu2  ;;  %v3091_v37 = vld [vmem:[#allocation2 + $0x62] sm:$0xff] }
 0x1b3   : > { %v1623_v31 = vpop.f32.mrf.mxu3  ;;  %2388 = vst.msk [vmem:[#allocation3 + $0x70] sm:$0xff] %vm222_vm1, %v2356_v23  ;;  %v1340_v43 = vadd.f32 %v1280_v39, %v1096_v48  ;;  %v2300_v61 = vpop.f32.mrf.mxu1  ;;  %7651 = vmatmul.msk.f32.gmra.mxu0 %vm222_vm1, %v3089_v54  ;;  %v1100_v23 = vld [vmem:[#allocation3 + $0xb0] sm:$0xff] }
 0x1b4   : > { %v1435_v45 = vld [vmem:[#allocation3 + $0x88] sm:$0xff] }
 0x1b5   : > { %1372 = vst.msk [vmem:[#allocation3 + $0x90] sm:$0xff] %vm222_vm1, %v1340_v43  ;;  %v1679_v51 = vadd.f32 %v1617_v8, %v1435_v45  ;;  %v2414_v43 = vld [vmem:[#allocation2 + $0x80] sm:$0xff] }
 0x1b6   : > { %v1774_v12 = vld [vmem:[#allocation3 + $0x80] sm:$0xff] }
 0x1b7   : > { %1711 = vst.msk [vmem:[#allocation3 + $0x88] sm:$0xff] %vm222_vm1, %v1679_v51  ;;  %v2018_v52 = vadd.f32 %v1954_v5, %v1774_v12  ;;  %7586 = vmatmul.msk.f32.gmra.mxu2 %vm222_vm1, %v2410_v49 }
 0x1b8   : > { %7620 = vmatmul.msk.f32.gmra.mxu3 %vm222_vm1, %v2751_v46  ;;  %v2113_v56 = vld [vmem:[#allocation3 + $0x78] sm:$0xff]  ;;  %v1963_v63 = vpop.f32.mrf.mxu0 }
 0x1b9   : > { %2050 = vst.msk [vmem:[#allocation3 + $0x80] sm:$0xff] %vm222_vm1, %v2018_v52  ;;  %v2357_v57 = vadd.f32 %v2291_v11, %v2113_v56  ;;  %v2753_v11 = vld [vmem:[#allocation2 + $0x79] sm:$0xff]  ;;  %v3092_v56 = vld [vmem:[#allocation2 + $0x6a] sm:$0xff] }
 0x1ba   : > { %v1283_v13 = vpop.f32.mrf.mxu2 }
 0x1bb   : > { %v1626_v60 = vpop.f32.mrf.mxu3  ;;  %2389 = vst.msk [vmem:[#allocation3 + $0x78] sm:$0xff] %vm222_vm1, %v2357_v57  ;;  %v1341_v41 = vadd.f32 %v1283_v13, %v1097_v50  ;;  %v2303_v8 = vpop.f32.mrf.mxu1  ;;  %7652 = vmatmul.msk.f32.gmra.mxu0 %vm222_vm1, %v3090_v18  ;;  %v1101_v57 = vld [vmem:[#allocation3 + $0xb8] sm:$0xff] }
 0x1bc   : > { %v1436_v36 = vld [vmem:[#allocation3 + $0x90] sm:$0xff] }
 0x1bd   : > { %1373 = vst.msk [vmem:[#allocation3 + $0x98] sm:$0xff] %vm222_vm1, %v1341_v41  ;;  %v1680_v53 = vadd.f32 %v1620_v26, %v1436_v36  ;;  %v2415_v41 = vld [vmem:[#allocation2 + $0x90] sm:$0xff] }
 0x1be   : > { %v1775_v0 = vld [vmem:[#allocation3 + $0x88] sm:$0xff] }
 0x1bf   : > { %1712 = vst.msk [vmem:[#allocation3 + $0x90] sm:$0xff] %vm222_vm1, %v1680_v53  ;;  %v2019_v1 = vadd.f32 %v1957_v58, %v1775_v0  ;;  %7587 = vmatmul.msk.f32.gmra.mxu2 %vm222_vm1, %v2411_v55 }
 0x1c0   : > { %7621 = vmatmul.msk.f32.gmra.mxu3 %vm222_vm1, %v2752_v17  ;;  %v2114_v2 = vld [vmem:[#allocation3 + $0x80] sm:$0xff]  ;;  %v1966_v33 = vpop.f32.mrf.mxu0 }
 0x1c1   : > { %2051 = vst.msk [vmem:[#allocation3 + $0x88] sm:$0xff] %vm222_vm1, %v2019_v1  ;;  %v2358_v4 = vadd.f32 %v2294_v24, %v2114_v2  ;;  %v2754_v24 = vld [vmem:[#allocation2 + $0x81] sm:$0xff] }
 0x1c2   : > { %v1286_v7 = vpop.f32.mrf.mxu2  ;;  %v3093_v2 = vld [vmem:[#allocation2 + $0x7a] sm:$0xff] }
 0x1c3   : > { %v1629_v47 = vpop.f32.mrf.mxu3  ;;  %2390 = vst.msk [vmem:[#allocation3 + $0x80] sm:$0xff] %vm222_vm1, %v2358_v4  ;;  %v1342_v19 = vadd.f32 %v1286_v7, %v1098_v35  ;;  %v2306_v40 = vpop.f32.mrf.mxu1  ;;  %7653 = vmatmul.msk.f32.gmra.mxu0 %vm222_vm1, %v3091_v37  ;;  %v1102_v4 = vld [vmem:[#allocation3 + $0xc0] sm:$0xff] }
 0x1c4   : > { %v1437_v9 = vld [vmem:[#allocation3 + $0x98] sm:$0xff] }
 0x1c5   : > { %1374 = vst.msk [vmem:[#allocation3 + $0xa0] sm:$0xff] %vm222_vm1, %v1342_v19  ;;  %v1681_v16 = vadd.f32 %v1623_v31, %v1437_v9  ;;  %v2757_v19 = vld [vmem:[#allocation2 + $0xa9] sm:$0xff] }
 0x1c6   : > { %v1776_v25 = vld [vmem:[#allocation3 + $0x90] sm:$0xff] }
 0x1c7   : > { %1713 = vst.msk [vmem:[#allocation3 + $0x98] sm:$0xff] %vm222_vm1, %v1681_v16  ;;  %v2020_v14 = vadd.f32 %v1960_v6, %v1776_v25  ;;  %7588 = vmatmul.msk.f32.gmra.mxu2 %vm222_vm1, %v2412_v10 }
 0x1c8   : > { %7622 = vmatmul.msk.f32.gmra.mxu3 %vm222_vm1, %v2753_v11  ;;  %v2115_v62 = vld [vmem:[#allocation3 + $0x88] sm:$0xff]  ;;  %v1969_v52 = vpop.f32.mrf.mxu0 }
 0x1c9   : > { %2052 = vst.msk [vmem:[#allocation3 + $0x90] sm:$0xff] %vm222_vm1, %v2020_v14  ;;  %v2359_v42 = vadd.f32 %v2297_v44, %v2115_v62  ;;  %v2755_v44 = vld [vmem:[#allocation2 + $0x91] sm:$0xff]  ;;  %v3094_v62 = vld [vmem:[#allocation2 + $0x82] sm:$0xff] }
 0x1ca   : > { %v1289_v21 = vpop.f32.mrf.mxu2 }
 0x1cb   : > { %v1632_v15 = vpop.f32.mrf.mxu3  ;;  %2391 = vst.msk [vmem:[#allocation3 + $0x88] sm:$0xff] %vm222_vm1, %v2359_v42  ;;  %v1343_v22 = vadd.f32 %v1289_v21, %v1099_v20  ;;  %v2309_v39 = vpop.f32.mrf.mxu1  ;;  %7654 = vmatmul.msk.f32.gmra.mxu0 %vm222_vm1, %v3092_v56  ;;  %v1103_v42 = vld [vmem:[#allocation3 + $0xc8] sm:$0xff] }
 0x1cc   : > { %v1438_v26 = vld [vmem:[#allocation3 + $0xa0] sm:$0xff] }
 0x1cd   : > { %1375 = vst.msk [vmem:[#allocation3 + $0xa8] sm:$0xff] %vm222_vm1, %v1343_v22  ;;  %v1682_v27 = vadd.f32 %v1626_v60, %v1438_v26  ;;  %v2758_v22 = vld [vmem:[#allocation2 + $0xb1] sm:$0xff] }
 0x1ce   : > { %v1777_v28 = vld [vmem:[#allocation3 + $0x98] sm:$0xff] }
 0x1cf   : > { %1714 = vst.msk [vmem:[#allocation3 + $0xa0] sm:$0xff] %vm222_vm1, %v1682_v27  ;;  %v2021_v29 = vadd.f32 %v1963_v63, %v1777_v28  ;;  %7589 = vmatmul.msk.f32.gmra.mxu2 %vm222_vm1, %v2413_v30 }
 0x1d0   : > { %7623 = vmatmul.msk.f32.gmra.mxu3 %vm222_vm1, %v2754_v24  ;;  %v2116_v3 = vld [vmem:[#allocation3 + $0x90] sm:$0xff]  ;;  %v1972_v1 = vpop.f32.mrf.mxu0 }
 0x1d1   : > { %2053 = vst.msk [vmem:[#allocation3 + $0x98] sm:$0xff] %vm222_vm1, %v2021_v29  ;;  %v2360_v32 = vadd.f32 %v2300_v61, %v2116_v3  ;;  %v2756_v61 = vld [vmem:[#allocation2 + $0x99] sm:$0xff] }
 0x1d2   : > { %v1292_v5 = vpop.f32.mrf.mxu2  ;;  %v3095_v3 = vld [vmem:[#allocation2 + $0x92] sm:$0xff] }
 0x1d3   : > { %v1635_v38 = vpop.f32.mrf.mxu3  ;;  %2392 = vst.msk [vmem:[#allocation3 + $0x90] sm:$0xff] %vm222_vm1, %v2360_v32  ;;  %v1344_v48 = vadd.f32 %v1292_v5, %v1100_v23  ;;  %v2312_v13 = vpop.f32.mrf.mxu1  ;;  %7655 = vmatmul.msk.f32.gmra.mxu0 %vm222_vm1, %v3093_v2  ;;  %v1104_v32 = vld [vmem:[#allocation3 + $0xd0] sm:$0xff] }
 0x1d4   : > { %v1439_v31 = vld [vmem:[#allocation3 + $0xa8] sm:$0xff] }
 0x1d5   : > { %1376 = vst.msk [vmem:[#allocation3 + $0xb0] sm:$0xff] %vm222_vm1, %v1344_v48  ;;  %v1683_v45 = vadd.f32 %v1629_v47, %v1439_v31  ;;  %v2416_v47 = vld [vmem:[#allocation2 + $0x98] sm:$0xff]  ;;  %v2759_v48 = vld [vmem:[#allocation2 + $0xc1] sm:$0xff] }
 0x1d6   : > { %v1778_v49 = vld [vmem:[#allocation3 + $0xa0] sm:$0xff] }
 0x1d7   : > { %1715 = vst.msk [vmem:[#allocation3 + $0xa8] sm:$0xff] %vm222_vm1, %v1683_v45  ;;  %v2022_v46 = vadd.f32 %v1966_v33, %v1778_v49  ;;  %7590 = vmatmul.msk.f32.gmra.mxu2 %vm222_vm1, %v2414_v43 }
 0x1d8   : > { %7624 = vmatmul.msk.f32.gmra.mxu3 %vm222_vm1, %v2755_v44  ;;  %v2117_v51 = vld [vmem:[#allocation3 + $0x98] sm:$0xff]  ;;  %v1975_v14 = vpop.f32.mrf.mxu0 }
 0x1d9   : > { %2054 = vst.msk [vmem:[#allocation3 + $0xa0] sm:$0xff] %vm222_vm1, %v2022_v46  ;;  %v2361_v12 = vadd.f32 %v2303_v8, %v2117_v51  ;;  %v3096_v46 = vld [vmem:[#allocation2 + $0x9a] sm:$0xff] }
 0x1da   : > { %v1295_v58 = vpop.f32.mrf.mxu2 }
 0x1db   : > { %v1638_v59 = vpop.f32.mrf.mxu3  ;;  %2393 = vst.msk [vmem:[#allocation3 + $0x98] sm:$0xff] %vm222_vm1, %v2361_v12  ;;  %v1345_v50 = vadd.f32 %v1295_v58, %v1101_v57  ;;  %v2315_v9 = vpop.f32.mrf.mxu1  ;;  %7656 = vmatmul.msk.f32.gmra.mxu0 %vm222_vm1, %v3094_v62  ;;  %v1105_v12 = vld [vmem:[#allocation3 + $0xd8] sm:$0xff] }
 0x1dc   : > { %v1440_v60 = vld [vmem:[#allocation3 + $0xb0] sm:$0xff] }
 0x1dd   : > { %1377 = vst.msk [vmem:[#allocation3 + $0xb8] sm:$0xff] %vm222_vm1, %v1345_v50  ;;  %v1684_v36 = vadd.f32 %v1632_v15, %v1440_v60  ;;  %v2417_v15 = vld [vmem:[#allocation2 + $0xa8] sm:$0xff] }
 0x1de   : > { %v1779_v55 = vld [vmem:[#allocation3 + $0xa8] sm:$0xff]  ;;  %v2760_v50 = vld [vmem:[#allocation2 + $0xc9] sm:$0xff] }
 0x1df   : > { %1716 = vst.msk [vmem:[#allocation3 + $0xb0] sm:$0xff] %vm222_vm1, %v1684_v36  ;;  %v2023_v17 = vadd.f32 %v1969_v52, %v1779_v55  ;;  %7591 = vmatmul.msk.f32.gmra.mxu2 %vm222_vm1, %v2415_v41 }
 0x1e0   : > { %7625 = vmatmul.msk.f32.gmra.mxu3 %vm222_vm1, %v2756_v61  ;;  %v2118_v53 = vld [vmem:[#allocation3 + $0xa0] sm:$0xff]  ;;  %v1978_v29 = vpop.f32.mrf.mxu0 }
 0x1e1   : > { %2055 = vst.msk [vmem:[#allocation3 + $0xa8] sm:$0xff] %vm222_vm1, %v2023_v17  ;;  %v2362_v0 = vadd.f32 %v2306_v40, %v2118_v53  ;;  %v3097_v17 = vld [vmem:[#allocation2 + $0xaa] sm:$0xff] }
 0x1e2   : > { %v1298_v6 = vpop.f32.mrf.mxu2  ;;  %v1106_v53 = vld [vmem:[#allocation3 + $0xe0] sm:$0xff] }
 0x1e3   : > { %v1641_v54 = vpop.f32.mrf.mxu3  ;;  %2394 = vst.msk [vmem:[#allocation3 + $0xa0] sm:$0xff] %vm222_vm1, %v2362_v0  ;;  %v1346_v35 = vadd.f32 %v1298_v6, %v1102_v4  ;;  %v2318_v24 = vpop.f32.mrf.mxu1  ;;  %7657 = vmatmul.msk.f32.gmra.mxu0 %vm222_vm1, %v3095_v3 }
 0x1e4   : > { %v1441_v7 = vld [vmem:[#allocation3 + $0xb8] sm:$0xff] }
 0x1e5   : > { %1378 = vst.msk [vmem:[#allocation3 + $0xc0] sm:$0xff] %vm222_vm1, %v1346_v35  ;;  %v1685_v8 = vadd.f32 %v1635_v38, %v1441_v7  ;;  %v2418_v38 = vld [vmem:[#allocation2 + $0xb0] sm:$0xff]  ;;  %v2761_v35 = vld [vmem:[#allocation2 + $0xd9] sm:$0xff] }
 0x1e6   : > { %v1780_v10 = vld [vmem:[#allocation3 + $0xb0] sm:$0xff] }
 0x1e7   : > { %1717 = vst.msk [vmem:[#allocation3 + $0xb8] sm:$0xff] %vm222_vm1, %v1685_v8  ;;  %v2024_v11 = vadd.f32 %v1972_v1, %v1780_v10  ;;  %7592 = vmatmul.msk.f32.gmra.mxu2 %vm222_vm1, %v2416_v47 }
 0x1e8   : > { %7626 = vmatmul.msk.f32.gmra.mxu3 %vm222_vm1, %v2757_v19  ;;  %v2119_v16 = vld [vmem:[#allocation3 + $0xa8] sm:$0xff]  ;;  %v1981_v49 = vpop.f32.mrf.mxu0 }
 0x1e9   : > { %2056 = vst.msk [vmem:[#allocation3 + $0xb0] sm:$0xff] %vm222_vm1, %v2024_v11  ;;  %v2363_v25 = vadd.f32 %v2309_v39, %v2119_v16  ;;  %v3098_v11 = vld [vmem:[#allocation2 + $0xb2] sm:$0xff] }
 0x1ea   : > { %v1301_v63 = vpop.f32.mrf.mxu2  ;;  %v1107_v16 = vld [vmem:[#allocation3 + $0xe8] sm:$0xff] }
 0x1eb   : > { %v1644_v18 = vpop.f32.mrf.mxu3  ;;  %2395 = vst.msk [vmem:[#allocation3 + $0xa8] sm:$0xff] %vm222_vm1, %v2363_v25  ;;  %v1347_v20 = vadd.f32 %v1301_v63, %v1103_v42  ;;  %v2321_v51 = vpop.f32.mrf.mxu1  ;;  %7658 = vmatmul.msk.f32.gmra.mxu0 %vm222_vm1, %v3096_v46  ;;  %v2421_v63 = vld [vmem:[#allocation2 + $0xd8] sm:$0xff] }
 0x1ec   : > { %v1442_v21 = vld [vmem:[#allocation3 + $0xc0] sm:$0xff] }
 0x1ed   : > { %1379 = vst.msk [vmem:[#allocation3 + $0xc8] sm:$0xff] %vm222_vm1, %v1347_v20  ;;  %v1686_v40 = vadd.f32 %v1638_v59, %v1442_v21  ;;  %v2419_v59 = vld [vmem:[#allocation2 + $0xc0] sm:$0xff] }
 0x1ee   : > { %v1781_v26 = vld [vmem:[#allocation3 + $0xb8] sm:$0xff] }
 0x1ef   : > { %1718 = vst.msk [vmem:[#allocation3 + $0xc0] sm:$0xff] %vm222_vm1, %v1686_v40  ;;  %v2025_v30 = vadd.f32 %v1975_v14, %v1781_v26  ;;  %7593 = vmatmul.msk.f32.gmra.mxu2 %vm222_vm1, %v2417_v15 }
 0x1f0   : > { %7627 = vmatmul.msk.f32.gmra.mxu3 %vm222_vm1, %v2758_v22  ;;  %v2120_v27 = vld [vmem:[#allocation3 + $0xb0] sm:$0xff]  ;;  %v1984_v55 = vpop.f32.mrf.mxu0 }
 0x1f1   : > { %2057 = vst.msk [vmem:[#allocation3 + $0xb8] sm:$0xff] %vm222_vm1, %v2025_v30  ;;  %v2364_v28 = vadd.f32 %v2312_v13, %v2120_v27  ;;  %v1108_v27 = vld [vmem:[#allocation3 + $0xf0] sm:$0xff] }
 0x1f2   : > { %v1304_v33 = vpop.f32.mrf.mxu2 }
 0x1f3   : > { %v1647_v37 = vpop.f32.mrf.mxu3  ;;  %2396 = vst.msk [vmem:[#allocation3 + $0xb0] sm:$0xff] %vm222_vm1, %v2364_v28  ;;  %v1348_v23 = vadd.f32 %v1304_v33, %v1104_v32  ;;  %v2324_v4 = vpop.f32.mrf.mxu1  ;;  %7659 = vmatmul.msk.f32.gmra.mxu0 %vm222_vm1, %v3097_v17  ;;  %v2422_v33 = vld [vmem:[#allocation2 + $0xe0] sm:$0xff] }
 0x1f4   : > { %v1443_v5 = vld [vmem:[#allocation3 + $0xc8] sm:$0xff] }
 0x1f5   : > { %1380 = vst.msk [vmem:[#allocation3 + $0xd0] sm:$0xff] %vm222_vm1, %v1348_v23  ;;  %v1687_v39 = vadd.f32 %v1641_v54, %v1443_v5  ;;  %v2420_v54 = vld [vmem:[#allocation2 + $0xc8] sm:$0xff] }
 0x1f6   : > { %v1782_v31 = vld [vmem:[#allocation3 + $0xc0] sm:$0xff] }
 0x1f7   : > { %1719 = vst.msk [vmem:[#allocation3 + $0xc8] sm:$0xff] %vm222_vm1, %v1687_v39  ;;  %v2026_v43 = vadd.f32 %v1978_v29, %v1782_v31  ;;  %7594 = vmatmul.msk.f32.gmra.mxu2 %vm222_vm1, %v2418_v38 }
 0x1f8   : > { %7628 = vmatmul.msk.f32.gmra.mxu3 %vm222_vm1, %v2759_v48  ;;  %v2121_v44 = vld [vmem:[#allocation3 + $0xb8] sm:$0xff]  ;;  %v1987_v10 = vpop.f32.mrf.mxu0 }
 0x1f9   : > { %2058 = vst.msk [vmem:[#allocation3 + $0xc0] sm:$0xff] %vm222_vm1, %v2026_v43  ;;  %v2365_v45 = vadd.f32 %v2315_v9, %v2121_v44  ;;  %v3100_v44 = vld [vmem:[#allocation2 + $0xca] sm:$0xff] }
 0x1fa   : > { %v1307_v52 = vpop.f32.mrf.mxu2 }
 0x1fb   : > { %v1650_v56 = vpop.f32.mrf.mxu3  ;;  %2397 = vst.msk [vmem:[#allocation3 + $0xb8] sm:$0xff] %vm222_vm1, %v2365_v45  ;;  %v1349_v57 = vadd.f32 %v1307_v52, %v1105_v12  ;;  %7660 = vmatmul.msk.f32.gmra.mxu0 %vm222_vm1, %v3098_v11  ;;  %v2327_v21 = vpop.f32.mrf.mxu1  ;;  %v1109_v45 = vld [vmem:[#allocation3 + $0xf8] sm:$0xff]  ;;  %v2423_v52 = vld [vmem:[#allocation2 + $0xf0] sm:$0xff] }
 0x1fc   : > { %v1444_v58 = vld [vmem:[#allocation3 + $0xd0] sm:$0xff] }
 0x1fd   : > { %1381 = vst.msk [vmem:[#allocation3 + $0xd8] sm:$0xff] %vm222_vm1, %v1349_v57  ;;  %v1688_v13 = vadd.f32 %v1644_v18, %v1444_v58  ;;  %v2762_v18 = vld [vmem:[#allocation2 + $0xe1] sm:$0xff] }
 0x1fe   : > { %v1783_v60 = vld [vmem:[#allocation3 + $0xc8] sm:$0xff] }
 0x1ff   : > { %1720 = vst.msk [vmem:[#allocation3 + $0xd0] sm:$0xff] %vm222_vm1, %v1688_v13  ;;  %v2027_v41 = vadd.f32 %v1981_v49, %v1783_v60  ;;  %7595 = vmatmul.msk.f32.gmra.mxu2 %vm222_vm1, %v2419_v59 }
 0x200   : > { %7629 = vmatmul.msk.f32.gmra.mxu3 %vm222_vm1, %v2760_v50  ;;  %v2122_v61 = vld [vmem:[#allocation3 + $0xc0] sm:$0xff]  ;;  %v1990_v30 = vpop.f32.mrf.mxu0 }
 0x201   : > { %2059 = vst.msk [vmem:[#allocation3 + $0xc8] sm:$0xff] %vm222_vm1, %v2027_v41  ;;  %v2366_v36 = vadd.f32 %v2318_v24, %v2122_v61  ;;  %v3099_v24 = vld [vmem:[#allocation2 + $0xc2] sm:$0xff]  ;;  %v3101_v61 = vld [vmem:[#allocation2 + $0xda] sm:$0xff] }
 0x202   : > { %v1310_v0 = vpop.f32.mrf.mxu2 }
 0x203   : > { %v1653_v1 = vpop.f32.mrf.mxu3  ;;  %2398 = vst.msk [vmem:[#allocation3 + $0xc0] sm:$0xff] %vm222_vm1, %v2366_v36  ;;  %v1350_v2 = vadd.f32 %v1310_v0, %v1106_v53  ;;  %7661 = vmatmul.msk.f32.gmra.mxu0 %vm222_vm1, %v3099_v24  ;;  %v2330_v48 = vpop.f32.mrf.mxu1  ;;  %v2439_v36 = vld [vmem:[#allocation3] sm:$0xff] }
 0x204   : > { %v1445_v6 = vld [vmem:[#allocation3 + $0xd8] sm:$0xff] }
 0x205   : > { %1382 = vst.msk [vmem:[#allocation3 + $0xe0] sm:$0xff] %vm222_vm1, %v1350_v2  ;;  %v1689_v7 = vadd.f32 %v1647_v37, %v1445_v6  ;;  %v2763_v37 = vld [vmem:[#allocation2 + $0xf1] sm:$0xff]  ;;  %v2765_v2 = vld [vmem:[#allocation2 + $0x109] sm:$0xff] }
 0x206   : > { %v1784_v47 = vld [vmem:[#allocation3 + $0xd0] sm:$0xff] }
 0x207   : > { %1721 = vst.msk [vmem:[#allocation3 + $0xd8] sm:$0xff] %vm222_vm1, %v1689_v7  ;;  %v2028_v19 = vadd.f32 %v1984_v55, %v1784_v47  ;;  %7596 = vmatmul.msk.f32.gmra.mxu2 %vm222_vm1, %v2420_v54 }
 0x208   : > { %7630 = vmatmul.msk.f32.gmra.mxu3 %vm222_vm1, %v2761_v35  ;;  %v2123_v8 = vld [vmem:[#allocation3 + $0xc8] sm:$0xff]  ;;  %v1993_v43 = vpop.f32.mrf.mxu0 }
 0x209   : > { %2060 = vst.msk [vmem:[#allocation3 + $0xd0] sm:$0xff] %vm222_vm1, %v2028_v19  ;;  %v2367_v9 = vadd.f32 %v2321_v51, %v2123_v8  ;;  %v3102_v19 = vld [vmem:[#allocation2 + $0xe2] sm:$0xff]  ;;  %v2440_v8 = vld [vmem:[#allocation3 + $0x8] sm:$0xff] }
 0x20a   : > { %v1313_v25 = vpop.f32.mrf.mxu2 }
 0x20b   : > { %v1656_v14 = vpop.f32.mrf.mxu3  ;;  %2399 = vst.msk [vmem:[#allocation3 + $0xc8] sm:$0xff] %vm222_vm1, %v2367_v9  ;;  %v1351_v62 = vadd.f32 %v1313_v25, %v1107_v16  ;;  %7662 = vmatmul.msk.f32.gmra.mxu0 %vm222_vm1, %v3100_v44  ;;  %v2333_v41 = vpop.f32.mrf.mxu1  ;;  %v2425_v25 = vld [vmem:[#allocation2 + $0x108] sm:$0xff] }
 0x20c   : > { %v1446_v42 = vld [vmem:[#allocation3 + $0xe0] sm:$0xff] }
 0x20d   : > { %1383 = vst.msk [vmem:[#allocation3 + $0xe8] sm:$0xff] %vm222_vm1, %v1351_v62  ;;  %v1690_v20 = vadd.f32 %v1650_v56, %v1446_v42  ;;  %v2764_v56 = vld [vmem:[#allocation2 + $0xf9] sm:$0xff]  ;;  %v2766_v62 = vld [vmem:[#allocation2 + $0x111] sm:$0xff] }
 0x20e   : > { %v1785_v15 = vld [vmem:[#allocation3 + $0xd8] sm:$0xff] }
 0x20f   : > { %1722 = vst.msk [vmem:[#allocation3 + $0xe0] sm:$0xff] %vm222_vm1, %v1690_v20  ;;  %v2029_v22 = vadd.f32 %v1987_v10, %v1785_v15  ;;  %7597 = vmatmul.msk.f32.gmra.mxu2 %vm222_vm1, %v2421_v63 }
 0x210   : > { %7631 = vmatmul.msk.f32.gmra.mxu3 %vm222_vm1, %v2762_v18  ;;  %v2124_v40 = vld [vmem:[#allocation3 + $0xd0] sm:$0xff]  ;;  %v1996_v60 = vpop.f32.mrf.mxu0 }
 0x211   : > { %2061 = vst.msk [vmem:[#allocation3 + $0xd8] sm:$0xff] %vm222_vm1, %v2029_v22  ;;  %v2368_v26 = vadd.f32 %v2324_v4, %v2124_v40  ;;  %v3103_v22 = vld [vmem:[#allocation2 + $0xf2] sm:$0xff]  ;;  %v2441_v40 = vld [vmem:[#allocation3 + $0x10] sm:$0xff] }
 0x212   : > { %v1316_v28 = vpop.f32.mrf.mxu2 }
 0x213   : > { %v1659_v29 = vpop.f32.mrf.mxu3  ;;  %2400 = vst.msk [vmem:[#allocation3 + $0xd0] sm:$0xff] %vm222_vm1, %v2368_v26  ;;  %v1352_v3 = vadd.f32 %v1316_v28, %v1108_v27  ;;  %7663 = vmatmul.msk.f32.gmra.mxu0 %vm222_vm1, %v3101_v61  ;;  %v2426_v28 = vld [vmem:[#allocation2 + $0x110] sm:$0xff]  ;;  %v2428_v61 = vld [vmem:[#allocation2 + $0x128] sm:$0xff] }
 0x214   : > { %v1447_v32 = vld [vmem:[#allocation3 + $0xe8] sm:$0xff] }
 0x215   : > { %1384 = vst.msk [vmem:[#allocation3 + $0xf0] sm:$0xff] %vm222_vm1, %v1352_v3  ;;  %v1691_v23 = vadd.f32 %v1653_v1, %v1447_v32  ;;  %v2424_v1 = vld [vmem:[#allocation2 + $0xf8] sm:$0xff] }
 0x216   : > { %v1786_v5 = vld [vmem:[#allocation3 + $0xe0] sm:$0xff] }
 0x217   : > { %1723 = vst.msk [vmem:[#allocation3 + $0xe8] sm:$0xff] %vm222_vm1, %v1691_v23  ;;  %v2030_v38 = vadd.f32 %v1990_v30, %v1786_v5  ;;  %7598 = vmatmul.msk.f32.gmra.mxu2 %vm222_vm1, %v2422_v33 }
 0x218   : > { %7632 = vmatmul.msk.f32.gmra.mxu3 %vm222_vm1, %v2763_v37  ;;  %v2125_v39 = vld [vmem:[#allocation3 + $0xd8] sm:$0xff]  ;;  %v1999_v47 = vpop.f32.mrf.mxu0 }
 0x219   : > { %2062 = vst.msk [vmem:[#allocation3 + $0xe0] sm:$0xff] %vm222_vm1, %v2030_v38  ;;  %v2369_v31 = vadd.f32 %v2327_v21, %v2125_v39  ;;  %v2442_v39 = vld [vmem:[#allocation3 + $0x18] sm:$0xff] }
 0x21a   : > { %v1319_v49 = vpop.f32.mrf.mxu2 }
 0x21b   : > { %v2927_v46 = vpop.f32.mrf.mxu3  ;;  %2401 = vst.msk [vmem:[#allocation3 + $0xd8] sm:$0xff] %vm222_vm1, %v2369_v31  ;;  %v1353_v51 = vadd.f32 %v1319_v49, %v1109_v45  ;;  %7664 = vmatmul.msk.f32.gmra.mxu0 %vm222_vm1, %v3102_v19  ;;  %v2427_v49 = vld [vmem:[#allocation2 + $0x120] sm:$0xff] }
 0x21c   : > { %v1448_v12 = vld [vmem:[#allocation3 + $0xf0] sm:$0xff] }
 0x21d   : > { %1385 = vst.msk [vmem:[#allocation3 + $0xf8] sm:$0xff] %vm222_vm1, %v1353_v51  ;;  %v1692_v57 = vadd.f32 %v1656_v14, %v1448_v12  ;;  %v2336_v14 = vpop.f32.mrf.mxu1  ;;  %v2770_v19 = vld [vmem:[#allocation2 + $0x141] sm:$0xff] }
 0x21e   : > { %v1787_v58 = vld [vmem:[#allocation3 + $0xe8] sm:$0xff] }
 0x21f   : > { %1724 = vst.msk [vmem:[#allocation3 + $0xf0] sm:$0xff] %vm222_vm1, %v1692_v57  ;;  %v2031_v59 = vadd.f32 %v1993_v43, %v1787_v58  ;;  %7599 = vmatmul.msk.f32.gmra.mxu2 %vm222_vm1, %v2423_v52  ;;  %v3105_v58 = vld [vmem:[#allocation2 + $0x10a] sm:$0xff] }
 0x220   : > { %7633 = vmatmul.msk.f32.gmra.mxu3 %vm222_vm1, %v2764_v56  ;;  %v2126_v50 = vld [vmem:[#allocation3 + $0xe0] sm:$0xff]  ;;  %v3267_v15 = vpop.f32.mrf.mxu0 }
 0x221   : > { %2063 = vst.msk [vmem:[#allocation3 + $0xe8] sm:$0xff] %vm222_vm1, %v2031_v59  ;;  %v2370_v13 = vadd.f32 %v2330_v48, %v2126_v50  ;;  %v3104_v48 = vld [vmem:[#allocation2 + $0xfa] sm:$0xff]  ;;  %v2443_v59 = vld [vmem:[#allocation3 + $0x20] sm:$0xff] }
 0x222   : > { %v2587_v55 = vpop.f32.mrf.mxu2 }
 0x223   : > { %v2930_v17 = vpop.f32.mrf.mxu3  ;;  %2402 = vst.msk [vmem:[#allocation3 + $0xe0] sm:$0xff] %vm222_vm1, %v2370_v13  ;;  %v2683_v53 = vadd.f32 %v2587_v55, %v2439_v36  ;;  %7665 = vmatmul.msk.f32.gmra.mxu0 %vm222_vm1, %v3103_v22  ;;  %v2769_v36 = vld [vmem:[#allocation2 + $0x139] sm:$0xff] }
 0x224   : > { %v1449_v0 = vld [vmem:[#allocation3 + $0xf8] sm:$0xff] }
 0x225   : > { %2715 = vst.msk [vmem:[#allocation3] sm:$0xff] %vm222_vm1, %v2683_v53  ;;  %v1693_v4 = vadd.f32 %v1659_v29, %v1449_v0  ;;  %v2767_v29 = vld [vmem:[#allocation2 + $0x121] sm:$0xff]  ;;  %v2339_v33 = vpop.f32.mrf.mxu1 }
 0x226   : > { %v1788_v6 = vld [vmem:[#allocation3 + $0xf0] sm:$0xff] }
 0x227   : > { %1725 = vst.msk [vmem:[#allocation3 + $0xf8] sm:$0xff] %vm222_vm1, %v1693_v4  ;;  %v2032_v54 = vadd.f32 %v1996_v60, %v1788_v6  ;;  %7600 = vmatmul.msk.f32.gmra.mxu2 %vm222_vm1, %v2424_v1  ;;  %v2444_v4 = vld [vmem:[#allocation3 + $0x28] sm:$0xff] }
 0x228   : > { %7634 = vmatmul.msk.f32.gmra.mxu3 %vm222_vm1, %v2765_v2  ;;  %v2127_v35 = vld [vmem:[#allocation3 + $0xe8] sm:$0xff]  ;;  %v3270_v38 = vpop.f32.mrf.mxu0 }
 0x229   : > { %2064 = vst.msk [vmem:[#allocation3 + $0xf0] sm:$0xff] %vm222_vm1, %v2032_v54  ;;  %v2371_v7 = vadd.f32 %v2333_v41, %v2127_v35  ;;  %v3106_v2 = vld [vmem:[#allocation2 + $0x112] sm:$0xff] }
 0x22a   : > { %v2590_v9 = vpop.f32.mrf.mxu2 }
 0x22b   : > { %v2933_v10 = vpop.f32.mrf.mxu3  ;;  %2403 = vst.msk [vmem:[#allocation3 + $0xe8] sm:$0xff] %vm222_vm1, %v2371_v7  ;;  %v2684_v11 = vadd.f32 %v2590_v9, %v2440_v8  ;;  %7666 = vmatmul.msk.f32.gmra.mxu0 %vm222_vm1, %v3104_v48 }
 0x22c   : > { %v2779_v16 = vld [vmem:[#allocation3] sm:$0xff] }
 0x22d   : > { %2716 = vst.msk [vmem:[#allocation3 + $0x8] sm:$0xff] %vm222_vm1, %v2684_v11  ;;  %v3023_v42 = vadd.f32 %v2927_v46, %v2779_v16  ;;  %v2768_v46 = vld [vmem:[#allocation2 + $0x129] sm:$0xff] }
 0x22e   : > { %v1789_v63 = vld [vmem:[#allocation3 + $0xf8] sm:$0xff] }
 0x22f   : > { %3055 = vst.msk [vmem:[#allocation3] sm:$0xff] %vm222_vm1, %v3023_v42  ;;  %v2033_v18 = vadd.f32 %v1999_v47, %v1789_v63  ;;  %7601 = vmatmul.msk.f32.gmra.mxu2 %vm222_vm1, %v2425_v25  ;;  %v2429_v47 = vld [vmem:[#allocation2 + $0x138] sm:$0xff]  ;;  %v3107_v25 = vld [vmem:[#allocation2 + $0x122] sm:$0xff] }
 0x230   : > { %7635 = vmatmul.msk.f32.gmra.mxu3 %vm222_vm1, %v2766_v62  ;;  %v2128_v20 = vld [vmem:[#allocation3 + $0xf0] sm:$0xff]  ;;  %v3273_v57 = vpop.f32.mrf.mxu0 }
 0x231   : > { %2065 = vst.msk [vmem:[#allocation3 + $0xf8] sm:$0xff] %vm222_vm1, %v2033_v18  ;;  %v2372_v21 = vadd.f32 %v2336_v14, %v2128_v20  ;;  %v2445_v14 = vld [vmem:[#allocation3 + $0x30] sm:$0xff] }
 0x232   : > { %v2593_v26 = vpop.f32.mrf.mxu2  ;;  %v2430_v20 = vld [vmem:[#allocation2 + $0x140] sm:$0xff] }
 0x233   : > { %v2936_v30 = vpop.f32.mrf.mxu3  ;;  %2404 = vst.msk [vmem:[#allocation3 + $0xf0] sm:$0xff] %vm222_vm1, %v2372_v21  ;;  %v2685_v24 = vadd.f32 %v2593_v26, %v2441_v40  ;;  %7667 = vmatmul.msk.f32.gmra.mxu0 %vm222_vm1, %v3105_v58  ;;  %v2771_v21 = vld [vmem:[#allocation2 + $0x151] sm:$0xff] }
 0x234   : > { %v2780_v27 = vld [vmem:[#allocation3 + $0x8] sm:$0xff] }
 0x235   : > { %2717 = vst.msk [vmem:[#allocation3 + $0x10] sm:$0xff] %vm222_vm1, %v2685_v24  ;;  %v3024_v3 = vadd.f32 %v2930_v17, %v2780_v27  ;;  %v3108_v24 = vld [vmem:[#allocation2 + $0x12a] sm:$0xff] }
 0x236   : > { %v3119_v32 = vld [vmem:[#allocation3] sm:$0xff]  ;;  %v2446_v27 = vld [vmem:[#allocation3 + $0x38] sm:$0xff] }
 0x237   : > { %3056 = vst.msk [vmem:[#allocation3 + $0x8] sm:$0xff] %vm222_vm1, %v3024_v3  ;;  %v3363_v37 = vadd.f32 %v3267_v15, %v3119_v32  ;;  %7602 = vmatmul.msk.f32.gmra.mxu2 %vm222_vm1, %v2426_v28 }
 0x238   : > { %7636 = vmatmul.msk.f32.gmra.mxu3 %vm222_vm1, %v2767_v29  ;;  %v2129_v23 = vld [vmem:[#allocation3 + $0xf8] sm:$0xff]  ;;  %v3276_v1 = vpop.f32.mrf.mxu0 }
 0x239   : > { %3395 = vst.msk [vmem:[#allocation3] sm:$0xff] %vm222_vm1, %v3363_v37  ;;  %v2373_v5 = vadd.f32 %v2339_v33, %v2129_v23  ;;  %v2431_v33 = vld [vmem:[#allocation2 + $0x150] sm:$0xff]  ;;  %v2772_v37 = vld [vmem:[#allocation2 + $0x159] sm:$0xff] }
 0x23a   : > { %v2596_v31 = vpop.f32.mrf.mxu2 }
 0x23b   : > { %v2939_v43 = vpop.f32.mrf.mxu3  ;;  %2405 = vst.msk [vmem:[#allocation3 + $0xf8] sm:$0xff] %vm222_vm1, %v2373_v5  ;;  %v2686_v44 = vadd.f32 %v2596_v31, %v2442_v39  ;;  %7668 = vmatmul.msk.f32.gmra.mxu0 %vm222_vm1, %v3106_v2  ;;  %v3109_v31 = vld [vmem:[#allocation2 + $0x13a] sm:$0xff] }
 0x23c   : > { %v2781_v45 = vld [vmem:[#allocation3 + $0x10] sm:$0xff] }
 0x23d   : > { %2718 = vst.msk [vmem:[#allocation3 + $0x18] sm:$0xff] %vm222_vm1, %v2686_v44  ;;  %v3025_v51 = vadd.f32 %v2933_v10, %v2781_v45 }
 0x23e   : > { %v3120_v12 = vld [vmem:[#allocation3 + $0x8] sm:$0xff] }
 0x23f   : > { %3057 = vst.msk [vmem:[#allocation3 + $0x10] sm:$0xff] %vm222_vm1, %v3025_v51  ;;  %v3364_v52 = vadd.f32 %v3270_v38, %v3120_v12  ;;  %7603 = vmatmul.msk.f32.gmra.mxu2 %vm222_vm1, %v2427_v49  ;;  %v2432_v51 = vld [vmem:[#allocation2 + $0x158] sm:$0xff]  ;;  %v2773_v12 = vld [vmem:[#allocation2 + $0x169] sm:$0xff] }
 0x240   : > { %7637 = vmatmul.msk.f32.gmra.mxu3 %vm222_vm1, %v2768_v46  ;;  %v8850_v56 = vld [vmem:[#allocation3] sm:$0xff]  ;;  %v3279_v16 = vpop.f32.mrf.mxu0 }
 0x241   : > { %3853 = vst.msk [vmem:[#allocation3] sm:$0xff] %vm222_vm1, %v8008_v34 }
 0x242   : > { %3396 = vst.msk [vmem:[#allocation3 + $0x8] sm:$0xff] %vm222_vm1, %v3364_v52  ;;  %v2599_v50 = vpop.f32.mrf.mxu2 }
 0x243   : > { %v2942_v13 = vpop.f32.mrf.mxu3  ;;  %v2687_v60 = vadd.f32 %v2599_v50, %v2443_v59  ;;  %7669 = vmatmul.msk.f32.gmra.mxu0 %vm222_vm1, %v3107_v25  ;;  %v277_v59 = vld [vmem:[#allocation2 + $0x19a] sm:$0x1]  ;;  %v2775_v25 = vld [vmem:[#allocation2 + $0x181] sm:$0xff] }
 0x244   : > { %v2782_v41 = vld [vmem:[#allocation3 + $0x18] sm:$0xff]  ;;  %296 = vst.msk [vmem:[#allocation2 + $0x198] sm:$0x1] %vm278_vm2, %v277_v59 }
 0x245   : > { %2719 = vst.msk [vmem:[#allocation3 + $0x20] sm:$0xff] %vm222_vm1, %v2687_v60  ;;  %v3026_v55 = vadd.f32 %v2936_v30, %v2782_v41  ;;  %v3110_v60 = vld [vmem:[#allocation2 + $0x142] sm:$0xff]  ;;  %v2448_v41 = vld [vmem:[#allocation3 + $0x48] sm:$0xff] }
 0x246   : > { %v3121_v17 = vld [vmem:[#allocation3 + $0x10] sm:$0xff] }
 0x247   : > { %3058 = vst.msk [vmem:[#allocation3 + $0x18] sm:$0xff] %vm222_vm1, %v3026_v55  ;;  %v3365_v53 = vadd.f32 %v3273_v57, %v3121_v17  ;;  %7604 = vmatmul.msk.f32.gmra.mxu2 %vm222_vm1, %v2428_v61 }
 0x248   : > { %7638 = vmatmul.msk.f32.gmra.mxu3 %vm222_vm1, %v2769_v36  ;;  %v3282_v30 = vpop.f32.mrf.mxu0 }
 0x249   : > { %v8860_v0 = vld [vmem:[#allocation3 + $0x8] sm:$0xff]  ;;  %3397 = vst.msk [vmem:[#allocation3 + $0x10] sm:$0xff] %vm222_vm1, %v3365_v53  ;;  %v2433_v53 = vld [vmem:[#allocation2 + $0x168] sm:$0xff] }
 0x24a   : > { %3854 = vst.msk [vmem:[#allocation3 + $0x8] sm:$0xff] %vm222_vm1, %v8008_v34  ;;  %v2602_v6 = vpop.f32.mrf.mxu2 }
 0x24b   : > { %v2945_v54 = vpop.f32.mrf.mxu3  ;;  %v2688_v35 = vadd.f32 %v2602_v6, %v2444_v4  ;;  %7670 = vmatmul.msk.f32.gmra.mxu0 %vm222_vm1, %v3108_v24  ;;  %v2435_v24 = vld [vmem:[#allocation2 + $0x180] sm:$0xff] }
 0x24c   : > { %v2783_v7 = vld [vmem:[#allocation3 + $0x20] sm:$0xff] }
 0x24d   : > { %2720 = vst.msk [vmem:[#allocation3 + $0x28] sm:$0xff] %vm222_vm1, %v2688_v35  ;;  %v3027_v8 = vadd.f32 %v2939_v43, %v2783_v7  ;;  %v2447_v43 = vld [vmem:[#allocation3 + $0x40] sm:$0xff] }
 0x24e   : > { %v3122_v9 = vld [vmem:[#allocation3 + $0x18] sm:$0xff]  ;;  %v3111_v7 = vld [vmem:[#allocation2 + $0x152] sm:$0xff] }
 0x24f   : > { %3059 = vst.msk [vmem:[#allocation3 + $0x20] sm:$0xff] %vm222_vm1, %v3027_v8  ;;  %v3366_v10 = vadd.f32 %v3276_v1, %v3122_v9  ;;  %7605 = vmatmul.msk.f32.gmra.mxu2 %vm222_vm1, %v2429_v47  ;;  %v2774_v1 = vld [vmem:[#allocation2 + $0x171] sm:$0xff]  ;;  %v2449_v47 = vld [vmem:[#allocation3 + $0x50] sm:$0xff] }
 0x250   : > { %7639 = vmatmul.msk.f32.gmra.mxu3 %vm222_vm1, %v2770_v19  ;;  %v8870_v11 = vld [vmem:[#allocation3 + $0x10] sm:$0xff]  ;;  %v3285_v39 = vpop.f32.mrf.mxu0 }
 0x251   : > { %3855 = vst.msk [vmem:[#allocation3 + $0x10] sm:$0xff] %vm222_vm1, %v8008_v34 }
 0x252   : > { %3398 = vst.msk [vmem:[#allocation3 + $0x18] sm:$0xff] %vm222_vm1, %v3366_v10  ;;  %v2605_v62 = vpop.f32.mrf.mxu2 }
 0x253   : > { %v2948_v42 = vpop.f32.mrf.mxu3  ;;  %v2689_v63 = vadd.f32 %v2605_v62, %v2445_v14  ;;  %7671 = vmatmul.msk.f32.gmra.mxu0 %vm222_vm1, %v3109_v31 }
 0x254   : > { %v2784_v18 = vld [vmem:[#allocation3 + $0x28] sm:$0xff] }
 0x255   : > { %2721 = vst.msk [vmem:[#allocation3 + $0x30] sm:$0xff] %vm222_vm1, %v2689_v63  ;;  %v3028_v15 = vadd.f32 %v2942_v13, %v2784_v18 }
 0x256   : > { %v3123_v22 = vld [vmem:[#allocation3 + $0x20] sm:$0xff] }
 0x257   : > { %3060 = vst.msk [vmem:[#allocation3 + $0x28] sm:$0xff] %vm222_vm1, %v3028_v15  ;;  %v3367_v40 = vadd.f32 %v3279_v16, %v3123_v22  ;;  %7606 = vmatmul.msk.f32.gmra.mxu2 %vm222_vm1, %v2430_v20  ;;  %v2434_v16 = vld [vmem:[#allocation2 + $0x170] sm:$0xff]  ;;  %v3112_v20 = vld [vmem:[#allocation2 + $0x15a] sm:$0xff] }
 0x258   : > { %7640 = vmatmul.msk.f32.gmra.mxu3 %vm222_vm1, %v2771_v21  ;;  %v3288_v13 = vpop.f32.mrf.mxu0  ;;  %v2450_v21 = vld [vmem:[#allocation3 + $0x58] sm:$0xff] }
 0x259   : > { %v8880_v26 = vld [vmem:[#allocation3 + $0x18] sm:$0xff]  ;;  %3399 = vst.msk [vmem:[#allocation3 + $0x20] sm:$0xff] %vm222_vm1, %v3367_v40 }
 0x25a   : > { %3856 = vst.msk [vmem:[#allocation3 + $0x18] sm:$0xff] %vm222_vm1, %v8008_v34  ;;  %v2608_v28 = vpop.f32.mrf.mxu2 }
 0x25b   : > { %v2951_v29 = vpop.f32.mrf.mxu3  ;;  %v2690_v3 = vadd.f32 %v2608_v28, %v2446_v27  ;;  %7672 = vmatmul.msk.f32.gmra.mxu0 %vm222_vm1, %v3110_v60  ;;  %v2776_v27 = vld [vmem:[#allocation2 + $0x189] sm:$0xff] }
 0x25c   : > { %v2785_v32 = vld [vmem:[#allocation3 + $0x30] sm:$0xff] }
 0x25d   : > { %2722 = vst.msk [vmem:[#allocation3 + $0x38] sm:$0xff] %vm222_vm1, %v2690_v3  ;;  %v3029_v23 = vadd.f32 %v2945_v54, %v2785_v32 }
 0x25e   : > { %v3124_v5 = vld [vmem:[#allocation3 + $0x28] sm:$0xff] }
 0x25f   : > { %3061 = vst.msk [vmem:[#allocation3 + $0x30] sm:$0xff] %vm222_vm1, %v3029_v23  ;;  %v3368_v38 = vadd.f32 %v3282_v30, %v3124_v5  ;;  %7607 = vmatmul.msk.f32.gmra.mxu2 %vm222_vm1, %v2431_v33  ;;  %v2451_v23 = vld [vmem:[#allocation3 + $0x60] sm:$0xff] }
 0x260   : > { %7641 = vmatmul.msk.f32.gmra.mxu3 %vm222_vm1, %v2772_v37  ;;  %v8890_v48 = vld [vmem:[#allocation3 + $0x20] sm:$0xff]  ;;  %v3291_v35 = vpop.f32.mrf.mxu0 }
 0x261   : > { %3857 = vst.msk [vmem:[#allocation3 + $0x20] sm:$0xff] %vm222_vm1, %v8008_v34  ;;  %v3113_v37 = vld [vmem:[#allocation2 + $0x16a] sm:$0xff] }
 0x262   : > { %3400 = vst.msk [vmem:[#allocation3 + $0x28] sm:$0xff] %vm222_vm1, %v3368_v38  ;;  %v2611_v44 = vpop.f32.mrf.mxu2 }
 0x263   : > { %v2954_v45 = vpop.f32.mrf.mxu3  ;;  %v2691_v49 = vadd.f32 %v2611_v44, %v2447_v43  ;;  %7673 = vmatmul.msk.f32.gmra.mxu0 %vm222_vm1, %v3111_v7  ;;  %v2436_v43 = vld [vmem:[#allocation2 + $0x188] sm:$0xff]  ;;  %v2777_v44 = vld [vmem:[#allocation2 + $0x199] sm:$0xff] }
 0x264   : > { %v2786_v46 = vld [vmem:[#allocation3 + $0x38] sm:$0xff] }
 0x265   : > { %2723 = vst.msk [vmem:[#allocation3 + $0x40] sm:$0xff] %vm222_vm1, %v2691_v49  ;;  %v3030_v52 = vadd.f32 %v2948_v42, %v2786_v46 }
 0x266   : > { %v3125_v57 = vld [vmem:[#allocation3 + $0x30] sm:$0xff] }
 0x267   : > { %3062 = vst.msk [vmem:[#allocation3 + $0x38] sm:$0xff] %vm222_vm1, %v3030_v52  ;;  %v3369_v58 = vadd.f32 %v3285_v39, %v3125_v57  ;;  %7608 = vmatmul.msk.f32.gmra.mxu2 %vm222_vm1, %v2432_v51  ;;  %v3114_v52 = vld [vmem:[#allocation2 + $0x172] sm:$0xff]  ;;  %v314_v57 = vld [vmem:[#allocation2 + $0x1a7] sm:$0x1] }
 0x268   : > { %7642 = vmatmul.msk.f32.gmra.mxu3 %vm222_vm1, %v2773_v12  ;;  %v3294_v18 = vpop.f32.mrf.mxu0  ;;  %332 = vst.msk [vmem:[#allocation2 + $0x1a9] sm:$0x1] %vm278_vm2, %v314_v57 }
 0x269   : > { %v8901_v50 = vld [vmem:[#allocation3 + $0x28] sm:$0xff]  ;;  %3401 = vst.msk [vmem:[#allocation3 + $0x30] sm:$0xff] %vm222_vm1, %v3369_v58 }
 0x26a   : > { %3858 = vst.msk [vmem:[#allocation3 + $0x28] sm:$0xff] %vm222_vm1, %v8008_v34  ;;  %v2614_v61 = vpop.f32.mrf.mxu2  ;;  %v2452_v58 = vld [vmem:[#allocation3 + $0x68] sm:$0xff] }
 0x26b   : > { %v2957_v36 = vpop.f32.mrf.mxu3  ;;  %v2692_v55 = vadd.f32 %v2614_v61, %v2448_v41  ;;  %7674 = vmatmul.msk.f32.gmra.mxu0 %vm222_vm1, %v3112_v20  ;;  %v2437_v61 = vld [vmem:[#allocation2 + $0x198] sm:$0xff] }
 0x26c   : > { %v2787_v17 = vld [vmem:[#allocation3 + $0x40] sm:$0xff] }
 0x26d   : > { %2724 = vst.msk [vmem:[#allocation3 + $0x48] sm:$0xff] %vm222_vm1, %v2692_v55  ;;  %v3031_v2 = vadd.f32 %v2951_v29, %v2787_v17 }
 0x26e   : > { %v3126_v4 = vld [vmem:[#allocation3 + $0x38] sm:$0xff] }
 0x26f   : > { %3063 = vst.msk [vmem:[#allocation3 + $0x40] sm:$0xff] %vm222_vm1, %v3031_v2  ;;  %v3370_v6 = vadd.f32 %v3288_v13, %v3126_v4  ;;  %7609 = vmatmul.msk.f32.gmra.mxu2 %vm222_vm1, %v2433_v53  ;;  %v3115_v4 = vld [vmem:[#allocation2 + $0x182] sm:$0xff] }
 0x270   : > { %7643 = vmatmul.msk.f32.gmra.mxu3 %vm222_vm1, %v2774_v1  ;;  %v8911_v54 = vld [vmem:[#allocation3 + $0x30] sm:$0xff]  ;;  %v3297_v33 = vpop.f32.mrf.mxu0 }
 0x271   : > { %3859 = vst.msk [vmem:[#allocation3 + $0x30] sm:$0xff] %vm222_vm1, %v8008_v34 }
 0x272   : > { %3402 = vst.msk [vmem:[#allocation3 + $0x38] sm:$0xff] %vm222_vm1, %v3370_v6  ;;  %v2617_v19 = vpop.f32.mrf.mxu2  ;;  %v2453_v6 = vld [vmem:[#allocation3 + $0x70] sm:$0xff] }
 0x273   : > { %v2960_v8 = vpop.f32.mrf.mxu3  ;;  %v2693_v9 = vadd.f32 %v2617_v19, %v2449_v47  ;;  %7675 = vmatmul.msk.f32.gmra.mxu0 %vm222_vm1, %v3113_v37 }
 0x274   : > { %v2788_v10 = vld [vmem:[#allocation3 + $0x48] sm:$0xff] }
 0x275   : > { %2725 = vst.msk [vmem:[#allocation3 + $0x50] sm:$0xff] %vm222_vm1, %v2693_v9  ;;  %v3032_v14 = vadd.f32 %v2954_v45, %v2788_v10 }
 0x276   : > { %v3127_v62 = vld [vmem:[#allocation3 + $0x40] sm:$0xff] }
 0x277   : > { %3064 = vst.msk [vmem:[#allocation3 + $0x48] sm:$0xff] %vm222_vm1, %v3032_v14  ;;  %v3371_v42 = vadd.f32 %v3291_v35, %v3127_v62  ;;  %7610 = vmatmul.msk.f32.gmra.mxu2 %vm222_vm1, %v2434_v16  ;;  %v3116_v62 = vld [vmem:[#allocation2 + $0x18a] sm:$0xff] }
 0x278   : > { %7644 = vmatmul.msk.f32.gmra.mxu3 %vm222_vm1, %v2775_v25  ;;  %v3300_v12 = vpop.f32.mrf.mxu0 }
 0x279   : > { %v8921_v63 = vld [vmem:[#allocation3 + $0x38] sm:$0xff]  ;;  %3403 = vst.msk [vmem:[#allocation3 + $0x40] sm:$0xff] %vm222_vm1, %v3371_v42 }
 0x27a   : > { %3860 = vst.msk [vmem:[#allocation3 + $0x38] sm:$0xff] %vm222_vm1, %v8008_v34  ;;  %v2620_v15 = vpop.f32.mrf.mxu2  ;;  %v2454_v42 = vld [vmem:[#allocation3 + $0x78] sm:$0xff] }
 0x27b   : > { %v2963_v22 = vpop.f32.mrf.mxu3  ;;  %v2694_v40 = vadd.f32 %v2620_v15, %v2450_v21  ;;  %7676 = vmatmul.msk.f32.gmra.mxu0 %vm222_vm1, %v3114_v52  ;;  %v212_v52 = vld [vmem:[%s10880_s2] sm:$0xf] }
 0x27c   : > { %v2789_v30 = vld [vmem:[#allocation3 + $0x50] sm:$0xff]  ;;  %7681 = vmatpush.msk.msra.mxu1 %vm525_vm0, %v212_v52 }
 0x27d   : > { %2726 = vst.msk [vmem:[#allocation3 + $0x58] sm:$0xff] %vm222_vm1, %v2694_v40  ;;  %v3033_v28 = vadd.f32 %v2957_v36, %v2789_v30  ;;  %v2778_v36 = vld [vmem:[#allocation2 + $0x1a1] sm:$0xff] }
 0x27e   : > { %v3128_v29 = vld [vmem:[#allocation3 + $0x48] sm:$0xff] }
 0x27f   : > { %3065 = vst.msk [vmem:[#allocation3 + $0x50] sm:$0xff] %vm222_vm1, %v3033_v28  ;;  %v3372_v3 = vadd.f32 %v3294_v18, %v3128_v29  ;;  %7611 = vmatmul.msk.f32.gmra.mxu2 %vm222_vm1, %v2435_v24  ;;  %v3117_v28 = vld [vmem:[#allocation2 + $0x19a] sm:$0xff]  ;;  %v2455_v29 = vld [vmem:[#allocation3 + $0x80] sm:$0xff] }
 0x280   : > { %7645 = vmatmul.msk.f32.gmra.mxu3 %vm222_vm1, %v2776_v27  ;;  %v8931_v32 = vld [vmem:[#allocation3 + $0x40] sm:$0xff]  ;;  %v3303_v2 = vpop.f32.mrf.mxu0 }
 0x281   : > { %3861 = vst.msk [vmem:[#allocation3 + $0x40] sm:$0xff] %vm222_vm1, %v8008_v34 }
 0x282   : > { %3404 = vst.msk [vmem:[#allocation3 + $0x48] sm:$0xff] %vm222_vm1, %v3372_v3  ;;  %v2623_v5 = vpop.f32.mrf.mxu2 }
 0x283   : > { %v2966_v38 = vpop.f32.mrf.mxu3  ;;  %v2695_v39 = vadd.f32 %v2623_v5, %v2451_v23  ;;  %7677 = vmatmul.msk.f32.gmra.mxu0 %vm222_vm1, %v3115_v4 }
 0x284   : > { %v2790_v31 = vld [vmem:[#allocation3 + $0x58] sm:$0xff] }
 0x285   : > { %2727 = vst.msk [vmem:[#allocation3 + $0x60] sm:$0xff] %vm222_vm1, %v2695_v39  ;;  %v3034_v45 = vadd.f32 %v2960_v8, %v2790_v31  ;;  %v2438_v8 = vld [vmem:[#allocation2 + $0x1a0] sm:$0xff] }
 0x286   : > { %v3129_v49 = vld [vmem:[#allocation3 + $0x50] sm:$0xff] }
 0x287   : > { %3066 = vst.msk [vmem:[#allocation3 + $0x58] sm:$0xff] %vm222_vm1, %v3034_v45  ;;  %v3373_v46 = vadd.f32 %v3297_v33, %v3129_v49  ;;  %7612 = vmatmul.msk.f32.gmra.mxu2 %vm222_vm1, %v2436_v43  ;;  %v2456_v45 = vld [vmem:[#allocation3 + $0x88] sm:$0xff] }
 0x288   : > { %7646 = vmatmul.msk.f32.gmra.mxu3 %vm222_vm1, %v2777_v44  ;;  %v3306_v14 = vpop.f32.mrf.mxu0  ;;  %v3118_v44 = vld [vmem:[#allocation2 + $0x1a2] sm:$0xff] }
 0x289   : > { %v8941_v51 = vld [vmem:[#allocation3 + $0x48] sm:$0xff]  ;;  %3405 = vst.msk [vmem:[#allocation3 + $0x50] sm:$0xff] %vm222_vm1, %v3373_v46 }
 0x28a   : > { %3862 = vst.msk [vmem:[#allocation3 + $0x48] sm:$0xff] %vm222_vm1, %v8008_v34  ;;  %v2626_v59 = vpop.f32.mrf.mxu2 }
 0x28b   : > { %v2969_v13 = vpop.f32.mrf.mxu3  ;;  %v2696_v60 = vadd.f32 %v2626_v59, %v2452_v58  ;;  %7678 = vmatmul.msk.f32.gmra.mxu0 %vm222_vm1, %v3116_v62 }
 0x28c   : > { %v2791_v41 = vld [vmem:[#allocation3 + $0x60] sm:$0xff] }
 0x28d   : > { %2728 = vst.msk [vmem:[#allocation3 + $0x68] sm:$0xff] %vm222_vm1, %v2696_v60  ;;  %v3035_v55 = vadd.f32 %v2963_v22, %v2791_v41 }
 0x28e   : > { %v3130_v17 = vld [vmem:[#allocation3 + $0x58] sm:$0xff] }
 0x28f   : > { %3067 = vst.msk [vmem:[#allocation3 + $0x60] sm:$0xff] %vm222_vm1, %v3035_v55  ;;  %v3374_v53 = vadd.f32 %v3300_v12, %v3130_v17  ;;  %7613 = vmatmul.msk.f32.gmra.mxu2 %vm222_vm1, %v2437_v61  ;;  %v2457_v61 = vld [vmem:[#allocation3 + $0x90] sm:$0xff] }
 0x290   : > { %7647 = vmatmul.msk.f32.gmra.mxu3 %vm222_vm1, %v2778_v36  ;;  %v8952_v1 = vld [vmem:[#allocation3 + $0x50] sm:$0xff]  ;;  %v3309_v27 = vpop.f32.mrf.mxu0 }
 0x291   : > { %3863 = vst.msk [vmem:[#allocation3 + $0x50] sm:$0xff] %vm222_vm1, %v8008_v34 }
 0x292   : > { %3406 = vst.msk [vmem:[#allocation3 + $0x58] sm:$0xff] %vm222_vm1, %v3374_v53  ;;  %v2629_v35 = vpop.f32.mrf.mxu2 }
 0x293   : > { %v2972_v7 = vpop.f32.mrf.mxu3  ;;  %v2697_v47 = vadd.f32 %v2629_v35, %v2453_v6  ;;  %7679 = vmatmul.msk.f32.gmra.mxu0 %vm222_vm1, %v3117_v28 }
 0x294   : > { %v2792_v19 = vld [vmem:[#allocation3 + $0x68] sm:$0xff] }
 0x295   : > { %2729 = vst.msk [vmem:[#allocation3 + $0x70] sm:$0xff] %vm222_vm1, %v2697_v47  ;;  %v3036_v9 = vadd.f32 %v2966_v38, %v2792_v19  ;;  %v2458_v47 = vld [vmem:[#allocation3 + $0x98] sm:$0xff] }
 0x296   : > { %v3131_v10 = vld [vmem:[#allocation3 + $0x60] sm:$0xff] }
 0x297   : > { %3068 = vst.msk [vmem:[#allocation3 + $0x68] sm:$0xff] %vm222_vm1, %v3036_v9  ;;  %v3375_v16 = vadd.f32 %v3303_v2, %v3131_v10  ;;  %7614 = vmatmul.msk.f32.gmra.mxu2 %vm222_vm1, %v2438_v8 }
 0x298   : > { %v3312_v43 = vpop.f32.mrf.mxu0 }
 0x299   : > { %v8961_v25 = vld [vmem:[#allocation3 + $0x58] sm:$0xff]  ;;  %3407 = vst.msk [vmem:[#allocation3 + $0x60] sm:$0xff] %vm222_vm1, %v3375_v16 }
 0x29a   : > { %3864 = vst.msk [vmem:[#allocation3 + $0x58] sm:$0xff] %vm222_vm1, %v8008_v34  ;;  %v2632_v18 = vpop.f32.mrf.mxu2 }
 0x29b   : > { %v2975_v20 = vpop.f32.mrf.mxu3  ;;  %v2698_v21 = vadd.f32 %v2632_v18, %v2454_v42  ;;  %7680 = vmatmul.msk.f32.gmra.mxu0 %vm222_vm1, %v3118_v44 }
 0x29c   : > { %v2793_v15 = vld [vmem:[#allocation3 + $0x70] sm:$0xff] }
 0x29d   : > { %2730 = vst.msk [vmem:[#allocation3 + $0x78] sm:$0xff] %vm222_vm1, %v2698_v21  ;;  %v3037_v22 = vadd.f32 %v2969_v13, %v2793_v15 }
 0x29e   : > { %v3132_v40 = vld [vmem:[#allocation3 + $0x68] sm:$0xff] }
 0x29f   : > { %3069 = vst.msk [vmem:[#allocation3 + $0x70] sm:$0xff] %vm222_vm1, %v3037_v22  ;;  %v3376_v30 = vadd.f32 %v3306_v14, %v3132_v40 }
 0x2a0   : > { %v8969_v24 = vld [vmem:[#allocation3 + $0x60] sm:$0xff]  ;;  %v3315_v41 = vpop.f32.mrf.mxu0 }
 0x2a1   : > { %3865 = vst.msk [vmem:[#allocation3 + $0x60] sm:$0xff] %vm222_vm1, %v8008_v34 }
 0x2a2   : > { %3408 = vst.msk [vmem:[#allocation3 + $0x68] sm:$0xff] %vm222_vm1, %v3376_v30  ;;  %v2635_v3 = vpop.f32.mrf.mxu2 }
 0x2a3   : > { %v2978_v33 = vpop.f32.mrf.mxu3  ;;  %v2699_v37 = vadd.f32 %v2635_v3, %v2455_v29 }
 0x2a4   : > { %v2794_v23 = vld [vmem:[#allocation3 + $0x78] sm:$0xff] }
 0x2a5   : > { %2731 = vst.msk [vmem:[#allocation3 + $0x80] sm:$0xff] %vm222_vm1, %v2699_v37  ;;  %v3038_v5 = vadd.f32 %v2972_v7, %v2794_v23 }
 0x2a6   : > { %v3133_v38 = vld [vmem:[#allocation3 + $0x70] sm:$0xff] }
 0x2a7   : > { %3070 = vst.msk [vmem:[#allocation3 + $0x78] sm:$0xff] %vm222_vm1, %v3038_v5  ;;  %v3377_v39 = vadd.f32 %v3309_v27, %v3133_v38 }
 0x2a8   : > { %v3318_v7 = vpop.f32.mrf.mxu0 }
 0x2a9   : > { %v8977_v31 = vld [vmem:[#allocation3 + $0x68] sm:$0xff]  ;;  %3409 = vst.msk [vmem:[#allocation3 + $0x70] sm:$0xff] %vm222_vm1, %v3377_v39 }
 0x2aa   : > { %3866 = vst.msk [vmem:[#allocation3 + $0x68] sm:$0xff] %vm222_vm1, %v8008_v34  ;;  %v2638_v49 = vpop.f32.mrf.mxu2 }
 0x2ab   : > { %v2981_v46 = vpop.f32.mrf.mxu3  ;;  %v2700_v12 = vadd.f32 %v2638_v49, %v2456_v45 }
 0x2ac   : > { %v2795_v57 = vld [vmem:[#allocation3 + $0x80] sm:$0xff] }
 0x2ad   : > { %2732 = vst.msk [vmem:[#allocation3 + $0x88] sm:$0xff] %vm222_vm1, %v2700_v12  ;;  %v3039_v58 = vadd.f32 %v2975_v20, %v2795_v57  ;;  %v2459_v20 = vld [vmem:[#allocation3 + $0xa0] sm:$0xff] }
 0x2ae   : > { %v3134_v59 = vld [vmem:[#allocation3 + $0x78] sm:$0xff] }
 0x2af   : > { %3071 = vst.msk [vmem:[#allocation3 + $0x80] sm:$0xff] %vm222_vm1, %v3039_v58  ;;  %v3378_v13 = vadd.f32 %v3312_v43, %v3134_v59 }
 0x2b0   : > { %v8989_v60 = vld [vmem:[#allocation3 + $0x70] sm:$0xff]  ;;  %v3321_v18 = vpop.f32.mrf.mxu0 }
 0x2b1   : > { %3867 = vst.msk [vmem:[#allocation3 + $0x70] sm:$0xff] %vm222_vm1, %v8008_v34 }
 0x2b2   : > { %3410 = vst.msk [vmem:[#allocation3 + $0x78] sm:$0xff] %vm222_vm1, %v3378_v13  ;;  %v2641_v36 = vpop.f32.mrf.mxu2 }
 0x2b3   : > { %v2984_v55 = vpop.f32.mrf.mxu3  ;;  %v2701_v17 = vadd.f32 %v2641_v36, %v2457_v61 }
 0x2b4   : > { %v2796_v53 = vld [vmem:[#allocation3 + $0x88] sm:$0xff] }
 0x2b5   : > { %2733 = vst.msk [vmem:[#allocation3 + $0x90] sm:$0xff] %vm222_vm1, %v2701_v17  ;;  %v3040_v2 = vadd.f32 %v2978_v33, %v2796_v53  ;;  %v2460_v33 = vld [vmem:[#allocation3 + $0xa8] sm:$0xff] }
 0x2b6   : > { %v3135_v4 = vld [vmem:[#allocation3 + $0x80] sm:$0xff] }
 0x2b7   : > { %3072 = vst.msk [vmem:[#allocation3 + $0x88] sm:$0xff] %vm222_vm1, %v3040_v2  ;;  %v3379_v6 = vadd.f32 %v3315_v41, %v3135_v4 }
 0x2b8   : > { %v3324_v3 = vpop.f32.mrf.mxu0 }
 0x2b9   : > { %v8996_v35 = vld [vmem:[#allocation3 + $0x78] sm:$0xff]  ;;  %3411 = vst.msk [vmem:[#allocation3 + $0x80] sm:$0xff] %vm222_vm1, %v3379_v6 }
 0x2ba   : > { %3868 = vst.msk [vmem:[#allocation3 + $0x78] sm:$0xff] %vm222_vm1, %v8008_v34  ;;  %v2644_v19 = vpop.f32.mrf.mxu2 }
 0x2bb   : > { %v2987_v8 = vpop.f32.mrf.mxu3  ;;  %v2702_v9 = vadd.f32 %v2644_v19, %v2458_v47 }
 0x2bc   : > { %v2797_v10 = vld [vmem:[#allocation3 + $0x90] sm:$0xff] }
 0x2bd   : > { %2734 = vst.msk [vmem:[#allocation3 + $0x98] sm:$0xff] %vm222_vm1, %v2702_v9  ;;  %v3041_v16 = vadd.f32 %v2981_v46, %v2797_v10  ;;  %v2461_v46 = vld [vmem:[#allocation3 + $0xb0] sm:$0xff]  ;;  %v2463_v9 = vld [vmem:[#allocation3 + $0xc0] sm:$0xff] }
 0x2be   : > { %v3136_v14 = vld [vmem:[#allocation3 + $0x88] sm:$0xff] }
 0x2bf   : > { %3073 = vst.msk [vmem:[#allocation3 + $0x90] sm:$0xff] %vm222_vm1, %v3041_v16  ;;  %v3380_v62 = vadd.f32 %v3318_v7, %v3136_v14 }
 0x2c0   : > { %v9003_v42 = vld [vmem:[#allocation3 + $0x80] sm:$0xff]  ;;  %v3327_v49 = vpop.f32.mrf.mxu0 }
 0x2c1   : > { %3869 = vst.msk [vmem:[#allocation3 + $0x80] sm:$0xff] %vm222_vm1, %v8008_v34 }
 0x2c2   : > { %3412 = vst.msk [vmem:[#allocation3 + $0x88] sm:$0xff] %vm222_vm1, %v3380_v62  ;;  %v2647_v21 = vpop.f32.mrf.mxu2 }
 0x2c3   : > { %v2990_v15 = vpop.f32.mrf.mxu3  ;;  %v2703_v22 = vadd.f32 %v2647_v21, %v2459_v20 }
 0x2c4   : > { %v2798_v40 = vld [vmem:[#allocation3 + $0x98] sm:$0xff] }
 0x2c5   : > { %2735 = vst.msk [vmem:[#allocation3 + $0xa0] sm:$0xff] %vm222_vm1, %v2703_v22  ;;  %v3042_v30 = vadd.f32 %v2984_v55, %v2798_v40  ;;  %v2462_v55 = vld [vmem:[#allocation3 + $0xb8] sm:$0xff]  ;;  %v2464_v40 = vld [vmem:[#allocation3 + $0xc8] sm:$0xff] }
 0x2c6   : > { %v3137_v27 = vld [vmem:[#allocation3 + $0x90] sm:$0xff] }
 0x2c7   : > { %3074 = vst.msk [vmem:[#allocation3 + $0x98] sm:$0xff] %vm222_vm1, %v3042_v30  ;;  %v3381_v28 = vadd.f32 %v3321_v18, %v3137_v27 }
 0x2c8   : > { %v3330_v36 = vpop.f32.mrf.mxu0 }
 0x2c9   : > { %v9010_v29 = vld [vmem:[#allocation3 + $0x88] sm:$0xff]  ;;  %3413 = vst.msk [vmem:[#allocation3 + $0x90] sm:$0xff] %vm222_vm1, %v3381_v28 }
 0x2ca   : > { %3870 = vst.msk [vmem:[#allocation3 + $0x88] sm:$0xff] %vm222_vm1, %v8008_v34  ;;  %v2650_v37 = vpop.f32.mrf.mxu2 }
 0x2cb   : > { %v2993_v23 = vpop.f32.mrf.mxu3  ;;  %v2704_v5 = vadd.f32 %v2650_v37, %v2460_v33 }
 0x2cc   : > { %v2799_v38 = vld [vmem:[#allocation3 + $0xa0] sm:$0xff] }
 0x2cd   : > { %2736 = vst.msk [vmem:[#allocation3 + $0xa8] sm:$0xff] %vm222_vm1, %v2704_v5  ;;  %v3043_v39 = vadd.f32 %v2987_v8, %v2799_v38 }
 0x2ce   : > { %v3138_v43 = vld [vmem:[#allocation3 + $0x98] sm:$0xff] }
 0x2cf   : > { %3075 = vst.msk [vmem:[#allocation3 + $0xa0] sm:$0xff] %vm222_vm1, %v3043_v39  ;;  %v3382_v44 = vadd.f32 %v3324_v3, %v3138_v43  ;;  %v2465_v39 = vld [vmem:[#allocation3 + $0xd0] sm:$0xff] }
 0x2d0   : > { %v9017_v45 = vld [vmem:[#allocation3 + $0x90] sm:$0xff]  ;;  %v3333_v8 = vpop.f32.mrf.mxu0 }
 0x2d1   : > { %3871 = vst.msk [vmem:[#allocation3 + $0x90] sm:$0xff] %vm222_vm1, %v8008_v34 }
 0x2d2   : > { %3414 = vst.msk [vmem:[#allocation3 + $0x98] sm:$0xff] %vm222_vm1, %v3382_v44  ;;  %v2653_v12 = vpop.f32.mrf.mxu2 }
 0x2d3   : > { %v2996_v52 = vpop.f32.mrf.mxu3  ;;  %v2705_v57 = vadd.f32 %v2653_v12, %v2461_v46 }
 0x2d4   : > { %v2800_v58 = vld [vmem:[#allocation3 + $0xa8] sm:$0xff] }
 0x2d5   : > { %2737 = vst.msk [vmem:[#allocation3 + $0xb0] sm:$0xff] %vm222_vm1, %v2705_v57  ;;  %v3044_v59 = vadd.f32 %v2990_v15, %v2800_v58 }
 0x2d6   : > { %v3139_v13 = vld [vmem:[#allocation3 + $0xa0] sm:$0xff] }
 0x2d7   : > { %3076 = vst.msk [vmem:[#allocation3 + $0xa8] sm:$0xff] %vm222_vm1, %v3044_v59  ;;  %v3383_v41 = vadd.f32 %v3327_v49, %v3139_v13  ;;  %v2466_v59 = vld [vmem:[#allocation3 + $0xd8] sm:$0xff] }
 0x2d8   : > { %v3336_v22 = vpop.f32.mrf.mxu0 }
 0x2d9   : > { %v9024_v61 = vld [vmem:[#allocation3 + $0x98] sm:$0xff]  ;;  %3415 = vst.msk [vmem:[#allocation3 + $0xa0] sm:$0xff] %vm222_vm1, %v3383_v41 }
 0x2da   : > { %3872 = vst.msk [vmem:[#allocation3 + $0x98] sm:$0xff] %vm222_vm1, %v8008_v34  ;;  %v2656_v17 = vpop.f32.mrf.mxu2 }
 0x2db   : > { %v2706_v53 = vadd.f32 %v2656_v17, %v2462_v55  ;;  %v2999_v4 = vpop.f32.mrf.mxu3  ;;  %v3460_v55 = vsel %vm222_vm1, %v8860_v0, 0.0 }
 0x2dc   : > { %v2801_v2 = vld [vmem:[#allocation3 + $0xb0] sm:$0xff] }
 0x2dd   : > { %2738 = vst.msk [vmem:[#allocation3 + $0xb8] sm:$0xff] %vm222_vm1, %v2706_v53  ;;  %v3045_v6 = vadd.f32 %v2993_v23, %v2801_v2  ;;  %v3459_v2 = vsel %vm222_vm1, %v8850_v56, 0.0 }
 0x2de   : > { %v3140_v7 = vld [vmem:[#allocation3 + $0xa8] sm:$0xff] }
 0x2df   : > { %3077 = vst.msk [vmem:[#allocation3 + $0xb0] sm:$0xff] %vm222_vm1, %v3045_v6  ;;  %v3384_v47 = vadd.f32 %v3330_v36, %v3140_v7  ;;  %v3461_v7 = vadd.f32 %v3460_v55, %v3459_v2  ;;  %v3478_v55 = vsel %vm222_vm1, %v8952_v1, 0.0 }
 0x2e0   : > { %v9031_v19 = vld [vmem:[#allocation3 + $0xa0] sm:$0xff]  ;;  %v3339_v38 = vpop.f32.mrf.mxu0 }
 0x2e1   : > { %3873 = vst.msk [vmem:[#allocation3 + $0xa0] sm:$0xff] %vm222_vm1, %v8008_v34 }
 0x2e2   : > { %3416 = vst.msk [vmem:[#allocation3 + $0xa8] sm:$0xff] %vm222_vm1, %v3384_v47  ;;  %v2659_v10 = vpop.f32.mrf.mxu2 }
 0x2e3   : > { %v2707_v16 = vadd.f32 %v2659_v10, %v2463_v9  ;;  %v3002_v20 = vpop.f32.mrf.mxu3 }
 0x2e4   : > { %v2802_v14 = vld [vmem:[#allocation3 + $0xb8] sm:$0xff] }
 0x2e5   : > { %2739 = vst.msk [vmem:[#allocation3 + $0xc0] sm:$0xff] %vm222_vm1, %v2707_v16  ;;  %v3046_v62 = vadd.f32 %v2996_v52, %v2802_v14  ;;  %v3466_v14 = vsel %vm222_vm1, %v8890_v48, 0.0 }
 0x2e6   : > { %v3141_v18 = vld [vmem:[#allocation3 + $0xb0] sm:$0xff] }
 0x2e7   : > { %3078 = vst.msk [vmem:[#allocation3 + $0xb8] sm:$0xff] %vm222_vm1, %v3046_v62  ;;  %v3385_v21 = vadd.f32 %v3333_v8, %v3141_v18  ;;  %v3464_v8 = vsel %vm222_vm1, %v8880_v26, 0.0  ;;  %v2467_v62 = vld [vmem:[#allocation3 + $0xe0] sm:$0xff] }
 0x2e8   : > { %v3342_v58 = vpop.f32.mrf.mxu0 }
 0x2e9   : > { %v9038_v15 = vld [vmem:[#allocation3 + $0xa8] sm:$0xff]  ;;  %3417 = vst.msk [vmem:[#allocation3 + $0xb0] sm:$0xff] %vm222_vm1, %v3385_v21 }
 0x2ea   : > { %3874 = vst.msk [vmem:[#allocation3 + $0xa8] sm:$0xff] %vm222_vm1, %v8008_v34  ;;  %v2662_v30 = vpop.f32.mrf.mxu2 }
 0x2eb   : > { %v2708_v27 = vadd.f32 %v2662_v30, %v2464_v40  ;;  %v3005_v5 = vpop.f32.mrf.mxu3 }
 0x2ec   : > { %v2803_v28 = vld [vmem:[#allocation3 + $0xc0] sm:$0xff] }
 0x2ed   : > { %2740 = vst.msk [vmem:[#allocation3 + $0xc8] sm:$0xff] %vm222_vm1, %v2708_v27  ;;  %v3047_v3 = vadd.f32 %v2999_v4, %v2803_v28  ;;  %v3462_v4 = vsel %vm222_vm1, %v8870_v11, 0.0 }
 0x2ee   : > { %v3142_v33 = vld [vmem:[#allocation3 + $0xb8] sm:$0xff]  ;;  %v3463_v10 = vadd.f32 %v3462_v4, %v3461_v7 }
 0x2ef   : > { %3079 = vst.msk [vmem:[#allocation3 + $0xc0] sm:$0xff] %vm222_vm1, %v3047_v3  ;;  %v3386_v37 = vadd.f32 %v3336_v22, %v3142_v33  ;;  %v3468_v22 = vsel %vm222_vm1, %v8901_v50, 0.0  ;;  %v3470_v3 = vsel %vm222_vm1, %v8911_v54, 0.0 }
 0x2f0   : > { %v9045_v23 = vld [vmem:[#allocation3 + $0xb0] sm:$0xff]  ;;  %v3345_v16 = vpop.f32.mrf.mxu0 }
 0x2f1   : > { %3875 = vst.msk [vmem:[#allocation3 + $0xb0] sm:$0xff] %vm222_vm1, %v8008_v34 }
 0x2f2   : > { %3418 = vst.msk [vmem:[#allocation3 + $0xb8] sm:$0xff] %vm222_vm1, %v3386_v37  ;;  %v2665_v43 = vpop.f32.mrf.mxu2 }
 0x2f3   : > { %v2709_v44 = vadd.f32 %v2665_v43, %v2465_v39  ;;  %v3008_v41 = vpop.f32.mrf.mxu3 }
 0x2f4   : > { %v2804_v49 = vld [vmem:[#allocation3 + $0xc8] sm:$0xff] }
 0x2f5   : > { %2741 = vst.msk [vmem:[#allocation3 + $0xd0] sm:$0xff] %vm222_vm1, %v2709_v44  ;;  %v3048_v46 = vadd.f32 %v3002_v20, %v2804_v49  ;;  %v3465_v20 = vadd.f32 %v3464_v8, %v3463_v10  ;;  %v3474_v49 = vsel %vm222_vm1, %v8931_v32, 0.0  ;;  %v3482_v10 = vsel %vm222_vm1, %v8969_v24, 0.0 }
 0x2f6   : > { %v3143_v12 = vld [vmem:[#allocation3 + $0xc0] sm:$0xff] }
 0x2f7   : > { %3080 = vst.msk [vmem:[#allocation3 + $0xc8] sm:$0xff] %vm222_vm1, %v3048_v46  ;;  %v3387_v52 = vadd.f32 %v3339_v38, %v3143_v12  ;;  %v3467_v27 = vadd.f32 %v3466_v14, %v3465_v20  ;;  %v3472_v38 = vsel %vm222_vm1, %v8921_v63, 0.0  ;;  %v2468_v46 = vld [vmem:[#allocation3 + $0xe8] sm:$0xff]  ;;  %v3484_v20 = vsel %vm222_vm1, %v8977_v31, 0.0 }
 0x2f8   : > { %v3348_v44 = vpop.f32.mrf.mxu0 }
 0x2f9   : > { %v9052_v57 = vld [vmem:[#allocation3 + $0xb8] sm:$0xff]  ;;  %3419 = vst.msk [vmem:[#allocation3 + $0xc0] sm:$0xff] %vm222_vm1, %v3387_v52  ;;  %v3469_v37 = vadd.f32 %v3468_v22, %v3467_v27 }
 0x2fa   : > { %3876 = vst.msk [vmem:[#allocation3 + $0xb8] sm:$0xff] %vm222_vm1, %v8008_v34  ;;  %v2668_v13 = vpop.f32.mrf.mxu2 }
 0x2fb   : > { %v2710_v36 = vadd.f32 %v2668_v13, %v2466_v59  ;;  %v3011_v30 = vpop.f32.mrf.mxu3  ;;  %v3471_v39 = vadd.f32 %v3470_v3, %v3469_v37  ;;  %v3476_v59 = vsel %vm222_vm1, %v8941_v51, 0.0 }
 0x2fc   : > { %v2805_v17 = vld [vmem:[#allocation3 + $0xd0] sm:$0xff] }
 0x2fd   : > { %2742 = vst.msk [vmem:[#allocation3 + $0xd8] sm:$0xff] %vm222_vm1, %v2710_v36  ;;  %v3049_v53 = vadd.f32 %v3005_v5, %v2805_v17  ;;  %v3473_v52 = vadd.f32 %v3472_v38, %v3471_v39 }
 0x2fe   : > { %v3144_v6 = vld [vmem:[#allocation3 + $0xc8] sm:$0xff] }
 0x2ff   : > { %3081 = vst.msk [vmem:[#allocation3 + $0xd0] sm:$0xff] %vm222_vm1, %v3049_v53  ;;  %v3388_v47 = vadd.f32 %v3342_v58, %v3144_v6  ;;  %v3480_v6 = vsel %vm222_vm1, %v8961_v25, 0.0 }
 0x300   : > { %v9067_v9 = vld [vmem:[#allocation3 + $0xc0] sm:$0xff]  ;;  %v3351_v8 = vpop.f32.mrf.mxu0 }
 0x301   : > { %3877 = vst.msk [vmem:[#allocation3 + $0xc0] sm:$0xff] %vm222_vm1, %v8008_v34 }
 0x302   : > { %3420 = vst.msk [vmem:[#allocation3 + $0xc8] sm:$0xff] %vm222_vm1, %v3388_v47  ;;  %v2671_v18 = vpop.f32.mrf.mxu2 }
 0x303   : > { %v2711_v21 = vadd.f32 %v2671_v18, %v2467_v62  ;;  %v3014_v53 = vpop.f32.mrf.mxu3 }
 0x304   : > { %v2806_v40 = vld [vmem:[#allocation3 + $0xd8] sm:$0xff] }
 0x305   : > { %2743 = vst.msk [vmem:[#allocation3 + $0xe0] sm:$0xff] %vm222_vm1, %v2711_v21  ;;  %v3050_v28 = vadd.f32 %v3008_v41, %v2806_v40  ;;  %v3475_v41 = vadd.f32 %v3474_v49, %v3473_v52  ;;  %v2470_v49 = vld [vmem:[#allocation3 + $0xf8] sm:$0xff] }
 0x306   : > { %v3145_v33 = vld [vmem:[#allocation3 + $0xd0] sm:$0xff] }
 0x307   : > { %3082 = vst.msk [vmem:[#allocation3 + $0xd8] sm:$0xff] %vm222_vm1, %v3050_v28  ;;  %v3389_v5 = vadd.f32 %v3345_v16, %v3145_v33  ;;  %v3477_v2 = vadd.f32 %v3476_v59, %v3475_v41  ;;  %v2469_v16 = vld [vmem:[#allocation3 + $0xf0] sm:$0xff]  ;;  %v3488_v33 = vsel %vm222_vm1, %v8996_v35, 0.0 }
 0x308   : > { %v3354_v39 = vpop.f32.mrf.mxu0 }
 0x309   : > { %v9082_v43 = vld [vmem:[#allocation3 + $0xc8] sm:$0xff]  ;;  %3421 = vst.msk [vmem:[#allocation3 + $0xd0] sm:$0xff] %vm222_vm1, %v3389_v5  ;;  %v3479_v47 = vadd.f32 %v3478_v55, %v3477_v2  ;;  %v3496_v2 = vsel %vm222_vm1, %v9024_v61, 0.0 }
 0x30a   : > { %3878 = vst.msk [vmem:[#allocation3 + $0xc8] sm:$0xff] %vm222_vm1, %v8008_v34  ;;  %v2674_v12 = vpop.f32.mrf.mxu2 }
 0x30b   : > { %v2712_v58 = vadd.f32 %v2674_v12, %v2468_v46  ;;  %v3481_v62 = vadd.f32 %v3480_v6, %v3479_v47  ;;  %v3017_v37 = vpop.f32.mrf.mxu3  ;;  %v3498_v47 = vsel %vm222_vm1, %v9031_v19, 0.0 }
 0x30c   : > { %v2807_v13 = vld [vmem:[#allocation3 + $0xe0] sm:$0xff] }
 0x30d   : > { %2744 = vst.msk [vmem:[#allocation3 + $0xe8] sm:$0xff] %vm222_vm1, %v2712_v58  ;;  %v3051_v36 = vadd.f32 %v3011_v30, %v2807_v13  ;;  %v3483_v22 = vadd.f32 %v3482_v10, %v3481_v62  ;;  %v3486_v30 = vsel %vm222_vm1, %v8989_v60, 0.0  ;;  %v3492_v58 = vsel %vm222_vm1, %v9010_v29, 0.0 }
 0x30e   : > { %v3146_v17 = vld [vmem:[#allocation3 + $0xd8] sm:$0xff] }
 0x30f   : > { %3083 = vst.msk [vmem:[#allocation3 + $0xe0] sm:$0xff] %vm222_vm1, %v3051_v36  ;;  %v3390_v4 = vadd.f32 %v3348_v44, %v3146_v17  ;;  %v3485_v28 = vadd.f32 %v3484_v20, %v3483_v22  ;;  %v3490_v44 = vsel %vm222_vm1, %v9003_v42, 0.0  ;;  %v3494_v36 = vsel %vm222_vm1, %v9017_v45, 0.0 }
 0x310   : > { %v9097_v7 = vld [vmem:[#allocation3 + $0xd0] sm:$0xff]  ;;  %v3357_v10 = vpop.f32.mrf.mxu0 }
 0x311   : > { %3879 = vst.msk [vmem:[#allocation3 + $0xd0] sm:$0xff] %vm222_vm1, %v8008_v34  ;;  %v3487_v5 = vadd.f32 %v3486_v30, %v3485_v28 }
 0x312   : > { %3422 = vst.msk [vmem:[#allocation3 + $0xd8] sm:$0xff] %vm222_vm1, %v3390_v4  ;;  %v2677_v14 = vpop.f32.mrf.mxu2 }
 0x313   : > { %v2713_v18 = vadd.f32 %v2677_v14, %v2469_v16  ;;  %v3489_v12 = vadd.f32 %v3488_v33, %v3487_v5  ;;  %v3500_v14 = vsel %vm222_vm1, %v9038_v15, 0.0  ;;  %v3506_v33 = vsel %vm222_vm1, %v9067_v9, 0.0 }
 0x314   : > { %v2808_v21 = vld [vmem:[#allocation3 + $0xe8] sm:$0xff]  ;;  %v3508_v5 = vsel %vm222_vm1, %v9082_v43, 0.0 }
 0x315   : > { %2745 = vst.msk [vmem:[#allocation3 + $0xf0] sm:$0xff] %vm222_vm1, %v2713_v18  ;;  %v3052_v40 = vadd.f32 %v3014_v53, %v2808_v21  ;;  %v3491_v13 = vadd.f32 %v3490_v44, %v3489_v12  ;;  %v3502_v21 = vsel %vm222_vm1, %v9045_v23, 0.0 }
 0x316   : > { %v3147_v27 = vld [vmem:[#allocation3 + $0xe0] sm:$0xff] }
 0x317   : > { %3084 = vst.msk [vmem:[#allocation3 + $0xe8] sm:$0xff] %vm222_vm1, %v3052_v40  ;;  %v3391_v3 = vadd.f32 %v3351_v8, %v3147_v27  ;;  %v3493_v17 = vadd.f32 %v3492_v58, %v3491_v13  ;;  %v3020_v8 = vpop.f32.mrf.mxu3  ;;  %v3504_v27 = vsel %vm222_vm1, %v9052_v57, 0.0 }
 0x319   : > { %v9112_v38 = vld [vmem:[#allocation3 + $0xd8] sm:$0xff]  ;;  %3423 = vst.msk [vmem:[#allocation3 + $0xe0] sm:$0xff] %vm222_vm1, %v3391_v3  ;;  %v3495_v6 = vadd.f32 %v3494_v36, %v3493_v17 }
 0x31a   : > { %3880 = vst.msk [vmem:[#allocation3 + $0xd8] sm:$0xff] %vm222_vm1, %v8008_v34  ;;  %v2680_v46 = vpop.f32.mrf.mxu2  ;;  %v3512_v58 = vsel %vm222_vm1, %v9112_v38, 0.0 }
 0x31b   : > { %v2714_v52 = vadd.f32 %v2680_v46, %v2470_v49  ;;  %v3497_v16 = vadd.f32 %v3496_v2, %v3495_v6  ;;  %v3510_v49 = vsel %vm222_vm1, %v9097_v7, 0.0 }
 0x31c   : > { %v2809_v59 = vld [vmem:[#allocation3 + $0xf0] sm:$0xff] }
 0x31d   : > { %2746 = vst.msk [vmem:[#allocation3 + $0xf8] sm:$0xff] %vm222_vm1, %v2714_v52  ;;  %v3053_v41 = vadd.f32 %v3017_v37, %v2809_v59  ;;  %v3499_v18 = vadd.f32 %v3498_v47, %v3497_v16 }
 0x31e   : > { %v3148_v55 = vld [vmem:[#allocation3 + $0xe8] sm:$0xff] }
 0x31f   : > { %3085 = vst.msk [vmem:[#allocation3 + $0xf0] sm:$0xff] %vm222_vm1, %v3053_v41  ;;  %v3392_v53 = vadd.f32 %v3354_v39, %v3148_v55  ;;  %v3501_v40 = vadd.f32 %v3500_v14, %v3499_v18  ;;  %v3360_v39 = vpop.f32.mrf.mxu0  ;;  %v8009_v55 = vmov 256.0  }
 0x320   : > { %v9127_v4 = vld [vmem:[#allocation3 + $0xe0] sm:$0xff]  ;;  %7994 = vrcp.f32 %v8009_v55 }
 0x321   : > { %3881 = vst.msk [vmem:[#allocation3 + $0xe0] sm:$0xff] %vm222_vm1, %v8008_v34  ;;  %v3503_v28 = vadd.f32 %v3502_v21, %v3501_v40  ;;  %v3514_v41 = vsel %vm222_vm1, %v9127_v4, 0.0 }
 0x322   : > { %3424 = vst.msk [vmem:[#allocation3 + $0xe8] sm:$0xff] %vm222_vm1, %v3392_v53 }
 0x323   : > { %v3505_v37 = vadd.f32 %v3504_v27, %v3503_v28 }
 0x324   : > { %v2810_v62 = vld [vmem:[#allocation3 + $0xf8] sm:$0xff] }
 0x325   : > { %v3054_v20 = vadd.f32 %v3020_v8, %v2810_v62  ;;  %v3507_v44 = vadd.f32 %v3506_v33, %v3505_v37 }
 0x326   : > { %v3149_v22 = vld [vmem:[#allocation3 + $0xf0] sm:$0xff]  ;;  %v7995_v47 = vpop.eup %7994 }
 0x327   : > { %3086 = vst.msk [vmem:[#allocation3 + $0xf8] sm:$0xff] %vm222_vm1, %v3054_v20  ;;  %v3393_v30 = vadd.f32 %v3357_v10, %v3149_v22  ;;  %v3509_v12 = vadd.f32 %v3508_v5, %v3507_v44  ;;  %v3529_v62 = vmul.f32 256.0, %v7995_v47  ;;  %vm3533_vm3 = vweird.f32 %v7995_v47 }
 0x329   : > { %v9141_v3 = vld [vmem:[#allocation3 + $0xe8] sm:$0xff]  ;;  %3425 = vst.msk [vmem:[#allocation3 + $0xf0] sm:$0xff] %vm222_vm1, %v3393_v30  ;;  %v3511_v13 = vadd.f32 %v3510_v49, %v3509_v12  ;;  %v3530_v21 = vsub.f32 1.0, %v3529_v62 }
 0x32a   : > { %3882 = vst.msk [vmem:[#allocation3 + $0xe8] sm:$0xff] %vm222_vm1, %v8008_v34  ;;  %v3516_v17 = vsel %vm222_vm1, %v9141_v3, 0.0 }
 0x32b   : > { %v3513_v36 = vadd.f32 %v3512_v58, %v3511_v13  ;;  %v3531_v30 = vmul.f32 %v7995_v47, %v3530_v21 }
 0x32d   : > { %v3515_v53 = vadd.f32 %v3514_v41, %v3513_v36  ;;  %v3532_v28 = vadd.f32 %v7995_v47, %v3531_v30 }
 0x32e   : > { %v3150_v46 = vld [vmem:[#allocation3 + $0xf8] sm:$0xff] }
 0x32f   : > { %v3394_v52 = vadd.f32 %v3360_v39, %v3150_v46  ;;  %v3517_v6 = vadd.f32 %v3516_v17, %v3515_v53  ;;  %v9171_v37 = vsel %vm3533_vm3, %v7995_v47, %v3532_v28 }
 0x330   : > { %v9154_v59 = vld [vmem:[#allocation3 + $0xf0] sm:$0xff] }
 0x331   : > { %3883 = vst.msk [vmem:[#allocation3 + $0xf0] sm:$0xff] %vm222_vm1, %v8008_v34  ;;  %v3518_v2 = vsel %vm222_vm1, %v9154_v59, 0.0 }
 0x332   : > { %3426 = vst.msk [vmem:[#allocation3 + $0xf8] sm:$0xff] %vm222_vm1, %v3394_v52  ;;  %v3519_v8 = vadd.f32 %v3518_v2, %v3517_v6 }
 0x339   : > { %v9165_v10 = vld [vmem:[#allocation3 + $0xf8] sm:$0xff] }
 0x33a   : > { %v3520_v16 = vsel %vm222_vm1, %v9165_v10, 0.0  ;;  %3884 = vst.msk [vmem:[#allocation3 + $0xf8] sm:$0xff] %vm222_vm1, %v8008_v34 }
 0x33b   : > { %v3521_v14 = vadd.f32 %v3520_v16, %v3519_v8 }
 0x33d   : > { %v3522_v18 = vrot.slane %v3521_v14, 4 }
 0x33f   : > { %v3523_v20 = vadd.f32 %v3522_v18, %v3521_v14 }
 0x341   : > { %v3524_v22 = vrot.slane %v3523_v20, 2 }
 0x343   : > { %v3525_v40 = vadd.f32 %v3524_v22, %v3523_v20 }
 0x345   : > { %v3526_v27 = vrot.slane %v3525_v40, 1 }
 0x347   : > { %v3527_v33 = vadd.f32 %v3526_v27, %v3525_v40 }
 0x349   : > { %v9174_v5 = vmul.f32 %v9171_v37, %v3527_v33 }
 0x34b   : > { %v9178_v34 = vsub.f32 %v8850_v56, %v9174_v5  ;;  %v9182_v39 = vsub.f32 %v8860_v0, %v9174_v5  ;;  %v9186_v44 = vsub.f32 %v8870_v11, %v9174_v5  ;;  %v9190_v49 = vsub.f32 %v8880_v26, %v9174_v5 }
 0x34c   : > { %v9198_v56 = vsub.f32 %v8890_v48, %v9174_v5  ;;  %v9204_v11 = vsub.f32 %v8901_v50, %v9174_v5  ;;  %v9212_v41 = vsub.f32 %v8911_v54, %v9174_v5  ;;  %v9219_v50 = vsub.f32 %v8921_v63, %v9174_v5 }
 0x34d   : > { %v3568_v46 = vmul.f32 %v9178_v34, %v9178_v34  ;;  %v3569_v12 = vmul.f32 %v9182_v39, %v9182_v39  ;;  %v3570_v0 = vmul.f32 %v9186_v44, %v9186_v44  ;;  %v3571_v26 = vmul.f32 %v9190_v49, %v9190_v49 }
 0x34e   : > { %v3572_v48 = vmul.f32 %v9198_v56, %v9198_v56  ;;  %v3573_v17 = vmul.f32 %v9204_v11, %v9204_v11  ;;  %v9226_v54 = vsub.f32 %v8931_v32, %v9174_v5  ;;  %v3574_v6 = vmul.f32 %v9212_v41, %v9212_v41 }
 0x34f   : > { %v3600_v52 = vsel %vm222_vm1, %v3568_v46, 0.0  ;;  %v3601_v58 = vsel %vm222_vm1, %v3569_v12, 0.0  ;;  %v3603_v36 = vsel %vm222_vm1, %v3570_v0, 0.0  ;;  %v3605_v53 = vsel %vm222_vm1, %v3571_v26, 0.0 }
 0x350   : > { %v3602_v13 = vadd.f32 %v3601_v58, %v3600_v52  ;;  %v3607_v47 = vsel %vm222_vm1, %v3572_v48, 0.0  ;;  %v9233_v63 = vsub.f32 %v8941_v51, %v9174_v5  ;;  %v3575_v16 = vmul.f32 %v9219_v50, %v9219_v50 }
 0x351   : > { %v3609_v14 = vsel %vm222_vm1, %v3573_v17, 0.0  ;;  %v9240_v32 = vsub.f32 %v8952_v1, %v9174_v5  ;;  %v3576_v18 = vmul.f32 %v9226_v54, %v9226_v54  ;;  %v3611_v20 = vsel %vm222_vm1, %v3574_v6, 0.0 }
 0x352   : > { %v3604_v55 = vadd.f32 %v3603_v36, %v3602_v13  ;;  %v9247_v51 = vsub.f32 %v8961_v25, %v9174_v5  ;;  %v3577_v22 = vmul.f32 %v9233_v63, %v9233_v63  ;;  %v3613_v40 = vsel %vm222_vm1, %v3575_v16, 0.0 }
 0x353   : > { %v9254_v1 = vsub.f32 %v8969_v24, %v9174_v5  ;;  %v3578_v27 = vmul.f32 %v9240_v32, %v9240_v32  ;;  %v3615_v28 = vsel %vm222_vm1, %v3576_v18, 0.0  ;;  %v9261_v25 = vsub.f32 %v8977_v31, %v9174_v5 }
 0x354   : > { %v3606_v2 = vadd.f32 %v3605_v53, %v3604_v55  ;;  %v3579_v46 = vmul.f32 %v9247_v51, %v9247_v51  ;;  %v3617_v12 = vsel %vm222_vm1, %v3577_v22, 0.0  ;;  %v9268_v24 = vsub.f32 %v8989_v60, %v9174_v5 }
 0x355   : > { %v3580_v26 = vmul.f32 %v9254_v1, %v9254_v1  ;;  %v3619_v52 = vsel %vm222_vm1, %v3578_v27, 0.0  ;;  %v9275_v31 = vsub.f32 %v8996_v35, %v9174_v5  ;;  %v3581_v13 = vmul.f32 %v9261_v25, %v9261_v25 }
 0x356   : > { %v3608_v8 = vadd.f32 %v3607_v47, %v3606_v2  ;;  %v3621_v48 = vsel %vm222_vm1, %v3579_v46, 0.0  ;;  %v9282_v60 = vsub.f32 %v9003_v42, %v9174_v5  ;;  %v3582_v55 = vmul.f32 %v9268_v24, %v9268_v24 }
 0x357   : > { %v3623_v17 = vsel %vm222_vm1, %v3580_v26, 0.0  ;;  %v9289_v35 = vsub.f32 %v9010_v29, %v9174_v5  ;;  %v3583_v2 = vmul.f32 %v9275_v31, %v9275_v31  ;;  %v3625_v6 = vsel %vm222_vm1, %v3581_v13, 0.0 }
 0x358   : > { %v3610_v62 = vadd.f32 %v3609_v14, %v3608_v8  ;;  %v9296_v42 = vsub.f32 %v9017_v45, %v9174_v5  ;;  %v3584_v8 = vmul.f32 %v9282_v60, %v9282_v60  ;;  %v3627_v16 = vsel %vm222_vm1, %v3582_v55, 0.0 }
 0x359   : > { %v9303_v29 = vsub.f32 %v9024_v61, %v9174_v5  ;;  %v3629_v18 = vsel %vm222_vm1, %v3583_v2, 0.0  ;;  %v9310_v45 = vsub.f32 %v9031_v19, %v9174_v5  ;;  %v9317_v61 = vsub.f32 %v9038_v15, %v9174_v5 }
 0x35a   : > { %v3612_v21 = vadd.f32 %v3611_v20, %v3610_v62  ;;  %v3585_v62 = vmul.f32 %v9289_v35, %v9289_v35  ;;  %v3631_v22 = vsel %vm222_vm1, %v3584_v8, 0.0  ;;  %v9324_v19 = vsub.f32 %v9045_v23, %v9174_v5 }
 0x35b   : > { %v9331_v15 = vsub.f32 %v9052_v57, %v9174_v5  ;;  %v9338_v23 = vsub.f32 %v9067_v9, %v9174_v5  ;;  %v9345_v57 = vsub.f32 %v9082_v43, %v9174_v5  ;;  %v9352_v9 = vsub.f32 %v9097_v7, %v9174_v5 }
 0x35c   : > { %v3614_v30 = vadd.f32 %v3613_v40, %v3612_v21  ;;  %v3586_v21 = vmul.f32 %v9296_v42, %v9296_v42  ;;  %v3633_v27 = vsel %vm222_vm1, %v3585_v62, 0.0  ;;  %v9359_v43 = vsub.f32 %v9112_v38, %v9174_v5 }
 0x35d   : > { %v9366_v7 = vsub.f32 %v9127_v4, %v9174_v5  ;;  %v9373_v38 = vsub.f32 %v9141_v3, %v9174_v5  ;;  %v9380_v4 = vsub.f32 %v9154_v59, %v9174_v5  ;;  %v3567_v3 = vsub.f32 %v9165_v10, %v9174_v5 }
 0x35e   : > { %v3616_v33 = vadd.f32 %v3615_v28, %v3614_v30  ;;  %v3587_v30 = vmul.f32 %v9303_v29, %v9303_v29  ;;  %v3635_v46 = vsel %vm222_vm1, %v3586_v21, 0.0 }
 0x360   : > { %v3618_v0 = vadd.f32 %v3617_v12, %v3616_v33  ;;  %v3588_v33 = vmul.f32 %v9310_v45, %v9310_v45  ;;  %v3637_v26 = vsel %vm222_vm1, %v3587_v30, 0.0 }
 0x362   : > { %v3620_v58 = vadd.f32 %v3619_v52, %v3618_v0  ;;  %v3589_v0 = vmul.f32 %v9317_v61, %v9317_v61  ;;  %v3639_v13 = vsel %vm222_vm1, %v3588_v33, 0.0 }
 0x364   : > { %v3622_v36 = vadd.f32 %v3621_v48, %v3620_v58  ;;  %v3590_v58 = vmul.f32 %v9324_v19, %v9324_v19  ;;  %v3641_v55 = vsel %vm222_vm1, %v3589_v0, 0.0 }
 0x366   : > { %v3624_v53 = vadd.f32 %v3623_v17, %v3622_v36  ;;  %v3591_v36 = vmul.f32 %v9331_v15, %v9331_v15  ;;  %v3643_v2 = vsel %vm222_vm1, %v3590_v58, 0.0 }
 0x368   : > { %v3626_v47 = vadd.f32 %v3625_v6, %v3624_v53  ;;  %v3592_v53 = vmul.f32 %v9338_v23, %v9338_v23  ;;  %v3645_v8 = vsel %vm222_vm1, %v3591_v36, 0.0 }
 0x36a   : > { %v3628_v14 = vadd.f32 %v3627_v16, %v3626_v47  ;;  %v3593_v47 = vmul.f32 %v9345_v57, %v9345_v57  ;;  %v3647_v62 = vsel %vm222_vm1, %v3592_v53, 0.0 }
 0x36c   : > { %v3630_v20 = vadd.f32 %v3629_v18, %v3628_v14  ;;  %v3594_v14 = vmul.f32 %v9352_v9, %v9352_v9  ;;  %v3649_v21 = vsel %vm222_vm1, %v3593_v47, 0.0  ;;  %v213_v47 = vld [vmem:[%s10880_s2 + $0x4] sm:$0xf] }
 0x36d   : > { %7714 = vmatpush.msk.msrb.mxu2 %vm525_vm0, %v213_v47 }
 0x36e   : > { %v3632_v40 = vadd.f32 %v3631_v22, %v3630_v20  ;;  %v3595_v20 = vmul.f32 %v9359_v43, %v9359_v43  ;;  %v3651_v30 = vsel %vm222_vm1, %v3594_v14, 0.0  ;;  %v214_v14 = vld [vmem:[%s10880_s2 + $0x8] sm:$0xf] }
 0x36f   : > { %7747 = vmatpush.msk.msrb.mxu3 %vm525_vm0, %v214_v14 }
 0x370   : > { %v3634_v28 = vadd.f32 %v3633_v27, %v3632_v40  ;;  %v3596_v40 = vmul.f32 %v9366_v7, %v9366_v7  ;;  %v3653_v33 = vsel %vm222_vm1, %v3595_v20, 0.0 }
 0x372   : > { %v3636_v12 = vadd.f32 %v3635_v46, %v3634_v28  ;;  %v3597_v28 = vmul.f32 %v9373_v38, %v9373_v38  ;;  %v3655_v59 = vsel %vm222_vm1, %v3596_v40, 0.0 }
 0x374   : > { %v3638_v52 = vadd.f32 %v3637_v26, %v3636_v12  ;;  %v3598_v12 = vmul.f32 %v9380_v4, %v9380_v4  ;;  %v3599_v26 = vmul.f32 %v3567_v3, %v3567_v3 }
 0x376   : > { %v3640_v48 = vadd.f32 %v3639_v13, %v3638_v52  ;;  %v3657_v52 = vsel %vm222_vm1, %v3597_v28, 0.0  ;;  %v3659_v13 = vsel %vm222_vm1, %v3598_v12, 0.0  ;;  %v3661_v10 = vsel %vm222_vm1, %v3599_v26, 0.0 }
 0x378   : > { %v3642_v17 = vadd.f32 %v3641_v55, %v3640_v48 }
 0x37a   : > { %v3644_v6 = vadd.f32 %v3643_v2, %v3642_v17 }
 0x37c   : > { %v3646_v16 = vadd.f32 %v3645_v8, %v3644_v6 }
 0x37e   : > { %v3648_v18 = vadd.f32 %v3647_v62, %v3646_v16 }
 0x380   : > { %v3650_v22 = vadd.f32 %v3649_v21, %v3648_v18 }
 0x382   : > { %v3652_v27 = vadd.f32 %v3651_v30, %v3650_v22 }
 0x384   : > { %v3654_v46 = vadd.f32 %v3653_v33, %v3652_v27 }
 0x386   : > { %v3656_v0 = vadd.f32 %v3655_v59, %v3654_v46 }
 0x388   : > { %v3658_v58 = vadd.f32 %v3657_v52, %v3656_v0 }
 0x38a   : > { %v3660_v48 = vadd.f32 %v3659_v13, %v3658_v58 }
 0x38c   : > { %v3662_v5 = vadd.f32 %v3661_v10, %v3660_v48 }
 0x38e   : > { %v3663_v36 = vrot.slane %v3662_v5, 4 }
 0x390   : > { %v3664_v55 = vadd.f32 %v3663_v36, %v3662_v5 }
 0x392   : > { %v3665_v17 = vrot.slane %v3664_v55, 2 }
 0x394   : > { %v3666_v53 = vadd.f32 %v3665_v17, %v3664_v55  ;;  %v215_v55 = vld [vmem:[%s10880_s2 + $0xc] sm:$0xf] }
 0x395   : > { %7780 = vmatpush.msk.msrb.mxu0 %vm525_vm0, %v215_v55 }
 0x396   : > { %v3667_v2 = vrot.slane %v3666_v53, 1 }
 0x398   : > { %v3668_v6 = vadd.f32 %v3667_v2, %v3666_v53 }
 0x39a   : > { %v3669_v8 = vmul.f32 %v3668_v6, %v9171_v37 }
 0x39c   : > { %v3670_v16 = vadd.f32 1e-05, %v3669_v8 }
 0x39e   : > { %7996 = vrsqrt.f32 %v3670_v16  ;;  %vm3677_vm5 = vweird.f32 %v3670_v16 }
 0x3a4   : > { %v7997_v62 = vpop.eup %7996 }
 0x3a5   : > { %v3672_v18 = vmul.f32 %v7997_v62, %v3670_v16  ;;  %vm3678_vm4 = vweird.f32 %v7997_v62 }
 0x3a6   : > { %vm3679_vm6 = vmor %vm3677_vm5, %vm3678_vm4 }
 0x3a7   : > { %v3673_v20 = vmul.f32 %v7997_v62, %v3672_v18 }
 0x3a9   : > { %v3674_v21 = vmul.f32 0.5, %v3673_v20 }
 0x3ab   : > { %v3675_v22 = vsub.f32 1.5, %v3674_v21 }
 0x3ad   : > { %v3676_v40 = vmul.f32 %v7997_v62, %v3675_v22 }
 0x3af   : > { %v9405_v30 = vsel %vm3679_vm6, %v7997_v62, %v3676_v40 }
 0x3b0   : > { %v3712_v27 = vmul.f32 %v9405_v30, %v3567_v3  ;;  %v3681_v33 = vmul.f32 %v9405_v30, %v9178_v34  ;;  %v3682_v46 = vmul.f32 %v9405_v30, %v9182_v39  ;;  %v9414_v12 = vmul.f32 %v9405_v30, %v9186_v44 }
 0x3b1   : > { %v9419_v59 = vmul.f32 %v9405_v30, %v9190_v49  ;;  %v3685_v3 = vmul.f32 %v9405_v30, %v9198_v56  ;;  %v3686_v0 = vmul.f32 %v9405_v30, %v9204_v11  ;;  %v3687_v34 = vmul.f32 %v9405_v30, %v9212_v41 }
 0x3b2   : > { %v3744_v28 = vmax.f32 %v3712_v27, 0.0  ;;  %v3713_v39 = vmax.f32 %v3681_v33, 0.0  ;;  %v3714_v26 = vmax.f32 %v3682_v46, 0.0  ;;  %v3715_v44 = vmax.f32 %v9414_v12, 0.0 }
 0x3b3   : > { %v3688_v52 = vmul.f32 %v9405_v30, %v9219_v50  ;;  %v3716_v58 = vmax.f32 %v9419_v59, 0.0  ;;  %v3689_v49 = vmul.f32 %v9405_v30, %v9226_v54  ;;  %v3717_v13 = vmax.f32 %v3685_v3, 0.0 }
 0x3b4   : > { %3776 = vst.msk [vmem:[#allocation2 + $0x189] sm:$0xff] %vm222_vm1, %v3744_v28  ;;  %v3690_v56 = vmul.f32 %v9405_v30, %v9233_v63  ;;  %v3718_v11 = vmax.f32 %v3686_v0, 0.0  ;;  %v3691_v41 = vmul.f32 %v9405_v30, %v9240_v32  ;;  %v3719_v48 = vmax.f32 %v3687_v34, 0.0 }
 0x3b5   : > { %3745 = vst.msk [vmem:[#allocation2 + $0x19] sm:$0xff] %vm222_vm1, %v3713_v39  ;;  %v3692_v50 = vmul.f32 %v9405_v30, %v9247_v51  ;;  %v3720_v54 = vmax.f32 %v3688_v52, 0.0  ;;  %v3693_v63 = vmul.f32 %v9405_v30, %v9254_v1  ;;  %v3721_v10 = vmax.f32 %v3689_v49, 0.0 }
 0x3b6   : > { %3746 = vst.msk [vmem:[#allocation2 + $0x21] sm:$0xff] %vm222_vm1, %v3714_v26  ;;  %v3694_v32 = vmul.f32 %v9405_v30, %v9261_v25  ;;  %v3722_v5 = vmax.f32 %v3690_v56, 0.0  ;;  %v3695_v51 = vmul.f32 %v9405_v30, %v9268_v24  ;;  %v3723_v36 = vmax.f32 %v3691_v41, 0.0 }
 0x3b7   : > { %3747 = vst.msk [vmem:[#allocation2 + $0x31] sm:$0xff] %vm222_vm1, %v3715_v44  ;;  %v3696_v1 = vmul.f32 %v9405_v30, %v9275_v31  ;;  %v3724_v17 = vmax.f32 %v3692_v50, 0.0  ;;  %v3697_v25 = vmul.f32 %v9405_v30, %v9282_v60  ;;  %v3725_v53 = vmax.f32 %v3693_v63, 0.0 }
 0x3b8   : > { %3748 = vst.msk [vmem:[#allocation2 + $0x39] sm:$0xff] %vm222_vm1, %v3716_v58  ;;  %v3698_v24 = vmul.f32 %v9405_v30, %v9289_v35  ;;  %v3726_v2 = vmax.f32 %v3694_v32, 0.0  ;;  %v3699_v31 = vmul.f32 %v9405_v30, %v9296_v42  ;;  %v3727_v6 = vmax.f32 %v3695_v51, 0.0 }
 0x3b9   : > { %3749 = vst.msk [vmem:[#allocation2 + $0x49] sm:$0xff] %vm222_vm1, %v3717_v13  ;;  %v3700_v47 = vmul.f32 %v9405_v30, %v9303_v29  ;;  %v3728_v8 = vmax.f32 %v3696_v1, 0.0  ;;  %v3701_v60 = vmul.f32 %v9405_v30, %v9310_v45  ;;  %v3729_v16 = vmax.f32 %v3697_v25, 0.0 }
 0x3ba   : > { %3750 = vst.msk [vmem:[#allocation2 + $0x51] sm:$0xff] %vm222_vm1, %v3718_v11  ;;  %v3702_v35 = vmul.f32 %v9405_v30, %v9317_v61  ;;  %v3730_v14 = vmax.f32 %v3698_v24, 0.0  ;;  %v3703_v42 = vmul.f32 %v9405_v30, %v9324_v19  ;;  %v3731_v62 = vmax.f32 %v3699_v31, 0.0  ;;  %v216_v61 = vld [vmem:[%s10880_s2 + $0x10] sm:$0xf] }
 0x3bb   : > { %3751 = vst.msk [vmem:[#allocation2 + $0x61] sm:$0xff] %vm222_vm1, %v3719_v48  ;;  %v3704_v29 = vmul.f32 %v9405_v30, %v9331_v15  ;;  %v3732_v18 = vmax.f32 %v3700_v47, 0.0  ;;  %v3705_v45 = vmul.f32 %v9405_v30, %v9338_v23  ;;  %v3733_v20 = vmax.f32 %v3701_v60, 0.0  ;;  %7813 = vmatpush.msk.msrb.mxu1 %vm525_vm0, %v216_v61 }
 0x3bc   : > { %3752 = vst.msk [vmem:[#allocation2 + $0x69] sm:$0xff] %vm222_vm1, %v3720_v54  ;;  %v3706_v19 = vmul.f32 %v9405_v30, %v9345_v57  ;;  %v3734_v21 = vmax.f32 %v3702_v35, 0.0  ;;  %v3707_v15 = vmul.f32 %v9405_v30, %v9352_v9  ;;  %v3735_v22 = vmax.f32 %v3703_v42, 0.0  ;;  %v4227_v24 = vld [vmem:[#allocation2 + $0x19] sm:$0xff] }
 0x3bd   : > { %3753 = vst.msk [vmem:[#allocation2 + $0x79] sm:$0xff] %vm222_vm1, %v3721_v10  ;;  %v3708_v23 = vmul.f32 %v9405_v30, %v9359_v43  ;;  %v3736_v40 = vmax.f32 %v3704_v29, 0.0  ;;  %v3709_v57 = vmul.f32 %v9405_v30, %v9366_v7  ;;  %v3737_v27 = vmax.f32 %v3705_v45, 0.0  ;;  %v4567_v31 = vld [vmem:[#allocation2 + $0x1a] sm:$0xff] }
 0x3be   : > { %3754 = vst.msk [vmem:[#allocation2 + $0x81] sm:$0xff] %vm222_vm1, %v3722_v5  ;;  %v3710_v28 = vmul.f32 %v9405_v30, %v9373_v38  ;;  %v3738_v33 = vmax.f32 %v3706_v19, 0.0  ;;  %v3711_v9 = vmul.f32 %v9405_v30, %v9380_v4  ;;  %v3739_v46 = vmax.f32 %v3707_v15, 0.0  ;;  %v3782_v38 = vld [vmem:[#allocation2 + $0x1a] sm:$0x1]  ;;  %v4229_v19 = vld [vmem:[#allocation2 + $0x31] sm:$0xff] }
 0x3bf   : > { %3755 = vst.msk [vmem:[#allocation2 + $0x91] sm:$0xff] %vm222_vm1, %v3723_v36  ;;  %v3740_v43 = vmax.f32 %v3708_v23, 0.0  ;;  %v3741_v3 = vmax.f32 %v3709_v57, 0.0  ;;  %v3818_v4 = vld [vmem:[#allocation2 + $0x27] sm:$0x1]  ;;  %v4908_v61 = vld [vmem:[#allocation2 + $0x38] sm:$0xff] }
 0x3c0   : > { %3756 = vst.msk [vmem:[#allocation2 + $0x99] sm:$0xff] %vm222_vm1, %v3724_v17  ;;  %v3742_v7 = vmax.f32 %v3710_v28, 0.0  ;;  %v3743_v0 = vmax.f32 %v3711_v9, 0.0  ;;  %v3783_v30 = vld [vmem:[#allocation2 + $0x32] sm:$0x1]  ;;  %v4906_v36 = vld [vmem:[#allocation2 + $0x20] sm:$0xff] }
 0x3c1   : > { %3757 = vst.msk [vmem:[#allocation2 + $0xa9] sm:$0xff] %vm222_vm1, %v3725_v53  ;;  %v3819_v34 = vld [vmem:[#allocation2 + $0x3f] sm:$0x1]  ;;  %v3784_v12 = vld [vmem:[#allocation2 + $0x4a] sm:$0x1] }
 0x3c2   : > { %3758 = vst.msk [vmem:[#allocation2 + $0xb1] sm:$0xff] %vm222_vm1, %v3726_v2  ;;  %v3820_v39 = vld [vmem:[#allocation2 + $0x57] sm:$0x1]  ;;  %v4231_v28 = vld [vmem:[#allocation2 + $0x49] sm:$0xff] }
 0x3c3   : > { %3759 = vst.msk [vmem:[#allocation2 + $0xc1] sm:$0xff] %vm222_vm1, %v3727_v6  ;;  %v3821_v49 = vld [vmem:[#allocation2 + $0x6f] sm:$0x1] }
 0x3c4   : > { %3760 = vst.msk [vmem:[#allocation2 + $0xc9] sm:$0xff] %vm222_vm1, %v3728_v8  ;;  %v3786_v56 = vld [vmem:[#allocation2 + $0x7a] sm:$0x1] }
 0x3c5   : > { %3761 = vst.msk [vmem:[#allocation2 + $0xd9] sm:$0xff] %vm222_vm1, %v3729_v16  ;;  %v3822_v11 = vld [vmem:[#allocation2 + $0x87] sm:$0x1] }
 0x3c6   : > { %3762 = vst.msk [vmem:[#allocation2 + $0xe1] sm:$0xff] %vm222_vm1, %v3730_v14  ;;  %v3787_v41 = vld [vmem:[#allocation2 + $0x92] sm:$0x1] }
 0x3c7   : > { %3763 = vst.msk [vmem:[#allocation2 + $0xf1] sm:$0xff] %vm222_vm1, %v3731_v62  ;;  %v3823_v48 = vld [vmem:[#allocation2 + $0x9f] sm:$0x1]  ;;  %v4228_v62 = vld [vmem:[#allocation2 + $0x21] sm:$0xff] }
 0x3c8   : > { %3764 = vst.msk [vmem:[#allocation2 + $0xf9] sm:$0xff] %vm222_vm1, %v3732_v18  ;;  %v3788_v63 = vld [vmem:[#allocation2 + $0xaa] sm:$0x1] }
 0x3c9   : > { %3765 = vst.msk [vmem:[#allocation2 + $0x109] sm:$0xff] %vm222_vm1, %v3733_v20  ;;  %v3824_v32 = vld [vmem:[#allocation2 + $0xb7] sm:$0x1] }
 0x3ca   : > { %3766 = vst.msk [vmem:[#allocation2 + $0x111] sm:$0xff] %vm222_vm1, %v3734_v21  ;;  %v3789_v5 = vld [vmem:[#allocation2 + $0xc2] sm:$0x1]  ;;  %v4569_v21 = vld [vmem:[#allocation2 + $0x32] sm:$0xff] }
 0x3cb   : > { %3767 = vst.msk [vmem:[#allocation2 + $0x121] sm:$0xff] %vm222_vm1, %v3735_v22  ;;  %v3825_v51 = vld [vmem:[#allocation2 + $0xcf] sm:$0x1]  ;;  %v4230_v22 = vld [vmem:[#allocation2 + $0x39] sm:$0xff] }
 0x3cc   : > { %3768 = vst.msk [vmem:[#allocation2 + $0x129] sm:$0xff] %vm222_vm1, %v3736_v40  ;;  %v3790_v55 = vld [vmem:[#allocation2 + $0xda] sm:$0x1]  ;;  %v4910_v40 = vld [vmem:[#allocation2 + $0x50] sm:$0xff] }
 0x3cd   : > { %3769 = vst.msk [vmem:[#allocation2 + $0x139] sm:$0xff] %vm222_vm1, %v3737_v27  ;;  %v3826_v1 = vld [vmem:[#allocation2 + $0xe7] sm:$0x1]  ;;  %v3833_v27 = vld [vmem:[#allocation2 + $0x18f] sm:$0x1] }
 0x3ce   : > { %3770 = vst.msk [vmem:[#allocation2 + $0x141] sm:$0xff] %vm222_vm1, %v3738_v33  ;;  %v3791_v17 = vld [vmem:[#allocation2 + $0xf2] sm:$0x1]  ;;  %v4571_v33 = vld [vmem:[#allocation2 + $0x4a] sm:$0xff] }
 0x3cf   : > { %3771 = vst.msk [vmem:[#allocation2 + $0x151] sm:$0xff] %vm222_vm1, %v3739_v46  ;;  %v3827_v25 = vld [vmem:[#allocation2 + $0xff] sm:$0x1]  ;;  %v4232_v46 = vld [vmem:[#allocation2 + $0x51] sm:$0xff] }
 0x3d0   : > { %3772 = vst.msk [vmem:[#allocation2 + $0x159] sm:$0xff] %vm222_vm1, %v3740_v43  ;;  %v3792_v2 = vld [vmem:[#allocation2 + $0x10a] sm:$0x1] }
 0x3d1   : > { %3773 = vst.msk [vmem:[#allocation2 + $0x169] sm:$0xff] %vm222_vm1, %v3741_v3  ;;  %v3828_v6 = vld [vmem:[#allocation2 + $0x117] sm:$0x1] }
 0x3d2   : > { %3774 = vst.msk [vmem:[#allocation2 + $0x171] sm:$0xff] %vm222_vm1, %v3742_v7  ;;  %v3793_v47 = vld [vmem:[#allocation2 + $0x122] sm:$0x1] }
 0x3d3   : > { %3775 = vst.msk [vmem:[#allocation2 + $0x181] sm:$0xff] %vm222_vm1, %v3743_v0  ;;  %v3829_v8 = vld [vmem:[#allocation2 + $0x12f] sm:$0x1]  ;;  %v4233_v0 = vld [vmem:[#allocation2 + $0x61] sm:$0xff] }
 0x3d4   : > { %3777 = vst.msk [vmem:[#allocation2 + $0x1] sm:$0xff] %vm222_vm1, %v3715_v44  ;;  %v3794_v16 = vld [vmem:[#allocation2 + $0x13a] sm:$0x1] }
 0x3d5   : > { %3778 = vst.msk [vmem:[#allocation2 + $0x9] sm:$0xff] %vm222_vm1, %v3716_v58  ;;  %v3785_v58 = vld [vmem:[#allocation2 + $0x62] sm:$0x1]  ;;  %v3830_v35 = vld [vmem:[#allocation2 + $0x147] sm:$0x1] }
 0x3d6   : > { %3779 = vst.msk [vmem:[#allocation2 + $0x199] sm:$0xff] %vm222_vm1, %v3741_v3  ;;  %v3795_v14 = vld [vmem:[#allocation2 + $0x152] sm:$0x1] }
 0x3d7   : > { %3780 = vst.msk [vmem:[#allocation2 + $0x1a1] sm:$0xff] %vm222_vm1, %v3742_v7  ;;  %v3831_v42 = vld [vmem:[#allocation2 + $0x15f] sm:$0x1]  ;;  %v4912_v7 = vld [vmem:[#allocation2 + $0x68] sm:$0xff] }
 0x3d8   : > { %3800 = vst.msk [vmem:[#allocation2 + $0x18] sm:$0x1] %vm278_vm2, %v3782_v38  ;;  %v3796_v29 = vld [vmem:[#allocation2 + $0x16a] sm:$0x1]  ;;  %v4573_v38 = vld [vmem:[#allocation2 + $0x62] sm:$0xff] }
 0x3d9   : > { %3836 = vst.msk [vmem:[#allocation2 + $0x29] sm:$0x1] %vm278_vm2, %v3818_v4  ;;  %v3832_v45 = vld [vmem:[#allocation2 + $0x177] sm:$0x1] }
 0x3da   : > { %3801 = vst.msk [vmem:[#allocation2 + $0x30] sm:$0x1] %vm278_vm2, %v3783_v30  ;;  %v3797_v20 = vld [vmem:[#allocation2 + $0x182] sm:$0x1]  ;;  %v4234_v30 = vld [vmem:[#allocation2 + $0x69] sm:$0xff] }
 0x3db   : > { %v4225_v26 = vld [vmem:[#allocation2 + $0x1] sm:$0xff]  ;;  %3837 = vst.msk [vmem:[#allocation2 + $0x41] sm:$0x1] %vm278_vm2, %v3819_v34 }
 0x3dc   : > { %v3781_v59 = vld [vmem:[#allocation2 + $0x2] sm:$0x1]  ;;  %7715 = vmatmul.msk.f32.vlgmr.msrb.gmra.mxu2 %vm222_vm1, %v4225_v26  ;;  %v3817_v52 = vld [vmem:[#allocation2 + $0xf] sm:$0x1]  ;;  %3802 = vst.msk [vmem:[#allocation2 + $0x48] sm:$0x1] %vm278_vm2, %v3784_v12 }
 0x3dd   : > { %v4565_v44 = vld [vmem:[#allocation2 + $0x2] sm:$0xff]  ;;  %3799 = vst.msk [vmem:[#allocation2] sm:$0x1] %vm278_vm2, %v3781_v59  ;;  %v3798_v57 = vld [vmem:[#allocation2 + $0x19a] sm:$0x1] }
 0x3de   : > { %7748 = vmatmul.msk.f32.vlgmr.msrb.gmra.mxu3 %vm222_vm1, %v4565_v44  ;;  %3835 = vst.msk [vmem:[#allocation2 + $0x11] sm:$0x1] %vm278_vm2, %v3817_v52  ;;  %v4226_v54 = vld [vmem:[#allocation2 + $0x9] sm:$0xff]  ;;  %v3834_v3 = vld [vmem:[#allocation2 + $0x1a7] sm:$0x1]  ;;  %v4575_v26 = vld [vmem:[#allocation2 + $0x7a] sm:$0xff] }
 0x3df   : > { %v4905_v13 = vld [vmem:[#allocation2 + $0x18] sm:$0xff]  ;;  %3838 = vst.msk [vmem:[#allocation2 + $0x59] sm:$0x1] %vm278_vm2, %v3820_v39  ;;  %v3886_v53 = vld [vmem:[#allocation2 + $0x8] sm:$0xff]  ;;  %v4914_v12 = vld [vmem:[#allocation2 + $0x80] sm:$0xff] }
 0x3e0   : > { %7781 = vmatmul.msk.f32.vlgmr.msrb.gmra.mxu0 %vm222_vm1, %v4905_v13  ;;  %3803 = vst.msk [vmem:[#allocation2 + $0x60] sm:$0x1] %vm278_vm2, %v3785_v58  ;;  %v4568_v18 = vld [vmem:[#allocation2 + $0x22] sm:$0xff]  ;;  %v4235_v39 = vld [vmem:[#allocation2 + $0x79] sm:$0xff] }
 0x3e1   : > { %3839 = vst.msk [vmem:[#allocation2 + $0x71] sm:$0x1] %vm278_vm2, %v3821_v49  ;;  %v4907_v60 = vld [vmem:[#allocation2 + $0x30] sm:$0xff]  ;;  %v4236_v44 = vld [vmem:[#allocation2 + $0x81] sm:$0xff]  ;;  %v4916_v58 = vld [vmem:[#allocation2 + $0x98] sm:$0xff] }
 0x3e2   : > { %3804 = vst.msk [vmem:[#allocation2 + $0x78] sm:$0x1] %vm278_vm2, %v3786_v56  ;;  %v4570_v23 = vld [vmem:[#allocation2 + $0x3a] sm:$0xff]  ;;  %v4237_v49 = vld [vmem:[#allocation2 + $0x91] sm:$0xff] }
 0x3e3   : > { %3840 = vst.msk [vmem:[#allocation2 + $0x89] sm:$0x1] %vm278_vm2, %v3822_v11  ;;  %v4909_v15 = vld [vmem:[#allocation2 + $0x48] sm:$0xff]  ;;  %v4238_v11 = vld [vmem:[#allocation2 + $0x99] sm:$0xff] }
 0x3e4   : > { %v3885_v50 = vld [vmem:[#allocation2] sm:$0xff]  ;;  %7716 = vmatmul.msk.f32.gmra.mxu2 %vm222_vm1, %v4226_v54  ;;  %3805 = vst.msk [vmem:[#allocation2 + $0x90] sm:$0x1] %vm278_vm2, %v3787_v41  ;;  %v4579_v54 = vld [vmem:[#allocation2 + $0xaa] sm:$0xff] }
 0x3e5   : > { %7682 = vmatmul.msk.f32.vlgmr.msra.gmra.mxu1 %vm222_vm1, %v3885_v50  ;;  %v4566_v10 = vld [vmem:[#allocation2 + $0xa] sm:$0xff]  ;;  %3841 = vst.msk [vmem:[#allocation2 + $0xa1] sm:$0x1] %vm278_vm2, %v3823_v48 }
 0x3e6   : > { %7749 = vmatmul.msk.f32.gmra.mxu3 %vm222_vm1, %v4566_v10  ;;  %3806 = vst.msk [vmem:[#allocation2 + $0xa8] sm:$0x1] %vm278_vm2, %v3788_v63  ;;  %v4572_v43 = vld [vmem:[#allocation2 + $0x52] sm:$0xff]  ;;  %v4239_v50 = vld [vmem:[#allocation2 + $0xa9] sm:$0xff] }
 0x3e7   : > { %3842 = vst.msk [vmem:[#allocation2 + $0xb9] sm:$0x1] %vm278_vm2, %v3824_v32  ;;  %v4911_v9 = vld [vmem:[#allocation2 + $0x60] sm:$0xff]  ;;  %v4918_v48 = vld [vmem:[#allocation2 + $0xb0] sm:$0xff] }
 0x3e8   : > { %7782 = vmatmul.msk.f32.gmra.mxu0 %vm222_vm1, %v4906_v36  ;;  %3807 = vst.msk [vmem:[#allocation2 + $0xc0] sm:$0x1] %vm278_vm2, %v3789_v5  ;;  %v4574_v34 = vld [vmem:[#allocation2 + $0x6a] sm:$0xff] }
 0x3e9   : > { %3843 = vst.msk [vmem:[#allocation2 + $0xd1] sm:$0x1] %vm278_vm2, %v3825_v51  ;;  %v4913_v4 = vld [vmem:[#allocation2 + $0x78] sm:$0xff]  ;;  %v4920_v5 = vld [vmem:[#allocation2 + $0xc8] sm:$0xff] }
 0x3ea   : > { %3808 = vst.msk [vmem:[#allocation2 + $0xd8] sm:$0x1] %vm278_vm2, %v3790_v55  ;;  %v4576_v52 = vld [vmem:[#allocation2 + $0x82] sm:$0xff]  ;;  %v4240_v10 = vld [vmem:[#allocation2 + $0xb1] sm:$0xff] }
 0x3eb   : > { %3844 = vst.msk [vmem:[#allocation2 + $0xe9] sm:$0x1] %vm278_vm2, %v3826_v1  ;;  %v4915_v59 = vld [vmem:[#allocation2 + $0x90] sm:$0xff]  ;;  %v4241_v51 = vld [vmem:[#allocation2 + $0xc1] sm:$0xff] }
 0x3ec   : > { %7717 = vmatmul.msk.f32.gmra.mxu2 %vm222_vm1, %v4227_v24  ;;  %3809 = vst.msk [vmem:[#allocation2 + $0xf0] sm:$0x1] %vm278_vm2, %v3791_v17  ;;  %v4578_v41 = vld [vmem:[#allocation2 + $0x9a] sm:$0xff]  ;;  %v3917_v17 = vld [vmem:[#allocation3] sm:$0xff] }
 0x3ed   : > { %7683 = vmatmul.msk.f32.gmra.mxu1 %vm222_vm1, %v3886_v53  ;;  %3845 = vst.msk [vmem:[#allocation2 + $0x101] sm:$0x1] %vm278_vm2, %v3827_v25  ;;  %v4917_v56 = vld [vmem:[#allocation2 + $0xa8] sm:$0xff] }
 0x3ee   : > { %7750 = vmatmul.msk.f32.gmra.mxu3 %vm222_vm1, %v4567_v31  ;;  %3810 = vst.msk [vmem:[#allocation2 + $0x108] sm:$0x1] %vm278_vm2, %v3792_v2  ;;  %v4580_v32 = vld [vmem:[#allocation2 + $0xb2] sm:$0xff]  ;;  %v4242_v31 = vld [vmem:[#allocation2 + $0xc9] sm:$0xff] }
 0x3ef   : > { %3846 = vst.msk [vmem:[#allocation2 + $0x119] sm:$0x1] %vm278_vm2, %v3828_v6  ;;  %v4919_v63 = vld [vmem:[#allocation2 + $0xc0] sm:$0xff] }
 0x3f0   : > { %7783 = vmatmul.msk.f32.gmra.mxu0 %vm222_vm1, %v4907_v60  ;;  %3811 = vst.msk [vmem:[#allocation2 + $0x120] sm:$0x1] %vm278_vm2, %v3793_v47  ;;  %v4582_v6 = vld [vmem:[#allocation2 + $0xca] sm:$0xff] }
 0x3f1   : > { %3847 = vst.msk [vmem:[#allocation2 + $0x131] sm:$0x1] %vm278_vm2, %v3829_v8  ;;  %v4921_v25 = vld [vmem:[#allocation2 + $0xd8] sm:$0xff] }
 0x3f2   : > { %3812 = vst.msk [vmem:[#allocation2 + $0x138] sm:$0x1] %vm278_vm2, %v3794_v16  ;;  %v4922_v16 = vld [vmem:[#allocation2 + $0xe0] sm:$0xff] }
 0x3f3   : > { %3848 = vst.msk [vmem:[#allocation2 + $0x149] sm:$0x1] %vm278_vm2, %v3830_v35 }
 0x3f4   : > { %7718 = vmatmul.msk.f32.gmra.mxu2 %vm222_vm1, %v4228_v62  ;;  %3813 = vst.msk [vmem:[#allocation2 + $0x150] sm:$0x1] %vm278_vm2, %v3795_v14 }
 0x3f5   : > { %7684 = vmatmul.msk.f32.gmra.mxu1 %vm222_vm1, %v4905_v13  ;;  %3849 = vst.msk [vmem:[#allocation2 + $0x161] sm:$0x1] %vm278_vm2, %v3831_v42  ;;  %v4577_v13 = vld [vmem:[#allocation2 + $0x92] sm:$0xff] }
 0x3f6   : > { %7751 = vmatmul.msk.f32.gmra.mxu3 %vm222_vm1, %v4568_v18  ;;  %3814 = vst.msk [vmem:[#allocation2 + $0x168] sm:$0x1] %vm278_vm2, %v3796_v29  ;;  %v4243_v29 = vld [vmem:[#allocation2 + $0xd9] sm:$0xff] }
 0x3f7   : > { %3850 = vst.msk [vmem:[#allocation2 + $0x179] sm:$0x1] %vm278_vm2, %v3832_v45  ;;  %v4583_v45 = vld [vmem:[#allocation2 + $0xda] sm:$0xff] }
 0x3f8   : > { %7784 = vmatmul.msk.f32.gmra.mxu0 %vm222_vm1, %v4908_v61  ;;  %3815 = vst.msk [vmem:[#allocation2 + $0x180] sm:$0x1] %vm278_vm2, %v3797_v20 }
 0x3f9   : > { %3816 = vst.msk [vmem:[#allocation2 + $0x198] sm:$0x1] %vm278_vm2, %v3798_v57  ;;  %v4244_v57 = vld [vmem:[#allocation2 + $0xe1] sm:$0xff] }
 0x3fa   : > { %3851 = vst.msk [vmem:[#allocation2 + $0x191] sm:$0x1] %vm278_vm2, %v3833_v27 }
 0x3fb   : > { %3852 = vst.msk [vmem:[#allocation2 + $0x1a9] sm:$0x1] %vm278_vm2, %v3834_v3  ;;  %v3920_v3 = vld [vmem:[#allocation3 + $0x18] sm:$0xff] }
 0x3fc   : > { %7719 = vmatmul.msk.f32.gmra.mxu2 %vm222_vm1, %v4229_v19  ;;  %v3919_v19 = vld [vmem:[#allocation3 + $0x10] sm:$0xff] }
 0x3fd   : > { %7685 = vmatmul.msk.f32.gmra.mxu1 %vm222_vm1, %v4906_v36  ;;  %v4581_v36 = vld [vmem:[#allocation2 + $0xc2] sm:$0xff] }
 0x3fe   : > { %7752 = vmatmul.msk.f32.gmra.mxu3 %vm222_vm1, %v4569_v21  ;;  %v4923_v21 = vld [vmem:[#allocation2 + $0xf0] sm:$0xff] }
 0x400   : > { %7785 = vmatmul.msk.f32.gmra.mxu0 %vm222_vm1, %v4909_v15 }
 0x404   : > { %7720 = vmatmul.msk.f32.gmra.mxu2 %vm222_vm1, %v4230_v22 }
 0x405   : > { %7686 = vmatmul.msk.f32.gmra.mxu1 %vm222_vm1, %v4907_v60  ;;  %v3918_v60 = vld [vmem:[#allocation3 + $0x8] sm:$0xff] }
 0x406   : > { %7753 = vmatmul.msk.f32.gmra.mxu3 %vm222_vm1, %v4570_v23 }
 0x408   : > { %7786 = vmatmul.msk.f32.gmra.mxu0 %vm222_vm1, %v4910_v40 }
 0x40c   : > { %7721 = vmatmul.msk.f32.gmra.mxu2 %vm222_vm1, %v4231_v28  ;;  %v4584_v28 = vld [vmem:[#allocation2 + $0xe2] sm:$0xff] }
 0x40d   : > { %7687 = vmatmul.msk.f32.gmra.mxu1 %vm222_vm1, %v4908_v61 }
 0x40e   : > { %7754 = vmatmul.msk.f32.gmra.mxu3 %vm222_vm1, %v4571_v33 }
 0x410   : > { %7787 = vmatmul.msk.f32.gmra.mxu0 %vm222_vm1, %v4911_v9 }
 0x414   : > { %7722 = vmatmul.msk.f32.gmra.mxu2 %vm222_vm1, %v4232_v46 }
 0x415   : > { %7688 = vmatmul.msk.f32.gmra.mxu1 %vm222_vm1, %v4909_v15 }
 0x416   : > { %7755 = vmatmul.msk.f32.gmra.mxu3 %vm222_vm1, %v4572_v43 }
 0x418   : > { %7788 = vmatmul.msk.f32.gmra.mxu0 %vm222_vm1, %v4912_v7 }
 0x41c   : > { %7723 = vmatmul.msk.f32.gmra.mxu2 %vm222_vm1, %v4233_v0 }
 0x41d   : > { %7689 = vmatmul.msk.f32.gmra.mxu1 %vm222_vm1, %v4910_v40 }
 0x41e   : > { %7756 = vmatmul.msk.f32.gmra.mxu3 %vm222_vm1, %v4573_v38 }
 0x420   : > { %7789 = vmatmul.msk.f32.gmra.mxu0 %vm222_vm1, %v4913_v4 }
 0x424   : > { %7724 = vmatmul.msk.f32.gmra.mxu2 %vm222_vm1, %v4234_v30 }
 0x425   : > { %7690 = vmatmul.msk.f32.gmra.mxu1 %vm222_vm1, %v4911_v9 }
 0x426   : > { %7757 = vmatmul.msk.f32.gmra.mxu3 %vm222_vm1, %v4574_v34  ;;  %v4245_v34 = vld [vmem:[#allocation2 + $0xf1] sm:$0xff] }
 0x428   : > { %7790 = vmatmul.msk.f32.gmra.mxu0 %vm222_vm1, %v4914_v12 }
 0x42c   : > { %7725 = vmatmul.msk.f32.gmra.mxu2 %vm222_vm1, %v4235_v39  ;;  %v4585_v39 = vld [vmem:[#allocation2 + $0xf2] sm:$0xff] }
 0x42d   : > { %7691 = vmatmul.msk.f32.gmra.mxu1 %vm222_vm1, %v4912_v7  ;;  %v4924_v7 = vld [vmem:[#allocation2 + $0xf8] sm:$0xff] }
 0x42e   : > { %7758 = vmatmul.msk.f32.gmra.mxu3 %vm222_vm1, %v4575_v26 }
 0x430   : > { %7791 = vmatmul.msk.f32.gmra.mxu0 %vm222_vm1, %v4915_v59 }
 0x434   : > { %7726 = vmatmul.msk.f32.gmra.mxu2 %vm222_vm1, %v4236_v44 }
 0x435   : > { %7692 = vmatmul.msk.f32.gmra.mxu1 %vm222_vm1, %v4913_v4 }
 0x436   : > { %7759 = vmatmul.msk.f32.gmra.mxu3 %vm222_vm1, %v4576_v52 }
 0x438   : > { %7792 = vmatmul.msk.f32.gmra.mxu0 %vm222_vm1, %v4916_v58 }
 0x43c   : > { %7727 = vmatmul.msk.f32.gmra.mxu2 %vm222_vm1, %v4237_v49  ;;  %v3921_v49 = vld [vmem:[#allocation3 + $0x20] sm:$0xff] }
 0x43d   : > { %7693 = vmatmul.msk.f32.gmra.mxu1 %vm222_vm1, %v4914_v12 }
 0x43e   : > { %7760 = vmatmul.msk.f32.gmra.mxu3 %vm222_vm1, %v4577_v13  ;;  %v4925_v13 = vld [vmem:[#allocation2 + $0x108] sm:$0xff] }
 0x440   : > { %7793 = vmatmul.msk.f32.gmra.mxu0 %vm222_vm1, %v4917_v56 }
 0x444   : > { %7728 = vmatmul.msk.f32.gmra.mxu2 %vm222_vm1, %v4238_v11 }
 0x445   : > { %7694 = vmatmul.msk.f32.gmra.mxu1 %vm222_vm1, %v4915_v59 }
 0x446   : > { %7761 = vmatmul.msk.f32.gmra.mxu3 %vm222_vm1, %v4578_v41 }
 0x448   : > { %7794 = vmatmul.msk.f32.gmra.mxu0 %vm222_vm1, %v4918_v48 }
 0x44c   : > { %7729 = vmatmul.msk.f32.gmra.mxu2 %vm222_vm1, %v4239_v50 }
 0x44d   : > { %7695 = vmatmul.msk.f32.gmra.mxu1 %vm222_vm1, %v4916_v58 }
 0x44e   : > { %7762 = vmatmul.msk.f32.gmra.mxu3 %vm222_vm1, %v4579_v54  ;;  %v4246_v54 = vld [vmem:[#allocation2 + $0xf9] sm:$0xff] }
 0x450   : > { %7795 = vmatmul.msk.f32.gmra.mxu0 %vm222_vm1, %v4919_v63 }
 0x454   : > { %7730 = vmatmul.msk.f32.gmra.mxu2 %vm222_vm1, %v4240_v10  ;;  %v4586_v10 = vld [vmem:[#allocation2 + $0xfa] sm:$0xff] }
 0x455   : > { %7696 = vmatmul.msk.f32.gmra.mxu1 %vm222_vm1, %v4917_v56 }
 0x456   : > { %7763 = vmatmul.msk.f32.gmra.mxu3 %vm222_vm1, %v4580_v32 }
 0x458   : > { %7796 = vmatmul.msk.f32.gmra.mxu0 %vm222_vm1, %v4920_v5 }
 0x45c   : > { %7731 = vmatmul.msk.f32.gmra.mxu2 %vm222_vm1, %v4241_v51 }
 0x45d   : > { %7697 = vmatmul.msk.f32.gmra.mxu1 %vm222_vm1, %v4918_v48  ;;  %v9630_v55 = vpop.f32.mrf.mxu0 }
 0x45e   : > { %7764 = vmatmul.msk.f32.gmra.mxu3 %vm222_vm1, %v4581_v36 }
 0x45f   : > { %v4405_v1 = vpop.f32.mrf.mxu2 }
 0x460   : > { %7797 = vmatmul.msk.f32.gmra.mxu0 %vm222_vm1, %v4921_v25 }
 0x461   : > { %v4745_v53 = vpop.f32.mrf.mxu3 }
 0x462   : > { %v4065_v24 = vpop.f32.mrf.mxu1 }
 0x463   : > { %v4161_v2 = vadd.f32 %v4065_v24, %v3917_v17  ;;  %v4926_v17 = vld [vmem:[#allocation2 + $0x110] sm:$0xff] }
 0x464   : > { %7732 = vmatmul.msk.f32.gmra.mxu2 %vm222_vm1, %v4242_v31 }
 0x465   : > { %4193 = vst.msk [vmem:[#allocation3] sm:$0xff] %vm222_vm1, %v4161_v2  ;;  %7698 = vmatmul.msk.f32.gmra.mxu1 %vm222_vm1, %v4919_v63  ;;  %v9637_v47 = vpop.f32.mrf.mxu0 }
 0x466   : > { %7765 = vmatmul.msk.f32.gmra.mxu3 %vm222_vm1, %v4582_v6  ;;  %v4247_v6 = vld [vmem:[#allocation2 + $0x109] sm:$0xff] }
 0x467   : > { %v4408_v8 = vpop.f32.mrf.mxu2 }
 0x468   : > { %7798 = vmatmul.msk.f32.gmra.mxu0 %vm222_vm1, %v4922_v16 }
 0x469   : > { %v4748_v35 = vpop.f32.mrf.mxu3 }
 0x46a   : > { %v4068_v14 = vpop.f32.mrf.mxu1 }
 0x46b   : > { %v4162_v42 = vadd.f32 %v4068_v14, %v3918_v60  ;;  %v4587_v60 = vld [vmem:[#allocation2 + $0x10a] sm:$0xff] }
 0x46c   : > { %v4257_v62 = vld [vmem:[#allocation3] sm:$0xff]  ;;  %7733 = vmatmul.msk.f32.gmra.mxu2 %vm222_vm1, %v4243_v29  ;;  %v4927_v29 = vld [vmem:[#allocation2 + $0x120] sm:$0xff] }
 0x46d   : > { %v4501_v18 = vadd.f32 %v4405_v1, %v4257_v62  ;;  %4194 = vst.msk [vmem:[#allocation3 + $0x8] sm:$0xff] %vm222_vm1, %v4162_v42  ;;  %7699 = vmatmul.msk.f32.gmra.mxu1 %vm222_vm1, %v4920_v5  ;;  %v9644_v20 = vpop.f32.mrf.mxu0  ;;  %v3922_v1 = vld [vmem:[#allocation3 + $0x28] sm:$0xff]  ;;  %v3923_v62 = vld [vmem:[#allocation3 + $0x30] sm:$0xff] }
 0x46e   : > { %7766 = vmatmul.msk.f32.gmra.mxu3 %vm222_vm1, %v4583_v45 }
 0x46f   : > { %4533 = vst.msk [vmem:[#allocation3] sm:$0xff] %vm222_vm1, %v4501_v18  ;;  %v4411_v61 = vpop.f32.mrf.mxu2 }
 0x470   : > { %7799 = vmatmul.msk.f32.gmra.mxu0 %vm222_vm1, %v4923_v21 }
 0x471   : > { %v4751_v15 = vpop.f32.mrf.mxu3 }
 0x472   : > { %v4071_v22 = vpop.f32.mrf.mxu1 }
 0x473   : > { %v4163_v23 = vadd.f32 %v4071_v22, %v3919_v19 }
 0x474   : > { %v4258_v40 = vld [vmem:[#allocation3 + $0x8] sm:$0xff]  ;;  %7734 = vmatmul.msk.f32.gmra.mxu2 %vm222_vm1, %v4244_v57 }
 0x475   : > { %v4502_v27 = vadd.f32 %v4408_v8, %v4258_v40  ;;  %4195 = vst.msk [vmem:[#allocation3 + $0x10] sm:$0xff] %vm222_vm1, %v4163_v23  ;;  %7700 = vmatmul.msk.f32.gmra.mxu1 %vm222_vm1, %v4921_v25  ;;  %v9652_v9 = vpop.f32.mrf.mxu0  ;;  %v4588_v23 = vld [vmem:[#allocation2 + $0x112] sm:$0xff] }
 0x476   : > { %v4597_v33 = vld [vmem:[#allocation3] sm:$0xff]  ;;  %7767 = vmatmul.msk.f32.gmra.mxu3 %vm222_vm1, %v4584_v28 }
 0x477   : > { %v4841_v46 = vadd.f32 %v4745_v53, %v4597_v33  ;;  %4534 = vst.msk [vmem:[#allocation3 + $0x8] sm:$0xff] %vm222_vm1, %v4502_v27  ;;  %v4414_v43 = vpop.f32.mrf.mxu2  ;;  %v3924_v33 = vld [vmem:[#allocation3 + $0x38] sm:$0xff] }
 0x478   : > { %7800 = vmatmul.msk.f32.gmra.mxu0 %vm222_vm1, %v4924_v7 }
 0x479   : > { %4873 = vst.msk [vmem:[#allocation3] sm:$0xff] %vm222_vm1, %v4841_v46  ;;  %v4754_v0 = vpop.f32.mrf.mxu3  ;;  %v4928_v46 = vld [vmem:[#allocation2 + $0x128] sm:$0xff] }
 0x47a   : > { %v4074_v38 = vpop.f32.mrf.mxu1 }
 0x47b   : > { %v4164_v4 = vadd.f32 %v4074_v38, %v3920_v3 }
 0x47c   : > { %v4259_v30 = vld [vmem:[#allocation3 + $0x10] sm:$0xff]  ;;  %7735 = vmatmul.msk.f32.gmra.mxu2 %vm222_vm1, %v4245_v34 }
 0x47d   : > { %v4503_v12 = vadd.f32 %v4411_v61, %v4259_v30  ;;  %4196 = vst.msk [vmem:[#allocation3 + $0x18] sm:$0xff] %vm222_vm1, %v4164_v4  ;;  %7701 = vmatmul.msk.f32.gmra.mxu1 %vm222_vm1, %v4922_v16  ;;  %v9661_v59 = vpop.f32.mrf.mxu0  ;;  %v4249_v4 = vld [vmem:[#allocation2 + $0x121] sm:$0xff] }
 0x47e   : > { %v4598_v26 = vld [vmem:[#allocation3 + $0x8] sm:$0xff]  ;;  %7768 = vmatmul.msk.f32.gmra.mxu3 %vm222_vm1, %v4585_v39  ;;  %v4589_v34 = vld [vmem:[#allocation2 + $0x122] sm:$0xff] }
 0x47f   : > { %v4842_v44 = vadd.f32 %v4748_v35, %v4598_v26  ;;  %4535 = vst.msk [vmem:[#allocation3 + $0x10] sm:$0xff] %vm222_vm1, %v4503_v12  ;;  %v4417_v58 = vpop.f32.mrf.mxu2 }
 0x480   : > { %v4937_v52 = vld [vmem:[#allocation3] sm:$0xff]  ;;  %7801 = vmatmul.msk.f32.gmra.mxu0 %vm222_vm1, %v4925_v13 }
 0x481   : > { %v5181_v56 = vadd.f32 %v9630_v55, %v4937_v52  ;;  %4874 = vst.msk [vmem:[#allocation3 + $0x8] sm:$0xff] %vm222_vm1, %v4842_v44  ;;  %v4757_v11 = vpop.f32.mrf.mxu3  ;;  %v3925_v52 = vld [vmem:[#allocation3 + $0x40] sm:$0xff] }
 0x482   : > { %v4077_v41 = vpop.f32.mrf.mxu1 }
 0x483   : > { %5213 = vst.msk [vmem:[#allocation3] sm:$0xff] %vm222_vm1, %v5181_v56  ;;  %v4165_v48 = vadd.f32 %v4077_v41, %v3921_v49 }
 0x484   : > { %v4260_v50 = vld [vmem:[#allocation3 + $0x18] sm:$0xff]  ;;  %7736 = vmatmul.msk.f32.gmra.mxu2 %vm222_vm1, %v4246_v54 }
 0x485   : > { %v4504_v63 = vadd.f32 %v4414_v43, %v4260_v50  ;;  %4197 = vst.msk [vmem:[#allocation3 + $0x20] sm:$0xff] %vm222_vm1, %v4165_v48  ;;  %7702 = vmatmul.msk.f32.gmra.mxu1 %vm222_vm1, %v4923_v21  ;;  %v9672_v5 = vpop.f32.mrf.mxu0  ;;  %v4250_v48 = vld [vmem:[#allocation2 + $0x129] sm:$0xff] }
 0x486   : > { %v4599_v32 = vld [vmem:[#allocation3 + $0x10] sm:$0xff]  ;;  %7769 = vmatmul.msk.f32.gmra.mxu3 %vm222_vm1, %v4586_v10  ;;  %v4590_v54 = vld [vmem:[#allocation2 + $0x12a] sm:$0xff] }
 0x487   : > { %v4843_v51 = vadd.f32 %v4751_v15, %v4599_v32  ;;  %4536 = vst.msk [vmem:[#allocation3 + $0x18] sm:$0xff] %vm222_vm1, %v4504_v63  ;;  %v4420_v55 = vpop.f32.mrf.mxu2  ;;  %v4248_v15 = vld [vmem:[#allocation2 + $0x111] sm:$0xff] }
 0x488   : > { %v4938_v36 = vld [vmem:[#allocation3 + $0x8] sm:$0xff]  ;;  %7802 = vmatmul.msk.f32.gmra.mxu0 %vm222_vm1, %v4926_v17 }
 0x489   : > { %v5182_v25 = vadd.f32 %v9637_v47, %v4938_v36  ;;  %4875 = vst.msk [vmem:[#allocation3 + $0x10] sm:$0xff] %vm222_vm1, %v4843_v51  ;;  %v4760_v53 = vpop.f32.mrf.mxu3  ;;  %v3926_v36 = vld [vmem:[#allocation3 + $0x48] sm:$0xff] }
 0x48a   : > { %v4080_v24 = vpop.f32.mrf.mxu1 }
 0x48b   : > { %5214 = vst.msk [vmem:[#allocation3 + $0x8] sm:$0xff] %vm222_vm1, %v5182_v25  ;;  %v4166_v2 = vadd.f32 %v4080_v24, %v3922_v1 }
 0x48c   : > { %v4261_v31 = vld [vmem:[#allocation3 + $0x20] sm:$0xff]  ;;  %7737 = vmatmul.msk.f32.gmra.mxu2 %vm222_vm1, %v4247_v6 }
 0x48d   : > { %v4505_v8 = vadd.f32 %v4417_v58, %v4261_v31  ;;  %4198 = vst.msk [vmem:[#allocation3 + $0x28] sm:$0xff] %vm222_vm1, %v4166_v2  ;;  %7703 = vmatmul.msk.f32.gmra.mxu1 %vm222_vm1, %v4924_v7  ;;  %v9683_v16 = vpop.f32.mrf.mxu0  ;;  %v4929_v58 = vld [vmem:[#allocation2 + $0x138] sm:$0xff] }
 0x48e   : > { %v4600_v47 = vld [vmem:[#allocation3 + $0x18] sm:$0xff]  ;;  %7770 = vmatmul.msk.f32.gmra.mxu3 %vm222_vm1, %v4587_v60  ;;  %v4251_v2 = vld [vmem:[#allocation2 + $0x139] sm:$0xff] }
 0x48f   : > { %v4844_v35 = vadd.f32 %v4754_v0, %v4600_v47  ;;  %4537 = vst.msk [vmem:[#allocation3 + $0x20] sm:$0xff] %vm222_vm1, %v4505_v8  ;;  %v4423_v42 = vpop.f32.mrf.mxu2 }
 0x490   : > { %v4939_v14 = vld [vmem:[#allocation3 + $0x10] sm:$0xff]  ;;  %7803 = vmatmul.msk.f32.gmra.mxu0 %vm222_vm1, %v4927_v29 }
 0x491   : > { %v5183_v18 = vadd.f32 %v9644_v20, %v4939_v14  ;;  %4876 = vst.msk [vmem:[#allocation3 + $0x18] sm:$0xff] %vm222_vm1, %v4844_v35  ;;  %v4763_v45 = vpop.f32.mrf.mxu3  ;;  %v3927_v14 = vld [vmem:[#allocation3 + $0x50] sm:$0xff] }
 0x492   : > { %v4083_v61 = vpop.f32.mrf.mxu1 }
 0x493   : > { %5215 = vst.msk [vmem:[#allocation3 + $0x10] sm:$0xff] %vm222_vm1, %v5183_v18  ;;  %v4167_v19 = vadd.f32 %v4083_v61, %v3923_v62 }
 0x494   : > { %v4262_v21 = vld [vmem:[#allocation3 + $0x28] sm:$0xff]  ;;  %7738 = vmatmul.msk.f32.gmra.mxu2 %vm222_vm1, %v4248_v15 }
 0x495   : > { %v4506_v22 = vadd.f32 %v4420_v55, %v4262_v21  ;;  %4199 = vst.msk [vmem:[#allocation3 + $0x30] sm:$0xff] %vm222_vm1, %v4167_v19  ;;  %7704 = vmatmul.msk.f32.gmra.mxu1 %vm222_vm1, %v4925_v13  ;;  %v9694_v40 = vpop.f32.mrf.mxu0  ;;  %v4930_v55 = vld [vmem:[#allocation2 + $0x140] sm:$0xff] }
 0x496   : > { %v4601_v20 = vld [vmem:[#allocation3 + $0x20] sm:$0xff]  ;;  %7771 = vmatmul.msk.f32.gmra.mxu3 %vm222_vm1, %v4588_v23  ;;  %v4252_v19 = vld [vmem:[#allocation2 + $0x141] sm:$0xff] }
 0x497   : > { %v4845_v57 = vadd.f32 %v4757_v11, %v4601_v20  ;;  %4538 = vst.msk [vmem:[#allocation3 + $0x28] sm:$0xff] %vm222_vm1, %v4506_v22  ;;  %v4426_v28 = vpop.f32.mrf.mxu2 }
 0x498   : > { %v4940_v27 = vld [vmem:[#allocation3 + $0x18] sm:$0xff]  ;;  %7804 = vmatmul.msk.f32.gmra.mxu0 %vm222_vm1, %v4928_v46 }
 0x499   : > { %v5184_v43 = vadd.f32 %v9652_v9, %v4940_v27  ;;  %4877 = vst.msk [vmem:[#allocation3 + $0x20] sm:$0xff] %vm222_vm1, %v4845_v57  ;;  %v4766_v3 = vpop.f32.mrf.mxu3  ;;  %v3928_v27 = vld [vmem:[#allocation3 + $0x58] sm:$0xff] }
 0x49a   : > { %v4086_v7 = vpop.f32.mrf.mxu1 }
 0x49b   : > { %5216 = vst.msk [vmem:[#allocation3 + $0x18] sm:$0xff] %vm222_vm1, %v5184_v43  ;;  %v4168_v0 = vadd.f32 %v4086_v7, %v3924_v33  ;;  %v217_v7 = vld [vmem:[%s10880_s2 + $0x14] sm:$0xf] }
 0x49c   : > { %v4263_v38 = vld [vmem:[#allocation3 + $0x30] sm:$0xff]  ;;  %7739 = vmatmul.msk.f32.gmra.mxu2 %vm222_vm1, %v4249_v4 }
 0x49d   : > { %v4507_v30 = vadd.f32 %v4423_v42, %v4263_v38  ;;  %4200 = vst.msk [vmem:[#allocation3 + $0x38] sm:$0xff] %vm222_vm1, %v4168_v0  ;;  %7705 = vmatmul.msk.f32.gmra.mxu1 %vm222_vm1, %v4926_v17  ;;  %v9705_v12 = vpop.f32.mrf.mxu0  ;;  %v4931_v42 = vld [vmem:[#allocation2 + $0x150] sm:$0xff]  ;;  %7846 = vmatpush.msk.msra.mxu2 %vm525_vm0, %v217_v7  ;;  %v219_v7 = vld [vmem:[%s10880_s2 + $0x1c] sm:$0xf] }
 0x49e   : > { %v4602_v9 = vld [vmem:[#allocation3 + $0x28] sm:$0xff]  ;;  %7772 = vmatmul.msk.f32.gmra.mxu3 %vm222_vm1, %v4589_v34  ;;  %7912 = vmatpush.msk.msra.mxu0 %vm525_vm0, %v219_v7 }
 0x49f   : > { %v4846_v39 = vadd.f32 %v4760_v53, %v4602_v9  ;;  %4539 = vst.msk [vmem:[#allocation3 + $0x30] sm:$0xff] %vm222_vm1, %v4507_v30  ;;  %v4429_v44 = vpop.f32.mrf.mxu2  ;;  %v4253_v38 = vld [vmem:[#allocation2 + $0x151] sm:$0xff] }
 0x4a0   : > { %v4941_v26 = vld [vmem:[#allocation3 + $0x20] sm:$0xff]  ;;  %7805 = vmatmul.msk.f32.gmra.mxu0 %vm222_vm1, %v4929_v58 }
 0x4a1   : > { %v5185_v49 = vadd.f32 %v9661_v59, %v4941_v26  ;;  %4878 = vst.msk [vmem:[#allocation3 + $0x28] sm:$0xff] %vm222_vm1, %v4846_v39  ;;  %v4769_v13 = vpop.f32.mrf.mxu3 }
 0x4a2   : > { %v4089_v56 = vpop.f32.mrf.mxu1 }
 0x4a3   : > { %5217 = vst.msk [vmem:[#allocation3 + $0x20] sm:$0xff] %vm222_vm1, %v5185_v49  ;;  %v4169_v11 = vadd.f32 %v4089_v56, %v3925_v52  ;;  %v4933_v52 = vld [vmem:[#allocation2 + $0x168] sm:$0xff] }
 0x4a4   : > { %v4264_v41 = vld [vmem:[#allocation3 + $0x38] sm:$0xff]  ;;  %7740 = vmatmul.msk.f32.gmra.mxu2 %vm222_vm1, %v4250_v48 }
 0x4a5   : > { %v4508_v50 = vadd.f32 %v4426_v28, %v4264_v41  ;;  %4201 = vst.msk [vmem:[#allocation3 + $0x40] sm:$0xff] %vm222_vm1, %v4169_v11  ;;  %7706 = vmatmul.msk.f32.gmra.mxu1 %vm222_vm1, %v4927_v29  ;;  %v9716_v63 = vpop.f32.mrf.mxu0  ;;  %v4932_v28 = vld [vmem:[#allocation2 + $0x158] sm:$0xff] }
 0x4a6   : > { %v4603_v59 = vld [vmem:[#allocation3 + $0x30] sm:$0xff]  ;;  %7773 = vmatmul.msk.f32.gmra.mxu3 %vm222_vm1, %v4590_v54 }
 0x4a7   : > { %v4847_v10 = vadd.f32 %v4763_v45, %v4603_v59  ;;  %4540 = vst.msk [vmem:[#allocation3 + $0x38] sm:$0xff] %vm222_vm1, %v4508_v50  ;;  %v4432_v51 = vpop.f32.mrf.mxu2  ;;  %v4254_v41 = vld [vmem:[#allocation2 + $0x159] sm:$0xff] }
 0x4a8   : > { %v4942_v32 = vld [vmem:[#allocation3 + $0x28] sm:$0xff]  ;;  %7806 = vmatmul.msk.f32.gmra.mxu0 %vm222_vm1, %v4930_v55 }
 0x4a9   : > { %v5186_v1 = vadd.f32 %v9672_v5, %v4942_v32  ;;  %4879 = vst.msk [vmem:[#allocation3 + $0x30] sm:$0xff] %vm222_vm1, %v4847_v10  ;;  %v9721_v17 = vpop.f32.mrf.mxu3  ;;  %v4591_v5 = vld [vmem:[#allocation2 + $0x13a] sm:$0xff] }
 0x4aa   : > { %v4092_v25 = vpop.f32.mrf.mxu1 }
 0x4ab   : > { %5218 = vst.msk [vmem:[#allocation3 + $0x28] sm:$0xff] %vm222_vm1, %v5186_v1  ;;  %v4170_v53 = vadd.f32 %v4092_v25, %v3926_v36  ;;  %v4934_v36 = vld [vmem:[#allocation2 + $0x170] sm:$0xff] }
 0x4ac   : > { %v4265_v24 = vld [vmem:[#allocation3 + $0x40] sm:$0xff]  ;;  %7741 = vmatmul.msk.f32.gmra.mxu2 %vm222_vm1, %v4251_v2 }
 0x4ad   : > { %v4509_v31 = vadd.f32 %v4429_v44, %v4265_v24  ;;  %4202 = vst.msk [vmem:[#allocation3 + $0x48] sm:$0xff] %vm222_vm1, %v4170_v53  ;;  %7707 = vmatmul.msk.f32.gmra.mxu1 %vm222_vm1, %v4928_v46  ;;  %v9729_v8 = vpop.f32.mrf.mxu0  ;;  %v3929_v44 = vld [vmem:[#allocation3 + $0x60] sm:$0xff]  ;;  %v218_v53 = vld [vmem:[%s10880_s2 + $0x18] sm:$0xf] }
 0x4ae   : > { %v4604_v6 = vld [vmem:[#allocation3 + $0x38] sm:$0xff]  ;;  %7774 = vmatmul.msk.f32.gmra.mxu3 %vm222_vm1, %v4591_v5 }
 0x4af   : > { %v4848_v60 = vadd.f32 %v4766_v3, %v4604_v6  ;;  %4541 = vst.msk [vmem:[#allocation3 + $0x40] sm:$0xff] %vm222_vm1, %v4509_v31  ;;  %v4435_v35 = vpop.f32.mrf.mxu2  ;;  %7879 = vmatpush.msk.msra.mxu3 %vm525_vm0, %v218_v53  ;;  %v4255_v2 = vld [vmem:[#allocation2 + $0x169] sm:$0xff] }
 0x4b0   : > { %v4943_v47 = vld [vmem:[#allocation3 + $0x30] sm:$0xff]  ;;  %7807 = vmatmul.msk.f32.gmra.mxu0 %vm222_vm1, %v4931_v42 }
 0x4b1   : > { %v5187_v62 = vadd.f32 %v9683_v16, %v4943_v47  ;;  %4880 = vst.msk [vmem:[#allocation3 + $0x38] sm:$0xff] %vm222_vm1, %v4848_v60  ;;  %v9734_v29 = vpop.f32.mrf.mxu3  ;;  %v4592_v16 = vld [vmem:[#allocation2 + $0x142] sm:$0xff] }
 0x4b2   : > { %v4095_v18 = vpop.f32.mrf.mxu1 }
 0x4b3   : > { %5219 = vst.msk [vmem:[#allocation3 + $0x30] sm:$0xff] %vm222_vm1, %v5187_v62  ;;  %v4171_v45 = vadd.f32 %v4095_v18, %v3927_v14  ;;  %v3931_v14 = vld [vmem:[#allocation3 + $0x70] sm:$0xff] }
 0x4b4   : > { %v4266_v61 = vld [vmem:[#allocation3 + $0x48] sm:$0xff]  ;;  %7742 = vmatmul.msk.f32.gmra.mxu2 %vm222_vm1, %v4252_v19 }
 0x4b5   : > { %v4510_v21 = vadd.f32 %v4432_v51, %v4266_v61  ;;  %4203 = vst.msk [vmem:[#allocation3 + $0x50] sm:$0xff] %vm222_vm1, %v4171_v45  ;;  %7708 = vmatmul.msk.f32.gmra.mxu1 %vm222_vm1, %v4929_v58  ;;  %v9742_v22 = vpop.f32.mrf.mxu0  ;;  %v3930_v51 = vld [vmem:[#allocation3 + $0x68] sm:$0xff] }
 0x4b6   : > { %v4605_v15 = vld [vmem:[#allocation3 + $0x40] sm:$0xff]  ;;  %7775 = vmatmul.msk.f32.gmra.mxu3 %vm222_vm1, %v4592_v16 }
 0x4b7   : > { %v4849_v23 = vadd.f32 %v4769_v13, %v4605_v15  ;;  %4542 = vst.msk [vmem:[#allocation3 + $0x48] sm:$0xff] %vm222_vm1, %v4510_v21  ;;  %v4438_v57 = vpop.f32.mrf.mxu2  ;;  %v4256_v19 = vld [vmem:[#allocation2 + $0x171] sm:$0xff] }
 0x4b8   : > { %v4944_v20 = vld [vmem:[#allocation3 + $0x38] sm:$0xff]  ;;  %7808 = vmatmul.msk.f32.gmra.mxu0 %vm222_vm1, %v4932_v28 }
 0x4b9   : > { %v5188_v33 = vadd.f32 %v9694_v40, %v4944_v20  ;;  %4881 = vst.msk [vmem:[#allocation3 + $0x40] sm:$0xff] %vm222_vm1, %v4849_v23  ;;  %v9747_v46 = vpop.f32.mrf.mxu3  ;;  %v4593_v40 = vld [vmem:[#allocation2 + $0x152] sm:$0xff] }
 0x4ba   : > { %v4098_v43 = vpop.f32.mrf.mxu1 }
 0x4bb   : > { %5220 = vst.msk [vmem:[#allocation3 + $0x38] sm:$0xff] %vm222_vm1, %v5188_v33  ;;  %v4172_v3 = vadd.f32 %v4098_v43, %v3928_v27  ;;  %v3932_v27 = vld [vmem:[#allocation3 + $0x78] sm:$0xff] }
 0x4bc   : > { %v4267_v0 = vld [vmem:[#allocation3 + $0x50] sm:$0xff]  ;;  %7743 = vmatmul.msk.f32.gmra.mxu2 %vm222_vm1, %v4253_v38 }
 0x4bd   : > { %v4511_v4 = vadd.f32 %v4435_v35, %v4267_v0  ;;  %4204 = vst.msk [vmem:[#allocation3 + $0x58] sm:$0xff] %vm222_vm1, %v4172_v3  ;;  %7709 = vmatmul.msk.f32.gmra.mxu1 %vm222_vm1, %v4930_v55  ;;  %v9759_v34 = vpop.f32.mrf.mxu0  ;;  %v5585_v38 = vld [vmem:[#allocation2 + $0x1a] sm:$0xff] }
 0x4be   : > { %v4606_v30 = vld [vmem:[#allocation3 + $0x48] sm:$0xff]  ;;  %7776 = vmatmul.msk.f32.gmra.mxu3 %vm222_vm1, %v4593_v40 }
 0x4bf   : > { %v4850_v9 = vadd.f32 %v9721_v17, %v4606_v30  ;;  %4543 = vst.msk [vmem:[#allocation3 + $0x50] sm:$0xff] %vm222_vm1, %v4511_v4  ;;  %v4441_v26 = vpop.f32.mrf.mxu2 }
 0x4c0   : > { %v4945_v39 = vld [vmem:[#allocation3 + $0x40] sm:$0xff]  ;;  %7809 = vmatmul.msk.f32.gmra.mxu0 %vm222_vm1, %v4933_v52 }
 0x4c1   : > { %v5189_v58 = vadd.f32 %v9705_v12, %v4945_v39  ;;  %4882 = vst.msk [vmem:[#allocation3 + $0x48] sm:$0xff] %vm222_vm1, %v4850_v9  ;;  %v9765_v49 = vpop.f32.mrf.mxu3  ;;  %v4594_v12 = vld [vmem:[#allocation2 + $0x15a] sm:$0xff] }
 0x4c2   : > { %v4101_v13 = vpop.f32.mrf.mxu1 }
 0x4c3   : > { %5221 = vst.msk [vmem:[#allocation3 + $0x40] sm:$0xff] %vm222_vm1, %v5189_v58  ;;  %v4173_v56 = vadd.f32 %v4101_v13, %v3929_v44  ;;  %v3933_v44 = vld [vmem:[#allocation3 + $0x80] sm:$0xff] }
 0x4c4   : > { %v4268_v11 = vld [vmem:[#allocation3 + $0x58] sm:$0xff]  ;;  %7744 = vmatmul.msk.f32.gmra.mxu2 %vm222_vm1, %v4254_v41 }
 0x4c5   : > { %v4512_v48 = vadd.f32 %v4438_v57, %v4268_v11  ;;  %4205 = vst.msk [vmem:[#allocation3 + $0x60] sm:$0xff] %vm222_vm1, %v4173_v56  ;;  %7710 = vmatmul.msk.f32.gmra.mxu1 %vm222_vm1, %v4931_v42  ;;  %v9773_v54 = vpop.f32.mrf.mxu0  ;;  %v4935_v42 = vld [vmem:[#allocation2 + $0x180] sm:$0xff] }
 0x4c6   : > { %v4607_v50 = vld [vmem:[#allocation3 + $0x50] sm:$0xff]  ;;  %7777 = vmatmul.msk.f32.gmra.mxu3 %vm222_vm1, %v4594_v12 }
 0x4c7   : > { %v4851_v59 = vadd.f32 %v9734_v29, %v4607_v50  ;;  %4544 = vst.msk [vmem:[#allocation3 + $0x58] sm:$0xff] %vm222_vm1, %v4512_v48  ;;  %v4444_v32 = vpop.f32.mrf.mxu2  ;;  %v220_v11 = vld [vmem:[%s10880_s2 + $0x20] sm:$0xf]  ;;  %v5926_v50 = vld [vmem:[#allocation2 + $0x38] sm:$0xff] }
 0x4c8   : > { %v4946_v10 = vld [vmem:[#allocation3 + $0x48] sm:$0xff]  ;;  %7810 = vmatmul.msk.f32.gmra.mxu0 %vm222_vm1, %v4934_v36  ;;  %v5586_v12 = vld [vmem:[#allocation2 + $0x22] sm:$0xff]  ;;  %7945 = vmatpush.msk.msra.mxu1 %vm525_vm0, %v220_v11 }
 0x4c9   : > { %v5190_v55 = vadd.f32 %v9716_v63, %v4946_v10  ;;  %4883 = vst.msk [vmem:[#allocation3 + $0x50] sm:$0xff] %vm222_vm1, %v4851_v59  ;;  %v9779_v1 = vpop.f32.mrf.mxu3  ;;  %v4595_v63 = vld [vmem:[#allocation2 + $0x16a] sm:$0xff]  ;;  %v5245_v48 = vld [vmem:[#allocation2 + $0x19] sm:$0xff] }
 0x4ca   : > { %v4104_v17 = vpop.f32.mrf.mxu1 }
 0x4cb   : > { %5222 = vst.msk [vmem:[#allocation3 + $0x48] sm:$0xff] %vm222_vm1, %v5190_v55  ;;  %v4174_v25 = vadd.f32 %v4104_v17, %v3930_v51  ;;  %v3934_v55 = vld [vmem:[#allocation3 + $0x88] sm:$0xff] }
 0x4cc   : > { %v4269_v24 = vld [vmem:[#allocation3 + $0x60] sm:$0xff]  ;;  %7745 = vmatmul.msk.f32.gmra.mxu2 %vm222_vm1, %v4255_v2 }
 0x4cd   : > { %v4513_v31 = vadd.f32 %v4441_v26, %v4269_v24  ;;  %4206 = vst.msk [vmem:[#allocation3 + $0x68] sm:$0xff] %vm222_vm1, %v4174_v25  ;;  %7711 = vmatmul.msk.f32.gmra.mxu1 %vm222_vm1, %v4932_v28  ;;  %v9791_v6 = vpop.f32.mrf.mxu0  ;;  %v4936_v28 = vld [vmem:[#allocation2 + $0x188] sm:$0xff] }
 0x4ce   : > { %v4608_v5 = vld [vmem:[#allocation3 + $0x58] sm:$0xff]  ;;  %7778 = vmatmul.msk.f32.gmra.mxu3 %vm222_vm1, %v4595_v63  ;;  %v5587_v63 = vld [vmem:[#allocation2 + $0x32] sm:$0xff] }
 0x4cf   : > { %v4852_v60 = vadd.f32 %v9747_v46, %v4608_v5  ;;  %4545 = vst.msk [vmem:[#allocation3 + $0x60] sm:$0xff] %vm222_vm1, %v4513_v31  ;;  %v4447_v35 = vpop.f32.mrf.mxu2  ;;  %v5246_v31 = vld [vmem:[#allocation2 + $0x21] sm:$0xff] }
 0x4d0   : > { %v4947_v47 = vld [vmem:[#allocation3 + $0x50] sm:$0xff]  ;;  %7811 = vmatmul.msk.f32.gmra.mxu0 %vm222_vm1, %v4935_v42 }
 0x4d1   : > { %v5191_v62 = vadd.f32 %v9729_v8, %v4947_v47  ;;  %4884 = vst.msk [vmem:[#allocation3 + $0x58] sm:$0xff] %vm222_vm1, %v4852_v60  ;;  %v9797_v29 = vpop.f32.mrf.mxu3  ;;  %v4596_v8 = vld [vmem:[#allocation2 + $0x172] sm:$0xff] }
 0x4d2   : > { %v4107_v18 = vpop.f32.mrf.mxu1 }
 0x4d3   : > { %5223 = vst.msk [vmem:[#allocation3 + $0x50] sm:$0xff] %vm222_vm1, %v5191_v62  ;;  %v4175_v45 = vadd.f32 %v4107_v18, %v3931_v14  ;;  %v3935_v62 = vld [vmem:[#allocation3 + $0x90] sm:$0xff] }
 0x4d4   : > { %v4270_v61 = vld [vmem:[#allocation3 + $0x68] sm:$0xff]  ;;  %7746 = vmatmul.msk.f32.gmra.mxu2 %vm222_vm1, %v4256_v19 }
 0x4d5   : > { %v4514_v21 = vadd.f32 %v4444_v32, %v4270_v61  ;;  %4207 = vst.msk [vmem:[#allocation3 + $0x70] sm:$0xff] %vm222_vm1, %v4175_v45  ;;  %7712 = vmatmul.msk.f32.gmra.mxu1 %vm222_vm1, %v4933_v52  ;;  %v9805_v15 = vpop.f32.mrf.mxu0  ;;  %v6265_v52 = vld [vmem:[#allocation2 + $0x31] sm:$0xff] }
 0x4d6   : > { %v4609_v16 = vld [vmem:[#allocation3 + $0x60] sm:$0xff]  ;;  %7779 = vmatmul.msk.f32.gmra.mxu3 %vm222_vm1, %v4596_v8  ;;  %v5588_v8 = vld [vmem:[#allocation2 + $0x3a] sm:$0xff] }
 0x4d7   : > { %v4853_v23 = vadd.f32 %v9765_v49, %v4609_v16  ;;  %4546 = vst.msk [vmem:[#allocation3 + $0x68] sm:$0xff] %vm222_vm1, %v4514_v21  ;;  %v4450_v57 = vpop.f32.mrf.mxu2 }
 0x4d8   : > { %v4948_v20 = vld [vmem:[#allocation3 + $0x58] sm:$0xff]  ;;  %7812 = vmatmul.msk.f32.gmra.mxu0 %vm222_vm1, %v4936_v28 }
 0x4d9   : > { %v5192_v33 = vadd.f32 %v9742_v22, %v4948_v20  ;;  %4885 = vst.msk [vmem:[#allocation3 + $0x60] sm:$0xff] %vm222_vm1, %v4853_v23  ;;  %v9811_v46 = vpop.f32.mrf.mxu3  ;;  %v5925_v22 = vld [vmem:[#allocation2 + $0x30] sm:$0xff] }
 0x4da   : > { %v4110_v43 = vpop.f32.mrf.mxu1  ;;  %v5928_v23 = vld [vmem:[#allocation2 + $0x50] sm:$0xff] }
 0x4db   : > { %5224 = vst.msk [vmem:[#allocation3 + $0x58] sm:$0xff] %vm222_vm1, %v5192_v33  ;;  %v4176_v3 = vadd.f32 %v4110_v43, %v3932_v27  ;;  %v3936_v33 = vld [vmem:[#allocation3 + $0x98] sm:$0xff] }
 0x4dc   : > { %v4271_v0 = vld [vmem:[#allocation3 + $0x70] sm:$0xff]  ;;  %7847 = vmatmul.msk.f32.vlgmr.msra.gmra.mxu2 %vm222_vm1, %v5585_v38 }
 0x4dd   : > { %v4515_v4 = vadd.f32 %v4447_v35, %v4271_v0  ;;  %4208 = vst.msk [vmem:[#allocation3 + $0x78] sm:$0xff] %vm222_vm1, %v4176_v3  ;;  %7713 = vmatmul.msk.f32.gmra.mxu1 %vm222_vm1, %v4934_v36  ;;  %v9823_v30 = vpop.f32.mrf.mxu0 }
 0x4de   : > { %v4610_v40 = vld [vmem:[#allocation3 + $0x68] sm:$0xff]  ;;  %7880 = vmatmul.msk.f32.vlgmr.msra.gmra.mxu3 %vm222_vm1, %v5925_v22 }
 0x4df   : > { %v4854_v9 = vadd.f32 %v9779_v1, %v4610_v40  ;;  %4547 = vst.msk [vmem:[#allocation3 + $0x70] sm:$0xff] %vm222_vm1, %v4515_v4  ;;  %v4453_v26 = vpop.f32.mrf.mxu2  ;;  %v6266_v1 = vld [vmem:[#allocation2 + $0x39] sm:$0xff]  ;;  %v5589_v4 = vld [vmem:[#allocation2 + $0x4a] sm:$0xff] }
 0x4e0   : > { %v4949_v39 = vld [vmem:[#allocation3 + $0x60] sm:$0xff]  ;;  %7913 = vmatmul.msk.f32.vlgmr.msra.gmra.mxu0 %vm222_vm1, %v6265_v52  ;;  %v5929_v40 = vld [vmem:[#allocation2 + $0x60] sm:$0xff] }
 0x4e1   : > { %v5193_v58 = vadd.f32 %v9759_v34, %v4949_v39  ;;  %4886 = vst.msk [vmem:[#allocation3 + $0x68] sm:$0xff] %vm222_vm1, %v4854_v9  ;;  %v9829_v49 = vpop.f32.mrf.mxu3 }
 0x4e2   : > { %v4113_v13 = vpop.f32.mrf.mxu1 }
 0x4e3   : > { %5225 = vst.msk [vmem:[#allocation3 + $0x60] sm:$0xff] %vm222_vm1, %v5193_v58  ;;  %v4177_v56 = vadd.f32 %v4113_v13, %v3933_v44  ;;  %v6269_v58 = vld [vmem:[#allocation2 + $0x61] sm:$0xff] }
 0x4e4   : > { %v4272_v41 = vld [vmem:[#allocation3 + $0x78] sm:$0xff]  ;;  %7848 = vmatmul.msk.f32.gmra.mxu2 %vm222_vm1, %v5586_v12 }
 0x4e5   : > { %v4516_v34 = vadd.f32 %v4450_v57, %v4272_v41  ;;  %4209 = vst.msk [vmem:[#allocation3 + $0x80] sm:$0xff] %vm222_vm1, %v4177_v56  ;;  %7814 = vmatmul.msk.f32.vlgmr.msrb.gmra.mxu1 %vm222_vm1, %v5245_v48  ;;  %v9841_v10 = vpop.f32.mrf.mxu0  ;;  %v5590_v48 = vld [vmem:[#allocation2 + $0x52] sm:$0xff] }
 0x4e6   : > { %v4611_v59 = vld [vmem:[#allocation3 + $0x70] sm:$0xff]  ;;  %7881 = vmatmul.msk.f32.gmra.mxu3 %vm222_vm1, %v5926_v50 }
 0x4e7   : > { %v4855_v32 = vadd.f32 %v9797_v29, %v4611_v59  ;;  %4548 = vst.msk [vmem:[#allocation3 + $0x78] sm:$0xff] %vm222_vm1, %v4516_v34  ;;  %v4456_v36 = vpop.f32.mrf.mxu2  ;;  %v6267_v29 = vld [vmem:[#allocation2 + $0x49] sm:$0xff] }
 0x4e8   : > { %v4950_v51 = vld [vmem:[#allocation3 + $0x68] sm:$0xff]  ;;  %7914 = vmatmul.msk.f32.gmra.mxu0 %vm222_vm1, %v6266_v1  ;;  %v5930_v34 = vld [vmem:[#allocation2 + $0x68] sm:$0xff] }
 0x4e9   : > { %v5194_v17 = vadd.f32 %v9773_v54, %v4950_v51  ;;  %4887 = vst.msk [vmem:[#allocation3 + $0x70] sm:$0xff] %vm222_vm1, %v4855_v32  ;;  %v4796_v25 = vpop.f32.mrf.mxu3  ;;  %v5927_v54 = vld [vmem:[#allocation2 + $0x48] sm:$0xff] }
 0x4ea   : > { %v4116_v53 = vpop.f32.mrf.mxu1 }
 0x4eb   : > { %5226 = vst.msk [vmem:[#allocation3 + $0x68] sm:$0xff] %vm222_vm1, %v5194_v17  ;;  %v4178_v24 = vadd.f32 %v4116_v53, %v3934_v55  ;;  %v6270_v55 = vld [vmem:[#allocation2 + $0x69] sm:$0xff] }
 0x4ec   : > { %v4273_v2 = vld [vmem:[#allocation3 + $0x80] sm:$0xff]  ;;  %7849 = vmatmul.msk.f32.gmra.mxu2 %vm222_vm1, %v5587_v63  ;;  %v5931_v63 = vld [vmem:[#allocation2 + $0x78] sm:$0xff] }
 0x4ed   : > { %v4517_v5 = vadd.f32 %v4453_v26, %v4273_v2  ;;  %4210 = vst.msk [vmem:[#allocation3 + $0x88] sm:$0xff] %vm222_vm1, %v4178_v24  ;;  %7815 = vmatmul.msk.f32.gmra.mxu1 %vm222_vm1, %v5246_v31  ;;  %v9853_v47 = vpop.f32.mrf.mxu0  ;;  %v5591_v2 = vld [vmem:[#allocation2 + $0x62] sm:$0xff] }
 0x4ee   : > { %v4612_v60 = vld [vmem:[#allocation3 + $0x78] sm:$0xff]  ;;  %7882 = vmatmul.msk.f32.gmra.mxu3 %vm222_vm1, %v5927_v54 }
 0x4ef   : > { %v4856_v35 = vadd.f32 %v9811_v46, %v4612_v60  ;;  %4549 = vst.msk [vmem:[#allocation3 + $0x80] sm:$0xff] %vm222_vm1, %v4517_v5  ;;  %v4459_v42 = vpop.f32.mrf.mxu2  ;;  %v6268_v46 = vld [vmem:[#allocation2 + $0x51] sm:$0xff] }
 0x4f0   : > { %v4951_v14 = vld [vmem:[#allocation3 + $0x70] sm:$0xff]  ;;  %7915 = vmatmul.msk.f32.gmra.mxu0 %vm222_vm1, %v6267_v29 }
 0x4f1   : > { %v5195_v18 = vadd.f32 %v9791_v6, %v4951_v14  ;;  %4888 = vst.msk [vmem:[#allocation3 + $0x78] sm:$0xff] %vm222_vm1, %v4856_v35  ;;  %v4799_v45 = vpop.f32.mrf.mxu3  ;;  %v3939_v14 = vld [vmem:[#allocation3 + $0xb0] sm:$0xff] }
 0x4f2   : > { %v4119_v61 = vpop.f32.mrf.mxu1 }
 0x4f3   : > { %5227 = vst.msk [vmem:[#allocation3 + $0x70] sm:$0xff] %vm222_vm1, %v5195_v18  ;;  %v4179_v19 = vadd.f32 %v4119_v61, %v3935_v62 }
 0x4f4   : > { %v4274_v21 = vld [vmem:[#allocation3 + $0x88] sm:$0xff]  ;;  %7850 = vmatmul.msk.f32.gmra.mxu2 %vm222_vm1, %v5588_v8  ;;  %v5932_v8 = vld [vmem:[#allocation2 + $0x80] sm:$0xff] }
 0x4f5   : > { %v4518_v16 = vadd.f32 %v4456_v36, %v4274_v21  ;;  %4211 = vst.msk [vmem:[#allocation3 + $0x90] sm:$0xff] %vm222_vm1, %v4179_v19  ;;  %7816 = vmatmul.msk.f32.gmra.mxu1 %vm222_vm1, %v6265_v52  ;;  %v9865_v20 = vpop.f32.mrf.mxu0  ;;  %v3937_v52 = vld [vmem:[#allocation3 + $0xa0] sm:$0xff]  ;;  %v3938_v36 = vld [vmem:[#allocation3 + $0xa8] sm:$0xff] }
 0x4f6   : > { %v4613_v6 = vld [vmem:[#allocation3 + $0x80] sm:$0xff]  ;;  %7883 = vmatmul.msk.f32.gmra.mxu3 %vm222_vm1, %v5928_v23 }
 0x4f7   : > { %v4857_v57 = vadd.f32 %v9829_v49, %v4613_v6  ;;  %4550 = vst.msk [vmem:[#allocation3 + $0x88] sm:$0xff] %vm222_vm1, %v4518_v16  ;;  %v4462_v28 = vpop.f32.mrf.mxu2  ;;  %v5592_v19 = vld [vmem:[#allocation2 + $0x6a] sm:$0xff] }
 0x4f8   : > { %v4952_v27 = vld [vmem:[#allocation3 + $0x78] sm:$0xff]  ;;  %7916 = vmatmul.msk.f32.gmra.mxu0 %vm222_vm1, %v6268_v46 }
 0x4f9   : > { %v5196_v43 = vadd.f32 %v9805_v15, %v4952_v27  ;;  %4889 = vst.msk [vmem:[#allocation3 + $0x80] sm:$0xff] %vm222_vm1, %v4857_v57  ;;  %v4802_v3 = vpop.f32.mrf.mxu3  ;;  %v3940_v27 = vld [vmem:[#allocation3 + $0xb8] sm:$0xff] }
 0x4fa   : > { %v4122_v7 = vpop.f32.mrf.mxu1 }
 0x4fb   : > { %5228 = vst.msk [vmem:[#allocation3 + $0x78] sm:$0xff] %vm222_vm1, %v5196_v43  ;;  %v4180_v0 = vadd.f32 %v4122_v7, %v3936_v33 }
 0x4fc   : > { %v4275_v38 = vld [vmem:[#allocation3 + $0x90] sm:$0xff]  ;;  %7851 = vmatmul.msk.f32.gmra.mxu2 %vm222_vm1, %v5589_v4  ;;  %v5933_v4 = vld [vmem:[#allocation2 + $0x90] sm:$0xff] }
 0x4fd   : > { %v4519_v22 = vadd.f32 %v4459_v42, %v4275_v38  ;;  %4212 = vst.msk [vmem:[#allocation3 + $0x98] sm:$0xff] %vm222_vm1, %v4180_v0  ;;  %7817 = vmatmul.msk.f32.gmra.mxu1 %vm222_vm1, %v6266_v1  ;;  %v9877_v9 = vpop.f32.mrf.mxu0  ;;  %v6271_v42 = vld [vmem:[#allocation2 + $0x79] sm:$0xff] }
 0x4fe   : > { %v4614_v15 = vld [vmem:[#allocation3 + $0x88] sm:$0xff]  ;;  %7884 = vmatmul.msk.f32.gmra.mxu3 %vm222_vm1, %v5929_v40 }
 0x4ff   : > { %v4858_v39 = vadd.f32 %v4796_v25, %v4614_v15  ;;  %4551 = vst.msk [vmem:[#allocation3 + $0x90] sm:$0xff] %vm222_vm1, %v4519_v22  ;;  %v4465_v44 = vpop.f32.mrf.mxu2  ;;  %v5593_v0 = vld [vmem:[#allocation2 + $0x7a] sm:$0xff] }
 0x500   : > { %v4953_v26 = vld [vmem:[#allocation3 + $0x80] sm:$0xff]  ;;  %7917 = vmatmul.msk.f32.gmra.mxu0 %vm222_vm1, %v6269_v58 }
 0x501   : > { %v5197_v49 = vadd.f32 %v9823_v30, %v4953_v26  ;;  %4890 = vst.msk [vmem:[#allocation3 + $0x88] sm:$0xff] %vm222_vm1, %v4858_v39  ;;  %v4805_v13 = vpop.f32.mrf.mxu3  ;;  %v3941_v26 = vld [vmem:[#allocation3 + $0xc0] sm:$0xff] }
 0x502   : > { %v4125_v56 = vpop.f32.mrf.mxu1 }
 0x503   : > { %5229 = vst.msk [vmem:[#allocation3 + $0x80] sm:$0xff] %vm222_vm1, %v5197_v49  ;;  %v4181_v11 = vadd.f32 %v4125_v56, %v3937_v52 }
 0x504   : > { %v4276_v41 = vld [vmem:[#allocation3 + $0x98] sm:$0xff]  ;;  %7852 = vmatmul.msk.f32.gmra.mxu2 %vm222_vm1, %v5590_v48  ;;  %v5934_v48 = vld [vmem:[#allocation2 + $0x98] sm:$0xff] }
 0x505   : > { %v4520_v12 = vadd.f32 %v4462_v28, %v4276_v41  ;;  %4213 = vst.msk [vmem:[#allocation3 + $0xa0] sm:$0xff] %vm222_vm1, %v4181_v11  ;;  %7818 = vmatmul.msk.f32.gmra.mxu1 %vm222_vm1, %v6267_v29  ;;  %v9888_v50 = vpop.f32.mrf.mxu0  ;;  %v6272_v28 = vld [vmem:[#allocation2 + $0x81] sm:$0xff] }
 0x506   : > { %v4615_v30 = vld [vmem:[#allocation3 + $0x90] sm:$0xff]  ;;  %7885 = vmatmul.msk.f32.gmra.mxu3 %vm222_vm1, %v5930_v34 }
 0x507   : > { %v4859_v59 = vadd.f32 %v4799_v45, %v4615_v30  ;;  %4552 = vst.msk [vmem:[#allocation3 + $0x98] sm:$0xff] %vm222_vm1, %v4520_v12  ;;  %v4468_v51 = vpop.f32.mrf.mxu2  ;;  %v5594_v11 = vld [vmem:[#allocation2 + $0x82] sm:$0xff] }
 0x508   : > { %v4954_v32 = vld [vmem:[#allocation3 + $0x88] sm:$0xff]  ;;  %7918 = vmatmul.msk.f32.gmra.mxu0 %vm222_vm1, %v6270_v55 }
 0x509   : > { %v5198_v1 = vadd.f32 %v9841_v10, %v4954_v32  ;;  %4891 = vst.msk [vmem:[#allocation3 + $0x90] sm:$0xff] %vm222_vm1, %v4859_v59  ;;  %v4808_v17 = vpop.f32.mrf.mxu3  ;;  %v3942_v32 = vld [vmem:[#allocation3 + $0xc8] sm:$0xff] }
 0x50a   : > { %v4128_v25 = vpop.f32.mrf.mxu1 }
 0x50b   : > { %5230 = vst.msk [vmem:[#allocation3 + $0x88] sm:$0xff] %vm222_vm1, %v5198_v1  ;;  %v4182_v53 = vadd.f32 %v4128_v25, %v3938_v36 }
 0x50c   : > { %v4277_v24 = vld [vmem:[#allocation3 + $0xa0] sm:$0xff]  ;;  %7853 = vmatmul.msk.f32.gmra.mxu2 %vm222_vm1, %v5591_v2  ;;  %v5935_v2 = vld [vmem:[#allocation2 + $0xa8] sm:$0xff] }
 0x50d   : > { %v4521_v31 = vadd.f32 %v4465_v44, %v4277_v24  ;;  %4214 = vst.msk [vmem:[#allocation3 + $0xa8] sm:$0xff] %vm222_vm1, %v4182_v53  ;;  %7819 = vmatmul.msk.f32.gmra.mxu1 %vm222_vm1, %v6268_v46  ;;  %v9899_v5 = vpop.f32.mrf.mxu0  ;;  %v6273_v44 = vld [vmem:[#allocation2 + $0x91] sm:$0xff] }
 0x50e   : > { %v4616_v10 = vld [vmem:[#allocation3 + $0x98] sm:$0xff]  ;;  %7886 = vmatmul.msk.f32.gmra.mxu3 %vm222_vm1, %v5931_v63  ;;  %v5595_v53 = vld [vmem:[#allocation2 + $0x92] sm:$0xff] }
 0x50f   : > { %v4860_v54 = vadd.f32 %v4802_v3, %v4616_v10  ;;  %4553 = vst.msk [vmem:[#allocation3 + $0xa0] sm:$0xff] %vm222_vm1, %v4521_v31  ;;  %v4471_v35 = vpop.f32.mrf.mxu2 }
 0x510   : > { %v4955_v60 = vld [vmem:[#allocation3 + $0x90] sm:$0xff]  ;;  %7919 = vmatmul.msk.f32.gmra.mxu0 %vm222_vm1, %v6271_v42 }
 0x511   : > { %v5199_v62 = vadd.f32 %v9853_v47, %v4955_v60  ;;  %4892 = vst.msk [vmem:[#allocation3 + $0x98] sm:$0xff] %vm222_vm1, %v4860_v54  ;;  %v4811_v29 = vpop.f32.mrf.mxu3  ;;  %v3943_v60 = vld [vmem:[#allocation3 + $0xd0] sm:$0xff] }
 0x512   : > { %v4131_v18 = vpop.f32.mrf.mxu1 }
 0x513   : > { %5231 = vst.msk [vmem:[#allocation3 + $0x90] sm:$0xff] %vm222_vm1, %v5199_v62  ;;  %v4183_v45 = vadd.f32 %v4131_v18, %v3939_v14 }
 0x514   : > { %v4278_v61 = vld [vmem:[#allocation3 + $0xa8] sm:$0xff]  ;;  %7854 = vmatmul.msk.f32.gmra.mxu2 %vm222_vm1, %v5592_v19  ;;  %v5936_v19 = vld [vmem:[#allocation2 + $0xb0] sm:$0xff] }
 0x515   : > { %v4522_v21 = vadd.f32 %v4468_v51, %v4278_v61  ;;  %4215 = vst.msk [vmem:[#allocation3 + $0xb0] sm:$0xff] %vm222_vm1, %v4183_v45  ;;  %7820 = vmatmul.msk.f32.gmra.mxu1 %vm222_vm1, %v6269_v58  ;;  %v9910_v16 = vpop.f32.mrf.mxu0  ;;  %v6274_v51 = vld [vmem:[#allocation2 + $0x99] sm:$0xff] }
 0x516   : > { %v4617_v47 = vld [vmem:[#allocation3 + $0xa0] sm:$0xff]  ;;  %7887 = vmatmul.msk.f32.gmra.mxu3 %vm222_vm1, %v5932_v8  ;;  %v5596_v45 = vld [vmem:[#allocation2 + $0x9a] sm:$0xff] }
 0x517   : > { %v4861_v23 = vadd.f32 %v4805_v13, %v4617_v47  ;;  %4554 = vst.msk [vmem:[#allocation3 + $0xa8] sm:$0xff] %vm222_vm1, %v4522_v21  ;;  %v4474_v57 = vpop.f32.mrf.mxu2 }
 0x518   : > { %v4956_v6 = vld [vmem:[#allocation3 + $0x98] sm:$0xff]  ;;  %7920 = vmatmul.msk.f32.gmra.mxu0 %vm222_vm1, %v6272_v28 }
 0x519   : > { %v5200_v33 = vadd.f32 %v9865_v20, %v4956_v6  ;;  %4893 = vst.msk [vmem:[#allocation3 + $0xa0] sm:$0xff] %vm222_vm1, %v4861_v23  ;;  %v4814_v46 = vpop.f32.mrf.mxu3  ;;  %v3944_v6 = vld [vmem:[#allocation3 + $0xd8] sm:$0xff] }
 0x51a   : > { %v4134_v43 = vpop.f32.mrf.mxu1 }
 0x51b   : > { %5232 = vst.msk [vmem:[#allocation3 + $0x98] sm:$0xff] %vm222_vm1, %v5200_v33  ;;  %v4184_v3 = vadd.f32 %v4134_v43, %v3940_v27 }
 0x51c   : > { %v4279_v7 = vld [vmem:[#allocation3 + $0xb0] sm:$0xff]  ;;  %7855 = vmatmul.msk.f32.gmra.mxu2 %vm222_vm1, %v5593_v0 }
 0x51d   : > { %v4523_v38 = vadd.f32 %v4471_v35, %v4279_v7  ;;  %4216 = vst.msk [vmem:[#allocation3 + $0xb8] sm:$0xff] %vm222_vm1, %v4184_v3  ;;  %7821 = vmatmul.msk.f32.gmra.mxu1 %vm222_vm1, %v6270_v55  ;;  %v9921_v22 = vpop.f32.mrf.mxu0  ;;  %v6275_v35 = vld [vmem:[#allocation2 + $0xa9] sm:$0xff]  ;;  %v5937_v0 = vld [vmem:[#allocation2 + $0xc0] sm:$0xff] }
 0x51e   : > { %v4618_v20 = vld [vmem:[#allocation3 + $0xa8] sm:$0xff]  ;;  %7888 = vmatmul.msk.f32.gmra.mxu3 %vm222_vm1, %v5933_v4  ;;  %v5597_v3 = vld [vmem:[#allocation2 + $0xaa] sm:$0xff] }
 0x51f   : > { %v4862_v40 = vadd.f32 %v4808_v17, %v4618_v20  ;;  %4555 = vst.msk [vmem:[#allocation3 + $0xb0] sm:$0xff] %vm222_vm1, %v4523_v38  ;;  %v4477_v39 = vpop.f32.mrf.mxu2 }
 0x520   : > { %v4957_v15 = vld [vmem:[#allocation3 + $0xa0] sm:$0xff]  ;;  %7921 = vmatmul.msk.f32.gmra.mxu0 %vm222_vm1, %v6273_v44 }
 0x521   : > { %v5201_v52 = vadd.f32 %v9877_v9, %v4957_v15  ;;  %4894 = vst.msk [vmem:[#allocation3 + $0xa8] sm:$0xff] %vm222_vm1, %v4862_v40  ;;  %v4817_v58 = vpop.f32.mrf.mxu3  ;;  %v3945_v15 = vld [vmem:[#allocation3 + $0xe0] sm:$0xff] }
 0x522   : > { %v4137_v49 = vpop.f32.mrf.mxu1 }
 0x523   : > { %5233 = vst.msk [vmem:[#allocation3 + $0xa0] sm:$0xff] %vm222_vm1, %v5201_v52  ;;  %v4185_v13 = vadd.f32 %v4137_v49, %v3941_v26 }
 0x524   : > { %v4280_v56 = vld [vmem:[#allocation3 + $0xb8] sm:$0xff]  ;;  %7856 = vmatmul.msk.f32.gmra.mxu2 %vm222_vm1, %v5594_v11 }
 0x525   : > { %v4524_v41 = vadd.f32 %v4474_v57, %v4280_v56  ;;  %4217 = vst.msk [vmem:[#allocation3 + $0xc0] sm:$0xff] %vm222_vm1, %v4185_v13  ;;  %7822 = vmatmul.msk.f32.gmra.mxu1 %vm222_vm1, %v6271_v42  ;;  %v9932_v12 = vpop.f32.mrf.mxu0  ;;  %v6276_v57 = vld [vmem:[#allocation2 + $0xb1] sm:$0xff]  ;;  %v5938_v11 = vld [vmem:[#allocation2 + $0xc8] sm:$0xff] }
 0x526   : > { %v4619_v9 = vld [vmem:[#allocation3 + $0xb0] sm:$0xff]  ;;  %7889 = vmatmul.msk.f32.gmra.mxu3 %vm222_vm1, %v5934_v48  ;;  %v5598_v13 = vld [vmem:[#allocation2 + $0xb2] sm:$0xff] }
 0x527   : > { %v4863_v34 = vadd.f32 %v4811_v29, %v4619_v9  ;;  %4556 = vst.msk [vmem:[#allocation3 + $0xb8] sm:$0xff] %vm222_vm1, %v4524_v41  ;;  %v4480_v59 = vpop.f32.mrf.mxu2 }
 0x528   : > { %v4958_v30 = vld [vmem:[#allocation3 + $0xa8] sm:$0xff]  ;;  %7922 = vmatmul.msk.f32.gmra.mxu0 %vm222_vm1, %v6274_v51 }
 0x529   : > { %v5202_v36 = vadd.f32 %v9888_v50, %v4958_v30  ;;  %4895 = vst.msk [vmem:[#allocation3 + $0xb0] sm:$0xff] %vm222_vm1, %v4863_v34  ;;  %v4820_v55 = vpop.f32.mrf.mxu3  ;;  %v3946_v30 = vld [vmem:[#allocation3 + $0xe8] sm:$0xff] }
 0x52a   : > { %v4140_v1 = vpop.f32.mrf.mxu1 }
 0x52b   : > { %5234 = vst.msk [vmem:[#allocation3 + $0xa8] sm:$0xff] %vm222_vm1, %v5202_v36  ;;  %v4186_v17 = vadd.f32 %v4140_v1, %v3942_v32 }
 0x52c   : > { %v4281_v25 = vld [vmem:[#allocation3 + $0xc0] sm:$0xff]  ;;  %7857 = vmatmul.msk.f32.gmra.mxu2 %vm222_vm1, %v5595_v53  ;;  %v5939_v53 = vld [vmem:[#allocation2 + $0xd8] sm:$0xff] }
 0x52d   : > { %v4525_v24 = vadd.f32 %v4477_v39, %v4281_v25  ;;  %4218 = vst.msk [vmem:[#allocation3 + $0xc8] sm:$0xff] %vm222_vm1, %v4186_v17  ;;  %7823 = vmatmul.msk.f32.gmra.mxu1 %vm222_vm1, %v6272_v28  ;;  %v9943_v31 = vpop.f32.mrf.mxu0  ;;  %v6277_v39 = vld [vmem:[#allocation2 + $0xc1] sm:$0xff] }
 0x52e   : > { %v4620_v50 = vld [vmem:[#allocation3 + $0xb8] sm:$0xff]  ;;  %7890 = vmatmul.msk.f32.gmra.mxu3 %vm222_vm1, %v5935_v2 }
 0x52f   : > { %v4864_v63 = vadd.f32 %v4814_v46, %v4620_v50  ;;  %4557 = vst.msk [vmem:[#allocation3 + $0xc0] sm:$0xff] %vm222_vm1, %v4525_v24  ;;  %v4483_v54 = vpop.f32.mrf.mxu2  ;;  %v5599_v17 = vld [vmem:[#allocation2 + $0xc2] sm:$0xff] }
 0x530   : > { %v4959_v10 = vld [vmem:[#allocation3 + $0xb0] sm:$0xff]  ;;  %7923 = vmatmul.msk.f32.gmra.mxu0 %vm222_vm1, %v6275_v35 }
 0x531   : > { %v5203_v14 = vadd.f32 %v9899_v5, %v4959_v10  ;;  %4896 = vst.msk [vmem:[#allocation3 + $0xb8] sm:$0xff] %vm222_vm1, %v4864_v63  ;;  %v4823_v42 = vpop.f32.mrf.mxu3  ;;  %v3947_v10 = vld [vmem:[#allocation3 + $0xf0] sm:$0xff] }
 0x532   : > { %v4143_v62 = vpop.f32.mrf.mxu1 }
 0x533   : > { %5235 = vst.msk [vmem:[#allocation3 + $0xb0] sm:$0xff] %vm222_vm1, %v5203_v14  ;;  %v4187_v29 = vadd.f32 %v4143_v62, %v3943_v60 }
 0x534   : > { %v4282_v18 = vld [vmem:[#allocation3 + $0xc8] sm:$0xff]  ;;  %7858 = vmatmul.msk.f32.gmra.mxu2 %vm222_vm1, %v5596_v45  ;;  %v5940_v45 = vld [vmem:[#allocation2 + $0xe0] sm:$0xff] }
 0x535   : > { %v4526_v61 = vadd.f32 %v4480_v59, %v4282_v18  ;;  %4219 = vst.msk [vmem:[#allocation3 + $0xd0] sm:$0xff] %vm222_vm1, %v4187_v29  ;;  %7824 = vmatmul.msk.f32.gmra.mxu1 %vm222_vm1, %v6273_v44  ;;  %v9954_v21 = vpop.f32.mrf.mxu0  ;;  %v6278_v59 = vld [vmem:[#allocation2 + $0xc9] sm:$0xff] }
 0x536   : > { %v4621_v5 = vld [vmem:[#allocation3 + $0xc0] sm:$0xff]  ;;  %7891 = vmatmul.msk.f32.gmra.mxu3 %vm222_vm1, %v5936_v19 }
 0x537   : > { %v4865_v8 = vadd.f32 %v4817_v58, %v4621_v5  ;;  %4558 = vst.msk [vmem:[#allocation3 + $0xc8] sm:$0xff] %vm222_vm1, %v4526_v61  ;;  %v4486_v23 = vpop.f32.mrf.mxu2  ;;  %v5600_v29 = vld [vmem:[#allocation2 + $0xca] sm:$0xff] }
 0x538   : > { %v4960_v47 = vld [vmem:[#allocation3 + $0xb8] sm:$0xff]  ;;  %7924 = vmatmul.msk.f32.gmra.mxu0 %vm222_vm1, %v6276_v57 }
 0x539   : > { %v5204_v27 = vadd.f32 %v9910_v16, %v4960_v47  ;;  %4897 = vst.msk [vmem:[#allocation3 + $0xc0] sm:$0xff] %vm222_vm1, %v4865_v8  ;;  %v4826_v28 = vpop.f32.mrf.mxu3  ;;  %v3948_v47 = vld [vmem:[#allocation3 + $0xf8] sm:$0xff] }
 0x53a   : > { %v4146_v33 = vpop.f32.mrf.mxu1 }
 0x53b   : > { %5236 = vst.msk [vmem:[#allocation3 + $0xb8] sm:$0xff] %vm222_vm1, %v5204_v27  ;;  %v4188_v46 = vadd.f32 %v4146_v33, %v3944_v6 }
 0x53c   : > { %v4283_v43 = vld [vmem:[#allocation3 + $0xd0] sm:$0xff]  ;;  %7859 = vmatmul.msk.f32.gmra.mxu2 %vm222_vm1, %v5597_v3  ;;  %v5941_v3 = vld [vmem:[#allocation2 + $0xf0] sm:$0xff] }
 0x53d   : > { %v4527_v7 = vadd.f32 %v4483_v54, %v4283_v43  ;;  %4220 = vst.msk [vmem:[#allocation3 + $0xd8] sm:$0xff] %vm222_vm1, %v4188_v46  ;;  %7825 = vmatmul.msk.f32.gmra.mxu1 %vm222_vm1, %v6274_v51  ;;  %v9965_v38 = vpop.f32.mrf.mxu0  ;;  %v6279_v54 = vld [vmem:[#allocation2 + $0xd9] sm:$0xff] }
 0x53e   : > { %v4622_v16 = vld [vmem:[#allocation3 + $0xc8] sm:$0xff]  ;;  %7892 = vmatmul.msk.f32.gmra.mxu3 %vm222_vm1, %v5937_v0 }
 0x53f   : > { %v4866_v4 = vadd.f32 %v4820_v55, %v4622_v16  ;;  %4559 = vst.msk [vmem:[#allocation3 + $0xd0] sm:$0xff] %vm222_vm1, %v4527_v7  ;;  %v4489_v40 = vpop.f32.mrf.mxu2  ;;  %v5601_v46 = vld [vmem:[#allocation2 + $0xda] sm:$0xff] }
 0x540   : > { %v4961_v20 = vld [vmem:[#allocation3 + $0xc0] sm:$0xff]  ;;  %7925 = vmatmul.msk.f32.gmra.mxu0 %vm222_vm1, %v6277_v39 }
 0x541   : > { %v5205_v26 = vadd.f32 %v9921_v22, %v4961_v20  ;;  %4898 = vst.msk [vmem:[#allocation3 + $0xc8] sm:$0xff] %vm222_vm1, %v4866_v4  ;;  %v4829_v44 = vpop.f32.mrf.mxu3  ;;  %v6281_v20 = vld [vmem:[#allocation2 + $0xf1] sm:$0xff] }
 0x542   : > { %v4149_v52 = vpop.f32.mrf.mxu1 }
 0x543   : > { %5237 = vst.msk [vmem:[#allocation3 + $0xc0] sm:$0xff] %vm222_vm1, %v5205_v26  ;;  %v4189_v58 = vadd.f32 %v4149_v52, %v3945_v15 }
 0x544   : > { %v4284_v49 = vld [vmem:[#allocation3 + $0xd8] sm:$0xff]  ;;  %7860 = vmatmul.msk.f32.gmra.mxu2 %vm222_vm1, %v5598_v13 }
 0x545   : > { %v4528_v56 = vadd.f32 %v4486_v23, %v4284_v49  ;;  %4221 = vst.msk [vmem:[#allocation3 + $0xe0] sm:$0xff] %vm222_vm1, %v4189_v58  ;;  %7826 = vmatmul.msk.f32.gmra.mxu1 %vm222_vm1, %v6275_v35  ;;  %v9976_v41 = vpop.f32.mrf.mxu0  ;;  %v6280_v23 = vld [vmem:[#allocation2 + $0xe1] sm:$0xff] }
 0x546   : > { %v4623_v22 = vld [vmem:[#allocation3 + $0xd0] sm:$0xff]  ;;  %7893 = vmatmul.msk.f32.gmra.mxu3 %vm222_vm1, %v5938_v11 }
 0x547   : > { %v4867_v48 = vadd.f32 %v4823_v42, %v4623_v22  ;;  %4560 = vst.msk [vmem:[#allocation3 + $0xd8] sm:$0xff] %vm222_vm1, %v4528_v56  ;;  %v4492_v34 = vpop.f32.mrf.mxu2  ;;  %v5602_v58 = vld [vmem:[#allocation2 + $0xe2] sm:$0xff] }
 0x548   : > { %v4962_v9 = vld [vmem:[#allocation3 + $0xc8] sm:$0xff]  ;;  %7926 = vmatmul.msk.f32.gmra.mxu0 %vm222_vm1, %v6278_v59 }
 0x549   : > { %v5206_v32 = vadd.f32 %v9932_v12, %v4962_v9  ;;  %4899 = vst.msk [vmem:[#allocation3 + $0xd0] sm:$0xff] %vm222_vm1, %v4867_v48  ;;  %v4832_v51 = vpop.f32.mrf.mxu3  ;;  %v6282_v9 = vld [vmem:[#allocation2 + $0xf9] sm:$0xff] }
 0x54a   : > { %v4152_v36 = vpop.f32.mrf.mxu1 }
 0x54b   : > { %5238 = vst.msk [vmem:[#allocation3 + $0xc8] sm:$0xff] %vm222_vm1, %v5206_v32  ;;  %v4190_v55 = vadd.f32 %v4152_v36, %v3946_v30 }
 0x54c   : > { %v4285_v1 = vld [vmem:[#allocation3 + $0xe0] sm:$0xff]  ;;  %7861 = vmatmul.msk.f32.gmra.mxu2 %vm222_vm1, %v5599_v17 }
 0x54d   : > { %v4529_v25 = vadd.f32 %v4489_v40, %v4285_v1  ;;  %4222 = vst.msk [vmem:[#allocation3 + $0xe8] sm:$0xff] %vm222_vm1, %v4190_v55  ;;  %7827 = vmatmul.msk.f32.gmra.mxu1 %vm222_vm1, %v6276_v57  ;;  %v9987_v24 = vpop.f32.mrf.mxu0  ;;  %v5603_v55 = vld [vmem:[#allocation2 + $0xf2] sm:$0xff] }
 0x54e   : > { %v4624_v12 = vld [vmem:[#allocation3 + $0xd8] sm:$0xff]  ;;  %7894 = vmatmul.msk.f32.gmra.mxu3 %vm222_vm1, %v5939_v53 }
 0x54f   : > { %v4868_v2 = vadd.f32 %v4826_v28, %v4624_v12  ;;  %4561 = vst.msk [vmem:[#allocation3 + $0xe0] sm:$0xff] %vm222_vm1, %v4529_v25  ;;  %v4495_v63 = vpop.f32.mrf.mxu2 }
 0x550   : > { %v4963_v50 = vld [vmem:[#allocation3 + $0xd0] sm:$0xff]  ;;  %7927 = vmatmul.msk.f32.gmra.mxu0 %vm222_vm1, %v6279_v54 }
 0x551   : > { %v5207_v60 = vadd.f32 %v9943_v31, %v4963_v50  ;;  %4900 = vst.msk [vmem:[#allocation3 + $0xd8] sm:$0xff] %vm222_vm1, %v4868_v2  ;;  %v4835_v35 = vpop.f32.mrf.mxu3  ;;  %v6283_v50 = vld [vmem:[#allocation2 + $0x109] sm:$0xff] }
 0x552   : > { %v4155_v14 = vpop.f32.mrf.mxu1 }
 0x553   : > { %5239 = vst.msk [vmem:[#allocation3 + $0xd0] sm:$0xff] %vm222_vm1, %v5207_v60  ;;  %v4191_v42 = vadd.f32 %v4155_v14, %v3947_v10 }
 0x554   : > { %v4286_v62 = vld [vmem:[#allocation3 + $0xe8] sm:$0xff]  ;;  %7862 = vmatmul.msk.f32.gmra.mxu2 %vm222_vm1, %v5600_v29 }
 0x555   : > { %v4530_v18 = vadd.f32 %v4492_v34, %v4286_v62  ;;  %4223 = vst.msk [vmem:[#allocation3 + $0xf0] sm:$0xff] %vm222_vm1, %v4191_v42  ;;  %7828 = vmatmul.msk.f32.gmra.mxu1 %vm222_vm1, %v6277_v39  ;;  %v9998_v61 = vpop.f32.mrf.mxu0  ;;  %v5277_v39 = vld [vmem:[#allocation3] sm:$0xff]  ;;  %v5604_v42 = vld [vmem:[#allocation2 + $0xfa] sm:$0xff] }
 0x556   : > { %v4625_v31 = vld [vmem:[#allocation3 + $0xe0] sm:$0xff]  ;;  %7895 = vmatmul.msk.f32.gmra.mxu3 %vm222_vm1, %v5940_v45 }
 0x557   : > { %v4869_v19 = vadd.f32 %v4829_v44, %v4625_v31  ;;  %4562 = vst.msk [vmem:[#allocation3 + $0xe8] sm:$0xff] %vm222_vm1, %v4530_v18  ;;  %v4498_v8 = vpop.f32.mrf.mxu2 }
 0x558   : > { %v4964_v5 = vld [vmem:[#allocation3 + $0xd8] sm:$0xff]  ;;  %7928 = vmatmul.msk.f32.gmra.mxu0 %vm222_vm1, %v6280_v23 }
 0x559   : > { %v5208_v6 = vadd.f32 %v9954_v21, %v4964_v5  ;;  %4901 = vst.msk [vmem:[#allocation3 + $0xe0] sm:$0xff] %vm222_vm1, %v4869_v19  ;;  %v4838_v57 = vpop.f32.mrf.mxu3  ;;  %v6284_v5 = vld [vmem:[#allocation2 + $0x111] sm:$0xff] }
 0x55a   : > { %v4158_v27 = vpop.f32.mrf.mxu1 }
 0x55b   : > { %5240 = vst.msk [vmem:[#allocation3 + $0xd8] sm:$0xff] %vm222_vm1, %v5208_v6  ;;  %v4192_v28 = vadd.f32 %v4158_v27, %v3948_v47 }
 0x55c   : > { %v4287_v33 = vld [vmem:[#allocation3 + $0xf0] sm:$0xff]  ;;  %7863 = vmatmul.msk.f32.gmra.mxu2 %vm222_vm1, %v5601_v46 }
 0x55d   : > { %v4531_v43 = vadd.f32 %v4495_v63, %v4287_v33  ;;  %4224 = vst.msk [vmem:[#allocation3 + $0xf8] sm:$0xff] %vm222_vm1, %v4192_v28  ;;  %7829 = vmatmul.msk.f32.gmra.mxu1 %vm222_vm1, %v6278_v59  ;;  %v10010_v4 = vpop.f32.mrf.mxu0  ;;  %v5278_v59 = vld [vmem:[#allocation3 + $0x8] sm:$0xff]  ;;  %v5605_v28 = vld [vmem:[#allocation2 + $0x10a] sm:$0xff] }
 0x55e   : > { %v4626_v21 = vld [vmem:[#allocation3 + $0xe8] sm:$0xff]  ;;  %7896 = vmatmul.msk.f32.gmra.mxu3 %vm222_vm1, %v5941_v3 }
 0x55f   : > { %v4870_v7 = vadd.f32 %v4832_v51, %v4626_v21  ;;  %4563 = vst.msk [vmem:[#allocation3 + $0xf0] sm:$0xff] %vm222_vm1, %v4531_v43  ;;  %v5765_v16 = vpop.f32.mrf.mxu2 }
 0x560   : > { %v4965_v0 = vld [vmem:[#allocation3 + $0xe0] sm:$0xff]  ;;  %7929 = vmatmul.msk.f32.gmra.mxu0 %vm222_vm1, %v6281_v20 }
 0x561   : > { %v5209_v40 = vadd.f32 %v9965_v38, %v4965_v0  ;;  %4902 = vst.msk [vmem:[#allocation3 + $0xe8] sm:$0xff] %vm222_vm1, %v4870_v7  ;;  %v6105_v15 = vpop.f32.mrf.mxu3  ;;  %v5942_v38 = vld [vmem:[#allocation2 + $0xf8] sm:$0xff]  ;;  %v6285_v0 = vld [vmem:[#allocation2 + $0x121] sm:$0xff] }
 0x562   : > { %v5425_v26 = vpop.f32.mrf.mxu1 }
 0x563   : > { %5241 = vst.msk [vmem:[#allocation3 + $0xe0] sm:$0xff] %vm222_vm1, %v5209_v40  ;;  %v5521_v44 = vadd.f32 %v5425_v26, %v5277_v39  ;;  %v5281_v40 = vld [vmem:[#allocation3 + $0x20] sm:$0xff] }
 0x564   : > { %v4288_v52 = vld [vmem:[#allocation3 + $0xf8] sm:$0xff]  ;;  %7864 = vmatmul.msk.f32.gmra.mxu2 %vm222_vm1, %v5602_v58 }
 0x565   : > { %v4532_v49 = vadd.f32 %v4498_v8, %v4288_v52  ;;  %5553 = vst.msk [vmem:[#allocation3] sm:$0xff] %vm222_vm1, %v5521_v44  ;;  %7830 = vmatmul.msk.f32.gmra.mxu1 %vm222_vm1, %v6279_v54  ;;  %v10021_v48 = vpop.f32.mrf.mxu0  ;;  %v5279_v54 = vld [vmem:[#allocation3 + $0x10] sm:$0xff]  ;;  %v5606_v44 = vld [vmem:[#allocation2 + $0x112] sm:$0xff] }
 0x566   : > { %v4627_v13 = vld [vmem:[#allocation3 + $0xf0] sm:$0xff]  ;;  %7897 = vmatmul.msk.f32.gmra.mxu3 %vm222_vm1, %v5942_v38 }
 0x567   : > { %v4871_v56 = vadd.f32 %v4835_v35, %v4627_v13  ;;  %4564 = vst.msk [vmem:[#allocation3 + $0xf8] sm:$0xff] %vm222_vm1, %v4532_v49  ;;  %v5768_v22 = vpop.f32.mrf.mxu2 }
 0x568   : > { %v4966_v11 = vld [vmem:[#allocation3 + $0xe8] sm:$0xff]  ;;  %7930 = vmatmul.msk.f32.gmra.mxu0 %vm222_vm1, %v6282_v9 }
 0x569   : > { %v5210_v34 = vadd.f32 %v9976_v41, %v4966_v11  ;;  %4903 = vst.msk [vmem:[#allocation3 + $0xf0] sm:$0xff] %vm222_vm1, %v4871_v56  ;;  %v6108_v30 = vpop.f32.mrf.mxu3  ;;  %v5943_v41 = vld [vmem:[#allocation2 + $0x108] sm:$0xff] }
 0x56a   : > { %v5428_v32 = vpop.f32.mrf.mxu1  ;;  %v6286_v11 = vld [vmem:[#allocation2 + $0x129] sm:$0xff] }
 0x56b   : > { %5242 = vst.msk [vmem:[#allocation3 + $0xe8] sm:$0xff] %vm222_vm1, %v5210_v34  ;;  %v5522_v51 = vadd.f32 %v5428_v32, %v5278_v59  ;;  %v5282_v34 = vld [vmem:[#allocation3 + $0x28] sm:$0xff] }
 0x56c   : > { %v5617_v36 = vld [vmem:[#allocation3] sm:$0xff]  ;;  %7865 = vmatmul.msk.f32.gmra.mxu2 %vm222_vm1, %v5603_v55 }
 0x56d   : > { %v5861_v1 = vadd.f32 %v5765_v16, %v5617_v36  ;;  %5554 = vst.msk [vmem:[#allocation3 + $0x8] sm:$0xff] %vm222_vm1, %v5522_v51  ;;  %7831 = vmatmul.msk.f32.gmra.mxu1 %vm222_vm1, %v6280_v23  ;;  %v10032_v2 = vpop.f32.mrf.mxu0  ;;  %v5280_v23 = vld [vmem:[#allocation3 + $0x18] sm:$0xff] }
 0x56e   : > { %v4628_v17 = vld [vmem:[#allocation3 + $0xf8] sm:$0xff]  ;;  %7898 = vmatmul.msk.f32.gmra.mxu3 %vm222_vm1, %v5943_v41 }
 0x56f   : > { %v4872_v25 = vadd.f32 %v4838_v57, %v4628_v17  ;;  %5893 = vst.msk [vmem:[#allocation3] sm:$0xff] %vm222_vm1, %v5861_v1  ;;  %v5771_v12 = vpop.f32.mrf.mxu2  ;;  %v5607_v51 = vld [vmem:[#allocation2 + $0x122] sm:$0xff] }
 0x570   : > { %v4967_v53 = vld [vmem:[#allocation3 + $0xf0] sm:$0xff]  ;;  %7931 = vmatmul.msk.f32.gmra.mxu0 %vm222_vm1, %v6283_v50 }
 0x571   : > { %v5211_v63 = vadd.f32 %v9987_v24, %v4967_v53  ;;  %4904 = vst.msk [vmem:[#allocation3 + $0xf8] sm:$0xff] %vm222_vm1, %v4872_v25  ;;  %v6111_v10 = vpop.f32.mrf.mxu3  ;;  %v5944_v24 = vld [vmem:[#allocation2 + $0x110] sm:$0xff]  ;;  %v6287_v53 = vld [vmem:[#allocation2 + $0x139] sm:$0xff] }
 0x572   : > { %v5431_v60 = vpop.f32.mrf.mxu1 }
 0x573   : > { %5243 = vst.msk [vmem:[#allocation3 + $0xf0] sm:$0xff] %vm222_vm1, %v5211_v63  ;;  %v5523_v35 = vadd.f32 %v5431_v60, %v5279_v54  ;;  %v5283_v63 = vld [vmem:[#allocation3 + $0x30] sm:$0xff] }
 0x574   : > { %v5618_v14 = vld [vmem:[#allocation3 + $0x8] sm:$0xff]  ;;  %7866 = vmatmul.msk.f32.gmra.mxu2 %vm222_vm1, %v5604_v42 }
 0x575   : > { %v5862_v62 = vadd.f32 %v5768_v22, %v5618_v14  ;;  %5555 = vst.msk [vmem:[#allocation3 + $0x10] sm:$0xff] %vm222_vm1, %v5523_v35  ;;  %7832 = vmatmul.msk.f32.gmra.mxu1 %vm222_vm1, %v6281_v20  ;;  %v10043_v19 = vpop.f32.mrf.mxu0  ;;  %v5608_v35 = vld [vmem:[#allocation2 + $0x12a] sm:$0xff] }
 0x576   : > { %v5957_v29 = vld [vmem:[#allocation3] sm:$0xff]  ;;  %7899 = vmatmul.msk.f32.gmra.mxu3 %vm222_vm1, %v5944_v24 }
 0x577   : > { %v6201_v18 = vadd.f32 %v6105_v15, %v5957_v29  ;;  %5894 = vst.msk [vmem:[#allocation3 + $0x8] sm:$0xff] %vm222_vm1, %v5862_v62  ;;  %v5774_v31 = vpop.f32.mrf.mxu2 }
 0x578   : > { %v4968_v45 = vld [vmem:[#allocation3 + $0xf8] sm:$0xff]  ;;  %7932 = vmatmul.msk.f32.gmra.mxu0 %vm222_vm1, %v6284_v5 }
 0x579   : > { %v5212_v8 = vadd.f32 %v9998_v61, %v4968_v45  ;;  %6233 = vst.msk [vmem:[#allocation3] sm:$0xff] %vm222_vm1, %v6201_v18  ;;  %v6114_v47 = vpop.f32.mrf.mxu3  ;;  %v5945_v61 = vld [vmem:[#allocation2 + $0x120] sm:$0xff] }
 0x57a   : > { %v5434_v6 = vpop.f32.mrf.mxu1  ;;  %v6288_v45 = vld [vmem:[#allocation2 + $0x141] sm:$0xff] }
 0x57b   : > { %5244 = vst.msk [vmem:[#allocation3 + $0xf8] sm:$0xff] %vm222_vm1, %v5212_v8  ;;  %v5524_v57 = vadd.f32 %v5434_v6, %v5280_v23  ;;  %v5284_v8 = vld [vmem:[#allocation3 + $0x38] sm:$0xff] }
 0x57c   : > { %v5619_v27 = vld [vmem:[#allocation3 + $0x10] sm:$0xff]  ;;  %7867 = vmatmul.msk.f32.gmra.mxu2 %vm222_vm1, %v5605_v28 }
 0x57d   : > { %v5863_v33 = vadd.f32 %v5771_v12, %v5619_v27  ;;  %5556 = vst.msk [vmem:[#allocation3 + $0x18] sm:$0xff] %vm222_vm1, %v5524_v57  ;;  %7833 = vmatmul.msk.f32.gmra.mxu1 %vm222_vm1, %v6282_v9  ;;  %v10054_v7 = vpop.f32.mrf.mxu0  ;;  %v5609_v57 = vld [vmem:[#allocation2 + $0x13a] sm:$0xff] }
 0x57e   : > { %v5958_v46 = vld [vmem:[#allocation3 + $0x8] sm:$0xff]  ;;  %7900 = vmatmul.msk.f32.gmra.mxu3 %vm222_vm1, %v5945_v61 }
 0x57f   : > { %v6202_v43 = vadd.f32 %v6108_v30, %v5958_v46  ;;  %5895 = vst.msk [vmem:[#allocation3 + $0x10] sm:$0xff] %vm222_vm1, %v5863_v33  ;;  %v5777_v21 = vpop.f32.mrf.mxu2 }
 0x580   : > { %v6297_v3 = vld [vmem:[#allocation3] sm:$0xff]  ;;  %7933 = vmatmul.msk.f32.gmra.mxu0 %vm222_vm1, %v6285_v0 }
 0x581   : > { %v6541_v16 = vadd.f32 %v10010_v4, %v6297_v3  ;;  %6234 = vst.msk [vmem:[#allocation3 + $0x8] sm:$0xff] %vm222_vm1, %v6202_v43  ;;  %v6117_v20 = vpop.f32.mrf.mxu3  ;;  %v5946_v4 = vld [vmem:[#allocation2 + $0x128] sm:$0xff]  ;;  %v6289_v3 = vld [vmem:[#allocation2 + $0x151] sm:$0xff] }
 0x582   : > { %v5437_v15 = vpop.f32.mrf.mxu1 }
 0x583   : > { %6573 = vst.msk [vmem:[#allocation3] sm:$0xff] %vm222_vm1, %v6541_v16  ;;  %v5525_v39 = vadd.f32 %v5437_v15, %v5281_v40  ;;  %v5285_v16 = vld [vmem:[#allocation3 + $0x40] sm:$0xff] }
 0x584   : > { %v5620_v26 = vld [vmem:[#allocation3 + $0x18] sm:$0xff]  ;;  %7868 = vmatmul.msk.f32.gmra.mxu2 %vm222_vm1, %v5606_v44 }
 0x585   : > { %v5864_v52 = vadd.f32 %v5774_v31, %v5620_v26  ;;  %5557 = vst.msk [vmem:[#allocation3 + $0x20] sm:$0xff] %vm222_vm1, %v5525_v39  ;;  %7834 = vmatmul.msk.f32.gmra.mxu1 %vm222_vm1, %v6283_v50  ;;  %v10065_v56 = vpop.f32.mrf.mxu0  ;;  %v5610_v39 = vld [vmem:[#allocation2 + $0x142] sm:$0xff] }
 0x586   : > { %v5959_v58 = vld [vmem:[#allocation3 + $0x10] sm:$0xff]  ;;  %7901 = vmatmul.msk.f32.gmra.mxu3 %vm222_vm1, %v5946_v4 }
 0x587   : > { %v6203_v49 = vadd.f32 %v6111_v10, %v5959_v58  ;;  %5896 = vst.msk [vmem:[#allocation3 + $0x18] sm:$0xff] %vm222_vm1, %v5864_v52  ;;  %v5780_v13 = vpop.f32.mrf.mxu2 }
 0x588   : > { %v6298_v38 = vld [vmem:[#allocation3 + $0x8] sm:$0xff]  ;;  %7934 = vmatmul.msk.f32.gmra.mxu0 %vm222_vm1, %v6286_v11 }
 0x589   : > { %v6542_v22 = vadd.f32 %v10021_v48, %v6298_v38  ;;  %6235 = vst.msk [vmem:[#allocation3 + $0x10] sm:$0xff] %vm222_vm1, %v6203_v49  ;;  %v6120_v9 = vpop.f32.mrf.mxu3  ;;  %v5947_v48 = vld [vmem:[#allocation2 + $0x138] sm:$0xff] }
 0x58a   : > { %v5440_v30 = vpop.f32.mrf.mxu1  ;;  %v6290_v38 = vld [vmem:[#allocation2 + $0x159] sm:$0xff] }
 0x58b   : > { %6574 = vst.msk [vmem:[#allocation3 + $0x8] sm:$0xff] %vm222_vm1, %v6542_v22  ;;  %v5526_v59 = vadd.f32 %v5440_v30, %v5282_v34  ;;  %v5286_v22 = vld [vmem:[#allocation3 + $0x48] sm:$0xff] }
 0x58c   : > { %v5621_v32 = vld [vmem:[#allocation3 + $0x20] sm:$0xff]  ;;  %7869 = vmatmul.msk.f32.gmra.mxu2 %vm222_vm1, %v5607_v51 }
 0x58d   : > { %v5865_v36 = vadd.f32 %v5777_v21, %v5621_v32  ;;  %5558 = vst.msk [vmem:[#allocation3 + $0x28] sm:$0xff] %vm222_vm1, %v5526_v59  ;;  %7835 = vmatmul.msk.f32.gmra.mxu1 %vm222_vm1, %v6284_v5  ;;  %v10076_v25 = vpop.f32.mrf.mxu0  ;;  %v5611_v59 = vld [vmem:[#allocation2 + $0x152] sm:$0xff] }
 0x58e   : > { %v5960_v55 = vld [vmem:[#allocation3 + $0x18] sm:$0xff]  ;;  %7902 = vmatmul.msk.f32.gmra.mxu3 %vm222_vm1, %v5947_v48 }
 0x58f   : > { %v6204_v1 = vadd.f32 %v6114_v47, %v5960_v55  ;;  %5897 = vst.msk [vmem:[#allocation3 + $0x20] sm:$0xff] %vm222_vm1, %v5865_v36  ;;  %v5783_v17 = vpop.f32.mrf.mxu2 }
 0x590   : > { %v6299_v41 = vld [vmem:[#allocation3 + $0x10] sm:$0xff]  ;;  %7935 = vmatmul.msk.f32.gmra.mxu0 %vm222_vm1, %v6287_v53 }
 0x591   : > { %v6543_v12 = vadd.f32 %v10032_v2, %v6299_v41  ;;  %6236 = vst.msk [vmem:[#allocation3 + $0x18] sm:$0xff] %vm222_vm1, %v6204_v1  ;;  %v6123_v50 = vpop.f32.mrf.mxu3  ;;  %v5948_v2 = vld [vmem:[#allocation2 + $0x140] sm:$0xff]  ;;  %v6291_v41 = vld [vmem:[#allocation2 + $0x169] sm:$0xff] }
 0x592   : > { %v5443_v10 = vpop.f32.mrf.mxu1 }
 0x593   : > { %6575 = vst.msk [vmem:[#allocation3 + $0x10] sm:$0xff] %vm222_vm1, %v6543_v12  ;;  %v5527_v54 = vadd.f32 %v5443_v10, %v5283_v63  ;;  %v5287_v12 = vld [vmem:[#allocation3 + $0x50] sm:$0xff] }
 0x594   : > { %v5622_v60 = vld [vmem:[#allocation3 + $0x28] sm:$0xff]  ;;  %7870 = vmatmul.msk.f32.gmra.mxu2 %vm222_vm1, %v5608_v35 }
 0x595   : > { %v5866_v14 = vadd.f32 %v5780_v13, %v5622_v60  ;;  %5559 = vst.msk [vmem:[#allocation3 + $0x30] sm:$0xff] %vm222_vm1, %v5527_v54  ;;  %7836 = vmatmul.msk.f32.gmra.mxu1 %vm222_vm1, %v6285_v0  ;;  %v10087_v18 = vpop.f32.mrf.mxu0  ;;  %v10126_v54 = vld [vmem:[#allocation2 + $0x15a] sm:$0xff] }
 0x596   : > { %v5961_v42 = vld [vmem:[#allocation3 + $0x20] sm:$0xff]  ;;  %7903 = vmatmul.msk.f32.gmra.mxu3 %vm222_vm1, %v5948_v2 }
 0x597   : > { %v6205_v62 = vadd.f32 %v6117_v20, %v5961_v42  ;;  %5898 = vst.msk [vmem:[#allocation3 + $0x28] sm:$0xff] %vm222_vm1, %v5866_v14  ;;  %v5786_v29 = vpop.f32.mrf.mxu2 }
 0x598   : > { %v6300_v24 = vld [vmem:[#allocation3 + $0x18] sm:$0xff]  ;;  %7936 = vmatmul.msk.f32.gmra.mxu0 %vm222_vm1, %v6288_v45 }
 0x599   : > { %v6544_v31 = vadd.f32 %v10043_v19, %v6300_v24  ;;  %6237 = vst.msk [vmem:[#allocation3 + $0x20] sm:$0xff] %vm222_vm1, %v6205_v62  ;;  %v6126_v5 = vpop.f32.mrf.mxu3  ;;  %v5949_v19 = vld [vmem:[#allocation2 + $0x150] sm:$0xff] }
 0x59a   : > { %v5446_v47 = vpop.f32.mrf.mxu1  ;;  %v6292_v24 = vld [vmem:[#allocation2 + $0x171] sm:$0xff] }
 0x59b   : > { %6576 = vst.msk [vmem:[#allocation3 + $0x18] sm:$0xff] %vm222_vm1, %v6544_v31  ;;  %v5528_v23 = vadd.f32 %v5446_v47, %v5284_v8  ;;  %v5288_v31 = vld [vmem:[#allocation3 + $0x58] sm:$0xff] }
 0x59c   : > { %v5623_v6 = vld [vmem:[#allocation3 + $0x30] sm:$0xff]  ;;  %7871 = vmatmul.msk.f32.gmra.mxu2 %vm222_vm1, %v5609_v57 }
 0x59d   : > { %v5867_v27 = vadd.f32 %v5783_v17, %v5623_v6  ;;  %5560 = vst.msk [vmem:[#allocation3 + $0x38] sm:$0xff] %vm222_vm1, %v5528_v23  ;;  %7837 = vmatmul.msk.f32.gmra.mxu1 %vm222_vm1, %v6286_v11  ;;  %v10098_v43 = vpop.f32.mrf.mxu0  ;;  %v10140_v23 = vld [vmem:[#allocation2 + $0x16a] sm:$0xff] }
 0x59e   : > { %v5962_v28 = vld [vmem:[#allocation3 + $0x28] sm:$0xff]  ;;  %7904 = vmatmul.msk.f32.gmra.mxu3 %vm222_vm1, %v5949_v19 }
 0x59f   : > { %v6206_v33 = vadd.f32 %v6120_v9, %v5962_v28  ;;  %5899 = vst.msk [vmem:[#allocation3 + $0x30] sm:$0xff] %vm222_vm1, %v5867_v27  ;;  %v5789_v46 = vpop.f32.mrf.mxu2 }
 0x5a0   : > { %v6301_v61 = vld [vmem:[#allocation3 + $0x20] sm:$0xff]  ;;  %7937 = vmatmul.msk.f32.gmra.mxu0 %vm222_vm1, %v6289_v3 }
 0x5a1   : > { %v6545_v21 = vadd.f32 %v10054_v7, %v6301_v61  ;;  %6238 = vst.msk [vmem:[#allocation3 + $0x28] sm:$0xff] %vm222_vm1, %v6206_v33  ;;  %v6129_v0 = vpop.f32.mrf.mxu3  ;;  %v5950_v7 = vld [vmem:[#allocation2 + $0x158] sm:$0xff]  ;;  %v6293_v61 = vld [vmem:[#allocation2 + $0x181] sm:$0xff] }
 0x5a2   : > { %v5449_v20 = vpop.f32.mrf.mxu1 }
 0x5a3   : > { %6577 = vst.msk [vmem:[#allocation3 + $0x20] sm:$0xff] %vm222_vm1, %v6545_v21  ;;  %v5529_v40 = vadd.f32 %v5449_v20, %v5285_v16  ;;  %v5289_v21 = vld [vmem:[#allocation3 + $0x60] sm:$0xff] }
 0x5a4   : > { %v5624_v15 = vld [vmem:[#allocation3 + $0x38] sm:$0xff]  ;;  %7872 = vmatmul.msk.f32.gmra.mxu2 %vm222_vm1, %v5610_v39 }
 0x5a5   : > { %v5868_v26 = vadd.f32 %v5786_v29, %v5624_v15  ;;  %5561 = vst.msk [vmem:[#allocation3 + $0x40] sm:$0xff] %vm222_vm1, %v5529_v40  ;;  %7838 = vmatmul.msk.f32.gmra.mxu1 %vm222_vm1, %v6287_v53  ;;  %v10109_v49 = vpop.f32.mrf.mxu0  ;;  %v10154_v40 = vld [vmem:[#allocation2 + $0x172] sm:$0xff] }
 0x5a6   : > { %v5963_v44 = vld [vmem:[#allocation3 + $0x30] sm:$0xff]  ;;  %7905 = vmatmul.msk.f32.gmra.mxu3 %vm222_vm1, %v5950_v7 }
 0x5a7   : > { %v6207_v52 = vadd.f32 %v6123_v50, %v5963_v44  ;;  %5900 = vst.msk [vmem:[#allocation3 + $0x38] sm:$0xff] %vm222_vm1, %v5868_v26  ;;  %v5792_v58 = vpop.f32.mrf.mxu2 }
 0x5a8   : > { %v6302_v4 = vld [vmem:[#allocation3 + $0x28] sm:$0xff]  ;;  %7938 = vmatmul.msk.f32.gmra.mxu0 %vm222_vm1, %v6290_v38 }
 0x5a9   : > { %v6546_v13 = vadd.f32 %v10065_v56, %v6302_v4  ;;  %6239 = vst.msk [vmem:[#allocation3 + $0x30] sm:$0xff] %vm222_vm1, %v6207_v52  ;;  %v6132_v11 = vpop.f32.mrf.mxu3  ;;  %v5951_v56 = vld [vmem:[#allocation2 + $0x168] sm:$0xff] }
 0x5aa   : > { %v5452_v9 = vpop.f32.mrf.mxu1  ;;  %v6294_v4 = vld [vmem:[#allocation2 + $0x189] sm:$0xff] }
 0x5ab   : > { %6578 = vst.msk [vmem:[#allocation3 + $0x28] sm:$0xff] %vm222_vm1, %v6546_v13  ;;  %v5530_v34 = vadd.f32 %v5452_v9, %v5286_v22  ;;  %v5290_v13 = vld [vmem:[#allocation3 + $0x68] sm:$0xff] }
 0x5ac   : > { %v5625_v30 = vld [vmem:[#allocation3 + $0x40] sm:$0xff]  ;;  %7873 = vmatmul.msk.f32.gmra.mxu2 %vm222_vm1, %v5611_v59 }
 0x5ad   : > { %v5869_v32 = vadd.f32 %v5789_v46, %v5625_v30  ;;  %5562 = vst.msk [vmem:[#allocation3 + $0x48] sm:$0xff] %vm222_vm1, %v5530_v34  ;;  %7839 = vmatmul.msk.f32.gmra.mxu1 %vm222_vm1, %v6288_v45  ;;  %v10120_v1 = vpop.f32.mrf.mxu0  ;;  %v10168_v34 = vld [vmem:[#allocation2 + $0x182] sm:$0xff] }
 0x5ae   : > { %v5964_v51 = vld [vmem:[#allocation3 + $0x38] sm:$0xff]  ;;  %7906 = vmatmul.msk.f32.gmra.mxu3 %vm222_vm1, %v5951_v56 }
 0x5af   : > { %v6208_v36 = vadd.f32 %v6126_v5, %v5964_v51  ;;  %5901 = vst.msk [vmem:[#allocation3 + $0x40] sm:$0xff] %vm222_vm1, %v5869_v32  ;;  %v5795_v55 = vpop.f32.mrf.mxu2 }
 0x5b0   : > { %v6303_v48 = vld [vmem:[#allocation3 + $0x30] sm:$0xff]  ;;  %7939 = vmatmul.msk.f32.gmra.mxu0 %vm222_vm1, %v6291_v41 }
 0x5b1   : > { %v6547_v17 = vadd.f32 %v10076_v25, %v6303_v48  ;;  %6240 = vst.msk [vmem:[#allocation3 + $0x38] sm:$0xff] %vm222_vm1, %v6208_v36  ;;  %v6135_v53 = vpop.f32.mrf.mxu3  ;;  %v5952_v25 = vld [vmem:[#allocation2 + $0x170] sm:$0xff]  ;;  %v6295_v48 = vld [vmem:[#allocation2 + $0x199] sm:$0xff] }
 0x5b2   : > { %v5455_v50 = vpop.f32.mrf.mxu1 }
 0x5b3   : > { %6579 = vst.msk [vmem:[#allocation3 + $0x30] sm:$0xff] %vm222_vm1, %v6547_v17  ;;  %v5531_v63 = vadd.f32 %v5455_v50, %v5287_v12  ;;  %v5291_v17 = vld [vmem:[#allocation3 + $0x70] sm:$0xff] }
 0x5b4   : > { %v5626_v10 = vld [vmem:[#allocation3 + $0x48] sm:$0xff]  ;;  %7874 = vmatmul.msk.f32.gmra.mxu2 %vm222_vm1, %v10126_v54 }
 0x5b5   : > { %v5870_v60 = vadd.f32 %v5792_v58, %v5626_v10  ;;  %5563 = vst.msk [vmem:[#allocation3 + $0x50] sm:$0xff] %vm222_vm1, %v5531_v63  ;;  %7840 = vmatmul.msk.f32.gmra.mxu1 %vm222_vm1, %v6289_v3  ;;  %v10134_v62 = vpop.f32.mrf.mxu0  ;;  %v10182_v63 = vld [vmem:[#allocation2 + $0x18a] sm:$0xff] }
 0x5b6   : > { %v5965_v35 = vld [vmem:[#allocation3 + $0x40] sm:$0xff]  ;;  %7907 = vmatmul.msk.f32.gmra.mxu3 %vm222_vm1, %v5952_v25 }
 0x5b7   : > { %v6209_v14 = vadd.f32 %v6129_v0, %v5965_v35  ;;  %5902 = vst.msk [vmem:[#allocation3 + $0x48] sm:$0xff] %vm222_vm1, %v5870_v60  ;;  %v5798_v42 = vpop.f32.mrf.mxu2 }
 0x5b8   : > { %v6304_v2 = vld [vmem:[#allocation3 + $0x38] sm:$0xff]  ;;  %7940 = vmatmul.msk.f32.gmra.mxu0 %vm222_vm1, %v6292_v24 }
 0x5b9   : > { %v6548_v29 = vadd.f32 %v10087_v18, %v6304_v2  ;;  %6241 = vst.msk [vmem:[#allocation3 + $0x40] sm:$0xff] %vm222_vm1, %v6209_v14  ;;  %v6138_v45 = vpop.f32.mrf.mxu3  ;;  %v5953_v18 = vld [vmem:[#allocation2 + $0x180] sm:$0xff] }
 0x5ba   : > { %v5458_v5 = vpop.f32.mrf.mxu1 }
 0x5bb   : > { %6580 = vst.msk [vmem:[#allocation3 + $0x38] sm:$0xff] %vm222_vm1, %v6548_v29  ;;  %v5532_v8 = vadd.f32 %v5458_v5, %v5288_v31 }
 0x5bc   : > { %v5627_v47 = vld [vmem:[#allocation3 + $0x50] sm:$0xff]  ;;  %7875 = vmatmul.msk.f32.gmra.mxu2 %vm222_vm1, %v10140_v23 }
 0x5bd   : > { %v5871_v6 = vadd.f32 %v5795_v55, %v5627_v47  ;;  %5564 = vst.msk [vmem:[#allocation3 + $0x58] sm:$0xff] %vm222_vm1, %v5532_v8  ;;  %7841 = vmatmul.msk.f32.gmra.mxu1 %vm222_vm1, %v6290_v38  ;;  %v10148_v33 = vpop.f32.mrf.mxu0 }
 0x5be   : > { %v5966_v57 = vld [vmem:[#allocation3 + $0x48] sm:$0xff]  ;;  %7908 = vmatmul.msk.f32.gmra.mxu3 %vm222_vm1, %v5953_v18 }
 0x5bf   : > { %v6210_v27 = vadd.f32 %v6132_v11, %v5966_v57  ;;  %5903 = vst.msk [vmem:[#allocation3 + $0x50] sm:$0xff] %vm222_vm1, %v5871_v6  ;;  %v5801_v28 = vpop.f32.mrf.mxu2 }
 0x5c0   : > { %v6305_v19 = vld [vmem:[#allocation3 + $0x40] sm:$0xff]  ;;  %7941 = vmatmul.msk.f32.gmra.mxu0 %vm222_vm1, %v6293_v61 }
 0x5c1   : > { %v6549_v46 = vadd.f32 %v10098_v43, %v6305_v19  ;;  %6242 = vst.msk [vmem:[#allocation3 + $0x48] sm:$0xff] %vm222_vm1, %v6210_v27  ;;  %v6141_v3 = vpop.f32.mrf.mxu3  ;;  %v5954_v43 = vld [vmem:[#allocation2 + $0x188] sm:$0xff] }
 0x5c2   : > { %v5461_v0 = vpop.f32.mrf.mxu1 }
 0x5c3   : > { %6581 = vst.msk [vmem:[#allocation3 + $0x40] sm:$0xff] %vm222_vm1, %v6549_v46  ;;  %v5533_v16 = vadd.f32 %v5461_v0, %v5289_v21  ;;  %v6605_v0 = vld [vmem:[#allocation2 + $0x32] sm:$0xff] }
 0x5c4   : > { %v5628_v20 = vld [vmem:[#allocation3 + $0x58] sm:$0xff]  ;;  %7876 = vmatmul.msk.f32.gmra.mxu2 %vm222_vm1, %v10154_v40 }
 0x5c5   : > { %v5872_v15 = vadd.f32 %v5798_v42, %v5628_v20  ;;  %5565 = vst.msk [vmem:[#allocation3 + $0x60] sm:$0xff] %vm222_vm1, %v5533_v16  ;;  %7842 = vmatmul.msk.f32.gmra.mxu1 %vm222_vm1, %v6291_v41  ;;  %v10162_v52 = vpop.f32.mrf.mxu0  ;;  %v6296_v42 = vld [vmem:[#allocation2 + $0x1a1] sm:$0xff] }
 0x5c6   : > { %v5967_v39 = vld [vmem:[#allocation3 + $0x50] sm:$0xff]  ;;  %7909 = vmatmul.msk.f32.gmra.mxu3 %vm222_vm1, %v5954_v43 }
 0x5c7   : > { %v6211_v26 = vadd.f32 %v6135_v53, %v5967_v39  ;;  %5904 = vst.msk [vmem:[#allocation3 + $0x58] sm:$0xff] %vm222_vm1, %v5872_v15  ;;  %v5804_v44 = vpop.f32.mrf.mxu2 }
 0x5c8   : > { %v6306_v7 = vld [vmem:[#allocation3 + $0x48] sm:$0xff]  ;;  %7942 = vmatmul.msk.f32.gmra.mxu0 %vm222_vm1, %v6294_v4 }
 0x5c9   : > { %v6550_v58 = vadd.f32 %v10109_v49, %v6306_v7  ;;  %6243 = vst.msk [vmem:[#allocation3 + $0x50] sm:$0xff] %vm222_vm1, %v6211_v26  ;;  %v6144_v38 = vpop.f32.mrf.mxu3  ;;  %v5955_v49 = vld [vmem:[#allocation2 + $0x198] sm:$0xff] }
 0x5ca   : > { %v5464_v11 = vpop.f32.mrf.mxu1  ;;  %v5294_v7 = vld [vmem:[#allocation3 + $0x88] sm:$0xff] }
 0x5cb   : > { %6582 = vst.msk [vmem:[#allocation3 + $0x48] sm:$0xff] %vm222_vm1, %v6550_v58  ;;  %v5534_v22 = vadd.f32 %v5464_v11, %v5290_v13  ;;  %v6606_v13 = vld [vmem:[#allocation2 + $0x3a] sm:$0xff] }
 0x5cc   : > { %v5629_v9 = vld [vmem:[#allocation3 + $0x60] sm:$0xff]  ;;  %7877 = vmatmul.msk.f32.gmra.mxu2 %vm222_vm1, %v10168_v34 }
 0x5cd   : > { %v5873_v30 = vadd.f32 %v5801_v28, %v5629_v9  ;;  %5566 = vst.msk [vmem:[#allocation3 + $0x68] sm:$0xff] %vm222_vm1, %v5534_v22  ;;  %7843 = vmatmul.msk.f32.gmra.mxu1 %vm222_vm1, %v6292_v24  ;;  %v10176_v36 = vpop.f32.mrf.mxu0 }
 0x5ce   : > { %v5968_v59 = vld [vmem:[#allocation3 + $0x58] sm:$0xff]  ;;  %7910 = vmatmul.msk.f32.gmra.mxu3 %vm222_vm1, %v5955_v49 }
 0x5cf   : > { %v6212_v32 = vadd.f32 %v6138_v45, %v5968_v59  ;;  %5905 = vst.msk [vmem:[#allocation3 + $0x60] sm:$0xff] %vm222_vm1, %v5873_v30  ;;  %v5807_v51 = vpop.f32.mrf.mxu2  ;;  %v5292_v45 = vld [vmem:[#allocation3 + $0x78] sm:$0xff] }
 0x5d0   : > { %v6307_v56 = vld [vmem:[#allocation3 + $0x50] sm:$0xff]  ;;  %7943 = vmatmul.msk.f32.gmra.mxu0 %vm222_vm1, %v6295_v48 }
 0x5d1   : > { %v6551_v55 = vadd.f32 %v10120_v1, %v6307_v56  ;;  %6244 = vst.msk [vmem:[#allocation3 + $0x58] sm:$0xff] %vm222_vm1, %v6212_v32  ;;  %v6147_v41 = vpop.f32.mrf.mxu3  ;;  %v5956_v1 = vld [vmem:[#allocation2 + $0x1a0] sm:$0xff] }
 0x5d2   : > { %v5467_v53 = vpop.f32.mrf.mxu1  ;;  %v5295_v32 = vld [vmem:[#allocation3 + $0x90] sm:$0xff] }
 0x5d3   : > { %6583 = vst.msk [vmem:[#allocation3 + $0x50] sm:$0xff] %vm222_vm1, %v6551_v55  ;;  %v5535_v12 = vadd.f32 %v5467_v53, %v5291_v17  ;;  %v6607_v55 = vld [vmem:[#allocation2 + $0x4a] sm:$0xff] }
 0x5d4   : > { %v5630_v50 = vld [vmem:[#allocation3 + $0x68] sm:$0xff]  ;;  %7878 = vmatmul.msk.f32.gmra.mxu2 %vm222_vm1, %v10182_v63 }
 0x5d5   : > { %v5874_v10 = vadd.f32 %v5804_v44, %v5630_v50  ;;  %5567 = vst.msk [vmem:[#allocation3 + $0x70] sm:$0xff] %vm222_vm1, %v5535_v12  ;;  %7844 = vmatmul.msk.f32.gmra.mxu1 %vm222_vm1, %v6293_v61  ;;  %v10190_v2 = vpop.f32.mrf.mxu0  ;;  %v5293_v61 = vld [vmem:[#allocation3 + $0x80] sm:$0xff] }
 0x5d6   : > { %v5969_v60 = vld [vmem:[#allocation3 + $0x60] sm:$0xff]  ;;  %7911 = vmatmul.msk.f32.gmra.mxu3 %vm222_vm1, %v5956_v1 }
 0x5d7   : > { %v6213_v25 = vadd.f32 %v6141_v3, %v5969_v60  ;;  %5906 = vst.msk [vmem:[#allocation3 + $0x68] sm:$0xff] %vm222_vm1, %v5874_v10  ;;  %v5810_v14 = vpop.f32.mrf.mxu2  ;;  %v5296_v60 = vld [vmem:[#allocation3 + $0x98] sm:$0xff] }
 0x5d8   : > { %v6308_v35 = vld [vmem:[#allocation3 + $0x58] sm:$0xff]  ;;  %7944 = vmatmul.msk.f32.gmra.mxu0 %vm222_vm1, %v6296_v42  ;;  %v6608_v42 = vld [vmem:[#allocation2 + $0x52] sm:$0xff] }
 0x5d9   : > { %v6552_v24 = vadd.f32 %v10134_v62, %v6308_v35  ;;  %6245 = vst.msk [vmem:[#allocation3 + $0x60] sm:$0xff] %vm222_vm1, %v6213_v25  ;;  %v6150_v29 = vpop.f32.mrf.mxu3 }
 0x5da   : > { %v5470_v31 = vpop.f32.mrf.mxu1 }
 0x5db   : > { %6584 = vst.msk [vmem:[#allocation3 + $0x58] sm:$0xff] %vm222_vm1, %v6552_v24  ;;  %v5536_v5 = vadd.f32 %v5470_v31, %v5292_v45 }
 0x5dc   : > { %v5631_v8 = vld [vmem:[#allocation3 + $0x70] sm:$0xff] }
 0x5dd   : > { %v5875_v47 = vadd.f32 %v5807_v51, %v5631_v8  ;;  %5568 = vst.msk [vmem:[#allocation3 + $0x78] sm:$0xff] %vm222_vm1, %v5536_v5  ;;  %7845 = vmatmul.msk.f32.gmra.mxu1 %vm222_vm1, %v6294_v4  ;;  %v10201_v28 = vpop.f32.mrf.mxu0 }
 0x5de   : > { %v5970_v6 = vld [vmem:[#allocation3 + $0x68] sm:$0xff] }
 0x5df   : > { %v6214_v18 = vadd.f32 %v6144_v38, %v5970_v6  ;;  %5907 = vst.msk [vmem:[#allocation3 + $0x70] sm:$0xff] %vm222_vm1, %v5875_v47  ;;  %v5813_v57 = vpop.f32.mrf.mxu2  ;;  %v5297_v6 = vld [vmem:[#allocation3 + $0xa0] sm:$0xff] }
 0x5e0   : > { %v6309_v62 = vld [vmem:[#allocation3 + $0x60] sm:$0xff] }
 0x5e1   : > { %v6553_v27 = vadd.f32 %v10148_v33, %v6309_v62  ;;  %6246 = vst.msk [vmem:[#allocation3 + $0x68] sm:$0xff] %vm222_vm1, %v6214_v18  ;;  %v6153_v19 = vpop.f32.mrf.mxu3 }
 0x5e2   : > { %v5473_v46 = vpop.f32.mrf.mxu1 }
 0x5e3   : > { %6585 = vst.msk [vmem:[#allocation3 + $0x60] sm:$0xff] %vm222_vm1, %v6553_v27  ;;  %v5537_v3 = vadd.f32 %v5473_v46, %v5293_v61  ;;  %v6609_v27 = vld [vmem:[#allocation2 + $0x62] sm:$0xff] }
 0x5e4   : > { %v5632_v21 = vld [vmem:[#allocation3 + $0x78] sm:$0xff] }
 0x5e5   : > { %v5876_v16 = vadd.f32 %v5810_v14, %v5632_v21  ;;  %5569 = vst.msk [vmem:[#allocation3 + $0x80] sm:$0xff] %vm222_vm1, %v5537_v3  ;;  %7946 = vmatmul.msk.f32.vlgmr.msra.gmra.mxu1 %vm222_vm1, %v6605_v0  ;;  %v10210_v58 = vpop.f32.mrf.mxu0 }
 0x5e6   : > { %v5971_v20 = vld [vmem:[#allocation3 + $0x70] sm:$0xff] }
 0x5e7   : > { %v6215_v15 = vadd.f32 %v6147_v41, %v5971_v20  ;;  %5908 = vst.msk [vmem:[#allocation3 + $0x78] sm:$0xff] %vm222_vm1, %v5876_v16  ;;  %v5816_v43 = vpop.f32.mrf.mxu2  ;;  %v5298_v20 = vld [vmem:[#allocation3 + $0xa8] sm:$0xff] }
 0x5e8   : > { %v6310_v33 = vld [vmem:[#allocation3 + $0x68] sm:$0xff] }
 0x5e9   : > { %v6554_v39 = vadd.f32 %v10162_v52, %v6310_v33  ;;  %6247 = vst.msk [vmem:[#allocation3 + $0x70] sm:$0xff] %vm222_vm1, %v6215_v15  ;;  %v6156_v26 = vpop.f32.mrf.mxu3 }
 0x5ea   : > { %v5476_v44 = vpop.f32.mrf.mxu1 }
 0x5eb   : > { %6586 = vst.msk [vmem:[#allocation3 + $0x68] sm:$0xff] %vm222_vm1, %v6554_v39  ;;  %v5538_v4 = vadd.f32 %v5476_v44, %v5294_v7  ;;  %v6610_v39 = vld [vmem:[#allocation2 + $0x6a] sm:$0xff] }
 0x5ec   : > { %v5633_v38 = vld [vmem:[#allocation3 + $0x80] sm:$0xff] }
 0x5ed   : > { %v5877_v11 = vadd.f32 %v5813_v57, %v5633_v38  ;;  %5570 = vst.msk [vmem:[#allocation3 + $0x88] sm:$0xff] %vm222_vm1, %v5538_v4  ;;  %7947 = vmatmul.msk.f32.gmra.mxu1 %vm222_vm1, %v6606_v13  ;;  %v6499_v17 = vpop.f32.mrf.mxu0  ;;  %v5299_v13 = vld [vmem:[#allocation3 + $0xb0] sm:$0xff] }
 0x5ee   : > { %v5972_v22 = vld [vmem:[#allocation3 + $0x78] sm:$0xff] }
 0x5ef   : > { %v6216_v9 = vadd.f32 %v6150_v29, %v5972_v22  ;;  %5909 = vst.msk [vmem:[#allocation3 + $0x80] sm:$0xff] %vm222_vm1, %v5877_v11  ;;  %v5819_v30 = vpop.f32.mrf.mxu2 }
 0x5f0   : > { %v6311_v52 = vld [vmem:[#allocation3 + $0x70] sm:$0xff] }
 0x5f1   : > { %v6555_v49 = vadd.f32 %v10176_v36, %v6311_v52  ;;  %6248 = vst.msk [vmem:[#allocation3 + $0x78] sm:$0xff] %vm222_vm1, %v6216_v9  ;;  %v6159_v59 = vpop.f32.mrf.mxu3 }
 0x5f2   : > { %v5479_v56 = vpop.f32.mrf.mxu1 }
 0x5f3   : > { %6587 = vst.msk [vmem:[#allocation3 + $0x70] sm:$0xff] %vm222_vm1, %v6555_v49  ;;  %v5539_v51 = vadd.f32 %v5479_v56, %v5295_v32  ;;  %v6611_v49 = vld [vmem:[#allocation2 + $0x7a] sm:$0xff] }
 0x5f4   : > { %v5634_v48 = vld [vmem:[#allocation3 + $0x88] sm:$0xff] }
 0x5f5   : > { %v5878_v41 = vadd.f32 %v5816_v43, %v5634_v48  ;;  %5571 = vst.msk [vmem:[#allocation3 + $0x90] sm:$0xff] %vm222_vm1, %v5539_v51  ;;  %7948 = vmatmul.msk.f32.gmra.mxu1 %vm222_vm1, %v6607_v55 }
 0x5f6   : > { %v5973_v53 = vld [vmem:[#allocation3 + $0x80] sm:$0xff] }
 0x5f7   : > { %v6217_v12 = vadd.f32 %v6153_v19, %v5973_v53  ;;  %5910 = vst.msk [vmem:[#allocation3 + $0x88] sm:$0xff] %vm222_vm1, %v5878_v41  ;;  %v5822_v50 = vpop.f32.mrf.mxu2  ;;  %v5300_v41 = vld [vmem:[#allocation3 + $0xb8] sm:$0xff] }
 0x5f8   : > { %v6312_v36 = vld [vmem:[#allocation3 + $0x78] sm:$0xff] }
 0x5f9   : > { %v6556_v10 = vadd.f32 %v10190_v2, %v6312_v36  ;;  %6249 = vst.msk [vmem:[#allocation3 + $0x80] sm:$0xff] %vm222_vm1, %v6217_v12  ;;  %v6162_v1 = vpop.f32.mrf.mxu3  ;;  %v6502_v2 = vpop.f32.mrf.mxu0  ;;  %v6612_v36 = vld [vmem:[#allocation2 + $0x82] sm:$0xff] }
 0x5fa   : > { %v5482_v25 = vpop.f32.mrf.mxu1 }
 0x5fb   : > { %6588 = vst.msk [vmem:[#allocation3 + $0x78] sm:$0xff] %vm222_vm1, %v6556_v10  ;;  %v5540_v35 = vadd.f32 %v5482_v25, %v5296_v60 }
 0x5fc   : > { %v5635_v14 = vld [vmem:[#allocation3 + $0x90] sm:$0xff] }
 0x5fd   : > { %v5879_v24 = vadd.f32 %v5819_v30, %v5635_v14  ;;  %5572 = vst.msk [vmem:[#allocation3 + $0x98] sm:$0xff] %vm222_vm1, %v5540_v35  ;;  %7949 = vmatmul.msk.f32.gmra.mxu1 %vm222_vm1, %v6608_v42 }
 0x5fe   : > { %v5974_v29 = vld [vmem:[#allocation3 + $0x88] sm:$0xff] }
 0x5ff   : > { %v6218_v45 = vadd.f32 %v6156_v26, %v5974_v29  ;;  %5911 = vst.msk [vmem:[#allocation3 + $0x90] sm:$0xff] %vm222_vm1, %v5879_v24  ;;  %v5825_v5 = vpop.f32.mrf.mxu2  ;;  %v5301_v24 = vld [vmem:[#allocation3 + $0xc0] sm:$0xff] }
 0x600   : > { %v6313_v31 = vld [vmem:[#allocation3 + $0x80] sm:$0xff] }
 0x601   : > { %v6557_v8 = vadd.f32 %v10201_v28, %v6313_v31  ;;  %6250 = vst.msk [vmem:[#allocation3 + $0x88] sm:$0xff] %vm222_vm1, %v6218_v45  ;;  %v6165_v47 = vpop.f32.mrf.mxu3  ;;  %v6505_v0 = vpop.f32.mrf.mxu0  ;;  %v6613_v31 = vld [vmem:[#allocation2 + $0x92] sm:$0xff] }
 0x602   : > { %v5485_v18 = vpop.f32.mrf.mxu1 }
 0x603   : > { %6589 = vst.msk [vmem:[#allocation3 + $0x80] sm:$0xff] %vm222_vm1, %v6557_v8  ;;  %v5541_v62 = vadd.f32 %v5485_v18, %v5297_v6 }
 0x604   : > { %v5636_v57 = vld [vmem:[#allocation3 + $0x98] sm:$0xff] }
 0x605   : > { %v5880_v19 = vadd.f32 %v5822_v50, %v5636_v57  ;;  %5573 = vst.msk [vmem:[#allocation3 + $0xa0] sm:$0xff] %vm222_vm1, %v5541_v62  ;;  %7950 = vmatmul.msk.f32.gmra.mxu1 %vm222_vm1, %v6609_v27 }
 0x606   : > { %v5975_v61 = vld [vmem:[#allocation3 + $0x90] sm:$0xff] }
 0x607   : > { %v6219_v46 = vadd.f32 %v6159_v59, %v5975_v61  ;;  %5912 = vst.msk [vmem:[#allocation3 + $0x98] sm:$0xff] %vm222_vm1, %v5880_v19  ;;  %v5828_v3 = vpop.f32.mrf.mxu2  ;;  %v5302_v19 = vld [vmem:[#allocation3 + $0xc8] sm:$0xff] }
 0x608   : > { %v6314_v28 = vld [vmem:[#allocation3 + $0x88] sm:$0xff] }
 0x609   : > { %v6558_v21 = vadd.f32 %v10210_v58, %v6314_v28  ;;  %6251 = vst.msk [vmem:[#allocation3 + $0x90] sm:$0xff] %vm222_vm1, %v6219_v46  ;;  %v6168_v16 = vpop.f32.mrf.mxu3  ;;  %v6508_v22 = vpop.f32.mrf.mxu0 }
 0x60a   : > { %v5488_v15 = vpop.f32.mrf.mxu1 }
 0x60b   : > { %6590 = vst.msk [vmem:[#allocation3 + $0x88] sm:$0xff] %vm222_vm1, %v6558_v21  ;;  %v5542_v33 = vadd.f32 %v5488_v15, %v5298_v20 }
 0x60c   : > { %v5637_v43 = vld [vmem:[#allocation3 + $0xa0] sm:$0xff] }
 0x60d   : > { %v5881_v26 = vadd.f32 %v5825_v5, %v5637_v43  ;;  %5574 = vst.msk [vmem:[#allocation3 + $0xa8] sm:$0xff] %vm222_vm1, %v5542_v33  ;;  %7951 = vmatmul.msk.f32.gmra.mxu1 %vm222_vm1, %v6610_v39 }
 0x60e   : > { %v5976_v7 = vld [vmem:[#allocation3 + $0x98] sm:$0xff] }
 0x60f   : > { %v6220_v44 = vadd.f32 %v6162_v1, %v5976_v7  ;;  %5913 = vst.msk [vmem:[#allocation3 + $0xa0] sm:$0xff] %vm222_vm1, %v5881_v26  ;;  %v5831_v58 = vpop.f32.mrf.mxu2  ;;  %v5303_v26 = vld [vmem:[#allocation3 + $0xd0] sm:$0xff] }
 0x610   : > { %v6315_v4 = vld [vmem:[#allocation3 + $0x90] sm:$0xff] }
 0x611   : > { %v6559_v38 = vadd.f32 %v6499_v17, %v6315_v4  ;;  %6252 = vst.msk [vmem:[#allocation3 + $0x98] sm:$0xff] %vm222_vm1, %v6220_v44  ;;  %v6171_v9 = vpop.f32.mrf.mxu3  ;;  %v6511_v10 = vpop.f32.mrf.mxu0 }
 0x612   : > { %v5491_v11 = vpop.f32.mrf.mxu1 }
 0x613   : > { %6591 = vst.msk [vmem:[#allocation3 + $0x90] sm:$0xff] %vm222_vm1, %v6559_v38  ;;  %v5543_v52 = vadd.f32 %v5491_v11, %v5299_v13 }
 0x614   : > { %v5638_v30 = vld [vmem:[#allocation3 + $0xa8] sm:$0xff] }
 0x615   : > { %v5882_v59 = vadd.f32 %v5828_v3, %v5638_v30  ;;  %5575 = vst.msk [vmem:[#allocation3 + $0xb0] sm:$0xff] %vm222_vm1, %v5543_v52  ;;  %7952 = vmatmul.msk.f32.gmra.mxu1 %vm222_vm1, %v6611_v49  ;;  %v6614_v3 = vld [vmem:[#allocation2 + $0x9a] sm:$0xff]  ;;  %v5304_v52 = vld [vmem:[#allocation3 + $0xd8] sm:$0xff] }
 0x616   : > { %v5977_v32 = vld [vmem:[#allocation3 + $0xa0] sm:$0xff] }
 0x617   : > { %v6221_v56 = vadd.f32 %v6165_v47, %v5977_v32  ;;  %5914 = vst.msk [vmem:[#allocation3 + $0xa8] sm:$0xff] %vm222_vm1, %v5882_v59  ;;  %v5834_v48 = vpop.f32.mrf.mxu2 }
 0x618   : > { %v6316_v51 = vld [vmem:[#allocation3 + $0x98] sm:$0xff] }
 0x619   : > { %v6560_v55 = vadd.f32 %v6502_v2, %v6316_v51  ;;  %6253 = vst.msk [vmem:[#allocation3 + $0xa0] sm:$0xff] %vm222_vm1, %v6221_v56  ;;  %v6174_v1 = vpop.f32.mrf.mxu3  ;;  %v6514_v6 = vpop.f32.mrf.mxu0 }
 0x61a   : > { %v5494_v17 = vpop.f32.mrf.mxu1 }
 0x61b   : > { %6592 = vst.msk [vmem:[#allocation3 + $0x98] sm:$0xff] %vm222_vm1, %v6560_v55  ;;  %v5544_v53 = vadd.f32 %v5494_v17, %v5300_v41 }
 0x61c   : > { %v5639_v12 = vld [vmem:[#allocation3 + $0xb0] sm:$0xff] }
 0x61d   : > { %v5883_v50 = vadd.f32 %v5831_v58, %v5639_v12  ;;  %5576 = vst.msk [vmem:[#allocation3 + $0xb8] sm:$0xff] %vm222_vm1, %v5544_v53  ;;  %7953 = vmatmul.msk.f32.gmra.mxu1 %vm222_vm1, %v6612_v36  ;;  %v6615_v58 = vld [vmem:[#allocation2 + $0xaa] sm:$0xff] }
 0x61e   : > { %v5978_v60 = vld [vmem:[#allocation3 + $0xa8] sm:$0xff]  ;;  %v5305_v36 = vld [vmem:[#allocation3 + $0xe0] sm:$0xff] }
 0x61f   : > { %v6222_v25 = vadd.f32 %v6168_v16, %v5978_v60  ;;  %5915 = vst.msk [vmem:[#allocation3 + $0xb0] sm:$0xff] %vm222_vm1, %v5883_v50  ;;  %v5837_v14 = vpop.f32.mrf.mxu2  ;;  %v6617_v60 = vld [vmem:[#allocation2 + $0xc2] sm:$0xff] }
 0x620   : > { %v6317_v35 = vld [vmem:[#allocation3 + $0xa0] sm:$0xff] }
 0x621   : > { %v6561_v42 = vadd.f32 %v6505_v0, %v6317_v35  ;;  %6254 = vst.msk [vmem:[#allocation3 + $0xa8] sm:$0xff] %vm222_vm1, %v6222_v25  ;;  %v6177_v18 = vpop.f32.mrf.mxu3  ;;  %v6517_v33 = vpop.f32.mrf.mxu0 }
 0x622   : > { %v5497_v29 = vpop.f32.mrf.mxu1 }
 0x623   : > { %6593 = vst.msk [vmem:[#allocation3 + $0xa0] sm:$0xff] %vm222_vm1, %v6561_v42  ;;  %v5545_v45 = vadd.f32 %v5497_v29, %v5301_v24 }
 0x624   : > { %v5640_v2 = vld [vmem:[#allocation3 + $0xb8] sm:$0xff] }
 0x625   : > { %v5884_v5 = vadd.f32 %v5834_v48, %v5640_v2  ;;  %5577 = vst.msk [vmem:[#allocation3 + $0xc0] sm:$0xff] %vm222_vm1, %v5545_v45  ;;  %7954 = vmatmul.msk.f32.gmra.mxu1 %vm222_vm1, %v6613_v31  ;;  %v6616_v48 = vld [vmem:[#allocation2 + $0xb2] sm:$0xff] }
 0x626   : > { %v5979_v8 = vld [vmem:[#allocation3 + $0xb0] sm:$0xff]  ;;  %v5306_v31 = vld [vmem:[#allocation3 + $0xe8] sm:$0xff] }
 0x627   : > { %v6223_v47 = vadd.f32 %v6171_v9, %v5979_v8  ;;  %5916 = vst.msk [vmem:[#allocation3 + $0xb8] sm:$0xff] %vm222_vm1, %v5884_v5  ;;  %v5840_v57 = vpop.f32.mrf.mxu2 }
 0x628   : > { %v6318_v62 = vld [vmem:[#allocation3 + $0xa8] sm:$0xff] }
 0x629   : > { %v6562_v27 = vadd.f32 %v6508_v22, %v6318_v62  ;;  %6255 = vst.msk [vmem:[#allocation3 + $0xb0] sm:$0xff] %vm222_vm1, %v6223_v47  ;;  %v6180_v43 = vpop.f32.mrf.mxu3  ;;  %v6520_v49 = vpop.f32.mrf.mxu0 }
 0x62a   : > { %v5500_v61 = vpop.f32.mrf.mxu1 }
 0x62b   : > { %6594 = vst.msk [vmem:[#allocation3 + $0xa8] sm:$0xff] %vm222_vm1, %v6562_v27  ;;  %v5546_v46 = vadd.f32 %v5500_v61, %v5302_v19 }
 0x62c   : > { %v5641_v28 = vld [vmem:[#allocation3 + $0xc0] sm:$0xff] }
 0x62d   : > { %v5885_v21 = vadd.f32 %v5837_v14, %v5641_v28  ;;  %5578 = vst.msk [vmem:[#allocation3 + $0xc8] sm:$0xff] %vm222_vm1, %v5546_v46  ;;  %7955 = vmatmul.msk.f32.gmra.mxu1 %vm222_vm1, %v6614_v3  ;;  %v5307_v3 = vld [vmem:[#allocation3 + $0xf0] sm:$0xff] }
 0x62e   : > { %v5980_v0 = vld [vmem:[#allocation3 + $0xb8] sm:$0xff] }
 0x62f   : > { %v6224_v16 = vadd.f32 %v6174_v1, %v5980_v0  ;;  %5917 = vst.msk [vmem:[#allocation3 + $0xc0] sm:$0xff] %vm222_vm1, %v5885_v21  ;;  %v5843_v39 = vpop.f32.mrf.mxu2 }
 0x630   : > { %v6319_v20 = vld [vmem:[#allocation3 + $0xb0] sm:$0xff] }
 0x631   : > { %v6563_v15 = vadd.f32 %v6511_v10, %v6319_v20  ;;  %6256 = vst.msk [vmem:[#allocation3 + $0xb8] sm:$0xff] %vm222_vm1, %v6224_v16  ;;  %v6183_v59 = vpop.f32.mrf.mxu3  ;;  %v6523_v25 = vpop.f32.mrf.mxu0  ;;  %v6619_v20 = vld [vmem:[#allocation2 + $0xda] sm:$0xff] }
 0x632   : > { %v5503_v7 = vpop.f32.mrf.mxu1 }
 0x633   : > { %6595 = vst.msk [vmem:[#allocation3 + $0xb0] sm:$0xff] %vm222_vm1, %v6563_v15  ;;  %v5547_v44 = vadd.f32 %v5503_v7, %v5303_v26 }
 0x634   : > { %v5642_v4 = vld [vmem:[#allocation3 + $0xc8] sm:$0xff] }
 0x635   : > { %v5886_v38 = vadd.f32 %v5840_v57, %v5642_v4  ;;  %5579 = vst.msk [vmem:[#allocation3 + $0xd0] sm:$0xff] %vm222_vm1, %v5547_v44  ;;  %7956 = vmatmul.msk.f32.gmra.mxu1 %vm222_vm1, %v6615_v58  ;;  %v5308_v58 = vld [vmem:[#allocation3 + $0xf8] sm:$0xff] }
 0x636   : > { %v5981_v13 = vld [vmem:[#allocation3 + $0xc0] sm:$0xff] }
 0x637   : > { %v6225_v11 = vadd.f32 %v6177_v18, %v5981_v13  ;;  %5918 = vst.msk [vmem:[#allocation3 + $0xc8] sm:$0xff] %vm222_vm1, %v5886_v38  ;;  %v5846_v51 = vpop.f32.mrf.mxu2 }
 0x638   : > { %v6320_v22 = vld [vmem:[#allocation3 + $0xb8] sm:$0xff] }
 0x639   : > { %v6564_v9 = vadd.f32 %v6514_v6, %v6320_v22  ;;  %6257 = vst.msk [vmem:[#allocation3 + $0xc0] sm:$0xff] %vm222_vm1, %v6225_v11  ;;  %v6186_v35 = vpop.f32.mrf.mxu3  ;;  %v6618_v6 = vld [vmem:[#allocation2 + $0xca] sm:$0xff]  ;;  %v6526_v27 = vpop.f32.mrf.mxu0  ;;  %v6620_v22 = vld [vmem:[#allocation2 + $0xe2] sm:$0xff] }
 0x63a   : > { %v5506_v30 = vpop.f32.mrf.mxu1 }
 0x63b   : > { %6596 = vst.msk [vmem:[#allocation3 + $0xb8] sm:$0xff] %vm222_vm1, %v6564_v9  ;;  %v5548_v32 = vadd.f32 %v5506_v30, %v5304_v52 }
 0x63c   : > { %v5643_v56 = vld [vmem:[#allocation3 + $0xd0] sm:$0xff] }
 0x63d   : > { %v5887_v55 = vadd.f32 %v5843_v39, %v5643_v56  ;;  %5580 = vst.msk [vmem:[#allocation3 + $0xd8] sm:$0xff] %vm222_vm1, %v5548_v32  ;;  %7957 = vmatmul.msk.f32.gmra.mxu1 %vm222_vm1, %v6616_v48  ;;  %v6637_v32 = vld [vmem:[#allocation3] sm:$0xff] }
 0x63e   : > { %v5982_v41 = vld [vmem:[#allocation3 + $0xc8] sm:$0xff] }
 0x63f   : > { %v6226_v17 = vadd.f32 %v6180_v43, %v5982_v41  ;;  %5919 = vst.msk [vmem:[#allocation3 + $0xd0] sm:$0xff] %vm222_vm1, %v5887_v55  ;;  %v5849_v24 = vpop.f32.mrf.mxu2 }
 0x640   : > { %v6321_v53 = vld [vmem:[#allocation3 + $0xc0] sm:$0xff] }
 0x641   : > { %v6565_v12 = vadd.f32 %v6517_v33, %v6321_v53  ;;  %6258 = vst.msk [vmem:[#allocation3 + $0xc8] sm:$0xff] %vm222_vm1, %v6226_v17  ;;  %v6189_v19 = vpop.f32.mrf.mxu3  ;;  %v6529_v7 = vpop.f32.mrf.mxu0  ;;  %v6621_v53 = vld [vmem:[#allocation2 + $0xf2] sm:$0xff] }
 0x642   : > { %v5509_v50 = vpop.f32.mrf.mxu1 }
 0x643   : > { %6597 = vst.msk [vmem:[#allocation3 + $0xc0] sm:$0xff] %vm222_vm1, %v6565_v12  ;;  %v5549_v10 = vadd.f32 %v5509_v50, %v5305_v36 }
 0x644   : > { %v5644_v1 = vld [vmem:[#allocation3 + $0xd8] sm:$0xff] }
 0x645   : > { %v5888_v14 = vadd.f32 %v5846_v51, %v5644_v1  ;;  %5581 = vst.msk [vmem:[#allocation3 + $0xe0] sm:$0xff] %vm222_vm1, %v5549_v10  ;;  %7958 = vmatmul.msk.f32.gmra.mxu1 %vm222_vm1, %v6617_v60  ;;  %v6638_v60 = vld [vmem:[#allocation3 + $0x8] sm:$0xff] }
 0x646   : > { %v5983_v42 = vld [vmem:[#allocation3 + $0xd0] sm:$0xff] }
 0x647   : > { %v6227_v29 = vadd.f32 %v6183_v59, %v5983_v42  ;;  %5920 = vst.msk [vmem:[#allocation3 + $0xd8] sm:$0xff] %vm222_vm1, %v5888_v14  ;;  %v5852_v46 = vpop.f32.mrf.mxu2  ;;  %v6622_v14 = vld [vmem:[#allocation2 + $0xfa] sm:$0xff] }
 0x648   : > { %v6322_v45 = vld [vmem:[#allocation3 + $0xc8] sm:$0xff] }
 0x649   : > { %v6566_v2 = vadd.f32 %v6520_v49, %v6322_v45  ;;  %6259 = vst.msk [vmem:[#allocation3 + $0xd0] sm:$0xff] %vm222_vm1, %v6227_v29  ;;  %v6192_v44 = vpop.f32.mrf.mxu3  ;;  %v6532_v51 = vpop.f32.mrf.mxu0 }
 0x64a   : > { %v5512_v5 = vpop.f32.mrf.mxu1 }
 0x64b   : > { %6598 = vst.msk [vmem:[#allocation3 + $0xc8] sm:$0xff] %vm222_vm1, %v6566_v2  ;;  %v5550_v8 = vadd.f32 %v5512_v5, %v5306_v31  ;;  %v6639_v5 = vld [vmem:[#allocation3 + $0x10] sm:$0xff] }
 0x64c   : > { %v5645_v47 = vld [vmem:[#allocation3 + $0xe0] sm:$0xff] }
 0x64d   : > { %v5889_v18 = vadd.f32 %v5849_v24, %v5645_v47  ;;  %5582 = vst.msk [vmem:[#allocation3 + $0xe8] sm:$0xff] %vm222_vm1, %v5550_v8  ;;  %7959 = vmatmul.msk.f32.gmra.mxu1 %vm222_vm1, %v6618_v6  ;;  %v6623_v6 = vld [vmem:[#allocation2 + $0x10a] sm:$0xff] }
 0x64e   : > { %v5984_v62 = vld [vmem:[#allocation3 + $0xd8] sm:$0xff] }
 0x64f   : > { %v6228_v57 = vadd.f32 %v6186_v35, %v5984_v62  ;;  %5921 = vst.msk [vmem:[#allocation3 + $0xe0] sm:$0xff] %vm222_vm1, %v5889_v18  ;;  %v5855_v4 = vpop.f32.mrf.mxu2 }
 0x650   : > { %v6323_v61 = vld [vmem:[#allocation3 + $0xd0] sm:$0xff] }
 0x651   : > { %v6567_v28 = vadd.f32 %v6523_v25, %v6323_v61  ;;  %6260 = vst.msk [vmem:[#allocation3 + $0xd8] sm:$0xff] %vm222_vm1, %v6228_v57  ;;  %v6195_v55 = vpop.f32.mrf.mxu3  ;;  %v6535_v42 = vpop.f32.mrf.mxu0 }
 0x652   : > { %v5515_v21 = vpop.f32.mrf.mxu1 }
 0x653   : > { %6599 = vst.msk [vmem:[#allocation3 + $0xd0] sm:$0xff] %vm222_vm1, %v6567_v28  ;;  %v5551_v0 = vadd.f32 %v5515_v21, %v5307_v3  ;;  %v6641_v28 = vld [vmem:[#allocation3 + $0x20] sm:$0xff] }
 0x654   : > { %v5646_v16 = vld [vmem:[#allocation3 + $0xe8] sm:$0xff] }
 0x655   : > { %v5890_v15 = vadd.f32 %v5852_v46, %v5646_v16  ;;  %5583 = vst.msk [vmem:[#allocation3 + $0xf0] sm:$0xff] %vm222_vm1, %v5551_v0  ;;  %7960 = vmatmul.msk.f32.gmra.mxu1 %vm222_vm1, %v6619_v20  ;;  %v6624_v46 = vld [vmem:[#allocation2 + $0x112] sm:$0xff]  ;;  %v6625_v0 = vld [vmem:[#allocation2 + $0x122] sm:$0xff] }
 0x656   : > { %v5985_v33 = vld [vmem:[#allocation3 + $0xe0] sm:$0xff]  ;;  %v6642_v16 = vld [vmem:[#allocation3 + $0x28] sm:$0xff] }
 0x657   : > { %v6229_v43 = vadd.f32 %v6189_v19, %v5985_v33  ;;  %5922 = vst.msk [vmem:[#allocation3 + $0xe8] sm:$0xff] %vm222_vm1, %v5890_v15  ;;  %v5858_v41 = vpop.f32.mrf.mxu2  ;;  %v6626_v33 = vld [vmem:[#allocation2 + $0x12a] sm:$0xff] }
 0x658   : > { %v6324_v39 = vld [vmem:[#allocation3 + $0xd8] sm:$0xff] }
 0x659   : > { %v6568_v26 = vadd.f32 %v6526_v27, %v6324_v39  ;;  %6261 = vst.msk [vmem:[#allocation3 + $0xe0] sm:$0xff] %vm222_vm1, %v6229_v43  ;;  %v6198_v24 = vpop.f32.mrf.mxu3  ;;  %v6538_v62 = vpop.f32.mrf.mxu0  ;;  %v6640_v27 = vld [vmem:[#allocation3 + $0x18] sm:$0xff]  ;;  %v6643_v43 = vld [vmem:[#allocation3 + $0x30] sm:$0xff] }
 0x65a   : > { %v5518_v38 = vpop.f32.mrf.mxu1 }
 0x65b   : > { %6600 = vst.msk [vmem:[#allocation3 + $0xd8] sm:$0xff] %vm222_vm1, %v6568_v26  ;;  %v5552_v13 = vadd.f32 %v5518_v38, %v5308_v58  ;;  %v6628_v38 = vld [vmem:[#allocation2 + $0x142] sm:$0xff] }
 0x65c   : > { %v5647_v11 = vld [vmem:[#allocation3 + $0xf0] sm:$0xff] }
 0x65d   : > { %v5891_v9 = vadd.f32 %v5855_v4, %v5647_v11  ;;  %5584 = vst.msk [vmem:[#allocation3 + $0xf8] sm:$0xff] %vm222_vm1, %v5552_v13  ;;  %7961 = vmatmul.msk.f32.gmra.mxu1 %vm222_vm1, %v6620_v22  ;;  %v6645_v13 = vld [vmem:[#allocation3 + $0x40] sm:$0xff] }
 0x65e   : > { %v5986_v52 = vld [vmem:[#allocation3 + $0xe8] sm:$0xff] }
 0x65f   : > { %v6230_v30 = vadd.f32 %v6192_v44, %v5986_v52  ;;  %5923 = vst.msk [vmem:[#allocation3 + $0xf0] sm:$0xff] %vm222_vm1, %v5891_v9  ;;  %v6644_v44 = vld [vmem:[#allocation3 + $0x38] sm:$0xff]  ;;  %v6629_v9 = vld [vmem:[#allocation2 + $0x152] sm:$0xff] }
 0x660   : > { %v6325_v49 = vld [vmem:[#allocation3 + $0xe0] sm:$0xff]  ;;  %v6646_v52 = vld [vmem:[#allocation3 + $0x48] sm:$0xff] }
 0x661   : > { %v6569_v59 = vadd.f32 %v6529_v7, %v6325_v49  ;;  %6262 = vst.msk [vmem:[#allocation3 + $0xe8] sm:$0xff] %vm222_vm1, %v6230_v30  ;;  %v6627_v7 = vld [vmem:[#allocation2 + $0x13a] sm:$0xff] }
 0x662   : > { %v6785_v56 = vpop.f32.mrf.mxu1 }
 0x663   : > { %6601 = vst.msk [vmem:[#allocation3 + $0xe0] sm:$0xff] %vm222_vm1, %v6569_v59  ;;  %v6881_v48 = vadd.f32 %v6785_v56, %v6637_v32  ;;  %v6647_v59 = vld [vmem:[#allocation3 + $0x50] sm:$0xff] }
 0x664   : > { %v5648_v17 = vld [vmem:[#allocation3 + $0xf8] sm:$0xff] }
 0x665   : > { %v5892_v12 = vadd.f32 %v5858_v41, %v5648_v17  ;;  %6913 = vst.msk [vmem:[#allocation3] sm:$0xff] %vm222_vm1, %v6881_v48  ;;  %7962 = vmatmul.msk.f32.gmra.mxu1 %vm222_vm1, %v6621_v53  ;;  %v6649_v41 = vld [vmem:[#allocation3 + $0x60] sm:$0xff] }
 0x666   : > { %v5987_v36 = vld [vmem:[#allocation3 + $0xf0] sm:$0xff] }
 0x667   : > { %v6231_v50 = vadd.f32 %v6195_v55, %v5987_v36  ;;  %5924 = vst.msk [vmem:[#allocation3 + $0xf8] sm:$0xff] %vm222_vm1, %v5892_v12 }
 0x668   : > { %v6326_v10 = vld [vmem:[#allocation3 + $0xe8] sm:$0xff] }
 0x669   : > { %v6570_v1 = vadd.f32 %v6532_v51, %v6326_v10  ;;  %6263 = vst.msk [vmem:[#allocation3 + $0xf0] sm:$0xff] %vm222_vm1, %v6231_v50  ;;  %v6648_v51 = vld [vmem:[#allocation3 + $0x58] sm:$0xff] }
 0x66a   : > { %v6788_v25 = vpop.f32.mrf.mxu1 }
 0x66b   : > { %6602 = vst.msk [vmem:[#allocation3 + $0xe8] sm:$0xff] %vm222_vm1, %v6570_v1  ;;  %v6882_v35 = vadd.f32 %v6788_v25, %v6638_v60  ;;  %v6652_v1 = vld [vmem:[#allocation3 + $0x78] sm:$0xff] }
 0x66d   : > { %6914 = vst.msk [vmem:[#allocation3 + $0x8] sm:$0xff] %vm222_vm1, %v6882_v35  ;;  %7963 = vmatmul.msk.f32.gmra.mxu1 %vm222_vm1, %v6622_v14  ;;  %v6653_v35 = vld [vmem:[#allocation3 + $0x80] sm:$0xff] }
 0x66e   : > { %v5988_v29 = vld [vmem:[#allocation3 + $0xf8] sm:$0xff] }
 0x66f   : > { %v6232_v45 = vadd.f32 %v6198_v24, %v5988_v29 }
 0x670   : > { %v6327_v2 = vld [vmem:[#allocation3 + $0xf0] sm:$0xff] }
 0x671   : > { %v6571_v31 = vadd.f32 %v6535_v42, %v6327_v2  ;;  %6264 = vst.msk [vmem:[#allocation3 + $0xf8] sm:$0xff] %vm222_vm1, %v6232_v45  ;;  %v6655_v45 = vld [vmem:[#allocation3 + $0x90] sm:$0xff] }
 0x672   : > { %v6791_v8 = vpop.f32.mrf.mxu1 }
 0x673   : > { %6603 = vst.msk [vmem:[#allocation3 + $0xf0] sm:$0xff] %vm222_vm1, %v6571_v31  ;;  %v6883_v47 = vadd.f32 %v6791_v8, %v6639_v5  ;;  %v6656_v5 = vld [vmem:[#allocation3 + $0x98] sm:$0xff] }
 0x675   : > { %6915 = vst.msk [vmem:[#allocation3 + $0x10] sm:$0xff] %vm222_vm1, %v6883_v47  ;;  %7964 = vmatmul.msk.f32.gmra.mxu1 %vm222_vm1, %v6623_v6  ;;  %v6657_v6 = vld [vmem:[#allocation3 + $0xa0] sm:$0xff] }
 0x678   : > { %v6328_v18 = vld [vmem:[#allocation3 + $0xf8] sm:$0xff] }
 0x679   : > { %v6572_v57 = vadd.f32 %v6538_v62, %v6328_v18 }
 0x67a   : > { %v6794_v19 = vpop.f32.mrf.mxu1 }
 0x67b   : > { %6604 = vst.msk [vmem:[#allocation3 + $0xf8] sm:$0xff] %vm222_vm1, %v6572_v57  ;;  %v6884_v61 = vadd.f32 %v6794_v19, %v6640_v27  ;;  %v6658_v57 = vld [vmem:[#allocation3 + $0xa8] sm:$0xff] }
 0x67d   : > { %6916 = vst.msk [vmem:[#allocation3 + $0x18] sm:$0xff] %vm222_vm1, %v6884_v61  ;;  %7965 = vmatmul.msk.f32.gmra.mxu1 %vm222_vm1, %v6624_v46  ;;  %v6659_v61 = vld [vmem:[#allocation3 + $0xb0] sm:$0xff] }
 0x682   : > { %v6797_v3 = vpop.f32.mrf.mxu1 }
 0x683   : > { %v6885_v21 = vadd.f32 %v6797_v3, %v6641_v28  ;;  %v6660_v3 = vld [vmem:[#allocation3 + $0xb8] sm:$0xff] }
 0x685   : > { %6917 = vst.msk [vmem:[#allocation3 + $0x20] sm:$0xff] %vm222_vm1, %v6885_v21  ;;  %7966 = vmatmul.msk.f32.gmra.mxu1 %vm222_vm1, %v6625_v0 }
 0x68a   : > { %v6800_v20 = vpop.f32.mrf.mxu1 }
 0x68b   : > { %v6886_v15 = vadd.f32 %v6800_v20, %v6642_v16  ;;  %v6661_v16 = vld [vmem:[#allocation3 + $0xc0] sm:$0xff] }
 0x68d   : > { %6918 = vst.msk [vmem:[#allocation3 + $0x28] sm:$0xff] %vm222_vm1, %v6886_v15  ;;  %7967 = vmatmul.msk.f32.gmra.mxu1 %vm222_vm1, %v6626_v33  ;;  %v10342_v33 = vld [vmem:[#allocation3 + $0x8] sm:$0xff] }
 0x692   : > { %v6803_v39 = vpop.f32.mrf.mxu1 }
 0x693   : > { %v6887_v26 = vadd.f32 %v6803_v39, %v6643_v43  ;;  %v10345_v43 = vld [vmem:[#allocation3] sm:$0xff]  ;;  %v10347_v39 = vld [vmem:[#allocation3 + $0x10] sm:$0xff] }
 0x695   : > { %6919 = vst.msk [vmem:[#allocation3 + $0x30] sm:$0xff] %vm222_vm1, %v6887_v26  ;;  %7968 = vmatmul.msk.f32.gmra.mxu1 %vm222_vm1, %v6627_v7  ;;  %v6978_v26 = vsel %vm222_vm1, %v10342_v33, 0.0  ;;  %v10351_v7 = vld [vmem:[#allocation3 + $0x18] sm:$0xff] }
 0x69a   : > { %v6806_v4 = vpop.f32.mrf.mxu1 }
 0x69b   : > { %v6888_v58 = vadd.f32 %v6806_v4, %v6644_v44  ;;  %v6977_v44 = vsel %vm222_vm1, %v10345_v43, 0.0  ;;  %v6980_v4 = vsel %vm222_vm1, %v10347_v39, 0.0 }
 0x69d   : > { %6920 = vst.msk [vmem:[#allocation3 + $0x38] sm:$0xff] %vm222_vm1, %v6888_v58  ;;  %7969 = vmatmul.msk.f32.gmra.mxu1 %vm222_vm1, %v6628_v38  ;;  %v6979_v58 = vadd.f32 %v6978_v26, %v6977_v44  ;;  %v10357_v38 = vld [vmem:[#allocation3 + $0x20] sm:$0xff] }
 0x6a2   : > { %v6809_v11 = vpop.f32.mrf.mxu1 }
 0x6a3   : > { %v6889_v22 = vadd.f32 %v6809_v11, %v6645_v13  ;;  %v6662_v13 = vld [vmem:[#allocation3 + $0xc8] sm:$0xff] }
 0x6a5   : > { %6921 = vst.msk [vmem:[#allocation3 + $0x40] sm:$0xff] %vm222_vm1, %v6889_v22  ;;  %7970 = vmatmul.msk.f32.gmra.mxu1 %vm222_vm1, %v6629_v9  ;;  %v6982_v22 = vsel %vm222_vm1, %v10351_v7, 0.0 }
 0x6aa   : > { %v6812_v30 = vpop.f32.mrf.mxu1 }
 0x6ab   : > { %v6890_v49 = vadd.f32 %v6812_v30, %v6646_v52  ;;  %v6981_v52 = vadd.f32 %v6980_v4, %v6979_v58  ;;  %v10361_v30 = vld [vmem:[#allocation3 + $0x28] sm:$0xff] }
 0x6ad   : > { %6922 = vst.msk [vmem:[#allocation3 + $0x48] sm:$0xff] %vm222_vm1, %v6890_v49  ;;  %7971 = vmatmul.msk.f32.gmra.mxu1 %vm222_vm1, %v10126_v54  ;;  %v6650_v54 = vld [vmem:[#allocation3 + $0x68] sm:$0xff]  ;;  %v6984_v49 = vsel %vm222_vm1, %v10357_v38, 0.0 }
 0x6b2   : > { %v6815_v32 = vpop.f32.mrf.mxu1 }
 0x6b3   : > { %v6891_v56 = vadd.f32 %v6815_v32, %v6647_v59  ;;  %v6983_v59 = vadd.f32 %v6982_v22, %v6981_v52  ;;  %v10366_v32 = vld [vmem:[#allocation3 + $0x30] sm:$0xff]  ;;  %v6666_v22 = vld [vmem:[#allocation3 + $0xe8] sm:$0xff] }
 0x6b5   : > { %6923 = vst.msk [vmem:[#allocation3 + $0x50] sm:$0xff] %vm222_vm1, %v6891_v56  ;;  %7972 = vmatmul.msk.f32.gmra.mxu1 %vm222_vm1, %v10140_v23  ;;  %v6651_v23 = vld [vmem:[#allocation3 + $0x70] sm:$0xff]  ;;  %v6986_v56 = vsel %vm222_vm1, %v10361_v30, 0.0 }
 0x6ba   : > { %v6818_v48 = vpop.f32.mrf.mxu1 }
 0x6bb   : > { %v6892_v55 = vadd.f32 %v6818_v48, %v6648_v51  ;;  %v6985_v51 = vadd.f32 %v6984_v49, %v6983_v59  ;;  %v10370_v48 = vld [vmem:[#allocation3 + $0x38] sm:$0xff] }
 0x6bd   : > { %6924 = vst.msk [vmem:[#allocation3 + $0x58] sm:$0xff] %vm222_vm1, %v6892_v55  ;;  %7973 = vmatmul.msk.f32.gmra.mxu1 %vm222_vm1, %v10154_v40  ;;  %v6635_v40 = vld [vmem:[#allocation2 + $0x19a] sm:$0xff]  ;;  %v6988_v55 = vsel %vm222_vm1, %v10366_v32, 0.0 }
 0x6c2   : > { %v6821_v17 = vpop.f32.mrf.mxu1 }
 0x6c3   : > { %v6893_v53 = vadd.f32 %v6821_v17, %v6649_v41  ;;  %v6987_v41 = vadd.f32 %v6986_v56, %v6985_v51  ;;  %v10374_v17 = vld [vmem:[#allocation3 + $0x40] sm:$0xff] }
 0x6c5   : > { %6925 = vst.msk [vmem:[#allocation3 + $0x60] sm:$0xff] %vm222_vm1, %v6893_v53  ;;  %7974 = vmatmul.msk.f32.gmra.mxu1 %vm222_vm1, %v10168_v34  ;;  %v6636_v34 = vld [vmem:[#allocation2 + $0x1a2] sm:$0xff] }
 0x6c6   : > { %v6663_v53 = vld [vmem:[#allocation3 + $0xd0] sm:$0xff] }
 0x6ca   : > { %v6824_v12 = vpop.f32.mrf.mxu1 }
 0x6cb   : > { %v6894_v36 = vadd.f32 %v6824_v12, %v6650_v54  ;;  %v6990_v12 = vsel %vm222_vm1, %v10370_v48, 0.0 }
 0x6cd   : > { %6926 = vst.msk [vmem:[#allocation3 + $0x68] sm:$0xff] %vm222_vm1, %v6894_v36  ;;  %7975 = vmatmul.msk.f32.gmra.mxu1 %vm222_vm1, %v10182_v63  ;;  %v6654_v63 = vld [vmem:[#allocation3 + $0x88] sm:$0xff] }
 0x6d2   : > { %v6827_v50 = vpop.f32.mrf.mxu1 }
 0x6d3   : > { %v6895_v10 = vadd.f32 %v6827_v50, %v6651_v23  ;;  %v6989_v23 = vadd.f32 %v6988_v55, %v6987_v41  ;;  %v10378_v50 = vld [vmem:[#allocation3 + $0x48] sm:$0xff] }
 0x6d5   : > { %6927 = vst.msk [vmem:[#allocation3 + $0x70] sm:$0xff] %vm222_vm1, %v6895_v10  ;;  %7976 = vmatmul.msk.f32.gmra.mxu1 %vm222_vm1, %v6635_v40  ;;  %v6992_v10 = vsel %vm222_vm1, %v10374_v17, 0.0  ;;  %v6991_v40 = vadd.f32 %v6990_v12, %v6989_v23 }
 0x6da   : > { %v6830_v60 = vpop.f32.mrf.mxu1 }
 0x6db   : > { %v6896_v25 = vadd.f32 %v6830_v60, %v6652_v1  ;;  %v10383_v1 = vld [vmem:[#allocation3 + $0x50] sm:$0xff]  ;;  %v6994_v60 = vsel %vm222_vm1, %v10378_v50, 0.0 }
 0x6dd   : > { %6928 = vst.msk [vmem:[#allocation3 + $0x78] sm:$0xff] %vm222_vm1, %v6896_v25  ;;  %7977 = vmatmul.msk.f32.gmra.mxu1 %vm222_vm1, %v6636_v34  ;;  %v6993_v25 = vadd.f32 %v6992_v10, %v6991_v40  ;;  %v10387_v34 = vld [vmem:[#allocation3 + $0x58] sm:$0xff]  ;;  %v6667_v40 = vld [vmem:[#allocation3 + $0xf0] sm:$0xff] }
 0x6e2   : > { %v6833_v14 = vpop.f32.mrf.mxu1 }
 0x6e3   : > { %v6897_v42 = vadd.f32 %v6833_v14, %v6653_v35  ;;  %v6996_v35 = vsel %vm222_vm1, %v10383_v1, 0.0  ;;  %v6995_v14 = vadd.f32 %v6994_v60, %v6993_v25 }
 0x6e5   : > { %6929 = vst.msk [vmem:[#allocation3 + $0x80] sm:$0xff] %vm222_vm1, %v6897_v42  ;;  %v10391_v42 = vld [vmem:[#allocation3 + $0x60] sm:$0xff] }
 0x6ea   : > { %v6836_v24 = vpop.f32.mrf.mxu1 }
 0x6eb   : > { %v6898_v29 = vadd.f32 %v6836_v24, %v6654_v63  ;;  %v6664_v63 = vld [vmem:[#allocation3 + $0xd8] sm:$0xff] }
 0x6ed   : > { %6930 = vst.msk [vmem:[#allocation3 + $0x88] sm:$0xff] %vm222_vm1, %v6898_v29  ;;  %v6998_v29 = vsel %vm222_vm1, %v10387_v34, 0.0 }
 0x6f2   : > { %v6839_v2 = vpop.f32.mrf.mxu1 }
 0x6f3   : > { %v6899_v31 = vadd.f32 %v6839_v2, %v6655_v45  ;;  %v6997_v2 = vadd.f32 %v6996_v35, %v6995_v14 }
 0x6f5   : > { %6931 = vst.msk [vmem:[#allocation3 + $0x90] sm:$0xff] %vm222_vm1, %v6899_v31  ;;  %v10395_v31 = vld [vmem:[#allocation3 + $0x68] sm:$0xff] }
 0x6fa   : > { %v6842_v8 = vpop.f32.mrf.mxu1 }
 0x6fb   : > { %v6900_v47 = vadd.f32 %v6842_v8, %v6656_v5  ;;  %v7000_v5 = vsel %vm222_vm1, %v10391_v42, 0.0  ;;  %v6999_v8 = vadd.f32 %v6998_v29, %v6997_v2 }
 0x6fd   : > { %6932 = vst.msk [vmem:[#allocation3 + $0x98] sm:$0xff] %vm222_vm1, %v6900_v47  ;;  %v10400_v47 = vld [vmem:[#allocation3 + $0x70] sm:$0xff] }
 0x702   : > { %v6845_v18 = vpop.f32.mrf.mxu1 }
 0x703   : > { %v6901_v62 = vadd.f32 %v6845_v18, %v6657_v6  ;;  %v7002_v6 = vsel %vm222_vm1, %v10395_v31, 0.0  ;;  %v7001_v18 = vadd.f32 %v7000_v5, %v6999_v8 }
 0x704   : > { %v10421_v4 = vld [vmem:[#allocation3 + $0x98] sm:$0xff] }
 0x705   : > { %6933 = vst.msk [vmem:[#allocation3 + $0xa0] sm:$0xff] %vm222_vm1, %v6901_v62  ;;  %v10404_v62 = vld [vmem:[#allocation3 + $0x78] sm:$0xff]  ;;  %v7014_v52 = vsel %vm222_vm1, %v10421_v4, 0.0 }
 0x70a   : > { %v6848_v27 = vpop.f32.mrf.mxu1 }
 0x70b   : > { %v6902_v19 = vadd.f32 %v6848_v27, %v6658_v57  ;;  %v7004_v57 = vsel %vm222_vm1, %v10400_v47, 0.0  ;;  %v7003_v27 = vadd.f32 %v7002_v6, %v7001_v18 }
 0x70d   : > { %6934 = vst.msk [vmem:[#allocation3 + $0xa8] sm:$0xff] %vm222_vm1, %v6902_v19  ;;  %v10408_v19 = vld [vmem:[#allocation3 + $0x80] sm:$0xff] }
 0x712   : > { %v6851_v46 = vpop.f32.mrf.mxu1 }
 0x713   : > { %v6903_v28 = vadd.f32 %v6851_v46, %v6659_v61  ;;  %v6665_v61 = vld [vmem:[#allocation3 + $0xe0] sm:$0xff] }
 0x714   : > { %v10429_v56 = vld [vmem:[#allocation3 + $0xa8] sm:$0xff] }
 0x715   : > { %6935 = vst.msk [vmem:[#allocation3 + $0xb0] sm:$0xff] %vm222_vm1, %v6903_v28  ;;  %v7006_v28 = vsel %vm222_vm1, %v10404_v62, 0.0 }
 0x71a   : > { %v6854_v21 = vpop.f32.mrf.mxu1 }
 0x71b   : > { %v6904_v0 = vadd.f32 %v6854_v21, %v6660_v3  ;;  %v7005_v21 = vadd.f32 %v7004_v57, %v7003_v27  ;;  %v6668_v27 = vld [vmem:[#allocation3 + $0xf8] sm:$0xff] }
 0x71c   : > { %v10434_v41 = vld [vmem:[#allocation3 + $0xb0] sm:$0xff] }
 0x71d   : > { %6936 = vst.msk [vmem:[#allocation3 + $0xb8] sm:$0xff] %vm222_vm1, %v6904_v0  ;;  %v10412_v0 = vld [vmem:[#allocation3 + $0x88] sm:$0xff] }
 0x71e   : > { %v7010_v26 = vsel %vm222_vm1, %v10412_v0, 0.0 }
 0x722   : > { %v6857_v20 = vpop.f32.mrf.mxu1 }
 0x723   : > { %v6905_v15 = vadd.f32 %v6857_v20, %v6661_v16  ;;  %v7008_v16 = vsel %vm222_vm1, %v10408_v19, 0.0  ;;  %v7007_v20 = vadd.f32 %v7006_v28, %v7005_v21 }
 0x724   : > { %v10438_v12 = vld [vmem:[#allocation3 + $0xb8] sm:$0xff] }
 0x725   : > { %6937 = vst.msk [vmem:[#allocation3 + $0xc0] sm:$0xff] %vm222_vm1, %v6905_v15  ;;  %v10417_v15 = vld [vmem:[#allocation3 + $0x90] sm:$0xff]  ;;  %v7009_v44 = vadd.f32 %v7008_v16, %v7007_v20  ;;  %v7022_v25 = vsel %vm222_vm1, %v10438_v12, 0.0 }
 0x726   : > { %v7012_v58 = vsel %vm222_vm1, %v10417_v15, 0.0 }
 0x72a   : > { %v6860_v11 = vpop.f32.mrf.mxu1 }
 0x72b   : > { %v6906_v9 = vadd.f32 %v6860_v11, %v6662_v13  ;;  %v7011_v13 = vadd.f32 %v7010_v26, %v7009_v44  ;;  %v10425_v11 = vld [vmem:[#allocation3 + $0xa0] sm:$0xff] }
 0x72c   : > { %v7016_v51 = vsel %vm222_vm1, %v10425_v11, 0.0  ;;  %v10442_v10 = vld [vmem:[#allocation3 + $0xc0] sm:$0xff] }
 0x72d   : > { %6938 = vst.msk [vmem:[#allocation3 + $0xc8] sm:$0xff] %vm222_vm1, %v6906_v9  ;;  %v7013_v59 = vadd.f32 %v7012_v58, %v7011_v13 }
 0x72f   : > { %v7015_v55 = vadd.f32 %v7014_v52, %v7013_v59 }
 0x732   : > { %v6863_v54 = vpop.f32.mrf.mxu1 }
 0x733   : > { %v6907_v36 = vadd.f32 %v6863_v54, %v6663_v53  ;;  %v7018_v53 = vsel %vm222_vm1, %v10429_v56, 0.0  ;;  %v7017_v54 = vadd.f32 %v7016_v51, %v7015_v55 }
 0x735   : > { %6939 = vst.msk [vmem:[#allocation3 + $0xd0] sm:$0xff] %vm222_vm1, %v6907_v36  ;;  %v7020_v36 = vsel %vm222_vm1, %v10434_v41, 0.0  ;;  %v7019_v23 = vadd.f32 %v7018_v53, %v7017_v54 }
 0x737   : > { %v7021_v14 = vadd.f32 %v7020_v36, %v7019_v23 }
 0x739   : > { %v7023_v29 = vadd.f32 %v7022_v25, %v7021_v14 }
 0x73a   : > { %v6866_v24 = vpop.f32.mrf.mxu1 }
 0x73b   : > { %v6908_v45 = vadd.f32 %v6866_v24, %v6664_v63  ;;  %v10446_v63 = vld [vmem:[#allocation3 + $0xc8] sm:$0xff]  ;;  %v7024_v24 = vsel %vm222_vm1, %v10442_v10, 0.0 }
 0x73c   : > { %v7026_v2 = vsel %vm222_vm1, %v10446_v63, 0.0  ;;  %v7025_v5 = vadd.f32 %v7024_v24, %v7023_v29 }
 0x73d   : > { %6940 = vst.msk [vmem:[#allocation3 + $0xd8] sm:$0xff] %vm222_vm1, %v6908_v45  ;;  %v10451_v45 = vld [vmem:[#allocation3 + $0xd0] sm:$0xff] }
 0x73e   : > { %v7028_v6 = vsel %vm222_vm1, %v10451_v45, 0.0  ;;  %v7027_v18 = vadd.f32 %v7026_v2, %v7025_v5 }
 0x742   : > { %v6869_v46 = vpop.f32.mrf.mxu1 }
 0x743   : > { %v6909_v3 = vadd.f32 %v6869_v46, %v6665_v61 }
 0x744   : > { %v10455_v8 = vld [vmem:[#allocation3 + $0xd8] sm:$0xff] }
 0x745   : > { %6941 = vst.msk [vmem:[#allocation3 + $0xe0] sm:$0xff] %vm222_vm1, %v6909_v3  ;;  %v7030_v46 = vsel %vm222_vm1, %v10455_v8, 0.0  ;;  %v7029_v3 = vadd.f32 %v7028_v6, %v7027_v18 }
 0x747   : > { %v7031_v20 = vadd.f32 %v7030_v46, %v7029_v3 }
 0x74a   : > { %v6872_v9 = vpop.f32.mrf.mxu1 }
 0x74b   : > { %v6910_v49 = vadd.f32 %v6872_v9, %v6666_v22 }
 0x74c   : > { %v10459_v57 = vld [vmem:[#allocation3 + $0xe0] sm:$0xff] }
 0x74d   : > { %6942 = vst.msk [vmem:[#allocation3 + $0xe8] sm:$0xff] %vm222_vm1, %v6910_v49  ;;  %v7032_v16 = vsel %vm222_vm1, %v10459_v57, 0.0 }
 0x74e   : > { %v7033_v58 = vadd.f32 %v7032_v16, %v7031_v20 }
 0x752   : > { %v6875_v60 = vpop.f32.mrf.mxu1 }
 0x753   : > { %v6911_v35 = vadd.f32 %v6875_v60, %v6667_v40 }
 0x754   : > { %v10463_v21 = vld [vmem:[#allocation3 + $0xe8] sm:$0xff] }
 0x755   : > { %6943 = vst.msk [vmem:[#allocation3 + $0xf0] sm:$0xff] %vm222_vm1, %v6911_v35  ;;  %v7034_v44 = vsel %vm222_vm1, %v10463_v21, 0.0 }
 0x756   : > { %v7035_v22 = vadd.f32 %v7034_v44, %v7033_v58 }
 0x75a   : > { %v6878_v61 = vpop.f32.mrf.mxu1 }
 0x75b   : > { %v6912_v28 = vadd.f32 %v6878_v61, %v6668_v27 }
 0x75c   : > { %v10468_v26 = vld [vmem:[#allocation3 + $0xf0] sm:$0xff] }
 0x75d   : > { %6944 = vst.msk [vmem:[#allocation3 + $0xf8] sm:$0xff] %vm222_vm1, %v6912_v28  ;;  %v7036_v13 = vsel %vm222_vm1, %v10468_v26, 0.0 }
 0x75e   : > { %v7037_v9 = vadd.f32 %v7036_v13, %v7035_v22 }
 0x764   : > { %v10474_v52 = vld [vmem:[#allocation3 + $0xf8] sm:$0xff] }
 0x765   : > { %v7038_v49 = vsel %vm222_vm1, %v10474_v52, 0.0 }
 0x766   : > { %v7039_v59 = vadd.f32 %v7038_v49, %v7037_v9 }
 0x768   : > { %v7040_v51 = vrot.slane %v7039_v59, 4 }
 0x76a   : > { %v7041_v55 = vadd.f32 %v7040_v51, %v7039_v59 }
 0x76c   : > { %v7042_v53 = vrot.slane %v7041_v55, 2 }
 0x76e   : > { %v7043_v54 = vadd.f32 %v7042_v53, %v7041_v55 }
 0x770   : > { %v7044_v36 = vrot.slane %v7043_v54, 1 }
 0x772   : > { %v7045_v23 = vadd.f32 %v7044_v36, %v7043_v54 }
 0x774   : > { %v10479_v40 = vmul.f32 %v7045_v23, %v9171_v37 }
 0x776   : > { %v10483_v60 = vsub.f32 %v10345_v43, %v10479_v40  ;;  %v10487_v25 = vsub.f32 %v10342_v33, %v10479_v40  ;;  %v10491_v35 = vsub.f32 %v10347_v39, %v10479_v40  ;;  %v10495_v14 = vsub.f32 %v10351_v7, %v10479_v40 }
 0x777   : > { %v10503_v43 = vsub.f32 %v10357_v38, %v10479_v40  ;;  %v10509_v39 = vsub.f32 %v10361_v30, %v10479_v40  ;;  %v10517_v18 = vsub.f32 %v10366_v32, %v10479_v40  ;;  %v10524_v30 = vsub.f32 %v10370_v48, %v10479_v40 }
 0x778   : > { %v7079_v24 = vmul.f32 %v10483_v60, %v10483_v60  ;;  %v7080_v29 = vmul.f32 %v10487_v25, %v10487_v25  ;;  %v7081_v33 = vmul.f32 %v10491_v35, %v10491_v35  ;;  %v7082_v7 = vmul.f32 %v10495_v14, %v10495_v14 }
 0x779   : > { %v7083_v38 = vmul.f32 %v10503_v43, %v10503_v43  ;;  %v7084_v46 = vmul.f32 %v10509_v39, %v10509_v39  ;;  %v10531_v32 = vsub.f32 %v10374_v17, %v10479_v40  ;;  %v7085_v16 = vmul.f32 %v10517_v18, %v10517_v18 }
 0x77a   : > { %v7111_v2 = vsel %vm222_vm1, %v7079_v24, 0.0  ;;  %v7112_v5 = vsel %vm222_vm1, %v7080_v29, 0.0  ;;  %v7114_v27 = vsel %vm222_vm1, %v7081_v33, 0.0  ;;  %v7116_v28 = vsel %vm222_vm1, %v7082_v7, 0.0 }
 0x77b   : > { %v7113_v6 = vadd.f32 %v7112_v5, %v7111_v2  ;;  %v7118_v20 = vsel %vm222_vm1, %v7083_v38, 0.0  ;;  %v10538_v48 = vsub.f32 %v10378_v50, %v10479_v40  ;;  %v7086_v58 = vmul.f32 %v10524_v30, %v10524_v30 }
 0x77c   : > { %v7120_v13 = vsel %vm222_vm1, %v7084_v46, 0.0  ;;  %v10545_v17 = vsub.f32 %v10383_v1, %v10479_v40  ;;  %v7087_v9 = vmul.f32 %v10531_v32, %v10531_v32  ;;  %v7122_v49 = vsel %vm222_vm1, %v7085_v16, 0.0 }
 0x77d   : > { %v7115_v61 = vadd.f32 %v7114_v27, %v7113_v6  ;;  %v10552_v50 = vsub.f32 %v10387_v34, %v10479_v40  ;;  %v7088_v51 = vmul.f32 %v10538_v48, %v10538_v48  ;;  %v7124_v55 = vsel %vm222_vm1, %v7086_v58, 0.0 }
 0x77e   : > { %v10559_v1 = vsub.f32 %v10391_v42, %v10479_v40  ;;  %v7089_v54 = vmul.f32 %v10545_v17, %v10545_v17  ;;  %v7126_v36 = vsel %vm222_vm1, %v7087_v9, 0.0  ;;  %v10566_v34 = vsub.f32 %v10395_v31, %v10479_v40 }
 0x77f   : > { %v7117_v3 = vadd.f32 %v7116_v28, %v7115_v61  ;;  %v7090_v24 = vmul.f32 %v10552_v50, %v10552_v50  ;;  %v7128_v29 = vsel %vm222_vm1, %v7088_v51, 0.0  ;;  %v10573_v42 = vsub.f32 %v10400_v47, %v10479_v40 }
 0x780   : > { %v7091_v7 = vmul.f32 %v10559_v1, %v10559_v1  ;;  %v7130_v2 = vsel %vm222_vm1, %v7089_v54, 0.0  ;;  %v10580_v31 = vsub.f32 %v10404_v62, %v10479_v40  ;;  %v7092_v6 = vmul.f32 %v10566_v34, %v10566_v34 }
 0x781   : > { %v7119_v44 = vadd.f32 %v7118_v20, %v7117_v3  ;;  %v7132_v38 = vsel %vm222_vm1, %v7090_v24, 0.0  ;;  %v10587_v47 = vsub.f32 %v10408_v19, %v10479_v40  ;;  %v7093_v61 = vmul.f32 %v10573_v42, %v10573_v42 }
 0x782   : > { %v7134_v46 = vsel %vm222_vm1, %v7091_v7, 0.0  ;;  %v10594_v62 = vsub.f32 %v10412_v0, %v10479_v40  ;;  %v7094_v3 = vmul.f32 %v10580_v31, %v10580_v31  ;;  %v7136_v16 = vsel %vm222_vm1, %v7092_v6, 0.0 }
 0x783   : > { %v7121_v22 = vadd.f32 %v7120_v13, %v7119_v44  ;;  %v10601_v19 = vsub.f32 %v10417_v15, %v10479_v40  ;;  %v7095_v44 = vmul.f32 %v10587_v47, %v10587_v47  ;;  %v7138_v58 = vsel %vm222_vm1, %v7093_v61, 0.0 }
 0x784   : > { %v10608_v0 = vsub.f32 %v10421_v4, %v10479_v40  ;;  %v7140_v9 = vsel %vm222_vm1, %v7094_v3, 0.0  ;;  %v10615_v15 = vsub.f32 %v10425_v11, %v10479_v40  ;;  %v10622_v4 = vsub.f32 %v10429_v56, %v10479_v40 }
 0x785   : > { %v7123_v59 = vadd.f32 %v7122_v49, %v7121_v22  ;;  %v7096_v22 = vmul.f32 %v10594_v62, %v10594_v62  ;;  %v7142_v51 = vsel %vm222_vm1, %v7095_v44, 0.0  ;;  %v10629_v11 = vsub.f32 %v10434_v41, %v10479_v40 }
 0x786   : > { %v10636_v56 = vsub.f32 %v10438_v12, %v10479_v40  ;;  %v10643_v41 = vsub.f32 %v10442_v10, %v10479_v40  ;;  %v10650_v12 = vsub.f32 %v10446_v63, %v10479_v40  ;;  %v10657_v10 = vsub.f32 %v10451_v45, %v10479_v40 }
 0x787   : > { %v7125_v53 = vadd.f32 %v7124_v55, %v7123_v59  ;;  %v7097_v59 = vmul.f32 %v10601_v19, %v10601_v19  ;;  %v7144_v54 = vsel %vm222_vm1, %v7096_v22, 0.0  ;;  %v10664_v63 = vsub.f32 %v10455_v8, %v10479_v40 }
 0x788   : > { %v10671_v45 = vsub.f32 %v10459_v57, %v10479_v40  ;;  %v10678_v8 = vsub.f32 %v10463_v21, %v10479_v40  ;;  %v10685_v57 = vsub.f32 %v10468_v26, %v10479_v40  ;;  %v10692_v21 = vsub.f32 %v10474_v52, %v10479_v40 }
 0x789   : > { %v7127_v23 = vadd.f32 %v7126_v36, %v7125_v53  ;;  %v7098_v53 = vmul.f32 %v10608_v0, %v10608_v0  ;;  %v7146_v24 = vsel %vm222_vm1, %v7097_v59, 0.0 }
 0x78a   : > { %v7109_v26 = vmul.f32 %v10685_v57, %v10685_v57 }
 0x78b   : > { %v7129_v33 = vadd.f32 %v7128_v29, %v7127_v23  ;;  %v7099_v23 = vmul.f32 %v10615_v15, %v10615_v15  ;;  %v7148_v7 = vsel %vm222_vm1, %v7098_v53, 0.0 }
 0x78c   : > { %v7170_v52 = vsel %vm222_vm1, %v7109_v26, 0.0 }
 0x78d   : > { %v7131_v5 = vadd.f32 %v7130_v2, %v7129_v33  ;;  %v7100_v33 = vmul.f32 %v10622_v4, %v10622_v4  ;;  %v7150_v6 = vsel %vm222_vm1, %v7099_v23, 0.0 }
 0x78f   : > { %v7133_v27 = vadd.f32 %v7132_v38, %v7131_v5  ;;  %v7101_v5 = vmul.f32 %v10629_v11, %v10629_v11  ;;  %v7152_v61 = vsel %vm222_vm1, %v7100_v33, 0.0 }
 0x791   : > { %v7135_v28 = vadd.f32 %v7134_v46, %v7133_v27  ;;  %v7102_v27 = vmul.f32 %v10636_v56, %v10636_v56  ;;  %v7154_v3 = vsel %vm222_vm1, %v7101_v5, 0.0 }
 0x793   : > { %v7137_v20 = vadd.f32 %v7136_v16, %v7135_v28  ;;  %v7103_v28 = vmul.f32 %v10643_v41, %v10643_v41  ;;  %v7156_v44 = vsel %vm222_vm1, %v7102_v27, 0.0 }
 0x795   : > { %v7139_v13 = vadd.f32 %v7138_v58, %v7137_v20  ;;  %v7104_v20 = vmul.f32 %v10650_v12, %v10650_v12  ;;  %v7158_v22 = vsel %vm222_vm1, %v7103_v28, 0.0 }
 0x797   : > { %v7141_v49 = vadd.f32 %v7140_v9, %v7139_v13  ;;  %v7105_v13 = vmul.f32 %v10657_v10, %v10657_v10  ;;  %v7160_v59 = vsel %vm222_vm1, %v7104_v20, 0.0 }
 0x799   : > { %v7143_v55 = vadd.f32 %v7142_v51, %v7141_v49  ;;  %v7106_v49 = vmul.f32 %v10664_v63, %v10664_v63  ;;  %v7162_v53 = vsel %vm222_vm1, %v7105_v13, 0.0 }
 0x79b   : > { %v7145_v36 = vadd.f32 %v7144_v54, %v7143_v55  ;;  %v7107_v55 = vmul.f32 %v10671_v45, %v10671_v45  ;;  %v7164_v23 = vsel %vm222_vm1, %v7106_v49, 0.0 }
 0x79d   : > { %v7147_v29 = vadd.f32 %v7146_v24, %v7145_v36  ;;  %v7108_v36 = vmul.f32 %v10678_v8, %v10678_v8 }
 0x79f   : > { %v7149_v2 = vadd.f32 %v7148_v7, %v7147_v29  ;;  %v7166_v29 = vsel %vm222_vm1, %v7107_v55, 0.0  ;;  %v7110_v7 = vmul.f32 %v10692_v21, %v10692_v21 }
 0x7a1   : > { %v7151_v38 = vadd.f32 %v7150_v6, %v7149_v2  ;;  %v7168_v2 = vsel %vm222_vm1, %v7108_v36, 0.0  ;;  %v7172_v6 = vsel %vm222_vm1, %v7110_v7, 0.0  ;;  %v7224_v36 = vld [vmem:[%s8064_s25] sm:$0xff] }
 0x7a3   : > { %v7153_v46 = vadd.f32 %v7152_v61, %v7151_v38 }
 0x7a5   : > { %v7155_v16 = vadd.f32 %v7154_v3, %v7153_v46 }
 0x7a7   : > { %v7157_v58 = vadd.f32 %v7156_v44, %v7155_v16 }
 0x7a9   : > { %v7159_v9 = vadd.f32 %v7158_v22, %v7157_v58 }
 0x7ab   : > { %v7161_v51 = vadd.f32 %v7160_v59, %v7159_v9 }
 0x7ad   : > { %v7163_v54 = vadd.f32 %v7162_v53, %v7161_v51 }
 0x7af   : > { %v7165_v24 = vadd.f32 %v7164_v23, %v7163_v54  ;;  %v7225_v23 = vld [vmem:[%s8064_s25 + $0x8] sm:$0xff] }
 0x7b1   : > { %v7167_v33 = vadd.f32 %v7166_v29, %v7165_v24  ;;  %v7226_v24 = vld [vmem:[%s8064_s25 + $0x10] sm:$0xff]  ;;  %v7227_v29 = vld [vmem:[%s8064_s25 + $0x18] sm:$0xff] }
 0x7b3   : > { %v7169_v5 = vadd.f32 %v7168_v2, %v7167_v33 }
 0x7b5   : > { %v7171_v40 = vadd.f32 %v7170_v52, %v7169_v5  ;;  %v7230_v5 = vld [vmem:[%s8064_s25 + $0x30] sm:$0xff] }
 0x7b7   : > { %v7173_v38 = vadd.f32 %v7172_v6, %v7171_v40  ;;  %v7231_v40 = vld [vmem:[%s8064_s25 + $0x38] sm:$0xff] }
 0x7b9   : > { %v7174_v27 = vrot.slane %v7173_v38, 4 }
 0x7bb   : > { %v7175_v61 = vadd.f32 %v7174_v27, %v7173_v38  ;;  %v7232_v38 = vld [vmem:[%s8064_s25 + $0x40] sm:$0xff] }
 0x7bd   : > { %v7176_v46 = vrot.slane %v7175_v61, 2 }
 0x7bf   : > { %v7177_v28 = vadd.f32 %v7176_v46, %v7175_v61  ;;  %v7233_v61 = vld [vmem:[%s8064_s25 + $0x48] sm:$0xff] }
 0x7c1   : > { %v7178_v3 = vrot.slane %v7177_v28, 1 }
 0x7c3   : > { %v7179_v16 = vadd.f32 %v7178_v3, %v7177_v28  ;;  %v7234_v28 = vld [vmem:[%s8064_s25 + $0x50] sm:$0xff] }
 0x7c5   : > { %v7180_v20 = vmul.f32 %v7179_v16, %v9171_v37  ;;  %v7235_v16 = vld [vmem:[%s8064_s25 + $0x58] sm:$0xff] }
 0x7c7   : > { %v7181_v44 = vadd.f32 1e-05, %v7180_v20 }
 0x7c9   : > { %7998 = vrsqrt.f32 %v7181_v44  ;;  %vm7188_vm8 = vweird.f32 %v7181_v44 }
 0x7cf   : > { %v7999_v58 = vpop.eup %7998 }
 0x7d0   : > { %v7183_v13 = vmul.f32 %v7999_v58, %v7181_v44  ;;  %vm7189_vm7 = vweird.f32 %v7999_v58  ;;  %v7236_v44 = vld [vmem:[%s8064_s25 + $0x60] sm:$0xff] }
 0x7d1   : > { %vm7190_vm9 = vmor %vm7188_vm8, %vm7189_vm7 }
 0x7d2   : > { %v7184_v22 = vmul.f32 %v7999_v58, %v7183_v13  ;;  %v7237_v13 = vld [vmem:[%s8064_s25 + $0x68] sm:$0xff] }
 0x7d4   : > { %v7185_v9 = vmul.f32 0.5, %v7184_v22 }
 0x7d6   : > { %v7186_v49 = vsub.f32 1.5, %v7185_v9  ;;  %v7238_v9 = vld [vmem:[%s8064_s25 + $0x70] sm:$0xff] }
 0x7d8   : > { %v7187_v59 = vmul.f32 %v7999_v58, %v7186_v49 }
 0x7da   : > { %v10706_v51 = vsel %vm7190_vm9, %v7999_v58, %v7187_v59  ;;  %v7239_v59 = vld [vmem:[%s8064_s25 + $0x78] sm:$0xff] }
 0x7db   : > { %v7192_v37 = vmul.f32 %v10706_v51, %v10483_v60  ;;  %v7193_v55 = vmul.f32 %v10706_v51, %v10487_v25  ;;  %v7194_v53 = vmul.f32 %v10706_v51, %v10491_v35  ;;  %v7195_v54 = vmul.f32 %v10706_v51, %v10495_v14  ;;  %v7228_v25 = vld [vmem:[%s8064_s25 + $0x20] sm:$0xff]  ;;  %v7229_v14 = vld [vmem:[%s8064_s25 + $0x28] sm:$0xff] }
 0x7dc   : > { %v7196_v26 = vmul.f32 %v10706_v51, %v10503_v43  ;;  %v7197_v60 = vmul.f32 %v10706_v51, %v10509_v39  ;;  %v7198_v35 = vmul.f32 %v10706_v51, %v10517_v18  ;;  %v7199_v2 = vmul.f32 %v10706_v51, %v10524_v30 }
 0x7dd   : > { %v7256_v43 = vadd.f32 %v7224_v36, %v7192_v37  ;;  %v7257_v33 = vadd.f32 %v7225_v23, %v7193_v55  ;;  %v7258_v7 = vadd.f32 %v7226_v24, %v7194_v53  ;;  %v7259_v52 = vadd.f32 %v7227_v29, %v7195_v54  ;;  %v7240_v55 = vld [vmem:[%s8064_s25 + $0x80] sm:$0xff]  ;;  %v7241_v54 = vld [vmem:[%s8064_s25 + $0x88] sm:$0xff]  ;;  %v7242_v23 = vld [vmem:[%s8064_s25 + $0x90] sm:$0xff] }
 0x7de   : > { %v7200_v39 = vmul.f32 %v10706_v51, %v10531_v32  ;;  %v7260_v6 = vadd.f32 %v7228_v25, %v7196_v26  ;;  %v7201_v18 = vmul.f32 %v10706_v51, %v10538_v48  ;;  %v7261_v27 = vadd.f32 %v7229_v14, %v7197_v60  ;;  %v7243_v26 = vld [vmem:[%s8064_s25 + $0x98] sm:$0xff]  ;;  %v7244_v60 = vld [vmem:[%s8064_s25 + $0xa0] sm:$0xff] }
 0x7df   : > { %7288 = vst.msk [vmem:[%s10727_s6] sm:$0xff] %vm222_vm1, %v7256_v43  ;;  %v7202_v30 = vmul.f32 %v10706_v51, %v10545_v17  ;;  %v7262_v32 = vadd.f32 %v7230_v5, %v7198_v35  ;;  %v7203_v46 = vmul.f32 %v10706_v51, %v10552_v50  ;;  %v7263_v48 = vadd.f32 %v7231_v40, %v7199_v2  ;;  %v7245_v35 = vld [vmem:[%s8064_s25 + $0xa8] sm:$0xff]  ;;  %v7246_v43 = vld [vmem:[%s8064_s25 + $0xb0] sm:$0xff]  ;;  %v7248_v5 = vld [vmem:[%s8064_s25 + $0xc0] sm:$0xff] }
 0x7e0   : > { %7289 = vst.msk [vmem:[%s10727_s6 + $0x8] sm:$0xff] %vm222_vm1, %v7257_v33  ;;  %v7204_v3 = vmul.f32 %v10706_v51, %v10559_v1  ;;  %v7264_v17 = vadd.f32 %v7232_v38, %v7200_v39  ;;  %v7205_v20 = vmul.f32 %v10706_v51, %v10566_v34  ;;  %v7265_v50 = vadd.f32 %v7233_v61, %v7201_v18  ;;  %v7249_v39 = vld [vmem:[%s8064_s25 + $0xc8] sm:$0xff] }
 0x7e1   : > { %7290 = vst.msk [vmem:[%s10727_s6 + $0x10] sm:$0xff] %vm222_vm1, %v7258_v7  ;;  %v7206_v58 = vmul.f32 %v10706_v51, %v10573_v42  ;;  %v7266_v1 = vadd.f32 %v7234_v28, %v7202_v30  ;;  %v7207_v22 = vmul.f32 %v10706_v51, %v10580_v31  ;;  %v7267_v34 = vadd.f32 %v7235_v16, %v7203_v46  ;;  %v7247_v7 = vld [vmem:[%s8064_s25 + $0xb8] sm:$0xff]  ;;  %v7254_v46 = vld [vmem:[%s8064_s25 + $0xf0] sm:$0xff] }
 0x7e2   : > { %7291 = vst.msk [vmem:[%s10727_s6 + $0x18] sm:$0xff] %vm222_vm1, %v7259_v52  ;;  %v7208_v49 = vmul.f32 %v10706_v51, %v10587_v47  ;;  %v7268_v42 = vadd.f32 %v7236_v44, %v7204_v3  ;;  %v7209_v37 = vmul.f32 %v10706_v51, %v10594_v62  ;;  %v7269_v31 = vadd.f32 %v7237_v13, %v7205_v20 }
 0x7e3   : > { %7292 = vst.msk [vmem:[%s10727_s6 + $0x20] sm:$0xff] %vm222_vm1, %v7260_v6  ;;  %v7210_v53 = vmul.f32 %v10706_v51, %v10601_v19  ;;  %v7270_v47 = vadd.f32 %v7238_v9, %v7206_v58  ;;  %v7211_v36 = vmul.f32 %v10706_v51, %v10608_v0  ;;  %v7271_v62 = vadd.f32 %v7239_v59, %v7207_v22  ;;  %v7250_v6 = vld [vmem:[%s8064_s25 + $0xd0] sm:$0xff] }
 0x7e4   : > { %7293 = vst.msk [vmem:[%s10727_s6 + $0x28] sm:$0xff] %vm222_vm1, %v7261_v27  ;;  %v7212_v24 = vmul.f32 %v10706_v51, %v10615_v15  ;;  %v7272_v19 = vadd.f32 %v7240_v55, %v7208_v49  ;;  %v7213_v29 = vmul.f32 %v10706_v51, %v10622_v4  ;;  %v7273_v0 = vadd.f32 %v7241_v54, %v7209_v37 }
 0x7e5   : > { %7294 = vst.msk [vmem:[%s10727_s6 + $0x30] sm:$0xff] %vm222_vm1, %v7262_v32  ;;  %v7214_v25 = vmul.f32 %v10706_v51, %v10629_v11  ;;  %v7274_v15 = vadd.f32 %v7242_v23, %v7210_v53  ;;  %v7215_v14 = vmul.f32 %v10706_v51, %v10636_v56  ;;  %v7275_v4 = vadd.f32 %v7243_v26, %v7211_v36 }
 0x7e6   : > { %7295 = vst.msk [vmem:[%s10727_s6 + $0x38] sm:$0xff] %vm222_vm1, %v7263_v48  ;;  %v7216_v33 = vmul.f32 %v10706_v51, %v10643_v41  ;;  %v7276_v11 = vadd.f32 %v7244_v60, %v7212_v24  ;;  %v7217_v2 = vmul.f32 %v10706_v51, %v10650_v12  ;;  %v7277_v56 = vadd.f32 %v7245_v35, %v7213_v29  ;;  %v7255_v48 = vld [vmem:[%s8064_s25 + $0xf8] sm:$0xff] }
 0x7e7   : > { %7296 = vst.msk [vmem:[%s10727_s6 + $0x40] sm:$0xff] %vm222_vm1, %v7264_v17  ;;  %v7218_v52 = vmul.f32 %v10706_v51, %v10657_v10  ;;  %v7278_v41 = vadd.f32 %v7246_v43, %v7214_v25  ;;  %v7219_v40 = vmul.f32 %v10706_v51, %v10664_v63  ;;  %v7279_v12 = vadd.f32 %v7247_v7, %v7215_v14  ;;  %v7251_v10 = vld [vmem:[%s8064_s25 + $0xd8] sm:$0xff]  ;;  %v7252_v63 = vld [vmem:[%s8064_s25 + $0xe0] sm:$0xff] }
 0x7e8   : > { %7297 = vst.msk [vmem:[%s10727_s6 + $0x48] sm:$0xff] %vm222_vm1, %v7265_v50  ;;  %v7220_v18 = vmul.f32 %v10706_v51, %v10671_v45  ;;  %v7280_v38 = vadd.f32 %v7248_v5, %v7216_v33  ;;  %v7221_v27 = vmul.f32 %v10706_v51, %v10678_v8  ;;  %v7281_v30 = vadd.f32 %v7249_v39, %v7217_v2  ;;  %v7253_v45 = vld [vmem:[%s8064_s25 + $0xe8] sm:$0xff] }
 0x7e9   : > { %7298 = vst.msk [vmem:[%s10727_s6 + $0x50] sm:$0xff] %vm222_vm1, %v7266_v1  ;;  %v7222_v61 = vmul.f32 %v10706_v51, %v10685_v57  ;;  %v7282_v32 = vadd.f32 %v7250_v6, %v7218_v52  ;;  %v7223_v8 = vmul.f32 %v10706_v51, %v10692_v21  ;;  %v7283_v28 = vadd.f32 %v7251_v10, %v7219_v40 }
 0x7ea   : > { %7299 = vst.msk [vmem:[%s10727_s6 + $0x58] sm:$0xff] %vm222_vm1, %v7267_v34  ;;  %v7284_v3 = vadd.f32 %v7252_v63, %v7220_v18  ;;  %v7285_v57 = vadd.f32 %v7253_v45, %v7221_v27 }
 0x7eb   : > { %7300 = vst.msk [vmem:[%s10727_s6 + $0x60] sm:$0xff] %vm222_vm1, %v7268_v42  ;;  %v7286_v16 = vadd.f32 %v7254_v46, %v7222_v61  ;;  %v7287_v17 = vadd.f32 %v7255_v48, %v7223_v8 }
 0x7ec   : > { %7301 = vst.msk [vmem:[%s10727_s6 + $0x68] sm:$0xff] %vm222_vm1, %v7269_v31 }
 0x7ed   : > { %7302 = vst.msk [vmem:[%s10727_s6 + $0x70] sm:$0xff] %vm222_vm1, %v7270_v47 }
 0x7ee   : > { %7303 = vst.msk [vmem:[%s10727_s6 + $0x78] sm:$0xff] %vm222_vm1, %v7271_v62 }
 0x7ef   : > { %7304 = vst.msk [vmem:[%s10727_s6 + $0x80] sm:$0xff] %vm222_vm1, %v7272_v19 }
 0x7f0   : > { %7305 = vst.msk [vmem:[%s10727_s6 + $0x88] sm:$0xff] %vm222_vm1, %v7273_v0 }
 0x7f1   : > { %7306 = vst.msk [vmem:[%s10727_s6 + $0x90] sm:$0xff] %vm222_vm1, %v7274_v15 }
 0x7f2   : > { %7307 = vst.msk [vmem:[%s10727_s6 + $0x98] sm:$0xff] %vm222_vm1, %v7275_v4 }
 0x7f3   : > { %7308 = vst.msk [vmem:[%s10727_s6 + $0xa0] sm:$0xff] %vm222_vm1, %v7276_v11 }
 0x7f4   : > { %7309 = vst.msk [vmem:[%s10727_s6 + $0xa8] sm:$0xff] %vm222_vm1, %v7277_v56 }
 0x7f5   : > { %7310 = vst.msk [vmem:[%s10727_s6 + $0xb0] sm:$0xff] %vm222_vm1, %v7278_v41 }
 0x7f6   : > { %7311 = vst.msk [vmem:[%s10727_s6 + $0xb8] sm:$0xff] %vm222_vm1, %v7279_v12 }
 0x7f7   : > { %7312 = vst.msk [vmem:[%s10727_s6 + $0xc0] sm:$0xff] %vm222_vm1, %v7280_v38 }
 0x7f8   : > { %7313 = vst.msk [vmem:[%s10727_s6 + $0xc8] sm:$0xff] %vm222_vm1, %v7281_v30 }
 0x7f9   : > { %7314 = vst.msk [vmem:[%s10727_s6 + $0xd0] sm:$0xff] %vm222_vm1, %v7282_v32 }
 0x7fa   : > { %7315 = vst.msk [vmem:[%s10727_s6 + $0xd8] sm:$0xff] %vm222_vm1, %v7283_v28 }
 0x7fb   : > { %7316 = vst.msk [vmem:[%s10727_s6 + $0xe0] sm:$0xff] %vm222_vm1, %v7284_v3 }
 0x7fc   : > { %7317 = vst.msk [vmem:[%s10727_s6 + $0xe8] sm:$0xff] %vm222_vm1, %v7285_v57 }
 0x7fd   : > { %7318 = vst.msk [vmem:[%s10727_s6 + $0xf0] sm:$0xff] %vm222_vm1, %v7286_v16 }
 0x7fe   : > { %7319 = vst.msk [vmem:[%s10727_s6 + $0xf8] sm:$0xff] %vm222_vm1, %v7287_v17 }
 0x7ff PF: > { %s13_s12 = sadd.s32 1, %s8006_s12  }
 0x800   : > { %p10_p4 = scmp.ge.s32.totalorder %s13_s12, 4  }
 0x802   :  { %12 = sbr.rel (!%p10_p4) target bundleno = 1 (0x1), region = 65 }

</bundles_post_ra>
